<compile_context>
chip_gen: v6e
topology: v6e:2x2x1
jax: 0.10.0
libtpu: 0.0.40
codegen_flags: <defaults>
</compile_context>

<pallas_src>
import functools
import math

import jax
import jax.numpy as jnp
from jax import lax
from jax.experimental import pallas as pl
from jax.experimental.pallas import tpu as pltpu

# ----------------------------- config ---------------------------------------
B = 2
C_IN = 3
IMG = 32
PATCH = 8
L = (IMG // PATCH) ** 2          # tokens (= args.conv_dim - 1) = 16
CPP = C_IN * PATCH * PATCH       # flattened patch = 192
D_VIT = 64                       # stands in for 768
D_VIM = 32                       # stands in for 384
D_MIX = D_VIT + D_VIM            # stands in for 1152
ADPT_H = 32                      # adapter hidden (same as module)
HEADS = 4
HEAD_DIM = D_VIT // HEADS
MLP_H = 4 * D_VIT
DEPTH = 2                        # stands in for 12 ViT blocks / 24 Vim layers
D_INNER = 2 * D_VIM
D_STATE = 8
DT_RANK = max(D_VIM // 16, 1)
K_CONV = 4
ATTR_NUM = 8

F32 = jnp.float32
BF16 = jnp.bfloat16


# --------------------------- kernel helpers ----------------------------------
def _ln(x, g, b, eps):
    mu = jnp.mean(x, axis=-1, keepdims=True)
    xc = x - mu
    var = jnp.mean(xc * xc, axis=-1, keepdims=True)
    return xc * lax.rsqrt(var + eps) * g + b


# ------------------------------ the kernel -----------------------------------
def _hybrid_kernel(
    # activations
    patches_ref,
    # patch embed (depth-invariant)
    pe_wv, pe_bv, pe_pv, pe_wm, pe_bm, pe_pm,
    # ViT block weights (leading depth axis squeezed away by the BlockSpec)
    v_ln1g, v_ln1b, v_wqkv, v_bqkv, v_wo, v_bo, v_ln2g, v_ln2b,
    v_w1, v_b1, v_w2, v_b2,
    # Vim (Mamba) weights; kernel-side leading dim 2 = the layer pair of this depth
    m_lng, m_lnb, m_win, m_cw, m_cb, m_xdt, m_xbt, m_xct,
    m_dtw, m_dtb, m_at, m_dsk, m_wout,
    # constant helper matrices
    conv_shift, scan_gather,
    # adapter weights (per depth)
    a_w1v, a_w1m, a_b1, a_w2, a_b2, a_w3v, a_w3m, a_b3v, a_b3m,
    # tail (depth-invariant)
    t_upw, t_upb, t_cpwt, t_wlwt, t_bias, t_bng, t_bnb, t_bnrm, t_bnrv,
    # output
    o_ref,
    # VMEM scratch: activation carry across depth + attention ctx assembly
    xv_sc, xm_sc, res_sc, ctx_sc,
    *, scale):
    d = pl.program_id(1)

    # ---- depth 0: patch embed + pos embed, initialise the carried state -----
    @pl.when(d == 0)
    def _init():
        pt = patches_ref[...]                                    # (L, CPP) bf16
        xv_sc[...] = (jnp.dot(pt, pe_wv[...], preferred_element_type=F32)
                      + pe_bv[...] + pe_pv[...])
        xm0 = (jnp.dot(pt, pe_wm[...], preferred_element_type=F32)
               + pe_bm[...] + pe_pm[...])
        xm_sc[...] = xm0
        res_sc[...] = jnp.zeros_like(xm0)    # residual=None -> residual = x

    # ---- ViT block: LN1 + fused QKV + MHA + fused out-proj + LN2 + MLP ------
    xv_in = xv_sc[...]                                           # (L, D_VIT) f32
    hn = _ln(xv_in, v_ln1g[...], v_ln1b[...], 1e-6).astype(BF16)
    qkv = jnp.dot(hn, v_wqkv[...], preferred_element_type=F32) + v_bqkv[...]
    for hh in range(HEADS):                                      # static unroll
        lo = hh * HEAD_DIM
        qh = qkv[:, lo:lo + HEAD_DIM].astype(BF16)
        kh = qkv[:, D_VIT + lo:D_VIT + lo + HEAD_DIM].astype(BF16)
        vh = qkv[:, 2 * D_VIT + lo:2 * D_VIT + lo + HEAD_DIM].astype(BF16)
        s = lax.dot_general(qh, kh, (((1,), (1,)), ((), ())),
                            preferred_element_type=F32) * scale  # (L, L)
        s = s - jnp.max(s, axis=-1, keepdims=True)
        e = jnp.exp(s)
        prob = e * pl.reciprocal(jnp.sum(e, axis=-1, keepdims=True), approx=True)
        # assemble (L, HEADS*HEAD_DIM) context in VMEM lane slots, so the
        # output projection is ONE (L,D)@(D,D) matmul (no serial acc chain).
        ctx_sc[:, lo:lo + HEAD_DIM] = jnp.dot(prob.astype(BF16), vh,
                                              preferred_element_type=F32)
    ctx = ctx_sc[...].astype(BF16)
    xv = xv_in + jnp.dot(ctx, v_wo[...], preferred_element_type=F32) + v_bo[...]
    h2 = _ln(xv, v_ln2g[...], v_ln2b[...], 1e-6).astype(BF16)
    mlp = jnp.dot(h2, v_w1[...], preferred_element_type=F32) + v_b1[...]
    # TODO(synk): torch nn.GELU defaults to exact erf; tanh approximation used.
    mlp = jax.nn.gelu(mlp, approximate=True)
    xv = xv + jnp.dot(mlp.astype(BF16), v_w2[...],
                      preferred_element_type=F32) + v_b2[...]

    # ---- two Vim (Mamba) layers ----------------------------------------------
    # TODO(synk): reference Vim uses bidirectional (bimamba-v2) scans; forward only.
    smat = conv_shift[...]                                       # (K*L, L) f32
    gmat = scan_gather[...]                                      # (L, L*Ds) f32
    xm = xm_sc[...]
    res = res_sc[...]
    for j in range(2):                                           # the layer pair
        res = xm + res
        xn = _ln(res, m_lng[j], m_lnb[j], 1e-5).astype(BF16)
        xz = jnp.dot(xn, m_win[j], preferred_element_type=F32)   # (L, 2*Di)
        xin = xz[:, :D_INNER]
        z = xz[:, D_INNER:]
        # causal depthwise conv as one banded (K*L,L)@(L,Di) matmul + K FMAs
        shifted = jnp.dot(smat, xin, preferred_element_type=F32)  # (K*L, Di)
        cw = m_cw[j]                                             # (K, Di)
        conv = m_cb[j]
        for k in range(K_CONV):
            conv = conv + shifted[k * L:(k + 1) * L, :] * cw[k:k + 1, :]
        u = conv * jax.nn.sigmoid(conv)                          # SiLU, (L, Di)
        ub = u.astype(BF16)
        dt_r = jnp.dot(ub, m_xdt[j], preferred_element_type=F32)  # (L, dt_rank)
        # B^T, C^T computed directly as (Ds, L) so the scan never relayouts
        bct = lax.dot_general(m_xbt[j], ub, (((1,), (1,)), ((), ())),
                              preferred_element_type=F32)        # (Ds, L)
        cct = lax.dot_general(m_xct[j], ub, (((1,), (1,)), ((), ())),
                              preferred_element_type=F32)        # (Ds, L)
        dt_raw = (jnp.dot(dt_r.astype(BF16), m_dtw[j],
                          preferred_element_type=F32) + m_dtb[j])  # (L, Di)
        # numerically stable softplus
        dt = jnp.maximum(dt_raw, 0.0) + jnp.log(1.0 + jnp.exp(-jnp.abs(dt_raw)))
        du = dt * u
        gate = z * jax.nn.sigmoid(z)
        at = m_at[j]                                             # (Ds, Di) f32
        # recurrence-invariant work hoisted out of the scan
        das = [jnp.exp(dt[t:t + 1, :] * at) for t in range(L)]       # (Ds, Di)
        dbus = [bct[:, t:t + 1] * du[t:t + 1, :] for t in range(L)]  # (Ds, Di)
        hstate = jnp.zeros((D_STATE, D_INNER), F32)
        whs = []
        for t in range(L):                   # serial chain: one VPU FMA / step
            hstate = das[t] * hstate + dbus[t]
            whs.append(hstate * cct[:, t:t + 1])
        # C-weighted states reduced once, post-loop, via one MXU gather matmul
        hcat = jnp.concatenate(whs, axis=0)                       # (L*Ds, Di)
        y = jnp.dot(gmat, hcat, preferred_element_type=F32)       # (L, Di)
        y = (y + m_dsk[j] * u) * gate
        xm = jnp.dot(y.astype(BF16), m_wout[j], preferred_element_type=F32)
    res_sc[...] = res

    # ---- adapter: concat + 3 linears + split + both residual adds (folded) ---
    xvb = xv.astype(BF16)
    xmb = xm.astype(BF16)
    a1 = (jnp.dot(xvb, a_w1v[...], preferred_element_type=F32)
          + jnp.dot(xmb, a_w1m[...], preferred_element_type=F32) + a_b1[...])
    a2 = jnp.dot(a1.astype(BF16), a_w2[...], preferred_element_type=F32) + a_b2[...]
    a2b = a2.astype(BF16)
    xv = xv + jnp.dot(a2b, a_w3v[...], preferred_element_type=F32) + a_b3v[...]
    xm = xm + jnp.dot(a2b, a_w3m[...], preferred_element_type=F32) + a_b3m[...]
    xv_sc[...] = xv
    xm_sc[...] = xm

    # ---- tail (only on the last depth step) ----------------------------------
    @pl.when(d == DEPTH - 1)
    def _tail():
        x = (xv + jnp.dot(xm.astype(BF16), t_upw[...],
                          preferred_element_type=F32) + t_upb[...])  # (L, D_VIT)
        # conv_pool (Conv1d k=1) + per-attribute Linear(D,1) heads fused:
        # logits[a] = sum_l cp[a,l] * (x[l] . wl[a]) + (cp_b[a]*sum(wl[a]) + wl_b[a])
        mm = jnp.dot(x.astype(BF16), t_wlwt[...],
                     preferred_element_type=F32)                     # (L, A)
        logits = jnp.sum(t_cpwt[...] * mm, axis=0, keepdims=True) + t_bias[...]
        # TODO(synk): BatchNorm1d in eval mode (running statistics).
        norm = (logits - t_bnrm[...]) * lax.rsqrt(t_bnrv[...] + 1e-5)
        o_ref[...] = norm * t_bng[...] + t_bnb[...]                  # (1, A)


# ------------------------------ model glue ------------------------------------
_CONST_KEYS = ["pe_wv", "pe_bv", "pe_pv", "pe_wm", "pe_bm", "pe_pm"]
_VIT_KEYS = ["v_ln1g", "v_ln1b", "v_wqkv", "v_bqkv", "v_wo", "v_bo",
             "v_ln2g", "v_ln2b", "v_w1", "v_b1", "v_w2", "v_b2"]
_VIM_KEYS = ["m_lng", "m_lnb", "m_win", "m_cw", "m_cb", "m_xdt", "m_xbt",
             "m_xct", "m_dtw", "m_dtb", "m_at", "m_dsk", "m_wout"]
_ADPT_KEYS = ["a_w1v", "a_w1m", "a_b1", "a_w2", "a_b2", "a_w3v", "a_w3m",
              "a_b3v", "a_b3m"]
_TAIL_KEYS = ["t_upw", "t_upb", "t_cpwt", "t_wlwt", "t_bias", "t_bng",
              "t_bnb", "t_bnrm", "t_bnrv"]


def im2col(imgs):
    Bb, C, H, W = imgs.shape
    gh, gw = H // PATCH, W // PATCH
    p = imgs.reshape(Bb, C, gh, PATCH, gw, PATCH)
    p = p.transpose(0, 2, 4, 1, 3, 5).reshape(Bb, gh * gw, C * PATCH * PATCH)
    return p


def hybrid_forward(kp, patches):
    Bb = patches.shape[0]
    arrays = [patches]
    specs = [pl.BlockSpec((None, L, CPP), lambda b, d: (b, 0, 0))]

    def add_const(name):
        a = kp[name]
        zero = (0,) * a.ndim
        arrays.append(a)
        specs.append(pl.BlockSpec(a.shape, lambda b, d, z=zero: z))

    def add_depth(name):          # stacked over depth; depth dim squeezed away
        a = kp[name]
        blk = (None,) + a.shape[1:]
        rest = (0,) * (a.ndim - 1)
        arrays.append(a)
        specs.append(pl.BlockSpec(blk, lambda b, d, r=rest: (d,) + r))

    for n in _CONST_KEYS:
        add_const(n)
    for n in _VIT_KEYS:
        add_depth(n)
    for n in _VIM_KEYS:
        add_depth(n)
    add_const("conv_shift")
    add_const("scan_gather")
    for n in _ADPT_KEYS:
        add_depth(n)
    for n in _TAIL_KEYS:
        add_const(n)

    out = pl.pallas_call(
        functools.partial(_hybrid_kernel, scale=1.0 / math.sqrt(HEAD_DIM)),
        grid=(Bb, DEPTH),
        in_specs=specs,
        out_specs=pl.BlockSpec((None, 1, ATTR_NUM), lambda b, d: (b, 0, 0)),
        out_shape=jax.ShapeDtypeStruct((Bb, 1, ATTR_NUM), F32),
        scratch_shapes=[pltpu.VMEM((L, D_VIT), F32),   # x_vit carry
                        pltpu.VMEM((L, D_VIM), F32),   # x_vim carry
                        pltpu.VMEM((L, D_VIM), F32),   # mamba residual carry
                        pltpu.VMEM((L, D_VIT), F32)],  # attention ctx assembly
        compiler_params=pltpu.CompilerParams(
            dimension_semantics=("parallel", "arbitrary")),
    )(*arrays)
    return out.reshape(Bb, ATTR_NUM)


# ---------------------------- parameter init ----------------------------------
def init_params(key):
    ks = iter(jax.random.split(key, 256))
    nrm = lambda shape, s=0.02: s * jax.random.normal(next(ks), shape, jnp.float32)
    zeros = lambda shape: jnp.zeros(shape, jnp.float32)
    ones = lambda shape: jnp.ones(shape, jnp.float32)

    p = {
        "patch_vit_w": nrm((CPP, D_VIT)), "patch_vit_b": zeros((D_VIT,)),
        "patch_vim_w": nrm((CPP, D_VIM)), "patch_vim_b": zeros((D_VIM,)),
        "pos_vit": zeros((1, L, D_VIT)),   # module inits pos_embed_* to zeros
        "pos_vim": zeros((1, L, D_VIM)),
        "up_final_w": nrm((D_VIM, D_VIT)), "up_final_b": zeros((D_VIT,)),
        "convpool_w": nrm((ATTR_NUM, L)), "convpool_b": zeros((ATTR_NUM,)),
        "wl_w": nrm((ATTR_NUM, D_VIT)), "wl_b": zeros((ATTR_NUM,)),
        "bn_g": ones((ATTR_NUM,)), "bn_b": zeros((ATTR_NUM,)),
        "bn_rm": zeros((ATTR_NUM,)), "bn_rv": ones((ATTR_NUM,)),
    }
    p["vit_blocks"] = []
    for _ in range(DEPTH):
        p["vit_blocks"].append(dict(
            ln1_g=ones((D_VIT,)), ln1_b=zeros((D_VIT,)),
            qkv_w=nrm((D_VIT, 3 * D_VIT)), qkv_b=zeros((3 * D_VIT,)),
            proj_w=nrm((D_VIT, D_VIT)), proj_b=zeros((D_VIT,)),
            ln2_g=ones((D_VIT,)), ln2_b=zeros((D_VIT,)),
            fc1_w=nrm((D_VIT, MLP_H)), fc1_b=zeros((MLP_H,)),
            fc2_w=nrm((MLP_H, D_VIT)), fc2_b=zeros((D_VIT,)),
        ))
    A_init = jnp.tile(jnp.arange(1, D_STATE + 1, dtype=jnp.float32)[None, :],
                      (D_INNER, 1))
    p["vim_layers"] = []
    for _ in range(2 * DEPTH):
        p["vim_layers"].append(dict(
            ln_g=ones((D_VIM,)), ln_b=zeros((D_VIM,)),
            in_w=nrm((D_VIM, 2 * D_INNER)),
            conv_w=nrm((K_CONV, D_INNER), 0.2), conv_b=zeros((D_INNER,)),
            xproj_w=nrm((D_INNER, DT_RANK + 2 * D_STATE)),
            dt_w=nrm((DT_RANK, D_INNER), 0.2), dt_b=nrm((D_INNER,), 0.1),
            A_log=jnp.log(A_init), Dsk=ones((D_INNER,)),
            out_w=nrm((D_INNER, D_VIM)),
        ))
    p["adapters"] = []
    for _ in range(DEPTH):
        p["adapters"].append(dict(
            w1=nrm((D_MIX, ADPT_H)), b1=zeros((ADPT_H,)),
            w2=nrm((ADPT_H, ADPT_H)), b2=zeros((ADPT_H,)),
            w3=nrm((ADPT_H, D_MIX)), b3=zeros((D_MIX,)),
        ))
    return p


def prepare_params(p):
    """Stack per-depth weights (leading depth index), split / transpose / cast
    into the fused-kernel layout (bf16 for MXU operands, f32 elsewhere)."""
    stk = lambda arrs: jnp.stack(arrs, axis=0)
    q = {
        "pe_wv": p["patch_vit_w"].astype(BF16),
        "pe_bv": p["patch_vit_b"].reshape(1, D_VIT),
        "pe_pv": p["pos_vit"].reshape(L, D_VIT),
        "pe_wm": p["patch_vim_w"].astype(BF16),
        "pe_bm": p["patch_vim_b"].reshape(1, D_VIM),
        "pe_pm": p["pos_vim"].reshape(L, D_VIM),
    }

    blocks = p["vit_blocks"]
    q["v_ln1g"] = stk([b["ln1_g"].reshape(1, D_VIT) for b in blocks])
    q["v_ln1b"] = stk([b["ln1_b"].reshape(1, D_VIT) for b in blocks])
    q["v_wqkv"] = stk([b["qkv_w"] for b in blocks]).astype(BF16)
    q["v_bqkv"] = stk([b["qkv_b"].reshape(1, 3 * D_VIT) for b in blocks])
    q["v_wo"] = stk([b["proj_w"] for b in blocks]).astype(BF16)
    q["v_bo"] = stk([b["proj_b"].reshape(1, D_VIT) for b in blocks])
    q["v_ln2g"] = stk([b["ln2_g"].reshape(1, D_VIT) for b in blocks])
    q["v_ln2b"] = stk([b["ln2_b"].reshape(1, D_VIT) for b in blocks])
    q["v_w1"] = stk([b["fc1_w"] for b in blocks]).astype(BF16)
    q["v_b1"] = stk([b["fc1_b"].reshape(1, MLP_H) for b in blocks])
    q["v_w2"] = stk([b["fc2_w"] for b in blocks]).astype(BF16)
    q["v_b2"] = stk([b["fc2_b"].reshape(1, D_VIT) for b in blocks])

    layers = p["vim_layers"]

    def stk2(fn, dtype=None):
        arr = jnp.stack([jnp.stack([fn(layers[2 * i + j]) for j in range(2)], 0)
                         for i in range(DEPTH)], 0)
        return arr.astype(dtype) if dtype is not None else arr

    q["m_lng"] = stk2(lambda l: l["ln_g"].reshape(1, D_VIM))
    q["m_lnb"] = stk2(lambda l: l["ln_b"].reshape(1, D_VIM))
    q["m_win"] = stk2(lambda l: l["in_w"], BF16)
    q["m_cw"] = stk2(lambda l: l["conv_w"])
    q["m_cb"] = stk2(lambda l: l["conv_b"].reshape(1, D_INNER))
    q["m_xdt"] = stk2(lambda l: l["xproj_w"][:, :DT_RANK], BF16)
    q["m_xbt"] = stk2(lambda l: l["xproj_w"][:, DT_RANK:DT_RANK + D_STATE].T, BF16)
    q["m_xct"] = stk2(lambda l: l["xproj_w"][:, DT_RANK + D_STATE:].T, BF16)
    q["m_dtw"] = stk2(lambda l: l["dt_w"], BF16)
    q["m_dtb"] = stk2(lambda l: l["dt_b"].reshape(1, D_INNER))
    q["m_at"] = stk2(lambda l: (-jnp.exp(l["A_log"])).T)      # (Ds, Di) f32
    q["m_dsk"] = stk2(lambda l: l["Dsk"].reshape(1, D_INNER))
    q["m_wout"] = stk2(lambda l: l["out_w"], BF16)

    # banded shift matrices for the causal depthwise conv (one fused matmul)
    t_idx = jnp.arange(L)[:, None]
    s_idx = jnp.arange(L)[None, :]
    mats = [(s_idx == (t_idx - (K_CONV - 1 - i))).astype(F32)
            for i in range(K_CONV)]
    q["conv_shift"] = jnp.concatenate(mats, axis=0)            # (K*L, L)
    # gather matrix reducing the L*Ds stacked, C-weighted scan states to (L, Di)
    k_idx = jnp.arange(L * D_STATE)[None, :]
    q["scan_gather"] = (k_idx // D_STATE == t_idx).astype(F32)  # (L, L*Ds)

    ads = p["adapters"]
    q["a_w1v"] = stk([a["w1"][:D_VIT, :] for a in ads]).astype(BF16)
    q["a_w1m"] = stk([a["w1"][D_VIT:, :] for a in ads]).astype(BF16)
    q["a_b1"] = stk([a["b1"].reshape(1, ADPT_H) for a in ads])
    q["a_w2"] = stk([a["w2"] for a in ads]).astype(BF16)
    q["a_b2"] = stk([a["b2"].reshape(1, ADPT_H) for a in ads])
    q["a_w3v"] = stk([a["w3"][:, :D_VIT] for a in ads]).astype(BF16)
    q["a_w3m"] = stk([a["w3"][:, D_VIT:] for a in ads]).astype(BF16)
    q["a_b3v"] = stk([a["b3"][:D_VIT].reshape(1, D_VIT) for a in ads])
    q["a_b3m"] = stk([a["b3"][D_VIT:].reshape(1, D_VIM) for a in ads])

    q["t_upw"] = p["up_final_w"].astype(BF16)
    q["t_upb"] = p["up_final_b"].reshape(1, D_VIT)
    q["t_cpwt"] = p["convpool_w"].T                            # (L, A) f32
    q["t_wlwt"] = p["wl_w"].T.astype(BF16)                     # (D_VIT, A)
    q["t_bias"] = (p["convpool_b"] * jnp.sum(p["wl_w"], axis=-1)
                   + p["wl_b"]).reshape(1, ATTR_NUM)
    q["t_bng"] = p["bn_g"].reshape(1, ATTR_NUM)
    q["t_bnb"] = p["bn_b"].reshape(1, ATTR_NUM)
    q["t_bnrm"] = p["bn_rm"].reshape(1, ATTR_NUM)
    q["t_bnrv"] = p["bn_rv"].reshape(1, ATTR_NUM)
    return q


# ------------------------------- main ----------------------------------------
if __name__ == "__main__":
    key = jax.random.PRNGKey(0)
    pkey, ikey = jax.random.split(key)
    params = init_params(pkey)
    kparams = prepare_params(params)
    imgs = jax.random.normal(ikey, (B, C_IN, IMG, IMG), jnp.float32)   # NCHW
    patches = im2col(imgs).astype(BF16)          # (B, L, CPP) bf16 kernel input

    fwd = jax.jit(hybrid_forward)
    logits = fwd(kparams, patches)
    jax.block_until_ready(logits)
    assert logits.shape == (B, ATTR_NUM), logits.shape
    assert bool(jnp.all(jnp.isfinite(logits)))
    print("KERNEL_OK")
</pallas_src>

<mosaic_0001>
module attributes {stable_mosaic.version = 11 : i64} {
  func.func @_hybrid_kernel(%arg0: i32, %arg1: i32, %arg2: memref<1x16x192xbf16, #tpu.memory_space<vmem>>, %arg3: memref<192x64xbf16, #tpu.memory_space<vmem>>, %arg4: memref<1x64xf32, #tpu.memory_space<vmem>>, %arg5: memref<16x64xf32, #tpu.memory_space<vmem>>, %arg6: memref<192x32xbf16, #tpu.memory_space<vmem>>, %arg7: memref<1x32xf32, #tpu.memory_space<vmem>>, %arg8: memref<16x32xf32, #tpu.memory_space<vmem>>, %arg9: memref<1x1x64xf32, #tpu.memory_space<vmem>>, %arg10: memref<1x1x64xf32, #tpu.memory_space<vmem>>, %arg11: memref<1x64x192xbf16, #tpu.memory_space<vmem>>, %arg12: memref<1x1x192xf32, #tpu.memory_space<vmem>>, %arg13: memref<1x64x64xbf16, #tpu.memory_space<vmem>>, %arg14: memref<1x1x64xf32, #tpu.memory_space<vmem>>, %arg15: memref<1x1x64xf32, #tpu.memory_space<vmem>>, %arg16: memref<1x1x64xf32, #tpu.memory_space<vmem>>, %arg17: memref<1x64x256xbf16, #tpu.memory_space<vmem>>, %arg18: memref<1x1x256xf32, #tpu.memory_space<vmem>>, %arg19: memref<1x256x64xbf16, #tpu.memory_space<vmem>>, %arg20: memref<1x1x64xf32, #tpu.memory_space<vmem>>, %arg21: memref<1x2x1x32xf32, #tpu.memory_space<vmem>>, %arg22: memref<1x2x1x32xf32, #tpu.memory_space<vmem>>, %arg23: memref<1x2x32x128xbf16, #tpu.memory_space<vmem>>, %arg24: memref<1x2x4x64xf32, #tpu.memory_space<vmem>>, %arg25: memref<1x2x1x64xf32, #tpu.memory_space<vmem>>, %arg26: memref<1x2x64x2xbf16, #tpu.memory_space<vmem>>, %arg27: memref<1x2x8x64xbf16, #tpu.memory_space<vmem>>, %arg28: memref<1x2x8x64xbf16, #tpu.memory_space<vmem>>, %arg29: memref<1x2x2x64xbf16, #tpu.memory_space<vmem>>, %arg30: memref<1x2x1x64xf32, #tpu.memory_space<vmem>>, %arg31: memref<1x2x8x64xf32, #tpu.memory_space<vmem>>, %arg32: memref<1x2x1x64xf32, #tpu.memory_space<vmem>>, %arg33: memref<1x2x64x32xbf16, #tpu.memory_space<vmem>>, %arg34: memref<64x16xf32, #tpu.memory_space<vmem>>, %arg35: memref<16x128xf32, #tpu.memory_space<vmem>>, %arg36: memref<1x64x32xbf16, #tpu.memory_space<vmem>>, %arg37: memref<1x32x32xbf16, #tpu.memory_space<vmem>>, %arg38: memref<1x1x32xf32, #tpu.memory_space<vmem>>, %arg39: memref<1x32x32xbf16, #tpu.memory_space<vmem>>, %arg40: memref<1x1x32xf32, #tpu.memory_space<vmem>>, %arg41: memref<1x32x64xbf16, #tpu.memory_space<vmem>>, %arg42: memref<1x32x32xbf16, #tpu.memory_space<vmem>>, %arg43: memref<1x1x64xf32, #tpu.memory_space<vmem>>, %arg44: memref<1x1x32xf32, #tpu.memory_space<vmem>>, %arg45: memref<32x64xbf16, #tpu.memory_space<vmem>>, %arg46: memref<1x64xf32, #tpu.memory_space<vmem>>, %arg47: memref<16x8xf32, #tpu.memory_space<vmem>>, %arg48: memref<64x8xbf16, #tpu.memory_space<vmem>>, %arg49: memref<1x8xf32, #tpu.memory_space<vmem>>, %arg50: memref<1x8xf32, #tpu.memory_space<vmem>>, %arg51: memref<1x8xf32, #tpu.memory_space<vmem>>, %arg52: memref<1x8xf32, #tpu.memory_space<vmem>>, %arg53: memref<1x8xf32, #tpu.memory_space<vmem>>, %arg54: memref<1x1x8xf32, #tpu.memory_space<vmem>>, %arg55: memref<16x64xf32, #tpu.memory_space<vmem>>, %arg56: memref<16x32xf32, #tpu.memory_space<vmem>>, %arg57: memref<16x32xf32, #tpu.memory_space<vmem>>, %arg58: memref<16x64xf32, #tpu.memory_space<vmem>>) attributes {dimension_semantics = [#tpu.dimension_semantics<parallel>, #tpu.dimension_semantics<arbitrary>], iteration_bounds = array<i64: 2, 2>, scalar_prefetch = 0 : i64, scratch_operands = 4 : i64, tpu.core_type = #tpu.core_type<tc>, window_params = [{transform_indices = @transform_0, window_bounds = array<i64: 1, 16, 192>}, {pipeline_mode = #tpu.pipeline_mode<synchronous>, transform_indices = @transform_1, window_bounds = array<i64: 192, 64>}, {pipeline_mode = #tpu.pipeline_mode<synchronous>, transform_indices = @transform_2, window_bounds = array<i64: 1, 64>}, {pipeline_mode = #tpu.pipeline_mode<synchronous>, transform_indices = @transform_3, window_bounds = array<i64: 16, 64>}, {pipeline_mode = #tpu.pipeline_mode<synchronous>, transform_indices = @transform_4, window_bounds = array<i64: 192, 32>}, {pipeline_mode = #tpu.pipeline_mode<synchronous>, transform_indices = @transform_5, window_bounds = array<i64: 1, 32>}, {pipeline_mode = #tpu.pipeline_mode<synchronous>, transform_indices = @transform_6, window_bounds = array<i64: 16, 32>}, {transform_indices = @transform_7, window_bounds = array<i64: 1, 1, 64>}, {transform_indices = @transform_8, window_bounds = array<i64: 1, 1, 64>}, {transform_indices = @transform_9, window_bounds = array<i64: 1, 64, 192>}, {transform_indices = @transform_10, window_bounds = array<i64: 1, 1, 192>}, {transform_indices = @transform_11, window_bounds = array<i64: 1, 64, 64>}, {transform_indices = @transform_12, window_bounds = array<i64: 1, 1, 64>}, {transform_indices = @transform_13, window_bounds = array<i64: 1, 1, 64>}, {transform_indices = @transform_14, window_bounds = array<i64: 1, 1, 64>}, {transform_indices = @transform_15, window_bounds = array<i64: 1, 64, 256>}, {transform_indices = @transform_16, window_bounds = array<i64: 1, 1, 256>}, {transform_indices = @transform_17, window_bounds = array<i64: 1, 256, 64>}, {transform_indices = @transform_18, window_bounds = array<i64: 1, 1, 64>}, {transform_indices = @transform_19, window_bounds = array<i64: 1, 2, 1, 32>}, {transform_indices = @transform_20, window_bounds = array<i64: 1, 2, 1, 32>}, {transform_indices = @transform_21, window_bounds = array<i64: 1, 2, 32, 128>}, {transform_indices = @transform_22, window_bounds = array<i64: 1, 2, 4, 64>}, {transform_indices = @transform_23, window_bounds = array<i64: 1, 2, 1, 64>}, {transform_indices = @transform_24, window_bounds = array<i64: 1, 2, 64, 2>}, {transform_indices = @transform_25, window_bounds = array<i64: 1, 2, 8, 64>}, {transform_indices = @transform_26, window_bounds = array<i64: 1, 2, 8, 64>}, {transform_indices = @transform_27, window_bounds = array<i64: 1, 2, 2, 64>}, {transform_indices = @transform_28, window_bounds = array<i64: 1, 2, 1, 64>}, {transform_indices = @transform_29, window_bounds = array<i64: 1, 2, 8, 64>}, {transform_indices = @transform_30, window_bounds = array<i64: 1, 2, 1, 64>}, {transform_indices = @transform_31, window_bounds = array<i64: 1, 2, 64, 32>}, {pipeline_mode = #tpu.pipeline_mode<synchronous>, transform_indices = @transform_32, window_bounds = array<i64: 64, 16>}, {pipeline_mode = #tpu.pipeline_mode<synchronous>, transform_indices = @transform_33, window_bounds = array<i64: 16, 128>}, {transform_indices = @transform_34, window_bounds = array<i64: 1, 64, 32>}, {transform_indices = @transform_35, window_bounds = array<i64: 1, 32, 32>}, {transform_indices = @transform_36, window_bounds = array<i64: 1, 1, 32>}, {transform_indices = @transform_37, window_bounds = array<i64: 1, 32, 32>}, {transform_indices = @transform_38, window_bounds = array<i64: 1, 1, 32>}, {transform_indices = @transform_39, window_bounds = array<i64: 1, 32, 64>}, {transform_indices = @transform_40, window_bounds = array<i64: 1, 32, 32>}, {transform_indices = @transform_41, window_bounds = array<i64: 1, 1, 64>}, {transform_indices = @transform_42, window_bounds = array<i64: 1, 1, 32>}, {pipeline_mode = #tpu.pipeline_mode<synchronous>, transform_indices = @transform_43, window_bounds = array<i64: 32, 64>}, {pipeline_mode = #tpu.pipeline_mode<synchronous>, transform_indices = @transform_44, window_bounds = array<i64: 1, 64>}, {pipeline_mode = #tpu.pipeline_mode<synchronous>, transform_indices = @transform_45, window_bounds = array<i64: 16, 8>}, {pipeline_mode = #tpu.pipeline_mode<synchronous>, transform_indices = @transform_46, window_bounds = array<i64: 64, 8>}, {pipeline_mode = #tpu.pipeline_mode<synchronous>, transform_indices = @transform_47, window_bounds = array<i64: 1, 8>}, {pipeline_mode = #tpu.pipeline_mode<synchronous>, transform_indices = @transform_48, window_bounds = array<i64: 1, 8>}, {pipeline_mode = #tpu.pipeline_mode<synchronous>, transform_indices = @transform_49, window_bounds = array<i64: 1, 8>}, {pipeline_mode = #tpu.pipeline_mode<synchronous>, transform_indices = @transform_50, window_bounds = array<i64: 1, 8>}, {pipeline_mode = #tpu.pipeline_mode<synchronous>, transform_indices = @transform_51, window_bounds = array<i64: 1, 8>}, {transform_indices = @transform_52, window_bounds = array<i64: 1, 1, 8>}]} {
    %c0_i32 = arith.constant 0 : i32
    %0 = arith.cmpi eq, %arg1, %c0_i32 : i32
    %1 = arith.extui %0 : i1 to i32
    %c0_i32_0 = arith.constant 0 : i32
    %2 = arith.cmpi ne, %1, %c0_i32_0 : i32
    scf.if %2 {
      %c0_270 = arith.constant 0 : index
      %c0_271 = arith.constant 0 : index
      %c0_272 = arith.constant 0 : index
      %910 = vector.load %arg2[%c0_270, %c0_271, %c0_272] : memref<1x16x192xbf16, #tpu.memory_space<vmem>>, vector<1x16x192xbf16>
      %911 = vector.shape_cast %910 : vector<1x16x192xbf16> to vector<16x192xbf16>
      %c0_273 = arith.constant 0 : index
      %c0_274 = arith.constant 0 : index
      %912 = vector.load %arg3[%c0_273, %c0_274] : memref<192x64xbf16, #tpu.memory_space<vmem>>, vector<192x64xbf16>
      %cst_275 = arith.constant dense<0.000000e+00> : vector<16x64xf32>
      %913 = tpu.matmul %911, %912, %cst_275 {dimension_numbers = #tpu.dot_dimension_numbers<[1], [0], [0], [1], [0, 0, 1, 1], [], []>} : vector<16x192xbf16>, vector<192x64xbf16>, vector<16x64xf32> -> vector<16x64xf32>
      %c0_276 = arith.constant 0 : index
      %c0_277 = arith.constant 0 : index
      %914 = vector.load %arg4[%c0_276, %c0_277] : memref<1x64xf32, #tpu.memory_space<vmem>>, vector<1x64xf32>
      %915 = vector.broadcast %914 : vector<1x64xf32> to vector<16x64xf32>
      %916 = arith.addf %913, %915 : vector<16x64xf32>
      %c0_278 = arith.constant 0 : index
      %c0_279 = arith.constant 0 : index
      %917 = vector.load %arg5[%c0_278, %c0_279] : memref<16x64xf32, #tpu.memory_space<vmem>>, vector<16x64xf32>
      %918 = arith.addf %916, %917 : vector<16x64xf32>
      %c0_280 = arith.constant 0 : index
      %c0_281 = arith.constant 0 : index
      %919 = vector.load %arg55[%c0_280, %c0_281] : memref<16x64xf32, #tpu.memory_space<vmem>>, vector<16x64xf32>
      tpu.vector_store %arg55[%c0_280, %c0_281], %918 {strides = array<i32>} : memref<16x64xf32, #tpu.memory_space<vmem>>, vector<16x64xf32>,
      %c0_282 = arith.constant 0 : index
      %c0_283 = arith.constant 0 : index
      %920 = vector.load %arg6[%c0_282, %c0_283] : memref<192x32xbf16, #tpu.memory_space<vmem>>, vector<192x32xbf16>
      %cst_284 = arith.constant dense<0.000000e+00> : vector<16x32xf32>
      %921 = tpu.matmul %911, %920, %cst_284 {dimension_numbers = #tpu.dot_dimension_numbers<[1], [0], [0], [1], [0, 0, 1, 1], [], []>} : vector<16x192xbf16>, vector<192x32xbf16>, vector<16x32xf32> -> vector<16x32xf32>
      %c0_285 = arith.constant 0 : index
      %c0_286 = arith.constant 0 : index
      %922 = vector.load %arg7[%c0_285, %c0_286] : memref<1x32xf32, #tpu.memory_space<vmem>>, vector<1x32xf32>
      %923 = vector.broadcast %922 : vector<1x32xf32> to vector<16x32xf32>
      %924 = arith.addf %921, %923 : vector<16x32xf32>
      %c0_287 = arith.constant 0 : index
      %c0_288 = arith.constant 0 : index
      %925 = vector.load %arg8[%c0_287, %c0_288] : memref<16x32xf32, #tpu.memory_space<vmem>>, vector<16x32xf32>
      %926 = arith.addf %924, %925 : vector<16x32xf32>
      %c0_289 = arith.constant 0 : index
      %c0_290 = arith.constant 0 : index
      %927 = vector.load %arg56[%c0_289, %c0_290] : memref<16x32xf32, #tpu.memory_space<vmem>>, vector<16x32xf32>
      tpu.vector_store %arg56[%c0_289, %c0_290], %926 {strides = array<i32>} : memref<16x32xf32, #tpu.memory_space<vmem>>, vector<16x32xf32>,
      %cst_291 = arith.constant 0.000000e+00 : f32
      %928 = vector.broadcast %cst_291 : f32 to vector<16x32xf32>
      %c0_292 = arith.constant 0 : index
      %c0_293 = arith.constant 0 : index
      %929 = vector.load %arg57[%c0_292, %c0_293] : memref<16x32xf32, #tpu.memory_space<vmem>>, vector<16x32xf32>
      tpu.vector_store %arg57[%c0_292, %c0_293], %928 {strides = array<i32>} : memref<16x32xf32, #tpu.memory_space<vmem>>, vector<16x32xf32>,
    } else {
    }
    %c0 = arith.constant 0 : index
    %c0_1 = arith.constant 0 : index
    %3 = vector.load %arg55[%c0, %c0_1] : memref<16x64xf32, #tpu.memory_space<vmem>>, vector<16x64xf32>
    %c0_2 = arith.constant 0 : index
    %c0_3 = arith.constant 0 : index
    %c0_4 = arith.constant 0 : index
    %4 = vector.load %arg9[%c0_2, %c0_3, %c0_4] : memref<1x1x64xf32, #tpu.memory_space<vmem>>, vector<1x1x64xf32>
    %5 = vector.shape_cast %4 : vector<1x1x64xf32> to vector<1x64xf32>
    %c0_5 = arith.constant 0 : index
    %c0_6 = arith.constant 0 : index
    %c0_7 = arith.constant 0 : index
    %6 = vector.load %arg10[%c0_5, %c0_6, %c0_7] : memref<1x1x64xf32, #tpu.memory_space<vmem>>, vector<1x1x64xf32>
    %7 = vector.shape_cast %6 : vector<1x1x64xf32> to vector<1x64xf32>
    %cst = arith.constant dense<0.000000e+00> : vector<16xf32>
    %8 = vector.multi_reduction <add>, %3, %cst [1] : vector<16x64xf32> to vector<16xf32>
    %9 = vector.shape_cast %8 : vector<16xf32> to vector<16x1xf32>
    %cst_8 = arith.constant 6.400000e+01 : f32
    %10 = vector.broadcast %cst_8 : f32 to vector<16x1xf32>
    %11 = arith.divf %9, %10 : vector<16x1xf32>
    %12 = vector.broadcast %11 : vector<16x1xf32> to vector<16x64xf32>
    %13 = arith.subf %3, %12 : vector<16x64xf32>
    %14 = arith.mulf %13, %13 : vector<16x64xf32>
    %cst_9 = arith.constant dense<0.000000e+00> : vector<16xf32>
    %15 = vector.multi_reduction <add>, %14, %cst_9 [1] : vector<16x64xf32> to vector<16xf32>
    %16 = vector.shape_cast %15 : vector<16xf32> to vector<16x1xf32>
    %cst_10 = arith.constant 6.400000e+01 : f32
    %17 = vector.broadcast %cst_10 : f32 to vector<16x1xf32>
    %18 = arith.divf %16, %17 : vector<16x1xf32>
    %cst_11 = arith.constant 9.99999997E-7 : f32
    %19 = vector.broadcast %cst_11 : f32 to vector<16x1xf32>
    %20 = arith.addf %18, %19 : vector<16x1xf32>
    %21 = math.rsqrt %20 : vector<16x1xf32>
    %22 = vector.broadcast %21 : vector<16x1xf32> to vector<16x64xf32>
    %23 = arith.mulf %13, %22 : vector<16x64xf32>
    %24 = vector.broadcast %5 : vector<1x64xf32> to vector<16x64xf32>
    %25 = arith.mulf %23, %24 : vector<16x64xf32>
    %26 = vector.broadcast %7 : vector<1x64xf32> to vector<16x64xf32>
    %27 = arith.addf %25, %26 : vector<16x64xf32>
    %28 = arith.truncf %27 : vector<16x64xf32> to vector<16x64xbf16>
    %c0_12 = arith.constant 0 : index
    %c0_13 = arith.constant 0 : index
    %c0_14 = arith.constant 0 : index
    %29 = vector.load %arg11[%c0_12, %c0_13, %c0_14] : memref<1x64x192xbf16, #tpu.memory_space<vmem>>, vector<1x64x192xbf16>
    %30 = vector.shape_cast %29 : vector<1x64x192xbf16> to vector<64x192xbf16>
    %cst_15 = arith.constant dense<0.000000e+00> : vector<16x192xf32>
    %31 = tpu.matmul %28, %30, %cst_15 {dimension_numbers = #tpu.dot_dimension_numbers<[1], [0], [0], [1], [0, 0, 1, 1], [], []>} : vector<16x64xbf16>, vector<64x192xbf16>, vector<16x192xf32> -> vector<16x192xf32>
    %c0_16 = arith.constant 0 : index
    %c0_17 = arith.constant 0 : index
    %c0_18 = arith.constant 0 : index
    %32 = vector.load %arg12[%c0_16, %c0_17, %c0_18] : memref<1x1x192xf32, #tpu.memory_space<vmem>>, vector<1x1x192xf32>
    %33 = vector.shape_cast %32 : vector<1x1x192xf32> to vector<1x192xf32>
    %34 = vector.broadcast %33 : vector<1x192xf32> to vector<16x192xf32>
    %35 = arith.addf %31, %34 : vector<16x192xf32>
    %36 = vector.extract_strided_slice %35 {offsets = [0, 0], sizes = [16, 16], strides = [1, 1]} : vector<16x192xf32> to vector<16x16xf32>
    %37 = arith.truncf %36 : vector<16x16xf32> to vector<16x16xbf16>
    %38 = vector.extract_strided_slice %35 {offsets = [0, 64], sizes = [16, 16], strides = [1, 1]} : vector<16x192xf32> to vector<16x16xf32>
    %39 = arith.truncf %38 : vector<16x16xf32> to vector<16x16xbf16>
    %40 = vector.extract_strided_slice %35 {offsets = [0, 128], sizes = [16, 16], strides = [1, 1]} : vector<16x192xf32> to vector<16x16xf32>
    %41 = arith.truncf %40 : vector<16x16xf32> to vector<16x16xbf16>
    %cst_19 = arith.constant dense<0.000000e+00> : vector<16x16xf32>
    %42 = tpu.matmul %37, %39, %cst_19 {dimension_numbers = #tpu.dot_dimension_numbers<[1], [1], [0], [0], [0, 0, 1, 0], [], []>} : vector<16x16xbf16>, vector<16x16xbf16>, vector<16x16xf32> -> vector<16x16xf32>
    %cst_20 = arith.constant 2.500000e-01 : f32
    %43 = vector.broadcast %cst_20 : f32 to vector<16x16xf32>
    %44 = arith.mulf %42, %43 : vector<16x16xf32>
    %cst_21 = arith.constant dense<0xFF800000> : vector<16xf32>
    %45 = vector.multi_reduction <maximumf>, %44, %cst_21 [1] : vector<16x16xf32> to vector<16xf32>
    %46 = vector.shape_cast %45 : vector<16xf32> to vector<16x1xf32>
    %47 = vector.broadcast %46 : vector<16x1xf32> to vector<16x16xf32>
    %48 = arith.subf %44, %47 : vector<16x16xf32>
    %49 = math.exp %48 : vector<16x16xf32>
    %cst_22 = arith.constant dense<0.000000e+00> : vector<16xf32>
    %50 = vector.multi_reduction <add>, %49, %cst_22 [1] : vector<16x16xf32> to vector<16xf32>
    %51 = vector.shape_cast %50 : vector<16xf32> to vector<16x1xf32>
    %52 = tpu.reciprocal %51 {approx = true} : vector<16x1xf32> -> vector<16x1xf32>
    %53 = vector.broadcast %52 : vector<16x1xf32> to vector<16x16xf32>
    %54 = arith.mulf %49, %53 : vector<16x16xf32>
    %55 = arith.truncf %54 : vector<16x16xf32> to vector<16x16xbf16>
    %cst_23 = arith.constant dense<0.000000e+00> : vector<16x16xf32>
    %56 = tpu.matmul %55, %41, %cst_23 {dimension_numbers = #tpu.dot_dimension_numbers<[1], [0], [0], [1], [0, 0, 1, 1], [], []>} : vector<16x16xbf16>, vector<16x16xbf16>, vector<16x16xf32> -> vector<16x16xf32>
    %c0_24 = arith.constant 0 : index
    %c0_25 = arith.constant 0 : index
    %57 = vector.load %arg58[%c0_24, %c0_25] : memref<16x64xf32, #tpu.memory_space<vmem>>, vector<16x16xf32>
    tpu.vector_store %arg58[%c0_24, %c0_25], %56 {strides = array<i32>} : memref<16x64xf32, #tpu.memory_space<vmem>>, vector<16x16xf32>,
    %58 = vector.extract_strided_slice %35 {offsets = [0, 16], sizes = [16, 16], strides = [1, 1]} : vector<16x192xf32> to vector<16x16xf32>
    %59 = arith.truncf %58 : vector<16x16xf32> to vector<16x16xbf16>
    %60 = vector.extract_strided_slice %35 {offsets = [0, 80], sizes = [16, 16], strides = [1, 1]} : vector<16x192xf32> to vector<16x16xf32>
    %61 = arith.truncf %60 : vector<16x16xf32> to vector<16x16xbf16>
    %62 = vector.extract_strided_slice %35 {offsets = [0, 144], sizes = [16, 16], strides = [1, 1]} : vector<16x192xf32> to vector<16x16xf32>
    %63 = arith.truncf %62 : vector<16x16xf32> to vector<16x16xbf16>
    %cst_26 = arith.constant dense<0.000000e+00> : vector<16x16xf32>
    %64 = tpu.matmul %59, %61, %cst_26 {dimension_numbers = #tpu.dot_dimension_numbers<[1], [1], [0], [0], [0, 0, 1, 0], [], []>} : vector<16x16xbf16>, vector<16x16xbf16>, vector<16x16xf32> -> vector<16x16xf32>
    %cst_27 = arith.constant 2.500000e-01 : f32
    %65 = vector.broadcast %cst_27 : f32 to vector<16x16xf32>
    %66 = arith.mulf %64, %65 : vector<16x16xf32>
    %cst_28 = arith.constant dense<0xFF800000> : vector<16xf32>
    %67 = vector.multi_reduction <maximumf>, %66, %cst_28 [1] : vector<16x16xf32> to vector<16xf32>
    %68 = vector.shape_cast %67 : vector<16xf32> to vector<16x1xf32>
    %69 = vector.broadcast %68 : vector<16x1xf32> to vector<16x16xf32>
    %70 = arith.subf %66, %69 : vector<16x16xf32>
    %71 = math.exp %70 : vector<16x16xf32>
    %cst_29 = arith.constant dense<0.000000e+00> : vector<16xf32>
    %72 = vector.multi_reduction <add>, %71, %cst_29 [1] : vector<16x16xf32> to vector<16xf32>
    %73 = vector.shape_cast %72 : vector<16xf32> to vector<16x1xf32>
    %74 = tpu.reciprocal %73 {approx = true} : vector<16x1xf32> -> vector<16x1xf32>
    %75 = vector.broadcast %74 : vector<16x1xf32> to vector<16x16xf32>
    %76 = arith.mulf %71, %75 : vector<16x16xf32>
    %77 = arith.truncf %76 : vector<16x16xf32> to vector<16x16xbf16>
    %cst_30 = arith.constant dense<0.000000e+00> : vector<16x16xf32>
    %78 = tpu.matmul %77, %63, %cst_30 {dimension_numbers = #tpu.dot_dimension_numbers<[1], [0], [0], [1], [0, 0, 1, 1], [], []>} : vector<16x16xbf16>, vector<16x16xbf16>, vector<16x16xf32> -> vector<16x16xf32>
    %c0_31 = arith.constant 0 : index
    %c16 = arith.constant 16 : index
    %79 = vector.load %arg58[%c0_31, %c16] : memref<16x64xf32, #tpu.memory_space<vmem>>, vector<16x16xf32>
    tpu.vector_store %arg58[%c0_31, %c16], %78 {strides = array<i32>} : memref<16x64xf32, #tpu.memory_space<vmem>>, vector<16x16xf32>,
    %80 = vector.extract_strided_slice %35 {offsets = [0, 32], sizes = [16, 16], strides = [1, 1]} : vector<16x192xf32> to vector<16x16xf32>
    %81 = arith.truncf %80 : vector<16x16xf32> to vector<16x16xbf16>
    %82 = vector.extract_strided_slice %35 {offsets = [0, 96], sizes = [16, 16], strides = [1, 1]} : vector<16x192xf32> to vector<16x16xf32>
    %83 = arith.truncf %82 : vector<16x16xf32> to vector<16x16xbf16>
    %84 = vector.extract_strided_slice %35 {offsets = [0, 160], sizes = [16, 16], strides = [1, 1]} : vector<16x192xf32> to vector<16x16xf32>
    %85 = arith.truncf %84 : vector<16x16xf32> to vector<16x16xbf16>
    %cst_32 = arith.constant dense<0.000000e+00> : vector<16x16xf32>
    %86 = tpu.matmul %81, %83, %cst_32 {dimension_numbers = #tpu.dot_dimension_numbers<[1], [1], [0], [0], [0, 0, 1, 0], [], []>} : vector<16x16xbf16>, vector<16x16xbf16>, vector<16x16xf32> -> vector<16x16xf32>
    %cst_33 = arith.constant 2.500000e-01 : f32
    %87 = vector.broadcast %cst_33 : f32 to vector<16x16xf32>
    %88 = arith.mulf %86, %87 : vector<16x16xf32>
    %cst_34 = arith.constant dense<0xFF800000> : vector<16xf32>
    %89 = vector.multi_reduction <maximumf>, %88, %cst_34 [1] : vector<16x16xf32> to vector<16xf32>
    %90 = vector.shape_cast %89 : vector<16xf32> to vector<16x1xf32>
    %91 = vector.broadcast %90 : vector<16x1xf32> to vector<16x16xf32>
    %92 = arith.subf %88, %91 : vector<16x16xf32>
    %93 = math.exp %92 : vector<16x16xf32>
    %cst_35 = arith.constant dense<0.000000e+00> : vector<16xf32>
    %94 = vector.multi_reduction <add>, %93, %cst_35 [1] : vector<16x16xf32> to vector<16xf32>
    %95 = vector.shape_cast %94 : vector<16xf32> to vector<16x1xf32>
    %96 = tpu.reciprocal %95 {approx = true} : vector<16x1xf32> -> vector<16x1xf32>
    %97 = vector.broadcast %96 : vector<16x1xf32> to vector<16x16xf32>
    %98 = arith.mulf %93, %97 : vector<16x16xf32>
    %99 = arith.truncf %98 : vector<16x16xf32> to vector<16x16xbf16>
    %cst_36 = arith.constant dense<0.000000e+00> : vector<16x16xf32>
    %100 = tpu.matmul %99, %85, %cst_36 {dimension_numbers = #tpu.dot_dimension_numbers<[1], [0], [0], [1], [0, 0, 1, 1], [], []>} : vector<16x16xbf16>, vector<16x16xbf16>, vector<16x16xf32> -> vector<16x16xf32>
    %c0_37 = arith.constant 0 : index
    %c32 = arith.constant 32 : index
    %101 = vector.load %arg58[%c0_37, %c32] : memref<16x64xf32, #tpu.memory_space<vmem>>, vector<16x16xf32>
    tpu.vector_store %arg58[%c0_37, %c32], %100 {strides = array<i32>} : memref<16x64xf32, #tpu.memory_space<vmem>>, vector<16x16xf32>,
    %102 = vector.extract_strided_slice %35 {offsets = [0, 48], sizes = [16, 16], strides = [1, 1]} : vector<16x192xf32> to vector<16x16xf32>
    %103 = arith.truncf %102 : vector<16x16xf32> to vector<16x16xbf16>
    %104 = vector.extract_strided_slice %35 {offsets = [0, 112], sizes = [16, 16], strides = [1, 1]} : vector<16x192xf32> to vector<16x16xf32>
    %105 = arith.truncf %104 : vector<16x16xf32> to vector<16x16xbf16>
    %106 = vector.extract_strided_slice %35 {offsets = [0, 176], sizes = [16, 16], strides = [1, 1]} : vector<16x192xf32> to vector<16x16xf32>
    %107 = arith.truncf %106 : vector<16x16xf32> to vector<16x16xbf16>
    %cst_38 = arith.constant dense<0.000000e+00> : vector<16x16xf32>
    %108 = tpu.matmul %103, %105, %cst_38 {dimension_numbers = #tpu.dot_dimension_numbers<[1], [1], [0], [0], [0, 0, 1, 0], [], []>} : vector<16x16xbf16>, vector<16x16xbf16>, vector<16x16xf32> -> vector<16x16xf32>
    %cst_39 = arith.constant 2.500000e-01 : f32
    %109 = vector.broadcast %cst_39 : f32 to vector<16x16xf32>
    %110 = arith.mulf %108, %109 : vector<16x16xf32>
    %cst_40 = arith.constant dense<0xFF800000> : vector<16xf32>
    %111 = vector.multi_reduction <maximumf>, %110, %cst_40 [1] : vector<16x16xf32> to vector<16xf32>
    %112 = vector.shape_cast %111 : vector<16xf32> to vector<16x1xf32>
    %113 = vector.broadcast %112 : vector<16x1xf32> to vector<16x16xf32>
    %114 = arith.subf %110, %113 : vector<16x16xf32>
    %115 = math.exp %114 : vector<16x16xf32>
    %cst_41 = arith.constant dense<0.000000e+00> : vector<16xf32>
    %116 = vector.multi_reduction <add>, %115, %cst_41 [1] : vector<16x16xf32> to vector<16xf32>
    %117 = vector.shape_cast %116 : vector<16xf32> to vector<16x1xf32>
    %118 = tpu.reciprocal %117 {approx = true} : vector<16x1xf32> -> vector<16x1xf32>
    %119 = vector.broadcast %118 : vector<16x1xf32> to vector<16x16xf32>
    %120 = arith.mulf %115, %119 : vector<16x16xf32>
    %121 = arith.truncf %120 : vector<16x16xf32> to vector<16x16xbf16>
    %cst_42 = arith.constant dense<0.000000e+00> : vector<16x16xf32>
    %122 = tpu.matmul %121, %107, %cst_42 {dimension_numbers = #tpu.dot_dimension_numbers<[1], [0], [0], [1], [0, 0, 1, 1], [], []>} : vector<16x16xbf16>, vector<16x16xbf16>, vector<16x16xf32> -> vector<16x16xf32>
    %c0_43 = arith.constant 0 : index
    %c48 = arith.constant 48 : index
    %123 = vector.load %arg58[%c0_43, %c48] : memref<16x64xf32, #tpu.memory_space<vmem>>, vector<16x16xf32>
    tpu.vector_store %arg58[%c0_43, %c48], %122 {strides = array<i32>} : memref<16x64xf32, #tpu.memory_space<vmem>>, vector<16x16xf32>,
    %c0_44 = arith.constant 0 : index
    %c0_45 = arith.constant 0 : index
    %124 = vector.load %arg58[%c0_44, %c0_45] : memref<16x64xf32, #tpu.memory_space<vmem>>, vector<16x64xf32>
    %125 = arith.truncf %124 : vector<16x64xf32> to vector<16x64xbf16>
    %c0_46 = arith.constant 0 : index
    %c0_47 = arith.constant 0 : index
    %c0_48 = arith.constant 0 : index
    %126 = vector.load %arg13[%c0_46, %c0_47, %c0_48] : memref<1x64x64xbf16, #tpu.memory_space<vmem>>, vector<1x64x64xbf16>
    %127 = vector.shape_cast %126 : vector<1x64x64xbf16> to vector<64x64xbf16>
    %cst_49 = arith.constant dense<0.000000e+00> : vector<16x64xf32>
    %128 = tpu.matmul %125, %127, %cst_49 {dimension_numbers = #tpu.dot_dimension_numbers<[1], [0], [0], [1], [0, 0, 1, 1], [], []>} : vector<16x64xbf16>, vector<64x64xbf16>, vector<16x64xf32> -> vector<16x64xf32>
    %129 = arith.addf %3, %128 : vector<16x64xf32>
    %c0_50 = arith.constant 0 : index
    %c0_51 = arith.constant 0 : index
    %c0_52 = arith.constant 0 : index
    %130 = vector.load %arg14[%c0_50, %c0_51, %c0_52] : memref<1x1x64xf32, #tpu.memory_space<vmem>>, vector<1x1x64xf32>
    %131 = vector.shape_cast %130 : vector<1x1x64xf32> to vector<1x64xf32>
    %132 = vector.broadcast %131 : vector<1x64xf32> to vector<16x64xf32>
    %133 = arith.addf %129, %132 : vector<16x64xf32>
    %c0_53 = arith.constant 0 : index
    %c0_54 = arith.constant 0 : index
    %c0_55 = arith.constant 0 : index
    %134 = vector.load %arg15[%c0_53, %c0_54, %c0_55] : memref<1x1x64xf32, #tpu.memory_space<vmem>>, vector<1x1x64xf32>
    %135 = vector.shape_cast %134 : vector<1x1x64xf32> to vector<1x64xf32>
    %c0_56 = arith.constant 0 : index
    %c0_57 = arith.constant 0 : index
    %c0_58 = arith.constant 0 : index
    %136 = vector.load %arg16[%c0_56, %c0_57, %c0_58] : memref<1x1x64xf32, #tpu.memory_space<vmem>>, vector<1x1x64xf32>
    %137 = vector.shape_cast %136 : vector<1x1x64xf32> to vector<1x64xf32>
    %cst_59 = arith.constant dense<0.000000e+00> : vector<16xf32>
    %138 = vector.multi_reduction <add>, %133, %cst_59 [1] : vector<16x64xf32> to vector<16xf32>
    %139 = vector.shape_cast %138 : vector<16xf32> to vector<16x1xf32>
    %cst_60 = arith.constant 6.400000e+01 : f32
    %140 = vector.broadcast %cst_60 : f32 to vector<16x1xf32>
    %141 = arith.divf %139, %140 : vector<16x1xf32>
    %142 = vector.broadcast %141 : vector<16x1xf32> to vector<16x64xf32>
    %143 = arith.subf %133, %142 : vector<16x64xf32>
    %144 = arith.mulf %143, %143 : vector<16x64xf32>
    %cst_61 = arith.constant dense<0.000000e+00> : vector<16xf32>
    %145 = vector.multi_reduction <add>, %144, %cst_61 [1] : vector<16x64xf32> to vector<16xf32>
    %146 = vector.shape_cast %145 : vector<16xf32> to vector<16x1xf32>
    %cst_62 = arith.constant 6.400000e+01 : f32
    %147 = vector.broadcast %cst_62 : f32 to vector<16x1xf32>
    %148 = arith.divf %146, %147 : vector<16x1xf32>
    %cst_63 = arith.constant 9.99999997E-7 : f32
    %149 = vector.broadcast %cst_63 : f32 to vector<16x1xf32>
    %150 = arith.addf %148, %149 : vector<16x1xf32>
    %151 = math.rsqrt %150 : vector<16x1xf32>
    %152 = vector.broadcast %151 : vector<16x1xf32> to vector<16x64xf32>
    %153 = arith.mulf %143, %152 : vector<16x64xf32>
    %154 = vector.broadcast %135 : vector<1x64xf32> to vector<16x64xf32>
    %155 = arith.mulf %153, %154 : vector<16x64xf32>
    %156 = vector.broadcast %137 : vector<1x64xf32> to vector<16x64xf32>
    %157 = arith.addf %155, %156 : vector<16x64xf32>
    %158 = arith.truncf %157 : vector<16x64xf32> to vector<16x64xbf16>
    %c0_64 = arith.constant 0 : index
    %c0_65 = arith.constant 0 : index
    %c0_66 = arith.constant 0 : index
    %159 = vector.load %arg17[%c0_64, %c0_65, %c0_66] : memref<1x64x256xbf16, #tpu.memory_space<vmem>>, vector<1x64x256xbf16>
    %160 = vector.shape_cast %159 : vector<1x64x256xbf16> to vector<64x256xbf16>
    %cst_67 = arith.constant dense<0.000000e+00> : vector<16x256xf32>
    %161 = tpu.matmul %158, %160, %cst_67 {dimension_numbers = #tpu.dot_dimension_numbers<[1], [0], [0], [1], [0, 0, 1, 1], [], []>} : vector<16x64xbf16>, vector<64x256xbf16>, vector<16x256xf32> -> vector<16x256xf32>
    %c0_68 = arith.constant 0 : index
    %c0_69 = arith.constant 0 : index
    %c0_70 = arith.constant 0 : index
    %162 = vector.load %arg18[%c0_68, %c0_69, %c0_70] : memref<1x1x256xf32, #tpu.memory_space<vmem>>, vector<1x1x256xf32>
    %163 = vector.shape_cast %162 : vector<1x1x256xf32> to vector<1x256xf32>
    %164 = vector.broadcast %163 : vector<1x256xf32> to vector<16x256xf32>
    %165 = arith.addf %161, %164 : vector<16x256xf32>
    %166 = arith.mulf %165, %165 : vector<16x256xf32>
    %167 = arith.mulf %165, %166 : vector<16x256xf32>
    %cst_71 = arith.constant 4.471500e-02 : f32
    %168 = vector.broadcast %cst_71 : f32 to vector<16x256xf32>
    %169 = arith.mulf %168, %167 : vector<16x256xf32>
    %170 = arith.addf %165, %169 : vector<16x256xf32>
    %cst_72 = arith.constant 0.797884583 : f32
    %171 = vector.broadcast %cst_72 : f32 to vector<16x256xf32>
    %172 = arith.mulf %171, %170 : vector<16x256xf32>
    %173 = math.tanh %172 : vector<16x256xf32>
    %cst_73 = arith.constant 1.000000e+00 : f32
    %174 = vector.broadcast %cst_73 : f32 to vector<16x256xf32>
    %175 = arith.addf %174, %173 : vector<16x256xf32>
    %cst_74 = arith.constant 5.000000e-01 : f32
    %176 = vector.broadcast %cst_74 : f32 to vector<16x256xf32>
    %177 = arith.mulf %176, %175 : vector<16x256xf32>
    %178 = arith.mulf %165, %177 : vector<16x256xf32>
    %179 = arith.truncf %178 : vector<16x256xf32> to vector<16x256xbf16>
    %c0_75 = arith.constant 0 : index
    %c0_76 = arith.constant 0 : index
    %c0_77 = arith.constant 0 : index
    %180 = vector.load %arg19[%c0_75, %c0_76, %c0_77] : memref<1x256x64xbf16, #tpu.memory_space<vmem>>, vector<1x256x64xbf16>
    %181 = vector.shape_cast %180 : vector<1x256x64xbf16> to vector<256x64xbf16>
    %cst_78 = arith.constant dense<0.000000e+00> : vector<16x64xf32>
    %182 = tpu.matmul %179, %181, %cst_78 {dimension_numbers = #tpu.dot_dimension_numbers<[1], [0], [0], [1], [0, 0, 1, 1], [], []>} : vector<16x256xbf16>, vector<256x64xbf16>, vector<16x64xf32> -> vector<16x64xf32>
    %183 = arith.addf %133, %182 : vector<16x64xf32>
    %c0_79 = arith.constant 0 : index
    %c0_80 = arith.constant 0 : index
    %c0_81 = arith.constant 0 : index
    %184 = vector.load %arg20[%c0_79, %c0_80, %c0_81] : memref<1x1x64xf32, #tpu.memory_space<vmem>>, vector<1x1x64xf32>
    %185 = vector.shape_cast %184 : vector<1x1x64xf32> to vector<1x64xf32>
    %186 = vector.broadcast %185 : vector<1x64xf32> to vector<16x64xf32>
    %187 = arith.addf %183, %186 : vector<16x64xf32>
    %c0_82 = arith.constant 0 : index
    %c0_83 = arith.constant 0 : index
    %188 = vector.load %arg34[%c0_82, %c0_83] : memref<64x16xf32, #tpu.memory_space<vmem>>, vector<64x16xf32>
    %c0_84 = arith.constant 0 : index
    %c0_85 = arith.constant 0 : index
    %189 = vector.load %arg35[%c0_84, %c0_85] : memref<16x128xf32, #tpu.memory_space<vmem>>, vector<16x128xf32>
    %c0_86 = arith.constant 0 : index
    %c0_87 = arith.constant 0 : index
    %190 = vector.load %arg56[%c0_86, %c0_87] : memref<16x32xf32, #tpu.memory_space<vmem>>, vector<16x32xf32>
    %c0_88 = arith.constant 0 : index
    %c0_89 = arith.constant 0 : index
    %191 = vector.load %arg57[%c0_88, %c0_89] : memref<16x32xf32, #tpu.memory_space<vmem>>, vector<16x32xf32>
    %192 = arith.addf %190, %191 : vector<16x32xf32>
    %c0_90 = arith.constant 0 : index
    %c0_91 = arith.constant 0 : index
    %c0_92 = arith.constant 0 : index
    %c0_93 = arith.constant 0 : index
    %193 = vector.load %arg21[%c0_90, %c0_91, %c0_92, %c0_93] : memref<1x2x1x32xf32, #tpu.memory_space<vmem>>, vector<1x1x1x32xf32>
    %194 = vector.shape_cast %193 : vector<1x1x1x32xf32> to vector<1x32xf32>
    %c0_94 = arith.constant 0 : index
    %c0_95 = arith.constant 0 : index
    %c0_96 = arith.constant 0 : index
    %c0_97 = arith.constant 0 : index
    %195 = vector.load %arg22[%c0_94, %c0_95, %c0_96, %c0_97] : memref<1x2x1x32xf32, #tpu.memory_space<vmem>>, vector<1x1x1x32xf32>
    %196 = vector.shape_cast %195 : vector<1x1x1x32xf32> to vector<1x32xf32>
    %cst_98 = arith.constant dense<0.000000e+00> : vector<16xf32>
    %197 = vector.multi_reduction <add>, %192, %cst_98 [1] : vector<16x32xf32> to vector<16xf32>
    %198 = vector.shape_cast %197 : vector<16xf32> to vector<16x1xf32>
    %cst_99 = arith.constant 3.200000e+01 : f32
    %199 = vector.broadcast %cst_99 : f32 to vector<16x1xf32>
    %200 = arith.divf %198, %199 : vector<16x1xf32>
    %201 = vector.broadcast %200 : vector<16x1xf32> to vector<16x32xf32>
    %202 = arith.subf %192, %201 : vector<16x32xf32>
    %203 = arith.mulf %202, %202 : vector<16x32xf32>
    %cst_100 = arith.constant dense<0.000000e+00> : vector<16xf32>
    %204 = vector.multi_reduction <add>, %203, %cst_100 [1] : vector<16x32xf32> to vector<16xf32>
    %205 = vector.shape_cast %204 : vector<16xf32> to vector<16x1xf32>
    %cst_101 = arith.constant 3.200000e+01 : f32
    %206 = vector.broadcast %cst_101 : f32 to vector<16x1xf32>
    %207 = arith.divf %205, %206 : vector<16x1xf32>
    %cst_102 = arith.constant 9.99999974E-6 : f32
    %208 = vector.broadcast %cst_102 : f32 to vector<16x1xf32>
    %209 = arith.addf %207, %208 : vector<16x1xf32>
    %210 = math.rsqrt %209 : vector<16x1xf32>
    %211 = vector.broadcast %210 : vector<16x1xf32> to vector<16x32xf32>
    %212 = arith.mulf %202, %211 : vector<16x32xf32>
    %213 = vector.broadcast %194 : vector<1x32xf32> to vector<16x32xf32>
    %214 = arith.mulf %212, %213 : vector<16x32xf32>
    %215 = vector.broadcast %196 : vector<1x32xf32> to vector<16x32xf32>
    %216 = arith.addf %214, %215 : vector<16x32xf32>
    %217 = arith.truncf %216 : vector<16x32xf32> to vector<16x32xbf16>
    %c0_103 = arith.constant 0 : index
    %c0_104 = arith.constant 0 : index
    %c0_105 = arith.constant 0 : index
    %c0_106 = arith.constant 0 : index
    %218 = vector.load %arg23[%c0_103, %c0_104, %c0_105, %c0_106] : memref<1x2x32x128xbf16, #tpu.memory_space<vmem>>, vector<1x1x32x128xbf16>
    %219 = vector.shape_cast %218 : vector<1x1x32x128xbf16> to vector<32x128xbf16>
    %cst_107 = arith.constant dense<0.000000e+00> : vector<16x128xf32>
    %220 = tpu.matmul %217, %219, %cst_107 {dimension_numbers = #tpu.dot_dimension_numbers<[1], [0], [0], [1], [0, 0, 1, 1], [], []>} : vector<16x32xbf16>, vector<32x128xbf16>, vector<16x128xf32> -> vector<16x128xf32>
    %221 = vector.extract_strided_slice %220 {offsets = [0, 0], sizes = [16, 64], strides = [1, 1]} : vector<16x128xf32> to vector<16x64xf32>
    %222 = vector.extract_strided_slice %220 {offsets = [0, 64], sizes = [16, 64], strides = [1, 1]} : vector<16x128xf32> to vector<16x64xf32>
    %cst_108 = arith.constant dense<0.000000e+00> : vector<64x64xf32>
    %223 = tpu.matmul %188, %221, %cst_108 {dimension_numbers = #tpu.dot_dimension_numbers<[1], [0], [0], [1], [0, 0, 1, 1], [], []>} : vector<64x16xf32>, vector<16x64xf32>, vector<64x64xf32> -> vector<64x64xf32>
    %c0_109 = arith.constant 0 : index
    %c0_110 = arith.constant 0 : index
    %c0_111 = arith.constant 0 : index
    %c0_112 = arith.constant 0 : index
    %224 = vector.load %arg24[%c0_109, %c0_110, %c0_111, %c0_112] : memref<1x2x4x64xf32, #tpu.memory_space<vmem>>, vector<1x1x4x64xf32>
    %225 = vector.shape_cast %224 : vector<1x1x4x64xf32> to vector<4x64xf32>
    %c0_113 = arith.constant 0 : index
    %c0_114 = arith.constant 0 : index
    %c0_115 = arith.constant 0 : index
    %c0_116 = arith.constant 0 : index
    %226 = vector.load %arg25[%c0_113, %c0_114, %c0_115, %c0_116] : memref<1x2x1x64xf32, #tpu.memory_space<vmem>>, vector<1x1x1x64xf32>
    %227 = vector.shape_cast %226 : vector<1x1x1x64xf32> to vector<1x64xf32>
    %228 = vector.extract_strided_slice %223 {offsets = [0, 0], sizes = [16, 64], strides = [1, 1]} : vector<64x64xf32> to vector<16x64xf32>
    %229 = vector.extract_strided_slice %225 {offsets = [0, 0], sizes = [1, 64], strides = [1, 1]} : vector<4x64xf32> to vector<1x64xf32>
    %230 = vector.broadcast %229 : vector<1x64xf32> to vector<16x64xf32>
    %231 = arith.mulf %228, %230 : vector<16x64xf32>
    %232 = vector.broadcast %227 : vector<1x64xf32> to vector<16x64xf32>
    %233 = arith.addf %232, %231 : vector<16x64xf32>
    %234 = vector.extract_strided_slice %223 {offsets = [16, 0], sizes = [16, 64], strides = [1, 1]} : vector<64x64xf32> to vector<16x64xf32>
    %235 = vector.extract_strided_slice %225 {offsets = [1, 0], sizes = [1, 64], strides = [1, 1]} : vector<4x64xf32> to vector<1x64xf32>
    %236 = vector.broadcast %235 : vector<1x64xf32> to vector<16x64xf32>
    %237 = arith.mulf %234, %236 : vector<16x64xf32>
    %238 = arith.addf %233, %237 : vector<16x64xf32>
    %239 = vector.extract_strided_slice %223 {offsets = [32, 0], sizes = [16, 64], strides = [1, 1]} : vector<64x64xf32> to vector<16x64xf32>
    %240 = vector.extract_strided_slice %225 {offsets = [2, 0], sizes = [1, 64], strides = [1, 1]} : vector<4x64xf32> to vector<1x64xf32>
    %241 = vector.broadcast %240 : vector<1x64xf32> to vector<16x64xf32>
    %242 = arith.mulf %239, %241 : vector<16x64xf32>
    %243 = arith.addf %238, %242 : vector<16x64xf32>
    %244 = vector.extract_strided_slice %223 {offsets = [48, 0], sizes = [16, 64], strides = [1, 1]} : vector<64x64xf32> to vector<16x64xf32>
    %245 = vector.extract_strided_slice %225 {offsets = [3, 0], sizes = [1, 64], strides = [1, 1]} : vector<4x64xf32> to vector<1x64xf32>
    %246 = vector.broadcast %245 : vector<1x64xf32> to vector<16x64xf32>
    %247 = arith.mulf %244, %246 : vector<16x64xf32>
    %248 = arith.addf %243, %247 : vector<16x64xf32>
    %249 = arith.negf %248 : vector<16x64xf32>
    %250 = math.exp %249 : vector<16x64xf32>
    %cst_117 = arith.constant 1.000000e+00 : f32
    %251 = vector.broadcast %cst_117 : f32 to vector<16x64xf32>
    %252 = arith.addf %251, %250 : vector<16x64xf32>
    %253 = arith.divf %251, %252 : vector<16x64xf32>
    %254 = arith.mulf %248, %253 : vector<16x64xf32>
    %255 = arith.truncf %254 : vector<16x64xf32> to vector<16x64xbf16>
    %c0_118 = arith.constant 0 : index
    %c0_119 = arith.constant 0 : index
    %c0_120 = arith.constant 0 : index
    %c0_121 = arith.constant 0 : index
    %256 = vector.load %arg26[%c0_118, %c0_119, %c0_120, %c0_121] : memref<1x2x64x2xbf16, #tpu.memory_space<vmem>>, vector<1x1x64x2xbf16>
    %257 = vector.shape_cast %256 : vector<1x1x64x2xbf16> to vector<64x2xbf16>
    %cst_122 = arith.constant dense<0.000000e+00> : vector<16x2xf32>
    %258 = tpu.matmul %255, %257, %cst_122 {dimension_numbers = #tpu.dot_dimension_numbers<[1], [0], [0], [1], [0, 0, 1, 1], [], []>} : vector<16x64xbf16>, vector<64x2xbf16>, vector<16x2xf32> -> vector<16x2xf32>
    %c0_123 = arith.constant 0 : index
    %c0_124 = arith.constant 0 : index
    %c0_125 = arith.constant 0 : index
    %c0_126 = arith.constant 0 : index
    %259 = vector.load %arg27[%c0_123, %c0_124, %c0_125, %c0_126] : memref<1x2x8x64xbf16, #tpu.memory_space<vmem>>, vector<1x1x8x64xbf16>
    %260 = vector.shape_cast %259 : vector<1x1x8x64xbf16> to vector<8x64xbf16>
    %cst_127 = arith.constant dense<0.000000e+00> : vector<8x16xf32>
    %261 = tpu.matmul %260, %255, %cst_127 {dimension_numbers = #tpu.dot_dimension_numbers<[1], [1], [0], [0], [0, 0, 1, 0], [], []>} : vector<8x64xbf16>, vector<16x64xbf16>, vector<8x16xf32> -> vector<8x16xf32>
    %c0_128 = arith.constant 0 : index
    %c0_129 = arith.constant 0 : index
    %c0_130 = arith.constant 0 : index
    %c0_131 = arith.constant 0 : index
    %262 = vector.load %arg28[%c0_128, %c0_129, %c0_130, %c0_131] : memref<1x2x8x64xbf16, #tpu.memory_space<vmem>>, vector<1x1x8x64xbf16>
    %263 = vector.shape_cast %262 : vector<1x1x8x64xbf16> to vector<8x64xbf16>
    %cst_132 = arith.constant dense<0.000000e+00> : vector<8x16xf32>
    %264 = tpu.matmul %263, %255, %cst_132 {dimension_numbers = #tpu.dot_dimension_numbers<[1], [1], [0], [0], [0, 0, 1, 0], [], []>} : vector<8x64xbf16>, vector<16x64xbf16>, vector<8x16xf32> -> vector<8x16xf32>
    %265 = arith.truncf %258 : vector<16x2xf32> to vector<16x2xbf16>
    %c0_133 = arith.constant 0 : index
    %c0_134 = arith.constant 0 : index
    %c0_135 = arith.constant 0 : index
    %c0_136 = arith.constant 0 : index
    %266 = vector.load %arg29[%c0_133, %c0_134, %c0_135, %c0_136] : memref<1x2x2x64xbf16, #tpu.memory_space<vmem>>, vector<1x1x2x64xbf16>
    %267 = vector.shape_cast %266 : vector<1x1x2x64xbf16> to vector<2x64xbf16>
    %cst_137 = arith.constant dense<0.000000e+00> : vector<16x64xf32>
    %268 = tpu.matmul %265, %267, %cst_137 {dimension_numbers = #tpu.dot_dimension_numbers<[1], [0], [0], [1], [0, 0, 1, 1], [], []>} : vector<16x2xbf16>, vector<2x64xbf16>, vector<16x64xf32> -> vector<16x64xf32>
    %c0_138 = arith.constant 0 : index
    %c0_139 = arith.constant 0 : index
    %c0_140 = arith.constant 0 : index
    %c0_141 = arith.constant 0 : index
    %269 = vector.load %arg30[%c0_138, %c0_139, %c0_140, %c0_141] : memref<1x2x1x64xf32, #tpu.memory_space<vmem>>, vector<1x1x1x64xf32>
    %270 = vector.shape_cast %269 : vector<1x1x1x64xf32> to vector<1x64xf32>
    %271 = vector.broadcast %270 : vector<1x64xf32> to vector<16x64xf32>
    %272 = arith.addf %268, %271 : vector<16x64xf32>
    %cst_142 = arith.constant 0.000000e+00 : f32
    %273 = vector.broadcast %cst_142 : f32 to vector<16x64xf32>
    %274 = arith.maximumf %272, %273 : vector<16x64xf32>
    %275 = math.absf %272 : vector<16x64xf32>
    %cst_143 = arith.constant 0.000000e+00 : f32
    %276 = vector.broadcast %cst_143 : f32 to vector<16x64xf32>
    %277 = arith.subf %276, %275 : vector<16x64xf32>
    %278 = math.exp %277 : vector<16x64xf32>
    %cst_144 = arith.constant 1.000000e+00 : f32
    %279 = vector.broadcast %cst_144 : f32 to vector<16x64xf32>
    %280 = arith.addf %279, %278 : vector<16x64xf32>
    %281 = math.log %280 : vector<16x64xf32>
    %282 = arith.addf %274, %281 : vector<16x64xf32>
    %283 = arith.mulf %282, %254 : vector<16x64xf32>
    %284 = arith.negf %222 : vector<16x64xf32>
    %285 = math.exp %284 : vector<16x64xf32>
    %cst_145 = arith.constant 1.000000e+00 : f32
    %286 = vector.broadcast %cst_145 : f32 to vector<16x64xf32>
    %287 = arith.addf %286, %285 : vector<16x64xf32>
    %288 = arith.divf %286, %287 : vector<16x64xf32>
    %289 = arith.mulf %222, %288 : vector<16x64xf32>
    %c0_146 = arith.constant 0 : index
    %c0_147 = arith.constant 0 : index
    %c0_148 = arith.constant 0 : index
    %c0_149 = arith.constant 0 : index
    %290 = vector.load %arg31[%c0_146, %c0_147, %c0_148, %c0_149] : memref<1x2x8x64xf32, #tpu.memory_space<vmem>>, vector<1x1x8x64xf32>
    %291 = vector.shape_cast %290 : vector<1x1x8x64xf32> to vector<8x64xf32>
    %292 = vector.extract_strided_slice %282 {offsets = [0, 0], sizes = [1, 64], strides = [1, 1]} : vector<16x64xf32> to vector<1x64xf32>
    %293 = vector.broadcast %292 : vector<1x64xf32> to vector<8x64xf32>
    %294 = arith.mulf %293, %291 : vector<8x64xf32>
    %295 = math.exp %294 : vector<8x64xf32>
    %296 = vector.extract_strided_slice %282 {offsets = [1, 0], sizes = [1, 64], strides = [1, 1]} : vector<16x64xf32> to vector<1x64xf32>
    %297 = vector.broadcast %296 : vector<1x64xf32> to vector<8x64xf32>
    %298 = arith.mulf %297, %291 : vector<8x64xf32>
    %299 = math.exp %298 : vector<8x64xf32>
    %300 = vector.extract_strided_slice %282 {offsets = [2, 0], sizes = [1, 64], strides = [1, 1]} : vector<16x64xf32> to vector<1x64xf32>
    %301 = vector.broadcast %300 : vector<1x64xf32> to vector<8x64xf32>
    %302 = arith.mulf %301, %291 : vector<8x64xf32>
    %303 = math.exp %302 : vector<8x64xf32>
    %304 = vector.extract_strided_slice %282 {offsets = [3, 0], sizes = [1, 64], strides = [1, 1]} : vector<16x64xf32> to vector<1x64xf32>
    %305 = vector.broadcast %304 : vector<1x64xf32> to vector<8x64xf32>
    %306 = arith.mulf %305, %291 : vector<8x64xf32>
    %307 = math.exp %306 : vector<8x64xf32>
    %308 = vector.extract_strided_slice %282 {offsets = [4, 0], sizes = [1, 64], strides = [1, 1]} : vector<16x64xf32> to vector<1x64xf32>
    %309 = vector.broadcast %308 : vector<1x64xf32> to vector<8x64xf32>
    %310 = arith.mulf %309, %291 : vector<8x64xf32>
    %311 = math.exp %310 : vector<8x64xf32>
    %312 = vector.extract_strided_slice %282 {offsets = [5, 0], sizes = [1, 64], strides = [1, 1]} : vector<16x64xf32> to vector<1x64xf32>
    %313 = vector.broadcast %312 : vector<1x64xf32> to vector<8x64xf32>
    %314 = arith.mulf %313, %291 : vector<8x64xf32>
    %315 = math.exp %314 : vector<8x64xf32>
    %316 = vector.extract_strided_slice %282 {offsets = [6, 0], sizes = [1, 64], strides = [1, 1]} : vector<16x64xf32> to vector<1x64xf32>
    %317 = vector.broadcast %316 : vector<1x64xf32> to vector<8x64xf32>
    %318 = arith.mulf %317, %291 : vector<8x64xf32>
    %319 = math.exp %318 : vector<8x64xf32>
    %320 = vector.extract_strided_slice %282 {offsets = [7, 0], sizes = [1, 64], strides = [1, 1]} : vector<16x64xf32> to vector<1x64xf32>
    %321 = vector.broadcast %320 : vector<1x64xf32> to vector<8x64xf32>
    %322 = arith.mulf %321, %291 : vector<8x64xf32>
    %323 = math.exp %322 : vector<8x64xf32>
    %324 = vector.extract_strided_slice %282 {offsets = [8, 0], sizes = [1, 64], strides = [1, 1]} : vector<16x64xf32> to vector<1x64xf32>
    %325 = vector.broadcast %324 : vector<1x64xf32> to vector<8x64xf32>
    %326 = arith.mulf %325, %291 : vector<8x64xf32>
    %327 = math.exp %326 : vector<8x64xf32>
    %328 = vector.extract_strided_slice %282 {offsets = [9, 0], sizes = [1, 64], strides = [1, 1]} : vector<16x64xf32> to vector<1x64xf32>
    %329 = vector.broadcast %328 : vector<1x64xf32> to vector<8x64xf32>
    %330 = arith.mulf %329, %291 : vector<8x64xf32>
    %331 = math.exp %330 : vector<8x64xf32>
    %332 = vector.extract_strided_slice %282 {offsets = [10, 0], sizes = [1, 64], strides = [1, 1]} : vector<16x64xf32> to vector<1x64xf32>
    %333 = vector.broadcast %332 : vector<1x64xf32> to vector<8x64xf32>
    %334 = arith.mulf %333, %291 : vector<8x64xf32>
    %335 = math.exp %334 : vector<8x64xf32>
    %336 = vector.extract_strided_slice %282 {offsets = [11, 0], sizes = [1, 64], strides = [1, 1]} : vector<16x64xf32> to vector<1x64xf32>
    %337 = vector.broadcast %336 : vector<1x64xf32> to vector<8x64xf32>
    %338 = arith.mulf %337, %291 : vector<8x64xf32>
    %339 = math.exp %338 : vector<8x64xf32>
    %340 = vector.extract_strided_slice %282 {offsets = [12, 0], sizes = [1, 64], strides = [1, 1]} : vector<16x64xf32> to vector<1x64xf32>
    %341 = vector.broadcast %340 : vector<1x64xf32> to vector<8x64xf32>
    %342 = arith.mulf %341, %291 : vector<8x64xf32>
    %343 = math.exp %342 : vector<8x64xf32>
    %344 = vector.extract_strided_slice %282 {offsets = [13, 0], sizes = [1, 64], strides = [1, 1]} : vector<16x64xf32> to vector<1x64xf32>
    %345 = vector.broadcast %344 : vector<1x64xf32> to vector<8x64xf32>
    %346 = arith.mulf %345, %291 : vector<8x64xf32>
    %347 = math.exp %346 : vector<8x64xf32>
    %348 = vector.extract_strided_slice %282 {offsets = [14, 0], sizes = [1, 64], strides = [1, 1]} : vector<16x64xf32> to vector<1x64xf32>
    %349 = vector.broadcast %348 : vector<1x64xf32> to vector<8x64xf32>
    %350 = arith.mulf %349, %291 : vector<8x64xf32>
    %351 = math.exp %350 : vector<8x64xf32>
    %352 = vector.extract_strided_slice %282 {offsets = [15, 0], sizes = [1, 64], strides = [1, 1]} : vector<16x64xf32> to vector<1x64xf32>
    %353 = vector.broadcast %352 : vector<1x64xf32> to vector<8x64xf32>
    %354 = arith.mulf %353, %291 : vector<8x64xf32>
    %355 = math.exp %354 : vector<8x64xf32>
    %356 = vector.extract_strided_slice %261 {offsets = [0, 0], sizes = [8, 1], strides = [1, 1]} : vector<8x16xf32> to vector<8x1xf32>
    %357 = vector.extract_strided_slice %283 {offsets = [0, 0], sizes = [1, 64], strides = [1, 1]} : vector<16x64xf32> to vector<1x64xf32>
    %358 = vector.broadcast %356 : vector<8x1xf32> to vector<8x64xf32>
    %359 = vector.broadcast %357 : vector<1x64xf32> to vector<8x64xf32>
    %360 = arith.mulf %358, %359 : vector<8x64xf32>
    %361 = vector.extract_strided_slice %261 {offsets = [0, 1], sizes = [8, 1], strides = [1, 1]} : vector<8x16xf32> to vector<8x1xf32>
    %362 = vector.extract_strided_slice %283 {offsets = [1, 0], sizes = [1, 64], strides = [1, 1]} : vector<16x64xf32> to vector<1x64xf32>
    %363 = vector.broadcast %361 : vector<8x1xf32> to vector<8x64xf32>
    %364 = vector.broadcast %362 : vector<1x64xf32> to vector<8x64xf32>
    %365 = arith.mulf %363, %364 : vector<8x64xf32>
    %366 = vector.extract_strided_slice %261 {offsets = [0, 2], sizes = [8, 1], strides = [1, 1]} : vector<8x16xf32> to vector<8x1xf32>
    %367 = vector.extract_strided_slice %283 {offsets = [2, 0], sizes = [1, 64], strides = [1, 1]} : vector<16x64xf32> to vector<1x64xf32>
    %368 = vector.broadcast %366 : vector<8x1xf32> to vector<8x64xf32>
    %369 = vector.broadcast %367 : vector<1x64xf32> to vector<8x64xf32>
    %370 = arith.mulf %368, %369 : vector<8x64xf32>
    %371 = vector.extract_strided_slice %261 {offsets = [0, 3], sizes = [8, 1], strides = [1, 1]} : vector<8x16xf32> to vector<8x1xf32>
    %372 = vector.extract_strided_slice %283 {offsets = [3, 0], sizes = [1, 64], strides = [1, 1]} : vector<16x64xf32> to vector<1x64xf32>
    %373 = vector.broadcast %371 : vector<8x1xf32> to vector<8x64xf32>
    %374 = vector.broadcast %372 : vector<1x64xf32> to vector<8x64xf32>
    %375 = arith.mulf %373, %374 : vector<8x64xf32>
    %376 = vector.extract_strided_slice %261 {offsets = [0, 4], sizes = [8, 1], strides = [1, 1]} : vector<8x16xf32> to vector<8x1xf32>
    %377 = vector.extract_strided_slice %283 {offsets = [4, 0], sizes = [1, 64], strides = [1, 1]} : vector<16x64xf32> to vector<1x64xf32>
    %378 = vector.broadcast %376 : vector<8x1xf32> to vector<8x64xf32>
    %379 = vector.broadcast %377 : vector<1x64xf32> to vector<8x64xf32>
    %380 = arith.mulf %378, %379 : vector<8x64xf32>
    %381 = vector.extract_strided_slice %261 {offsets = [0, 5], sizes = [8, 1], strides = [1, 1]} : vector<8x16xf32> to vector<8x1xf32>
    %382 = vector.extract_strided_slice %283 {offsets = [5, 0], sizes = [1, 64], strides = [1, 1]} : vector<16x64xf32> to vector<1x64xf32>
    %383 = vector.broadcast %381 : vector<8x1xf32> to vector<8x64xf32>
    %384 = vector.broadcast %382 : vector<1x64xf32> to vector<8x64xf32>
    %385 = arith.mulf %383, %384 : vector<8x64xf32>
    %386 = vector.extract_strided_slice %261 {offsets = [0, 6], sizes = [8, 1], strides = [1, 1]} : vector<8x16xf32> to vector<8x1xf32>
    %387 = vector.extract_strided_slice %283 {offsets = [6, 0], sizes = [1, 64], strides = [1, 1]} : vector<16x64xf32> to vector<1x64xf32>
    %388 = vector.broadcast %386 : vector<8x1xf32> to vector<8x64xf32>
    %389 = vector.broadcast %387 : vector<1x64xf32> to vector<8x64xf32>
    %390 = arith.mulf %388, %389 : vector<8x64xf32>
    %391 = vector.extract_strided_slice %261 {offsets = [0, 7], sizes = [8, 1], strides = [1, 1]} : vector<8x16xf32> to vector<8x1xf32>
    %392 = vector.extract_strided_slice %283 {offsets = [7, 0], sizes = [1, 64], strides = [1, 1]} : vector<16x64xf32> to vector<1x64xf32>
    %393 = vector.broadcast %391 : vector<8x1xf32> to vector<8x64xf32>
    %394 = vector.broadcast %392 : vector<1x64xf32> to vector<8x64xf32>
    %395 = arith.mulf %393, %394 : vector<8x64xf32>
    %396 = vector.extract_strided_slice %261 {offsets = [0, 8], sizes = [8, 1], strides = [1, 1]} : vector<8x16xf32> to vector<8x1xf32>
    %397 = vector.extract_strided_slice %283 {offsets = [8, 0], sizes = [1, 64], strides = [1, 1]} : vector<16x64xf32> to vector<1x64xf32>
    %398 = vector.broadcast %396 : vector<8x1xf32> to vector<8x64xf32>
    %399 = vector.broadcast %397 : vector<1x64xf32> to vector<8x64xf32>
    %400 = arith.mulf %398, %399 : vector<8x64xf32>
    %401 = vector.extract_strided_slice %261 {offsets = [0, 9], sizes = [8, 1], strides = [1, 1]} : vector<8x16xf32> to vector<8x1xf32>
    %402 = vector.extract_strided_slice %283 {offsets = [9, 0], sizes = [1, 64], strides = [1, 1]} : vector<16x64xf32> to vector<1x64xf32>
    %403 = vector.broadcast %401 : vector<8x1xf32> to vector<8x64xf32>
    %404 = vector.broadcast %402 : vector<1x64xf32> to vector<8x64xf32>
    %405 = arith.mulf %403, %404 : vector<8x64xf32>
    %406 = vector.extract_strided_slice %261 {offsets = [0, 10], sizes = [8, 1], strides = [1, 1]} : vector<8x16xf32> to vector<8x1xf32>
    %407 = vector.extract_strided_slice %283 {offsets = [10, 0], sizes = [1, 64], strides = [1, 1]} : vector<16x64xf32> to vector<1x64xf32>
    %408 = vector.broadcast %406 : vector<8x1xf32> to vector<8x64xf32>
    %409 = vector.broadcast %407 : vector<1x64xf32> to vector<8x64xf32>
    %410 = arith.mulf %408, %409 : vector<8x64xf32>
    %411 = vector.extract_strided_slice %261 {offsets = [0, 11], sizes = [8, 1], strides = [1, 1]} : vector<8x16xf32> to vector<8x1xf32>
    %412 = vector.extract_strided_slice %283 {offsets = [11, 0], sizes = [1, 64], strides = [1, 1]} : vector<16x64xf32> to vector<1x64xf32>
    %413 = vector.broadcast %411 : vector<8x1xf32> to vector<8x64xf32>
    %414 = vector.broadcast %412 : vector<1x64xf32> to vector<8x64xf32>
    %415 = arith.mulf %413, %414 : vector<8x64xf32>
    %416 = vector.extract_strided_slice %261 {offsets = [0, 12], sizes = [8, 1], strides = [1, 1]} : vector<8x16xf32> to vector<8x1xf32>
    %417 = vector.extract_strided_slice %283 {offsets = [12, 0], sizes = [1, 64], strides = [1, 1]} : vector<16x64xf32> to vector<1x64xf32>
    %418 = vector.broadcast %416 : vector<8x1xf32> to vector<8x64xf32>
    %419 = vector.broadcast %417 : vector<1x64xf32> to vector<8x64xf32>
    %420 = arith.mulf %418, %419 : vector<8x64xf32>
    %421 = vector.extract_strided_slice %261 {offsets = [0, 13], sizes = [8, 1], strides = [1, 1]} : vector<8x16xf32> to vector<8x1xf32>
    %422 = vector.extract_strided_slice %283 {offsets = [13, 0], sizes = [1, 64], strides = [1, 1]} : vector<16x64xf32> to vector<1x64xf32>
    %423 = vector.broadcast %421 : vector<8x1xf32> to vector<8x64xf32>
    %424 = vector.broadcast %422 : vector<1x64xf32> to vector<8x64xf32>
    %425 = arith.mulf %423, %424 : vector<8x64xf32>
    %426 = vector.extract_strided_slice %261 {offsets = [0, 14], sizes = [8, 1], strides = [1, 1]} : vector<8x16xf32> to vector<8x1xf32>
    %427 = vector.extract_strided_slice %283 {offsets = [14, 0], sizes = [1, 64], strides = [1, 1]} : vector<16x64xf32> to vector<1x64xf32>
    %428 = vector.broadcast %426 : vector<8x1xf32> to vector<8x64xf32>
    %429 = vector.broadcast %427 : vector<1x64xf32> to vector<8x64xf32>
    %430 = arith.mulf %428, %429 : vector<8x64xf32>
    %431 = vector.extract_strided_slice %261 {offsets = [0, 15], sizes = [8, 1], strides = [1, 1]} : vector<8x16xf32> to vector<8x1xf32>
    %432 = vector.extract_strided_slice %283 {offsets = [15, 0], sizes = [1, 64], strides = [1, 1]} : vector<16x64xf32> to vector<1x64xf32>
    %433 = vector.broadcast %431 : vector<8x1xf32> to vector<8x64xf32>
    %434 = vector.broadcast %432 : vector<1x64xf32> to vector<8x64xf32>
    %435 = arith.mulf %433, %434 : vector<8x64xf32>
    %cst_150 = arith.constant 0.000000e+00 : f32
    %436 = vector.broadcast %cst_150 : f32 to vector<8x64xf32>
    %437 = arith.mulf %295, %436 : vector<8x64xf32>
    %438 = arith.addf %437, %360 : vector<8x64xf32>
    %439 = vector.extract_strided_slice %264 {offsets = [0, 0], sizes = [8, 1], strides = [1, 1]} : vector<8x16xf32> to vector<8x1xf32>
    %440 = vector.broadcast %439 : vector<8x1xf32> to vector<8x64xf32>
    %441 = arith.mulf %438, %440 : vector<8x64xf32>
    %442 = arith.mulf %299, %438 : vector<8x64xf32>
    %443 = arith.addf %442, %365 : vector<8x64xf32>
    %444 = vector.extract_strided_slice %264 {offsets = [0, 1], sizes = [8, 1], strides = [1, 1]} : vector<8x16xf32> to vector<8x1xf32>
    %445 = vector.broadcast %444 : vector<8x1xf32> to vector<8x64xf32>
    %446 = arith.mulf %443, %445 : vector<8x64xf32>
    %447 = arith.mulf %303, %443 : vector<8x64xf32>
    %448 = arith.addf %447, %370 : vector<8x64xf32>
    %449 = vector.extract_strided_slice %264 {offsets = [0, 2], sizes = [8, 1], strides = [1, 1]} : vector<8x16xf32> to vector<8x1xf32>
    %450 = vector.broadcast %449 : vector<8x1xf32> to vector<8x64xf32>
    %451 = arith.mulf %448, %450 : vector<8x64xf32>
    %452 = arith.mulf %307, %448 : vector<8x64xf32>
    %453 = arith.addf %452, %375 : vector<8x64xf32>
    %454 = vector.extract_strided_slice %264 {offsets = [0, 3], sizes = [8, 1], strides = [1, 1]} : vector<8x16xf32> to vector<8x1xf32>
    %455 = vector.broadcast %454 : vector<8x1xf32> to vector<8x64xf32>
    %456 = arith.mulf %453, %455 : vector<8x64xf32>
    %457 = arith.mulf %311, %453 : vector<8x64xf32>
    %458 = arith.addf %457, %380 : vector<8x64xf32>
    %459 = vector.extract_strided_slice %264 {offsets = [0, 4], sizes = [8, 1], strides = [1, 1]} : vector<8x16xf32> to vector<8x1xf32>
    %460 = vector.broadcast %459 : vector<8x1xf32> to vector<8x64xf32>
    %461 = arith.mulf %458, %460 : vector<8x64xf32>
    %462 = arith.mulf %315, %458 : vector<8x64xf32>
    %463 = arith.addf %462, %385 : vector<8x64xf32>
    %464 = vector.extract_strided_slice %264 {offsets = [0, 5], sizes = [8, 1], strides = [1, 1]} : vector<8x16xf32> to vector<8x1xf32>
    %465 = vector.broadcast %464 : vector<8x1xf32> to vector<8x64xf32>
    %466 = arith.mulf %463, %465 : vector<8x64xf32>
    %467 = arith.mulf %319, %463 : vector<8x64xf32>
    %468 = arith.addf %467, %390 : vector<8x64xf32>
    %469 = vector.extract_strided_slice %264 {offsets = [0, 6], sizes = [8, 1], strides = [1, 1]} : vector<8x16xf32> to vector<8x1xf32>
    %470 = vector.broadcast %469 : vector<8x1xf32> to vector<8x64xf32>
    %471 = arith.mulf %468, %470 : vector<8x64xf32>
    %472 = arith.mulf %323, %468 : vector<8x64xf32>
    %473 = arith.addf %472, %395 : vector<8x64xf32>
    %474 = vector.extract_strided_slice %264 {offsets = [0, 7], sizes = [8, 1], strides = [1, 1]} : vector<8x16xf32> to vector<8x1xf32>
    %475 = vector.broadcast %474 : vector<8x1xf32> to vector<8x64xf32>
    %476 = arith.mulf %473, %475 : vector<8x64xf32>
    %477 = arith.mulf %327, %473 : vector<8x64xf32>
    %478 = arith.addf %477, %400 : vector<8x64xf32>
    %479 = vector.extract_strided_slice %264 {offsets = [0, 8], sizes = [8, 1], strides = [1, 1]} : vector<8x16xf32> to vector<8x1xf32>
    %480 = vector.broadcast %479 : vector<8x1xf32> to vector<8x64xf32>
    %481 = arith.mulf %478, %480 : vector<8x64xf32>
    %482 = arith.mulf %331, %478 : vector<8x64xf32>
    %483 = arith.addf %482, %405 : vector<8x64xf32>
    %484 = vector.extract_strided_slice %264 {offsets = [0, 9], sizes = [8, 1], strides = [1, 1]} : vector<8x16xf32> to vector<8x1xf32>
    %485 = vector.broadcast %484 : vector<8x1xf32> to vector<8x64xf32>
    %486 = arith.mulf %483, %485 : vector<8x64xf32>
    %487 = arith.mulf %335, %483 : vector<8x64xf32>
    %488 = arith.addf %487, %410 : vector<8x64xf32>
    %489 = vector.extract_strided_slice %264 {offsets = [0, 10], sizes = [8, 1], strides = [1, 1]} : vector<8x16xf32> to vector<8x1xf32>
    %490 = vector.broadcast %489 : vector<8x1xf32> to vector<8x64xf32>
    %491 = arith.mulf %488, %490 : vector<8x64xf32>
    %492 = arith.mulf %339, %488 : vector<8x64xf32>
    %493 = arith.addf %492, %415 : vector<8x64xf32>
    %494 = vector.extract_strided_slice %264 {offsets = [0, 11], sizes = [8, 1], strides = [1, 1]} : vector<8x16xf32> to vector<8x1xf32>
    %495 = vector.broadcast %494 : vector<8x1xf32> to vector<8x64xf32>
    %496 = arith.mulf %493, %495 : vector<8x64xf32>
    %497 = arith.mulf %343, %493 : vector<8x64xf32>
    %498 = arith.addf %497, %420 : vector<8x64xf32>
    %499 = vector.extract_strided_slice %264 {offsets = [0, 12], sizes = [8, 1], strides = [1, 1]} : vector<8x16xf32> to vector<8x1xf32>
    %500 = vector.broadcast %499 : vector<8x1xf32> to vector<8x64xf32>
    %501 = arith.mulf %498, %500 : vector<8x64xf32>
    %502 = arith.mulf %347, %498 : vector<8x64xf32>
    %503 = arith.addf %502, %425 : vector<8x64xf32>
    %504 = vector.extract_strided_slice %264 {offsets = [0, 13], sizes = [8, 1], strides = [1, 1]} : vector<8x16xf32> to vector<8x1xf32>
    %505 = vector.broadcast %504 : vector<8x1xf32> to vector<8x64xf32>
    %506 = arith.mulf %503, %505 : vector<8x64xf32>
    %507 = arith.mulf %351, %503 : vector<8x64xf32>
    %508 = arith.addf %507, %430 : vector<8x64xf32>
    %509 = vector.extract_strided_slice %264 {offsets = [0, 14], sizes = [8, 1], strides = [1, 1]} : vector<8x16xf32> to vector<8x1xf32>
    %510 = vector.broadcast %509 : vector<8x1xf32> to vector<8x64xf32>
    %511 = arith.mulf %508, %510 : vector<8x64xf32>
    %512 = arith.mulf %355, %508 : vector<8x64xf32>
    %513 = arith.addf %512, %435 : vector<8x64xf32>
    %514 = vector.extract_strided_slice %264 {offsets = [0, 15], sizes = [8, 1], strides = [1, 1]} : vector<8x16xf32> to vector<8x1xf32>
    %515 = vector.broadcast %514 : vector<8x1xf32> to vector<8x64xf32>
    %516 = arith.mulf %513, %515 : vector<8x64xf32>
    %517 = tpu.concatenate %441, %446, %451, %456, %461, %466, %471, %476, %481, %486, %491, %496, %501, %506, %511, %516 in 0 : vector<8x64xf32>, vector<8x64xf32>, vector<8x64xf32>, vector<8x64xf32>, vector<8x64xf32>, vector<8x64xf32>, vector<8x64xf32>, vector<8x64xf32>, vector<8x64xf32>, vector<8x64xf32>, vector<8x64xf32>, vector<8x64xf32>, vector<8x64xf32>, vector<8x64xf32>, vector<8x64xf32>, vector<8x64xf32> -> vector<128x64xf32>
    %cst_151 = arith.constant dense<0.000000e+00> : vector<16x64xf32>
    %518 = tpu.matmul %189, %517, %cst_151 {dimension_numbers = #tpu.dot_dimension_numbers<[1], [0], [0], [1], [0, 0, 1, 1], [], []>} : vector<16x128xf32>, vector<128x64xf32>, vector<16x64xf32> -> vector<16x64xf32>
    %c0_152 = arith.constant 0 : index
    %c0_153 = arith.constant 0 : index
    %c0_154 = arith.constant 0 : index
    %c0_155 = arith.constant 0 : index
    %519 = vector.load %arg32[%c0_152, %c0_153, %c0_154, %c0_155] : memref<1x2x1x64xf32, #tpu.memory_space<vmem>>, vector<1x1x1x64xf32>
    %520 = vector.shape_cast %519 : vector<1x1x1x64xf32> to vector<1x64xf32>
    %521 = vector.broadcast %520 : vector<1x64xf32> to vector<16x64xf32>
    %522 = arith.mulf %521, %254 : vector<16x64xf32>
    %523 = arith.addf %518, %522 : vector<16x64xf32>
    %524 = arith.mulf %523, %289 : vector<16x64xf32>
    %525 = arith.truncf %524 : vector<16x64xf32> to vector<16x64xbf16>
    %c0_156 = arith.constant 0 : index
    %c0_157 = arith.constant 0 : index
    %c0_158 = arith.constant 0 : index
    %c0_159 = arith.constant 0 : index
    %526 = vector.load %arg33[%c0_156, %c0_157, %c0_158, %c0_159] : memref<1x2x64x32xbf16, #tpu.memory_space<vmem>>, vector<1x1x64x32xbf16>
    %527 = vector.shape_cast %526 : vector<1x1x64x32xbf16> to vector<64x32xbf16>
    %cst_160 = arith.constant dense<0.000000e+00> : vector<16x32xf32>
    %528 = tpu.matmul %525, %527, %cst_160 {dimension_numbers = #tpu.dot_dimension_numbers<[1], [0], [0], [1], [0, 0, 1, 1], [], []>} : vector<16x64xbf16>, vector<64x32xbf16>, vector<16x32xf32> -> vector<16x32xf32>
    %529 = arith.addf %528, %192 : vector<16x32xf32>
    %c0_161 = arith.constant 0 : index
    %c1 = arith.constant 1 : index
    %c0_162 = arith.constant 0 : index
    %c0_163 = arith.constant 0 : index
    %530 = vector.load %arg21[%c0_161, %c1, %c0_162, %c0_163] : memref<1x2x1x32xf32, #tpu.memory_space<vmem>>, vector<1x1x1x32xf32>
    %531 = vector.shape_cast %530 : vector<1x1x1x32xf32> to vector<1x32xf32>
    %c0_164 = arith.constant 0 : index
    %c1_165 = arith.constant 1 : index
    %c0_166 = arith.constant 0 : index
    %c0_167 = arith.constant 0 : index
    %532 = vector.load %arg22[%c0_164, %c1_165, %c0_166, %c0_167] : memref<1x2x1x32xf32, #tpu.memory_space<vmem>>, vector<1x1x1x32xf32>
    %533 = vector.shape_cast %532 : vector<1x1x1x32xf32> to vector<1x32xf32>
    %cst_168 = arith.constant dense<0.000000e+00> : vector<16xf32>
    %534 = vector.multi_reduction <add>, %529, %cst_168 [1] : vector<16x32xf32> to vector<16xf32>
    %535 = vector.shape_cast %534 : vector<16xf32> to vector<16x1xf32>
    %cst_169 = arith.constant 3.200000e+01 : f32
    %536 = vector.broadcast %cst_169 : f32 to vector<16x1xf32>
    %537 = arith.divf %535, %536 : vector<16x1xf32>
    %538 = vector.broadcast %537 : vector<16x1xf32> to vector<16x32xf32>
    %539 = arith.subf %529, %538 : vector<16x32xf32>
    %540 = arith.mulf %539, %539 : vector<16x32xf32>
    %cst_170 = arith.constant dense<0.000000e+00> : vector<16xf32>
    %541 = vector.multi_reduction <add>, %540, %cst_170 [1] : vector<16x32xf32> to vector<16xf32>
    %542 = vector.shape_cast %541 : vector<16xf32> to vector<16x1xf32>
    %cst_171 = arith.constant 3.200000e+01 : f32
    %543 = vector.broadcast %cst_171 : f32 to vector<16x1xf32>
    %544 = arith.divf %542, %543 : vector<16x1xf32>
    %cst_172 = arith.constant 9.99999974E-6 : f32
    %545 = vector.broadcast %cst_172 : f32 to vector<16x1xf32>
    %546 = arith.addf %544, %545 : vector<16x1xf32>
    %547 = math.rsqrt %546 : vector<16x1xf32>
    %548 = vector.broadcast %547 : vector<16x1xf32> to vector<16x32xf32>
    %549 = arith.mulf %539, %548 : vector<16x32xf32>
    %550 = vector.broadcast %531 : vector<1x32xf32> to vector<16x32xf32>
    %551 = arith.mulf %549, %550 : vector<16x32xf32>
    %552 = vector.broadcast %533 : vector<1x32xf32> to vector<16x32xf32>
    %553 = arith.addf %551, %552 : vector<16x32xf32>
    %554 = arith.truncf %553 : vector<16x32xf32> to vector<16x32xbf16>
    %c0_173 = arith.constant 0 : index
    %c1_174 = arith.constant 1 : index
    %c0_175 = arith.constant 0 : index
    %c0_176 = arith.constant 0 : index
    %555 = vector.load %arg23[%c0_173, %c1_174, %c0_175, %c0_176] : memref<1x2x32x128xbf16, #tpu.memory_space<vmem>>, vector<1x1x32x128xbf16>
    %556 = vector.shape_cast %555 : vector<1x1x32x128xbf16> to vector<32x128xbf16>
    %cst_177 = arith.constant dense<0.000000e+00> : vector<16x128xf32>
    %557 = tpu.matmul %554, %556, %cst_177 {dimension_numbers = #tpu.dot_dimension_numbers<[1], [0], [0], [1], [0, 0, 1, 1], [], []>} : vector<16x32xbf16>, vector<32x128xbf16>, vector<16x128xf32> -> vector<16x128xf32>
    %558 = vector.extract_strided_slice %557 {offsets = [0, 0], sizes = [16, 64], strides = [1, 1]} : vector<16x128xf32> to vector<16x64xf32>
    %559 = vector.extract_strided_slice %557 {offsets = [0, 64], sizes = [16, 64], strides = [1, 1]} : vector<16x128xf32> to vector<16x64xf32>
    %cst_178 = arith.constant dense<0.000000e+00> : vector<64x64xf32>
    %560 = tpu.matmul %188, %558, %cst_178 {dimension_numbers = #tpu.dot_dimension_numbers<[1], [0], [0], [1], [0, 0, 1, 1], [], []>} : vector<64x16xf32>, vector<16x64xf32>, vector<64x64xf32> -> vector<64x64xf32>
    %c0_179 = arith.constant 0 : index
    %c1_180 = arith.constant 1 : index
    %c0_181 = arith.constant 0 : index
    %c0_182 = arith.constant 0 : index
    %561 = vector.load %arg24[%c0_179, %c1_180, %c0_181, %c0_182] : memref<1x2x4x64xf32, #tpu.memory_space<vmem>>, vector<1x1x4x64xf32>
    %562 = vector.shape_cast %561 : vector<1x1x4x64xf32> to vector<4x64xf32>
    %c0_183 = arith.constant 0 : index
    %c1_184 = arith.constant 1 : index
    %c0_185 = arith.constant 0 : index
    %c0_186 = arith.constant 0 : index
    %563 = vector.load %arg25[%c0_183, %c1_184, %c0_185, %c0_186] : memref<1x2x1x64xf32, #tpu.memory_space<vmem>>, vector<1x1x1x64xf32>
    %564 = vector.shape_cast %563 : vector<1x1x1x64xf32> to vector<1x64xf32>
    %565 = vector.extract_strided_slice %560 {offsets = [0, 0], sizes = [16, 64], strides = [1, 1]} : vector<64x64xf32> to vector<16x64xf32>
    %566 = vector.extract_strided_slice %562 {offsets = [0, 0], sizes = [1, 64], strides = [1, 1]} : vector<4x64xf32> to vector<1x64xf32>
    %567 = vector.broadcast %566 : vector<1x64xf32> to vector<16x64xf32>
    %568 = arith.mulf %565, %567 : vector<16x64xf32>
    %569 = vector.broadcast %564 : vector<1x64xf32> to vector<16x64xf32>
    %570 = arith.addf %569, %568 : vector<16x64xf32>
    %571 = vector.extract_strided_slice %560 {offsets = [16, 0], sizes = [16, 64], strides = [1, 1]} : vector<64x64xf32> to vector<16x64xf32>
    %572 = vector.extract_strided_slice %562 {offsets = [1, 0], sizes = [1, 64], strides = [1, 1]} : vector<4x64xf32> to vector<1x64xf32>
    %573 = vector.broadcast %572 : vector<1x64xf32> to vector<16x64xf32>
    %574 = arith.mulf %571, %573 : vector<16x64xf32>
    %575 = arith.addf %570, %574 : vector<16x64xf32>
    %576 = vector.extract_strided_slice %560 {offsets = [32, 0], sizes = [16, 64], strides = [1, 1]} : vector<64x64xf32> to vector<16x64xf32>
    %577 = vector.extract_strided_slice %562 {offsets = [2, 0], sizes = [1, 64], strides = [1, 1]} : vector<4x64xf32> to vector<1x64xf32>
    %578 = vector.broadcast %577 : vector<1x64xf32> to vector<16x64xf32>
    %579 = arith.mulf %576, %578 : vector<16x64xf32>
    %580 = arith.addf %575, %579 : vector<16x64xf32>
    %581 = vector.extract_strided_slice %560 {offsets = [48, 0], sizes = [16, 64], strides = [1, 1]} : vector<64x64xf32> to vector<16x64xf32>
    %582 = vector.extract_strided_slice %562 {offsets = [3, 0], sizes = [1, 64], strides = [1, 1]} : vector<4x64xf32> to vector<1x64xf32>
    %583 = vector.broadcast %582 : vector<1x64xf32> to vector<16x64xf32>
    %584 = arith.mulf %581, %583 : vector<16x64xf32>
    %585 = arith.addf %580, %584 : vector<16x64xf32>
    %586 = arith.negf %585 : vector<16x64xf32>
    %587 = math.exp %586 : vector<16x64xf32>
    %cst_187 = arith.constant 1.000000e+00 : f32
    %588 = vector.broadcast %cst_187 : f32 to vector<16x64xf32>
    %589 = arith.addf %588, %587 : vector<16x64xf32>
    %590 = arith.divf %588, %589 : vector<16x64xf32>
    %591 = arith.mulf %585, %590 : vector<16x64xf32>
    %592 = arith.truncf %591 : vector<16x64xf32> to vector<16x64xbf16>
    %c0_188 = arith.constant 0 : index
    %c1_189 = arith.constant 1 : index
    %c0_190 = arith.constant 0 : index
    %c0_191 = arith.constant 0 : index
    %593 = vector.load %arg26[%c0_188, %c1_189, %c0_190, %c0_191] : memref<1x2x64x2xbf16, #tpu.memory_space<vmem>>, vector<1x1x64x2xbf16>
    %594 = vector.shape_cast %593 : vector<1x1x64x2xbf16> to vector<64x2xbf16>
    %cst_192 = arith.constant dense<0.000000e+00> : vector<16x2xf32>
    %595 = tpu.matmul %592, %594, %cst_192 {dimension_numbers = #tpu.dot_dimension_numbers<[1], [0], [0], [1], [0, 0, 1, 1], [], []>} : vector<16x64xbf16>, vector<64x2xbf16>, vector<16x2xf32> -> vector<16x2xf32>
    %c0_193 = arith.constant 0 : index
    %c1_194 = arith.constant 1 : index
    %c0_195 = arith.constant 0 : index
    %c0_196 = arith.constant 0 : index
    %596 = vector.load %arg27[%c0_193, %c1_194, %c0_195, %c0_196] : memref<1x2x8x64xbf16, #tpu.memory_space<vmem>>, vector<1x1x8x64xbf16>
    %597 = vector.shape_cast %596 : vector<1x1x8x64xbf16> to vector<8x64xbf16>
    %cst_197 = arith.constant dense<0.000000e+00> : vector<8x16xf32>
    %598 = tpu.matmul %597, %592, %cst_197 {dimension_numbers = #tpu.dot_dimension_numbers<[1], [1], [0], [0], [0, 0, 1, 0], [], []>} : vector<8x64xbf16>, vector<16x64xbf16>, vector<8x16xf32> -> vector<8x16xf32>
    %c0_198 = arith.constant 0 : index
    %c1_199 = arith.constant 1 : index
    %c0_200 = arith.constant 0 : index
    %c0_201 = arith.constant 0 : index
    %599 = vector.load %arg28[%c0_198, %c1_199, %c0_200, %c0_201] : memref<1x2x8x64xbf16, #tpu.memory_space<vmem>>, vector<1x1x8x64xbf16>
    %600 = vector.shape_cast %599 : vector<1x1x8x64xbf16> to vector<8x64xbf16>
    %cst_202 = arith.constant dense<0.000000e+00> : vector<8x16xf32>
    %601 = tpu.matmul %600, %592, %cst_202 {dimension_numbers = #tpu.dot_dimension_numbers<[1], [1], [0], [0], [0, 0, 1, 0], [], []>} : vector<8x64xbf16>, vector<16x64xbf16>, vector<8x16xf32> -> vector<8x16xf32>
    %602 = arith.truncf %595 : vector<16x2xf32> to vector<16x2xbf16>
    %c0_203 = arith.constant 0 : index
    %c1_204 = arith.constant 1 : index
    %c0_205 = arith.constant 0 : index
    %c0_206 = arith.constant 0 : index
    %603 = vector.load %arg29[%c0_203, %c1_204, %c0_205, %c0_206] : memref<1x2x2x64xbf16, #tpu.memory_space<vmem>>, vector<1x1x2x64xbf16>
    %604 = vector.shape_cast %603 : vector<1x1x2x64xbf16> to vector<2x64xbf16>
    %cst_207 = arith.constant dense<0.000000e+00> : vector<16x64xf32>
    %605 = tpu.matmul %602, %604, %cst_207 {dimension_numbers = #tpu.dot_dimension_numbers<[1], [0], [0], [1], [0, 0, 1, 1], [], []>} : vector<16x2xbf16>, vector<2x64xbf16>, vector<16x64xf32> -> vector<16x64xf32>
    %c0_208 = arith.constant 0 : index
    %c1_209 = arith.constant 1 : index
    %c0_210 = arith.constant 0 : index
    %c0_211 = arith.constant 0 : index
    %606 = vector.load %arg30[%c0_208, %c1_209, %c0_210, %c0_211] : memref<1x2x1x64xf32, #tpu.memory_space<vmem>>, vector<1x1x1x64xf32>
    %607 = vector.shape_cast %606 : vector<1x1x1x64xf32> to vector<1x64xf32>
    %608 = vector.broadcast %607 : vector<1x64xf32> to vector<16x64xf32>
    %609 = arith.addf %605, %608 : vector<16x64xf32>
    %cst_212 = arith.constant 0.000000e+00 : f32
    %610 = vector.broadcast %cst_212 : f32 to vector<16x64xf32>
    %611 = arith.maximumf %609, %610 : vector<16x64xf32>
    %612 = math.absf %609 : vector<16x64xf32>
    %cst_213 = arith.constant 0.000000e+00 : f32
    %613 = vector.broadcast %cst_213 : f32 to vector<16x64xf32>
    %614 = arith.subf %613, %612 : vector<16x64xf32>
    %615 = math.exp %614 : vector<16x64xf32>
    %cst_214 = arith.constant 1.000000e+00 : f32
    %616 = vector.broadcast %cst_214 : f32 to vector<16x64xf32>
    %617 = arith.addf %616, %615 : vector<16x64xf32>
    %618 = math.log %617 : vector<16x64xf32>
    %619 = arith.addf %611, %618 : vector<16x64xf32>
    %620 = arith.mulf %619, %591 : vector<16x64xf32>
    %621 = arith.negf %559 : vector<16x64xf32>
    %622 = math.exp %621 : vector<16x64xf32>
    %cst_215 = arith.constant 1.000000e+00 : f32
    %623 = vector.broadcast %cst_215 : f32 to vector<16x64xf32>
    %624 = arith.addf %623, %622 : vector<16x64xf32>
    %625 = arith.divf %623, %624 : vector<16x64xf32>
    %626 = arith.mulf %559, %625 : vector<16x64xf32>
    %c0_216 = arith.constant 0 : index
    %c1_217 = arith.constant 1 : index
    %c0_218 = arith.constant 0 : index
    %c0_219 = arith.constant 0 : index
    %627 = vector.load %arg31[%c0_216, %c1_217, %c0_218, %c0_219] : memref<1x2x8x64xf32, #tpu.memory_space<vmem>>, vector<1x1x8x64xf32>
    %628 = vector.shape_cast %627 : vector<1x1x8x64xf32> to vector<8x64xf32>
    %629 = vector.extract_strided_slice %619 {offsets = [0, 0], sizes = [1, 64], strides = [1, 1]} : vector<16x64xf32> to vector<1x64xf32>
    %630 = vector.broadcast %629 : vector<1x64xf32> to vector<8x64xf32>
    %631 = arith.mulf %630, %628 : vector<8x64xf32>
    %632 = math.exp %631 : vector<8x64xf32>
    %633 = vector.extract_strided_slice %619 {offsets = [1, 0], sizes = [1, 64], strides = [1, 1]} : vector<16x64xf32> to vector<1x64xf32>
    %634 = vector.broadcast %633 : vector<1x64xf32> to vector<8x64xf32>
    %635 = arith.mulf %634, %628 : vector<8x64xf32>
    %636 = math.exp %635 : vector<8x64xf32>
    %637 = vector.extract_strided_slice %619 {offsets = [2, 0], sizes = [1, 64], strides = [1, 1]} : vector<16x64xf32> to vector<1x64xf32>
    %638 = vector.broadcast %637 : vector<1x64xf32> to vector<8x64xf32>
    %639 = arith.mulf %638, %628 : vector<8x64xf32>
    %640 = math.exp %639 : vector<8x64xf32>
    %641 = vector.extract_strided_slice %619 {offsets = [3, 0], sizes = [1, 64], strides = [1, 1]} : vector<16x64xf32> to vector<1x64xf32>
    %642 = vector.broadcast %641 : vector<1x64xf32> to vector<8x64xf32>
    %643 = arith.mulf %642, %628 : vector<8x64xf32>
    %644 = math.exp %643 : vector<8x64xf32>
    %645 = vector.extract_strided_slice %619 {offsets = [4, 0], sizes = [1, 64], strides = [1, 1]} : vector<16x64xf32> to vector<1x64xf32>
    %646 = vector.broadcast %645 : vector<1x64xf32> to vector<8x64xf32>
    %647 = arith.mulf %646, %628 : vector<8x64xf32>
    %648 = math.exp %647 : vector<8x64xf32>
    %649 = vector.extract_strided_slice %619 {offsets = [5, 0], sizes = [1, 64], strides = [1, 1]} : vector<16x64xf32> to vector<1x64xf32>
    %650 = vector.broadcast %649 : vector<1x64xf32> to vector<8x64xf32>
    %651 = arith.mulf %650, %628 : vector<8x64xf32>
    %652 = math.exp %651 : vector<8x64xf32>
    %653 = vector.extract_strided_slice %619 {offsets = [6, 0], sizes = [1, 64], strides = [1, 1]} : vector<16x64xf32> to vector<1x64xf32>
    %654 = vector.broadcast %653 : vector<1x64xf32> to vector<8x64xf32>
    %655 = arith.mulf %654, %628 : vector<8x64xf32>
    %656 = math.exp %655 : vector<8x64xf32>
    %657 = vector.extract_strided_slice %619 {offsets = [7, 0], sizes = [1, 64], strides = [1, 1]} : vector<16x64xf32> to vector<1x64xf32>
    %658 = vector.broadcast %657 : vector<1x64xf32> to vector<8x64xf32>
    %659 = arith.mulf %658, %628 : vector<8x64xf32>
    %660 = math.exp %659 : vector<8x64xf32>
    %661 = vector.extract_strided_slice %619 {offsets = [8, 0], sizes = [1, 64], strides = [1, 1]} : vector<16x64xf32> to vector<1x64xf32>
    %662 = vector.broadcast %661 : vector<1x64xf32> to vector<8x64xf32>
    %663 = arith.mulf %662, %628 : vector<8x64xf32>
    %664 = math.exp %663 : vector<8x64xf32>
    %665 = vector.extract_strided_slice %619 {offsets = [9, 0], sizes = [1, 64], strides = [1, 1]} : vector<16x64xf32> to vector<1x64xf32>
    %666 = vector.broadcast %665 : vector<1x64xf32> to vector<8x64xf32>
    %667 = arith.mulf %666, %628 : vector<8x64xf32>
    %668 = math.exp %667 : vector<8x64xf32>
    %669 = vector.extract_strided_slice %619 {offsets = [10, 0], sizes = [1, 64], strides = [1, 1]} : vector<16x64xf32> to vector<1x64xf32>
    %670 = vector.broadcast %669 : vector<1x64xf32> to vector<8x64xf32>
    %671 = arith.mulf %670, %628 : vector<8x64xf32>
    %672 = math.exp %671 : vector<8x64xf32>
    %673 = vector.extract_strided_slice %619 {offsets = [11, 0], sizes = [1, 64], strides = [1, 1]} : vector<16x64xf32> to vector<1x64xf32>
    %674 = vector.broadcast %673 : vector<1x64xf32> to vector<8x64xf32>
    %675 = arith.mulf %674, %628 : vector<8x64xf32>
    %676 = math.exp %675 : vector<8x64xf32>
    %677 = vector.extract_strided_slice %619 {offsets = [12, 0], sizes = [1, 64], strides = [1, 1]} : vector<16x64xf32> to vector<1x64xf32>
    %678 = vector.broadcast %677 : vector<1x64xf32> to vector<8x64xf32>
    %679 = arith.mulf %678, %628 : vector<8x64xf32>
    %680 = math.exp %679 : vector<8x64xf32>
    %681 = vector.extract_strided_slice %619 {offsets = [13, 0], sizes = [1, 64], strides = [1, 1]} : vector<16x64xf32> to vector<1x64xf32>
    %682 = vector.broadcast %681 : vector<1x64xf32> to vector<8x64xf32>
    %683 = arith.mulf %682, %628 : vector<8x64xf32>
    %684 = math.exp %683 : vector<8x64xf32>
    %685 = vector.extract_strided_slice %619 {offsets = [14, 0], sizes = [1, 64], strides = [1, 1]} : vector<16x64xf32> to vector<1x64xf32>
    %686 = vector.broadcast %685 : vector<1x64xf32> to vector<8x64xf32>
    %687 = arith.mulf %686, %628 : vector<8x64xf32>
    %688 = math.exp %687 : vector<8x64xf32>
    %689 = vector.extract_strided_slice %619 {offsets = [15, 0], sizes = [1, 64], strides = [1, 1]} : vector<16x64xf32> to vector<1x64xf32>
    %690 = vector.broadcast %689 : vector<1x64xf32> to vector<8x64xf32>
    %691 = arith.mulf %690, %628 : vector<8x64xf32>
    %692 = math.exp %691 : vector<8x64xf32>
    %693 = vector.extract_strided_slice %598 {offsets = [0, 0], sizes = [8, 1], strides = [1, 1]} : vector<8x16xf32> to vector<8x1xf32>
    %694 = vector.extract_strided_slice %620 {offsets = [0, 0], sizes = [1, 64], strides = [1, 1]} : vector<16x64xf32> to vector<1x64xf32>
    %695 = vector.broadcast %693 : vector<8x1xf32> to vector<8x64xf32>
    %696 = vector.broadcast %694 : vector<1x64xf32> to vector<8x64xf32>
    %697 = arith.mulf %695, %696 : vector<8x64xf32>
    %698 = vector.extract_strided_slice %598 {offsets = [0, 1], sizes = [8, 1], strides = [1, 1]} : vector<8x16xf32> to vector<8x1xf32>
    %699 = vector.extract_strided_slice %620 {offsets = [1, 0], sizes = [1, 64], strides = [1, 1]} : vector<16x64xf32> to vector<1x64xf32>
    %700 = vector.broadcast %698 : vector<8x1xf32> to vector<8x64xf32>
    %701 = vector.broadcast %699 : vector<1x64xf32> to vector<8x64xf32>
    %702 = arith.mulf %700, %701 : vector<8x64xf32>
    %703 = vector.extract_strided_slice %598 {offsets = [0, 2], sizes = [8, 1], strides = [1, 1]} : vector<8x16xf32> to vector<8x1xf32>
    %704 = vector.extract_strided_slice %620 {offsets = [2, 0], sizes = [1, 64], strides = [1, 1]} : vector<16x64xf32> to vector<1x64xf32>
    %705 = vector.broadcast %703 : vector<8x1xf32> to vector<8x64xf32>
    %706 = vector.broadcast %704 : vector<1x64xf32> to vector<8x64xf32>
    %707 = arith.mulf %705, %706 : vector<8x64xf32>
    %708 = vector.extract_strided_slice %598 {offsets = [0, 3], sizes = [8, 1], strides = [1, 1]} : vector<8x16xf32> to vector<8x1xf32>
    %709 = vector.extract_strided_slice %620 {offsets = [3, 0], sizes = [1, 64], strides = [1, 1]} : vector<16x64xf32> to vector<1x64xf32>
    %710 = vector.broadcast %708 : vector<8x1xf32> to vector<8x64xf32>
    %711 = vector.broadcast %709 : vector<1x64xf32> to vector<8x64xf32>
    %712 = arith.mulf %710, %711 : vector<8x64xf32>
    %713 = vector.extract_strided_slice %598 {offsets = [0, 4], sizes = [8, 1], strides = [1, 1]} : vector<8x16xf32> to vector<8x1xf32>
    %714 = vector.extract_strided_slice %620 {offsets = [4, 0], sizes = [1, 64], strides = [1, 1]} : vector<16x64xf32> to vector<1x64xf32>
    %715 = vector.broadcast %713 : vector<8x1xf32> to vector<8x64xf32>
    %716 = vector.broadcast %714 : vector<1x64xf32> to vector<8x64xf32>
    %717 = arith.mulf %715, %716 : vector<8x64xf32>
    %718 = vector.extract_strided_slice %598 {offsets = [0, 5], sizes = [8, 1], strides = [1, 1]} : vector<8x16xf32> to vector<8x1xf32>
    %719 = vector.extract_strided_slice %620 {offsets = [5, 0], sizes = [1, 64], strides = [1, 1]} : vector<16x64xf32> to vector<1x64xf32>
    %720 = vector.broadcast %718 : vector<8x1xf32> to vector<8x64xf32>
    %721 = vector.broadcast %719 : vector<1x64xf32> to vector<8x64xf32>
    %722 = arith.mulf %720, %721 : vector<8x64xf32>
    %723 = vector.extract_strided_slice %598 {offsets = [0, 6], sizes = [8, 1], strides = [1, 1]} : vector<8x16xf32> to vector<8x1xf32>
    %724 = vector.extract_strided_slice %620 {offsets = [6, 0], sizes = [1, 64], strides = [1, 1]} : vector<16x64xf32> to vector<1x64xf32>
    %725 = vector.broadcast %723 : vector<8x1xf32> to vector<8x64xf32>
    %726 = vector.broadcast %724 : vector<1x64xf32> to vector<8x64xf32>
    %727 = arith.mulf %725, %726 : vector<8x64xf32>
    %728 = vector.extract_strided_slice %598 {offsets = [0, 7], sizes = [8, 1], strides = [1, 1]} : vector<8x16xf32> to vector<8x1xf32>
    %729 = vector.extract_strided_slice %620 {offsets = [7, 0], sizes = [1, 64], strides = [1, 1]} : vector<16x64xf32> to vector<1x64xf32>
    %730 = vector.broadcast %728 : vector<8x1xf32> to vector<8x64xf32>
    %731 = vector.broadcast %729 : vector<1x64xf32> to vector<8x64xf32>
    %732 = arith.mulf %730, %731 : vector<8x64xf32>
    %733 = vector.extract_strided_slice %598 {offsets = [0, 8], sizes = [8, 1], strides = [1, 1]} : vector<8x16xf32> to vector<8x1xf32>
    %734 = vector.extract_strided_slice %620 {offsets = [8, 0], sizes = [1, 64], strides = [1, 1]} : vector<16x64xf32> to vector<1x64xf32>
    %735 = vector.broadcast %733 : vector<8x1xf32> to vector<8x64xf32>
    %736 = vector.broadcast %734 : vector<1x64xf32> to vector<8x64xf32>
    %737 = arith.mulf %735, %736 : vector<8x64xf32>
    %738 = vector.extract_strided_slice %598 {offsets = [0, 9], sizes = [8, 1], strides = [1, 1]} : vector<8x16xf32> to vector<8x1xf32>
    %739 = vector.extract_strided_slice %620 {offsets = [9, 0], sizes = [1, 64], strides = [1, 1]} : vector<16x64xf32> to vector<1x64xf32>
    %740 = vector.broadcast %738 : vector<8x1xf32> to vector<8x64xf32>
    %741 = vector.broadcast %739 : vector<1x64xf32> to vector<8x64xf32>
    %742 = arith.mulf %740, %741 : vector<8x64xf32>
    %743 = vector.extract_strided_slice %598 {offsets = [0, 10], sizes = [8, 1], strides = [1, 1]} : vector<8x16xf32> to vector<8x1xf32>
    %744 = vector.extract_strided_slice %620 {offsets = [10, 0], sizes = [1, 64], strides = [1, 1]} : vector<16x64xf32> to vector<1x64xf32>
    %745 = vector.broadcast %743 : vector<8x1xf32> to vector<8x64xf32>
    %746 = vector.broadcast %744 : vector<1x64xf32> to vector<8x64xf32>
    %747 = arith.mulf %745, %746 : vector<8x64xf32>
    %748 = vector.extract_strided_slice %598 {offsets = [0, 11], sizes = [8, 1], strides = [1, 1]} : vector<8x16xf32> to vector<8x1xf32>
    %749 = vector.extract_strided_slice %620 {offsets = [11, 0], sizes = [1, 64], strides = [1, 1]} : vector<16x64xf32> to vector<1x64xf32>
    %750 = vector.broadcast %748 : vector<8x1xf32> to vector<8x64xf32>
    %751 = vector.broadcast %749 : vector<1x64xf32> to vector<8x64xf32>
    %752 = arith.mulf %750, %751 : vector<8x64xf32>
    %753 = vector.extract_strided_slice %598 {offsets = [0, 12], sizes = [8, 1], strides = [1, 1]} : vector<8x16xf32> to vector<8x1xf32>
    %754 = vector.extract_strided_slice %620 {offsets = [12, 0], sizes = [1, 64], strides = [1, 1]} : vector<16x64xf32> to vector<1x64xf32>
    %755 = vector.broadcast %753 : vector<8x1xf32> to vector<8x64xf32>
    %756 = vector.broadcast %754 : vector<1x64xf32> to vector<8x64xf32>
    %757 = arith.mulf %755, %756 : vector<8x64xf32>
    %758 = vector.extract_strided_slice %598 {offsets = [0, 13], sizes = [8, 1], strides = [1, 1]} : vector<8x16xf32> to vector<8x1xf32>
    %759 = vector.extract_strided_slice %620 {offsets = [13, 0], sizes = [1, 64], strides = [1, 1]} : vector<16x64xf32> to vector<1x64xf32>
    %760 = vector.broadcast %758 : vector<8x1xf32> to vector<8x64xf32>
    %761 = vector.broadcast %759 : vector<1x64xf32> to vector<8x64xf32>
    %762 = arith.mulf %760, %761 : vector<8x64xf32>
    %763 = vector.extract_strided_slice %598 {offsets = [0, 14], sizes = [8, 1], strides = [1, 1]} : vector<8x16xf32> to vector<8x1xf32>
    %764 = vector.extract_strided_slice %620 {offsets = [14, 0], sizes = [1, 64], strides = [1, 1]} : vector<16x64xf32> to vector<1x64xf32>
    %765 = vector.broadcast %763 : vector<8x1xf32> to vector<8x64xf32>
    %766 = vector.broadcast %764 : vector<1x64xf32> to vector<8x64xf32>
    %767 = arith.mulf %765, %766 : vector<8x64xf32>
    %768 = vector.extract_strided_slice %598 {offsets = [0, 15], sizes = [8, 1], strides = [1, 1]} : vector<8x16xf32> to vector<8x1xf32>
    %769 = vector.extract_strided_slice %620 {offsets = [15, 0], sizes = [1, 64], strides = [1, 1]} : vector<16x64xf32> to vector<1x64xf32>
    %770 = vector.broadcast %768 : vector<8x1xf32> to vector<8x64xf32>
    %771 = vector.broadcast %769 : vector<1x64xf32> to vector<8x64xf32>
    %772 = arith.mulf %770, %771 : vector<8x64xf32>
    %cst_220 = arith.constant 0.000000e+00 : f32
    %773 = vector.broadcast %cst_220 : f32 to vector<8x64xf32>
    %774 = arith.mulf %632, %773 : vector<8x64xf32>
    %775 = arith.addf %774, %697 : vector<8x64xf32>
    %776 = vector.extract_strided_slice %601 {offsets = [0, 0], sizes = [8, 1], strides = [1, 1]} : vector<8x16xf32> to vector<8x1xf32>
    %777 = vector.broadcast %776 : vector<8x1xf32> to vector<8x64xf32>
    %778 = arith.mulf %775, %777 : vector<8x64xf32>
    %779 = arith.mulf %636, %775 : vector<8x64xf32>
    %780 = arith.addf %779, %702 : vector<8x64xf32>
    %781 = vector.extract_strided_slice %601 {offsets = [0, 1], sizes = [8, 1], strides = [1, 1]} : vector<8x16xf32> to vector<8x1xf32>
    %782 = vector.broadcast %781 : vector<8x1xf32> to vector<8x64xf32>
    %783 = arith.mulf %780, %782 : vector<8x64xf32>
    %784 = arith.mulf %640, %780 : vector<8x64xf32>
    %785 = arith.addf %784, %707 : vector<8x64xf32>
    %786 = vector.extract_strided_slice %601 {offsets = [0, 2], sizes = [8, 1], strides = [1, 1]} : vector<8x16xf32> to vector<8x1xf32>
    %787 = vector.broadcast %786 : vector<8x1xf32> to vector<8x64xf32>
    %788 = arith.mulf %785, %787 : vector<8x64xf32>
    %789 = arith.mulf %644, %785 : vector<8x64xf32>
    %790 = arith.addf %789, %712 : vector<8x64xf32>
    %791 = vector.extract_strided_slice %601 {offsets = [0, 3], sizes = [8, 1], strides = [1, 1]} : vector<8x16xf32> to vector<8x1xf32>
    %792 = vector.broadcast %791 : vector<8x1xf32> to vector<8x64xf32>
    %793 = arith.mulf %790, %792 : vector<8x64xf32>
    %794 = arith.mulf %648, %790 : vector<8x64xf32>
    %795 = arith.addf %794, %717 : vector<8x64xf32>
    %796 = vector.extract_strided_slice %601 {offsets = [0, 4], sizes = [8, 1], strides = [1, 1]} : vector<8x16xf32> to vector<8x1xf32>
    %797 = vector.broadcast %796 : vector<8x1xf32> to vector<8x64xf32>
    %798 = arith.mulf %795, %797 : vector<8x64xf32>
    %799 = arith.mulf %652, %795 : vector<8x64xf32>
    %800 = arith.addf %799, %722 : vector<8x64xf32>
    %801 = vector.extract_strided_slice %601 {offsets = [0, 5], sizes = [8, 1], strides = [1, 1]} : vector<8x16xf32> to vector<8x1xf32>
    %802 = vector.broadcast %801 : vector<8x1xf32> to vector<8x64xf32>
    %803 = arith.mulf %800, %802 : vector<8x64xf32>
    %804 = arith.mulf %656, %800 : vector<8x64xf32>
    %805 = arith.addf %804, %727 : vector<8x64xf32>
    %806 = vector.extract_strided_slice %601 {offsets = [0, 6], sizes = [8, 1], strides = [1, 1]} : vector<8x16xf32> to vector<8x1xf32>
    %807 = vector.broadcast %806 : vector<8x1xf32> to vector<8x64xf32>
    %808 = arith.mulf %805, %807 : vector<8x64xf32>
    %809 = arith.mulf %660, %805 : vector<8x64xf32>
    %810 = arith.addf %809, %732 : vector<8x64xf32>
    %811 = vector.extract_strided_slice %601 {offsets = [0, 7], sizes = [8, 1], strides = [1, 1]} : vector<8x16xf32> to vector<8x1xf32>
    %812 = vector.broadcast %811 : vector<8x1xf32> to vector<8x64xf32>
    %813 = arith.mulf %810, %812 : vector<8x64xf32>
    %814 = arith.mulf %664, %810 : vector<8x64xf32>
    %815 = arith.addf %814, %737 : vector<8x64xf32>
    %816 = vector.extract_strided_slice %601 {offsets = [0, 8], sizes = [8, 1], strides = [1, 1]} : vector<8x16xf32> to vector<8x1xf32>
    %817 = vector.broadcast %816 : vector<8x1xf32> to vector<8x64xf32>
    %818 = arith.mulf %815, %817 : vector<8x64xf32>
    %819 = arith.mulf %668, %815 : vector<8x64xf32>
    %820 = arith.addf %819, %742 : vector<8x64xf32>
    %821 = vector.extract_strided_slice %601 {offsets = [0, 9], sizes = [8, 1], strides = [1, 1]} : vector<8x16xf32> to vector<8x1xf32>
    %822 = vector.broadcast %821 : vector<8x1xf32> to vector<8x64xf32>
    %823 = arith.mulf %820, %822 : vector<8x64xf32>
    %824 = arith.mulf %672, %820 : vector<8x64xf32>
    %825 = arith.addf %824, %747 : vector<8x64xf32>
    %826 = vector.extract_strided_slice %601 {offsets = [0, 10], sizes = [8, 1], strides = [1, 1]} : vector<8x16xf32> to vector<8x1xf32>
    %827 = vector.broadcast %826 : vector<8x1xf32> to vector<8x64xf32>
    %828 = arith.mulf %825, %827 : vector<8x64xf32>
    %829 = arith.mulf %676, %825 : vector<8x64xf32>
    %830 = arith.addf %829, %752 : vector<8x64xf32>
    %831 = vector.extract_strided_slice %601 {offsets = [0, 11], sizes = [8, 1], strides = [1, 1]} : vector<8x16xf32> to vector<8x1xf32>
    %832 = vector.broadcast %831 : vector<8x1xf32> to vector<8x64xf32>
    %833 = arith.mulf %830, %832 : vector<8x64xf32>
    %834 = arith.mulf %680, %830 : vector<8x64xf32>
    %835 = arith.addf %834, %757 : vector<8x64xf32>
    %836 = vector.extract_strided_slice %601 {offsets = [0, 12], sizes = [8, 1], strides = [1, 1]} : vector<8x16xf32> to vector<8x1xf32>
    %837 = vector.broadcast %836 : vector<8x1xf32> to vector<8x64xf32>
    %838 = arith.mulf %835, %837 : vector<8x64xf32>
    %839 = arith.mulf %684, %835 : vector<8x64xf32>
    %840 = arith.addf %839, %762 : vector<8x64xf32>
    %841 = vector.extract_strided_slice %601 {offsets = [0, 13], sizes = [8, 1], strides = [1, 1]} : vector<8x16xf32> to vector<8x1xf32>
    %842 = vector.broadcast %841 : vector<8x1xf32> to vector<8x64xf32>
    %843 = arith.mulf %840, %842 : vector<8x64xf32>
    %844 = arith.mulf %688, %840 : vector<8x64xf32>
    %845 = arith.addf %844, %767 : vector<8x64xf32>
    %846 = vector.extract_strided_slice %601 {offsets = [0, 14], sizes = [8, 1], strides = [1, 1]} : vector<8x16xf32> to vector<8x1xf32>
    %847 = vector.broadcast %846 : vector<8x1xf32> to vector<8x64xf32>
    %848 = arith.mulf %845, %847 : vector<8x64xf32>
    %849 = arith.mulf %692, %845 : vector<8x64xf32>
    %850 = arith.addf %849, %772 : vector<8x64xf32>
    %851 = vector.extract_strided_slice %601 {offsets = [0, 15], sizes = [8, 1], strides = [1, 1]} : vector<8x16xf32> to vector<8x1xf32>
    %852 = vector.broadcast %851 : vector<8x1xf32> to vector<8x64xf32>
    %853 = arith.mulf %850, %852 : vector<8x64xf32>
    %854 = tpu.concatenate %778, %783, %788, %793, %798, %803, %808, %813, %818, %823, %828, %833, %838, %843, %848, %853 in 0 : vector<8x64xf32>, vector<8x64xf32>, vector<8x64xf32>, vector<8x64xf32>, vector<8x64xf32>, vector<8x64xf32>, vector<8x64xf32>, vector<8x64xf32>, vector<8x64xf32>, vector<8x64xf32>, vector<8x64xf32>, vector<8x64xf32>, vector<8x64xf32>, vector<8x64xf32>, vector<8x64xf32>, vector<8x64xf32> -> vector<128x64xf32>
    %cst_221 = arith.constant dense<0.000000e+00> : vector<16x64xf32>
    %855 = tpu.matmul %189, %854, %cst_221 {dimension_numbers = #tpu.dot_dimension_numbers<[1], [0], [0], [1], [0, 0, 1, 1], [], []>} : vector<16x128xf32>, vector<128x64xf32>, vector<16x64xf32> -> vector<16x64xf32>
    %c0_222 = arith.constant 0 : index
    %c1_223 = arith.constant 1 : index
    %c0_224 = arith.constant 0 : index
    %c0_225 = arith.constant 0 : index
    %856 = vector.load %arg32[%c0_222, %c1_223, %c0_224, %c0_225] : memref<1x2x1x64xf32, #tpu.memory_space<vmem>>, vector<1x1x1x64xf32>
    %857 = vector.shape_cast %856 : vector<1x1x1x64xf32> to vector<1x64xf32>
    %858 = vector.broadcast %857 : vector<1x64xf32> to vector<16x64xf32>
    %859 = arith.mulf %858, %591 : vector<16x64xf32>
    %860 = arith.addf %855, %859 : vector<16x64xf32>
    %861 = arith.mulf %860, %626 : vector<16x64xf32>
    %862 = arith.truncf %861 : vector<16x64xf32> to vector<16x64xbf16>
    %c0_226 = arith.constant 0 : index
    %c1_227 = arith.constant 1 : index
    %c0_228 = arith.constant 0 : index
    %c0_229 = arith.constant 0 : index
    %863 = vector.load %arg33[%c0_226, %c1_227, %c0_228, %c0_229] : memref<1x2x64x32xbf16, #tpu.memory_space<vmem>>, vector<1x1x64x32xbf16>
    %864 = vector.shape_cast %863 : vector<1x1x64x32xbf16> to vector<64x32xbf16>
    %cst_230 = arith.constant dense<0.000000e+00> : vector<16x32xf32>
    %865 = tpu.matmul %862, %864, %cst_230 {dimension_numbers = #tpu.dot_dimension_numbers<[1], [0], [0], [1], [0, 0, 1, 1], [], []>} : vector<16x64xbf16>, vector<64x32xbf16>, vector<16x32xf32> -> vector<16x32xf32>
    %c0_231 = arith.constant 0 : index
    %c0_232 = arith.constant 0 : index
    %866 = vector.load %arg57[%c0_231, %c0_232] : memref<16x32xf32, #tpu.memory_space<vmem>>, vector<16x32xf32>
    tpu.vector_store %arg57[%c0_231, %c0_232], %529 {strides = array<i32>} : memref<16x32xf32, #tpu.memory_space<vmem>>, vector<16x32xf32>,
    %867 = arith.truncf %187 : vector<16x64xf32> to vector<16x64xbf16>
    %868 = arith.truncf %865 : vector<16x32xf32> to vector<16x32xbf16>
    %c0_233 = arith.constant 0 : index
    %c0_234 = arith.constant 0 : index
    %c0_235 = arith.constant 0 : index
    %869 = vector.load %arg36[%c0_233, %c0_234, %c0_235] : memref<1x64x32xbf16, #tpu.memory_space<vmem>>, vector<1x64x32xbf16>
    %870 = vector.shape_cast %869 : vector<1x64x32xbf16> to vector<64x32xbf16>
    %cst_236 = arith.constant dense<0.000000e+00> : vector<16x32xf32>
    %871 = tpu.matmul %867, %870, %cst_236 {dimension_numbers = #tpu.dot_dimension_numbers<[1], [0], [0], [1], [0, 0, 1, 1], [], []>} : vector<16x64xbf16>, vector<64x32xbf16>, vector<16x32xf32> -> vector<16x32xf32>
    %c0_237 = arith.constant 0 : index
    %c0_238 = arith.constant 0 : index
    %c0_239 = arith.constant 0 : index
    %872 = vector.load %arg37[%c0_237, %c0_238, %c0_239] : memref<1x32x32xbf16, #tpu.memory_space<vmem>>, vector<1x32x32xbf16>
    %873 = vector.shape_cast %872 : vector<1x32x32xbf16> to vector<32x32xbf16>
    %cst_240 = arith.constant dense<0.000000e+00> : vector<16x32xf32>
    %874 = tpu.matmul %868, %873, %cst_240 {dimension_numbers = #tpu.dot_dimension_numbers<[1], [0], [0], [1], [0, 0, 1, 1], [], []>} : vector<16x32xbf16>, vector<32x32xbf16>, vector<16x32xf32> -> vector<16x32xf32>
    %875 = arith.addf %871, %874 : vector<16x32xf32>
    %c0_241 = arith.constant 0 : index
    %c0_242 = arith.constant 0 : index
    %c0_243 = arith.constant 0 : index
    %876 = vector.load %arg38[%c0_241, %c0_242, %c0_243] : memref<1x1x32xf32, #tpu.memory_space<vmem>>, vector<1x1x32xf32>
    %877 = vector.shape_cast %876 : vector<1x1x32xf32> to vector<1x32xf32>
    %878 = vector.broadcast %877 : vector<1x32xf32> to vector<16x32xf32>
    %879 = arith.addf %875, %878 : vector<16x32xf32>
    %880 = arith.truncf %879 : vector<16x32xf32> to vector<16x32xbf16>
    %c0_244 = arith.constant 0 : index
    %c0_245 = arith.constant 0 : index
    %c0_246 = arith.constant 0 : index
    %881 = vector.load %arg39[%c0_244, %c0_245, %c0_246] : memref<1x32x32xbf16, #tpu.memory_space<vmem>>, vector<1x32x32xbf16>
    %882 = vector.shape_cast %881 : vector<1x32x32xbf16> to vector<32x32xbf16>
    %cst_247 = arith.constant dense<0.000000e+00> : vector<16x32xf32>
    %883 = tpu.matmul %880, %882, %cst_247 {dimension_numbers = #tpu.dot_dimension_numbers<[1], [0], [0], [1], [0, 0, 1, 1], [], []>} : vector<16x32xbf16>, vector<32x32xbf16>, vector<16x32xf32> -> vector<16x32xf32>
    %c0_248 = arith.constant 0 : index
    %c0_249 = arith.constant 0 : index
    %c0_250 = arith.constant 0 : index
    %884 = vector.load %arg40[%c0_248, %c0_249, %c0_250] : memref<1x1x32xf32, #tpu.memory_space<vmem>>, vector<1x1x32xf32>
    %885 = vector.shape_cast %884 : vector<1x1x32xf32> to vector<1x32xf32>
    %886 = vector.broadcast %885 : vector<1x32xf32> to vector<16x32xf32>
    %887 = arith.addf %883, %886 : vector<16x32xf32>
    %888 = arith.truncf %887 : vector<16x32xf32> to vector<16x32xbf16>
    %c0_251 = arith.constant 0 : index
    %c0_252 = arith.constant 0 : index
    %c0_253 = arith.constant 0 : index
    %889 = vector.load %arg41[%c0_251, %c0_252, %c0_253] : memref<1x32x64xbf16, #tpu.memory_space<vmem>>, vector<1x32x64xbf16>
    %890 = vector.shape_cast %889 : vector<1x32x64xbf16> to vector<32x64xbf16>
    %cst_254 = arith.constant dense<0.000000e+00> : vector<16x64xf32>
    %891 = tpu.matmul %888, %890, %cst_254 {dimension_numbers = #tpu.dot_dimension_numbers<[1], [0], [0], [1], [0, 0, 1, 1], [], []>} : vector<16x32xbf16>, vector<32x64xbf16>, vector<16x64xf32> -> vector<16x64xf32>
    %892 = arith.addf %187, %891 : vector<16x64xf32>
    %c0_255 = arith.constant 0 : index
    %c0_256 = arith.constant 0 : index
    %c0_257 = arith.constant 0 : index
    %893 = vector.load %arg43[%c0_255, %c0_256, %c0_257] : memref<1x1x64xf32, #tpu.memory_space<vmem>>, vector<1x1x64xf32>
    %894 = vector.shape_cast %893 : vector<1x1x64xf32> to vector<1x64xf32>
    %895 = vector.broadcast %894 : vector<1x64xf32> to vector<16x64xf32>
    %896 = arith.addf %892, %895 : vector<16x64xf32>
    %c0_258 = arith.constant 0 : index
    %c0_259 = arith.constant 0 : index
    %c0_260 = arith.constant 0 : index
    %897 = vector.load %arg42[%c0_258, %c0_259, %c0_260] : memref<1x32x32xbf16, #tpu.memory_space<vmem>>, vector<1x32x32xbf16>
    %898 = vector.shape_cast %897 : vector<1x32x32xbf16> to vector<32x32xbf16>
    %cst_261 = arith.constant dense<0.000000e+00> : vector<16x32xf32>
    %899 = tpu.matmul %888, %898, %cst_261 {dimension_numbers = #tpu.dot_dimension_numbers<[1], [0], [0], [1], [0, 0, 1, 1], [], []>} : vector<16x32xbf16>, vector<32x32xbf16>, vector<16x32xf32> -> vector<16x32xf32>
    %900 = arith.addf %865, %899 : vector<16x32xf32>
    %c0_262 = arith.constant 0 : index
    %c0_263 = arith.constant 0 : index
    %c0_264 = arith.constant 0 : index
    %901 = vector.load %arg44[%c0_262, %c0_263, %c0_264] : memref<1x1x32xf32, #tpu.memory_space<vmem>>, vector<1x1x32xf32>
    %902 = vector.shape_cast %901 : vector<1x1x32xf32> to vector<1x32xf32>
    %903 = vector.broadcast %902 : vector<1x32xf32> to vector<16x32xf32>
    %904 = arith.addf %900, %903 : vector<16x32xf32>
    %c0_265 = arith.constant 0 : index
    %c0_266 = arith.constant 0 : index
    %905 = vector.load %arg55[%c0_265, %c0_266] : memref<16x64xf32, #tpu.memory_space<vmem>>, vector<16x64xf32>
    tpu.vector_store %arg55[%c0_265, %c0_266], %896 {strides = array<i32>} : memref<16x64xf32, #tpu.memory_space<vmem>>, vector<16x64xf32>,
    %c0_267 = arith.constant 0 : index
    %c0_268 = arith.constant 0 : index
    %906 = vector.load %arg56[%c0_267, %c0_268] : memref<16x32xf32, #tpu.memory_space<vmem>>, vector<16x32xf32>
    tpu.vector_store %arg56[%c0_267, %c0_268], %904 {strides = array<i32>} : memref<16x32xf32, #tpu.memory_space<vmem>>, vector<16x32xf32>,
    %c1_i32 = arith.constant 1 : i32
    %907 = arith.cmpi eq, %arg1, %c1_i32 : i32
    %908 = arith.extui %907 : i1 to i32
    %c0_i32_269 = arith.constant 0 : i32
    %909 = arith.cmpi ne, %908, %c0_i32_269 : i32
    scf.if %909 {
      %910 = arith.truncf %904 : vector<16x32xf32> to vector<16x32xbf16>
      %c0_270 = arith.constant 0 : index
      %c0_271 = arith.constant 0 : index
      %911 = vector.load %arg45[%c0_270, %c0_271] : memref<32x64xbf16, #tpu.memory_space<vmem>>, vector<32x64xbf16>
      %cst_272 = arith.constant dense<0.000000e+00> : vector<16x64xf32>
      %912 = tpu.matmul %910, %911, %cst_272 {dimension_numbers = #tpu.dot_dimension_numbers<[1], [0], [0], [1], [0, 0, 1, 1], [], []>} : vector<16x32xbf16>, vector<32x64xbf16>, vector<16x64xf32> -> vector<16x64xf32>
      %913 = arith.addf %896, %912 : vector<16x64xf32>
      %c0_273 = arith.constant 0 : index
      %c0_274 = arith.constant 0 : index
      %914 = vector.load %arg46[%c0_273, %c0_274] : memref<1x64xf32, #tpu.memory_space<vmem>>, vector<1x64xf32>
      %915 = vector.broadcast %914 : vector<1x64xf32> to vector<16x64xf32>
      %916 = arith.addf %913, %915 : vector<16x64xf32>
      %917 = arith.truncf %916 : vector<16x64xf32> to vector<16x64xbf16>
      %c0_275 = arith.constant 0 : index
      %c0_276 = arith.constant 0 : index
      %918 = vector.load %arg48[%c0_275, %c0_276] : memref<64x8xbf16, #tpu.memory_space<vmem>>, vector<64x8xbf16>
      %cst_277 = arith.constant dense<0.000000e+00> : vector<16x8xf32>
      %919 = tpu.matmul %917, %918, %cst_277 {dimension_numbers = #tpu.dot_dimension_numbers<[1], [0], [0], [1], [0, 0, 1, 1], [], []>} : vector<16x64xbf16>, vector<64x8xbf16>, vector<16x8xf32> -> vector<16x8xf32>
      %c0_278 = arith.constant 0 : index
      %c0_279 = arith.constant 0 : index
      %920 = vector.load %arg47[%c0_278, %c0_279] : memref<16x8xf32, #tpu.memory_space<vmem>>, vector<16x8xf32>
      %921 = arith.mulf %920, %919 : vector<16x8xf32>
      %cst_280 = arith.constant dense<0.000000e+00> : vector<8xf32>
      %922 = vector.multi_reduction <add>, %921, %cst_280 [0] : vector<16x8xf32> to vector<8xf32>
      %923 = vector.shape_cast %922 : vector<8xf32> to vector<1x8xf32>
      %c0_281 = arith.constant 0 : index
      %c0_282 = arith.constant 0 : index
      %924 = vector.load %arg49[%c0_281, %c0_282] : memref<1x8xf32, #tpu.memory_space<vmem>>, vector<1x8xf32>
      %925 = arith.addf %923, %924 : vector<1x8xf32>
      %c0_283 = arith.constant 0 : index
      %c0_284 = arith.constant 0 : index
      %926 = vector.load %arg52[%c0_283, %c0_284] : memref<1x8xf32, #tpu.memory_space<vmem>>, vector<1x8xf32>
      %927 = arith.subf %925, %926 : vector<1x8xf32>
      %c0_285 = arith.constant 0 : index
      %c0_286 = arith.constant 0 : index
      %928 = vector.load %arg53[%c0_285, %c0_286] : memref<1x8xf32, #tpu.memory_space<vmem>>, vector<1x8xf32>
      %cst_287 = arith.constant 9.99999974E-6 : f32
      %929 = vector.broadcast %cst_287 : f32 to vector<1x8xf32>
      %930 = arith.addf %928, %929 : vector<1x8xf32>
      %931 = math.rsqrt %930 : vector<1x8xf32>
      %932 = arith.mulf %927, %931 : vector<1x8xf32>
      %c0_288 = arith.constant 0 : index
      %c0_289 = arith.constant 0 : index
      %933 = vector.load %arg50[%c0_288, %c0_289] : memref<1x8xf32, #tpu.memory_space<vmem>>, vector<1x8xf32>
      %934 = arith.mulf %932, %933 : vector<1x8xf32>
      %c0_290 = arith.constant 0 : index
      %c0_291 = arith.constant 0 : index
      %935 = vector.load %arg51[%c0_290, %c0_291] : memref<1x8xf32, #tpu.memory_space<vmem>>, vector<1x8xf32>
      %936 = arith.addf %934, %935 : vector<1x8xf32>
      %c0_292 = arith.constant 0 : index
      %c0_293 = arith.constant 0 : index
      %c0_294 = arith.constant 0 : index
      %937 = vector.load %arg54[%c0_292, %c0_293, %c0_294] : memref<1x1x8xf32, #tpu.memory_space<vmem>>, vector<1x1x8xf32>
      %938 = vector.shape_cast %937 : vector<1x1x8xf32> to vector<1x8xf32>
      %939 = vector.shape_cast %936 : vector<1x8xf32> to vector<1x1x8xf32>
      tpu.vector_store %arg54[%c0_292, %c0_293, %c0_294], %939 {strides = array<i32>} : memref<1x1x8xf32, #tpu.memory_space<vmem>>, vector<1x1x8xf32>,
    } else {
    }
    return
  }
  func.func @transform_0(%arg0: i32, %arg1: i32) -> (i32, i32, i32) {
    %c0_i32 = arith.constant 0 : i32
    %c0_i32_0 = arith.constant 0 : i32
    %c0_i32_1 = arith.constant 0 : i32
    return %arg0, %c0_i32, %c0_i32_0 : i32, i32, i32
  }
  func.func @transform_1(%arg0: i32, %arg1: i32) -> (i32, i32) {
    %c0_i32 = arith.constant 0 : i32
    %c0_i32_0 = arith.constant 0 : i32
    %c0_i32_1 = arith.constant 0 : i32
    return %c0_i32, %c0_i32_0 : i32, i32
  }
  func.func @transform_2(%arg0: i32, %arg1: i32) -> (i32, i32) {
    %c0_i32 = arith.constant 0 : i32
    %c0_i32_0 = arith.constant 0 : i32
    %c0_i32_1 = arith.constant 0 : i32
    return %c0_i32, %c0_i32_0 : i32, i32
  }
  func.func @transform_3(%arg0: i32, %arg1: i32) -> (i32, i32) {
    %c0_i32 = arith.constant 0 : i32
    %c0_i32_0 = arith.constant 0 : i32
    %c0_i32_1 = arith.constant 0 : i32
    return %c0_i32, %c0_i32_0 : i32, i32
  }
  func.func @transform_4(%arg0: i32, %arg1: i32) -> (i32, i32) {
    %c0_i32 = arith.constant 0 : i32
    %c0_i32_0 = arith.constant 0 : i32
    %c0_i32_1 = arith.constant 0 : i32
    return %c0_i32, %c0_i32_0 : i32, i32
  }
  func.func @transform_5(%arg0: i32, %arg1: i32) -> (i32, i32) {
    %c0_i32 = arith.constant 0 : i32
    %c0_i32_0 = arith.constant 0 : i32
    %c0_i32_1 = arith.constant 0 : i32
    return %c0_i32, %c0_i32_0 : i32, i32
  }
  func.func @transform_6(%arg0: i32, %arg1: i32) -> (i32, i32) {
    %c0_i32 = arith.constant 0 : i32
    %c0_i32_0 = arith.constant 0 : i32
    %c0_i32_1 = arith.constant 0 : i32
    return %c0_i32, %c0_i32_0 : i32, i32
  }
  func.func @transform_7(%arg0: i32, %arg1: i32) -> (i32, i32, i32) {
    %c0_i32 = arith.constant 0 : i32
    %c0_i32_0 = arith.constant 0 : i32
    %c0_i32_1 = arith.constant 0 : i32
    return %arg1, %c0_i32, %c0_i32_0 : i32, i32, i32
  }
  func.func @transform_8(%arg0: i32, %arg1: i32) -> (i32, i32, i32) {
    %c0_i32 = arith.constant 0 : i32
    %c0_i32_0 = arith.constant 0 : i32
    %c0_i32_1 = arith.constant 0 : i32
    return %arg1, %c0_i32, %c0_i32_0 : i32, i32, i32
  }
  func.func @transform_9(%arg0: i32, %arg1: i32) -> (i32, i32, i32) {
    %c0_i32 = arith.constant 0 : i32
    %c0_i32_0 = arith.constant 0 : i32
    %c0_i32_1 = arith.constant 0 : i32
    return %arg1, %c0_i32, %c0_i32_0 : i32, i32, i32
  }
  func.func @transform_10(%arg0: i32, %arg1: i32) -> (i32, i32, i32) {
    %c0_i32 = arith.constant 0 : i32
    %c0_i32_0 = arith.constant 0 : i32
    %c0_i32_1 = arith.constant 0 : i32
    return %arg1, %c0_i32, %c0_i32_0 : i32, i32, i32
  }
  func.func @transform_11(%arg0: i32, %arg1: i32) -> (i32, i32, i32) {
    %c0_i32 = arith.constant 0 : i32
    %c0_i32_0 = arith.constant 0 : i32
    %c0_i32_1 = arith.constant 0 : i32
    return %arg1, %c0_i32, %c0_i32_0 : i32, i32, i32
  }
  func.func @transform_12(%arg0: i32, %arg1: i32) -> (i32, i32, i32) {
    %c0_i32 = arith.constant 0 : i32
    %c0_i32_0 = arith.constant 0 : i32
    %c0_i32_1 = arith.constant 0 : i32
    return %arg1, %c0_i32, %c0_i32_0 : i32, i32, i32
  }
  func.func @transform_13(%arg0: i32, %arg1: i32) -> (i32, i32, i32) {
    %c0_i32 = arith.constant 0 : i32
    %c0_i32_0 = arith.constant 0 : i32
    %c0_i32_1 = arith.constant 0 : i32
    return %arg1, %c0_i32, %c0_i32_0 : i32, i32, i32
  }
  func.func @transform_14(%arg0: i32, %arg1: i32) -> (i32, i32, i32) {
    %c0_i32 = arith.constant 0 : i32
    %c0_i32_0 = arith.constant 0 : i32
    %c0_i32_1 = arith.constant 0 : i32
    return %arg1, %c0_i32, %c0_i32_0 : i32, i32, i32
  }
  func.func @transform_15(%arg0: i32, %arg1: i32) -> (i32, i32, i32) {
    %c0_i32 = arith.constant 0 : i32
    %c0_i32_0 = arith.constant 0 : i32
    %c0_i32_1 = arith.constant 0 : i32
    return %arg1, %c0_i32, %c0_i32_0 : i32, i32, i32
  }
  func.func @transform_16(%arg0: i32, %arg1: i32) -> (i32, i32, i32) {
    %c0_i32 = arith.constant 0 : i32
    %c0_i32_0 = arith.constant 0 : i32
    %c0_i32_1 = arith.constant 0 : i32
    return %arg1, %c0_i32, %c0_i32_0 : i32, i32, i32
  }
  func.func @transform_17(%arg0: i32, %arg1: i32) -> (i32, i32, i32) {
    %c0_i32 = arith.constant 0 : i32
    %c0_i32_0 = arith.constant 0 : i32
    %c0_i32_1 = arith.constant 0 : i32
    return %arg1, %c0_i32, %c0_i32_0 : i32, i32, i32
  }
  func.func @transform_18(%arg0: i32, %arg1: i32) -> (i32, i32, i32) {
    %c0_i32 = arith.constant 0 : i32
    %c0_i32_0 = arith.constant 0 : i32
    %c0_i32_1 = arith.constant 0 : i32
    return %arg1, %c0_i32, %c0_i32_0 : i32, i32, i32
  }
  func.func @transform_19(%arg0: i32, %arg1: i32) -> (i32, i32, i32, i32) {
    %c0_i32 = arith.constant 0 : i32
    %c0_i32_0 = arith.constant 0 : i32
    %c0_i32_1 = arith.constant 0 : i32
    %c0_i32_2 = arith.constant 0 : i32
    return %arg1, %c0_i32, %c0_i32_0, %c0_i32_1 : i32, i32, i32, i32
  }
  func.func @transform_20(%arg0: i32, %arg1: i32) -> (i32, i32, i32, i32) {
    %c0_i32 = arith.constant 0 : i32
    %c0_i32_0 = arith.constant 0 : i32
    %c0_i32_1 = arith.constant 0 : i32
    %c0_i32_2 = arith.constant 0 : i32
    return %arg1, %c0_i32, %c0_i32_0, %c0_i32_1 : i32, i32, i32, i32
  }
  func.func @transform_21(%arg0: i32, %arg1: i32) -> (i32, i32, i32, i32) {
    %c0_i32 = arith.constant 0 : i32
    %c0_i32_0 = arith.constant 0 : i32
    %c0_i32_1 = arith.constant 0 : i32
    %c0_i32_2 = arith.constant 0 : i32
    return %arg1, %c0_i32, %c0_i32_0, %c0_i32_1 : i32, i32, i32, i32
  }
  func.func @transform_22(%arg0: i32, %arg1: i32) -> (i32, i32, i32, i32) {
    %c0_i32 = arith.constant 0 : i32
    %c0_i32_0 = arith.constant 0 : i32
    %c0_i32_1 = arith.constant 0 : i32
    %c0_i32_2 = arith.constant 0 : i32
    return %arg1, %c0_i32, %c0_i32_0, %c0_i32_1 : i32, i32, i32, i32
  }
  func.func @transform_23(%arg0: i32, %arg1: i32) -> (i32, i32, i32, i32) {
    %c0_i32 = arith.constant 0 : i32
    %c0_i32_0 = arith.constant 0 : i32
    %c0_i32_1 = arith.constant 0 : i32
    %c0_i32_2 = arith.constant 0 : i32
    return %arg1, %c0_i32, %c0_i32_0, %c0_i32_1 : i32, i32, i32, i32
  }
  func.func @transform_24(%arg0: i32, %arg1: i32) -> (i32, i32, i32, i32) {
    %c0_i32 = arith.constant 0 : i32
    %c0_i32_0 = arith.constant 0 : i32
    %c0_i32_1 = arith.constant 0 : i32
    %c0_i32_2 = arith.constant 0 : i32
    return %arg1, %c0_i32, %c0_i32_0, %c0_i32_1 : i32, i32, i32, i32
  }
  func.func @transform_25(%arg0: i32, %arg1: i32) -> (i32, i32, i32, i32) {
    %c0_i32 = arith.constant 0 : i32
    %c0_i32_0 = arith.constant 0 : i32
    %c0_i32_1 = arith.constant 0 : i32
    %c0_i32_2 = arith.constant 0 : i32
    return %arg1, %c0_i32, %c0_i32_0, %c0_i32_1 : i32, i32, i32, i32
  }
  func.func @transform_26(%arg0: i32, %arg1: i32) -> (i32, i32, i32, i32) {
    %c0_i32 = arith.constant 0 : i32
    %c0_i32_0 = arith.constant 0 : i32
    %c0_i32_1 = arith.constant 0 : i32
    %c0_i32_2 = arith.constant 0 : i32
    return %arg1, %c0_i32, %c0_i32_0, %c0_i32_1 : i32, i32, i32, i32
  }
  func.func @transform_27(%arg0: i32, %arg1: i32) -> (i32, i32, i32, i32) {
    %c0_i32 = arith.constant 0 : i32
    %c0_i32_0 = arith.constant 0 : i32
    %c0_i32_1 = arith.constant 0 : i32
    %c0_i32_2 = arith.constant 0 : i32
    return %arg1, %c0_i32, %c0_i32_0, %c0_i32_1 : i32, i32, i32, i32
  }
  func.func @transform_28(%arg0: i32, %arg1: i32) -> (i32, i32, i32, i32) {
    %c0_i32 = arith.constant 0 : i32
    %c0_i32_0 = arith.constant 0 : i32
    %c0_i32_1 = arith.constant 0 : i32
    %c0_i32_2 = arith.constant 0 : i32
    return %arg1, %c0_i32, %c0_i32_0, %c0_i32_1 : i32, i32, i32, i32
  }
  func.func @transform_29(%arg0: i32, %arg1: i32) -> (i32, i32, i32, i32) {
    %c0_i32 = arith.constant 0 : i32
    %c0_i32_0 = arith.constant 0 : i32
    %c0_i32_1 = arith.constant 0 : i32
    %c0_i32_2 = arith.constant 0 : i32
    return %arg1, %c0_i32, %c0_i32_0, %c0_i32_1 : i32, i32, i32, i32
  }
  func.func @transform_30(%arg0: i32, %arg1: i32) -> (i32, i32, i32, i32) {
    %c0_i32 = arith.constant 0 : i32
    %c0_i32_0 = arith.constant 0 : i32
    %c0_i32_1 = arith.constant 0 : i32
    %c0_i32_2 = arith.constant 0 : i32
    return %arg1, %c0_i32, %c0_i32_0, %c0_i32_1 : i32, i32, i32, i32
  }
  func.func @transform_31(%arg0: i32, %arg1: i32) -> (i32, i32, i32, i32) {
    %c0_i32 = arith.constant 0 : i32
    %c0_i32_0 = arith.constant 0 : i32
    %c0_i32_1 = arith.constant 0 : i32
    %c0_i32_2 = arith.constant 0 : i32
    return %arg1, %c0_i32, %c0_i32_0, %c0_i32_1 : i32, i32, i32, i32
  }
  func.func @transform_32(%arg0: i32, %arg1: i32) -> (i32, i32) {
    %c0_i32 = arith.constant 0 : i32
    %c0_i32_0 = arith.constant 0 : i32
    %c0_i32_1 = arith.constant 0 : i32
    return %c0_i32, %c0_i32_0 : i32, i32
  }
  func.func @transform_33(%arg0: i32, %arg1: i32) -> (i32, i32) {
    %c0_i32 = arith.constant 0 : i32
    %c0_i32_0 = arith.constant 0 : i32
    %c0_i32_1 = arith.constant 0 : i32
    return %c0_i32, %c0_i32_0 : i32, i32
  }
  func.func @transform_34(%arg0: i32, %arg1: i32) -> (i32, i32, i32) {
    %c0_i32 = arith.constant 0 : i32
    %c0_i32_0 = arith.constant 0 : i32
    %c0_i32_1 = arith.constant 0 : i32
    return %arg1, %c0_i32, %c0_i32_0 : i32, i32, i32
  }
  func.func @transform_35(%arg0: i32, %arg1: i32) -> (i32, i32, i32) {
    %c0_i32 = arith.constant 0 : i32
    %c0_i32_0 = arith.constant 0 : i32
    %c0_i32_1 = arith.constant 0 : i32
    return %arg1, %c0_i32, %c0_i32_0 : i32, i32, i32
  }
  func.func @transform_36(%arg0: i32, %arg1: i32) -> (i32, i32, i32) {
    %c0_i32 = arith.constant 0 : i32
    %c0_i32_0 = arith.constant 0 : i32
    %c0_i32_1 = arith.constant 0 : i32
    return %arg1, %c0_i32, %c0_i32_0 : i32, i32, i32
  }
  func.func @transform_37(%arg0: i32, %arg1: i32) -> (i32, i32, i32) {
    %c0_i32 = arith.constant 0 : i32
    %c0_i32_0 = arith.constant 0 : i32
    %c0_i32_1 = arith.constant 0 : i32
    return %arg1, %c0_i32, %c0_i32_0 : i32, i32, i32
  }
  func.func @transform_38(%arg0: i32, %arg1: i32) -> (i32, i32, i32) {
    %c0_i32 = arith.constant 0 : i32
    %c0_i32_0 = arith.constant 0 : i32
    %c0_i32_1 = arith.constant 0 : i32
    return %arg1, %c0_i32, %c0_i32_0 : i32, i32, i32
  }
  func.func @transform_39(%arg0: i32, %arg1: i32) -> (i32, i32, i32) {
    %c0_i32 = arith.constant 0 : i32
    %c0_i32_0 = arith.constant 0 : i32
    %c0_i32_1 = arith.constant 0 : i32
    return %arg1, %c0_i32, %c0_i32_0 : i32, i32, i32
  }
  func.func @transform_40(%arg0: i32, %arg1: i32) -> (i32, i32, i32) {
    %c0_i32 = arith.constant 0 : i32
    %c0_i32_0 = arith.constant 0 : i32
    %c0_i32_1 = arith.constant 0 : i32
    return %arg1, %c0_i32, %c0_i32_0 : i32, i32, i32
  }
  func.func @transform_41(%arg0: i32, %arg1: i32) -> (i32, i32, i32) {
    %c0_i32 = arith.constant 0 : i32
    %c0_i32_0 = arith.constant 0 : i32
    %c0_i32_1 = arith.constant 0 : i32
    return %arg1, %c0_i32, %c0_i32_0 : i32, i32, i32
  }
  func.func @transform_42(%arg0: i32, %arg1: i32) -> (i32, i32, i32) {
    %c0_i32 = arith.constant 0 : i32
    %c0_i32_0 = arith.constant 0 : i32
    %c0_i32_1 = arith.constant 0 : i32
    return %arg1, %c0_i32, %c0_i32_0 : i32, i32, i32
  }
  func.func @transform_43(%arg0: i32, %arg1: i32) -> (i32, i32) {
    %c0_i32 = arith.constant 0 : i32
    %c0_i32_0 = arith.constant 0 : i32
    %c0_i32_1 = arith.constant 0 : i32
    return %c0_i32, %c0_i32_0 : i32, i32
  }
  func.func @transform_44(%arg0: i32, %arg1: i32) -> (i32, i32) {
    %c0_i32 = arith.constant 0 : i32
    %c0_i32_0 = arith.constant 0 : i32
    %c0_i32_1 = arith.constant 0 : i32
    return %c0_i32, %c0_i32_0 : i32, i32
  }
  func.func @transform_45(%arg0: i32, %arg1: i32) -> (i32, i32) {
    %c0_i32 = arith.constant 0 : i32
    %c0_i32_0 = arith.constant 0 : i32
    %c0_i32_1 = arith.constant 0 : i32
    return %c0_i32, %c0_i32_0 : i32, i32
  }
  func.func @transform_46(%arg0: i32, %arg1: i32) -> (i32, i32) {
    %c0_i32 = arith.constant 0 : i32
    %c0_i32_0 = arith.constant 0 : i32
    %c0_i32_1 = arith.constant 0 : i32
    return %c0_i32, %c0_i32_0 : i32, i32
  }
  func.func @transform_47(%arg0: i32, %arg1: i32) -> (i32, i32) {
    %c0_i32 = arith.constant 0 : i32
    %c0_i32_0 = arith.constant 0 : i32
    %c0_i32_1 = arith.constant 0 : i32
    return %c0_i32, %c0_i32_0 : i32, i32
  }
  func.func @transform_48(%arg0: i32, %arg1: i32) -> (i32, i32) {
    %c0_i32 = arith.constant 0 : i32
    %c0_i32_0 = arith.constant 0 : i32
    %c0_i32_1 = arith.constant 0 : i32
    return %c0_i32, %c0_i32_0 : i32, i32
  }
  func.func @transform_49(%arg0: i32, %arg1: i32) -> (i32, i32) {
    %c0_i32 = arith.constant 0 : i32
    %c0_i32_0 = arith.constant 0 : i32
    %c0_i32_1 = arith.constant 0 : i32
    return %c0_i32, %c0_i32_0 : i32, i32
  }
  func.func @transform_50(%arg0: i32, %arg1: i32) -> (i32, i32) {
    %c0_i32 = arith.constant 0 : i32
    %c0_i32_0 = arith.constant 0 : i32
    %c0_i32_1 = arith.constant 0 : i32
    return %c0_i32, %c0_i32_0 : i32, i32
  }
  func.func @transform_51(%arg0: i32, %arg1: i32) -> (i32, i32) {
    %c0_i32 = arith.constant 0 : i32
    %c0_i32_0 = arith.constant 0 : i32
    %c0_i32_1 = arith.constant 0 : i32
    return %c0_i32, %c0_i32_0 : i32, i32
  }
  func.func @transform_52(%arg0: i32, %arg1: i32) -> (i32, i32, i32) {
    %c0_i32 = arith.constant 0 : i32
    %c0_i32_0 = arith.constant 0 : i32
    %c0_i32_1 = arith.constant 0 : i32
    return %arg0, %c0_i32, %c0_i32_0 : i32, i32, i32
  }
}

</mosaic_0001>

<bundles_post_ra>
// kernel: hybrid_forward.1
= control target key start
LH: loop header
LB: loop body
LE: loop exit
PB: predicated region body
PF: predicated region fallthrough
CT: control target
= control target key end

     0   :  { %s8892_s6 = smov 1   ;;  %s8893_s10 = smov 2   ;;  %s10717_s0 = inlined_call_operand.smem [shape: u32[53], index: -1, kind: input, shape index: {}] }
   0x1   :  { %s8992_s5 = sld [smem:[%s10717_s0]]   ;;  %s8894_s14 = smov 3  }
   0x2   :  { %s8997_s9 = sld [smem:[%s10717_s0 + %s8892_s6]]   ;;  %s8895_s18 = smov 4  }
   0x3   :  { %s9002_s13 = sld [smem:[%s10717_s0 + %s8893_s10]]   ;;  %s8896_s22 = smov 5  }
   0x4   :  { %s9007_s17 = sld [smem:[%s10717_s0 + %s8894_s14]]   ;;  %s8897_s26 = smov 6  }
   0x5   :  { %s9012_s21 = sld [smem:[%s10717_s0 + %s8895_s18]]   ;;  %s8898_s30 = smov 7  }
   0x6   :  { %s9017_s25 = sld [smem:[%s10717_s0 + %s8896_s22]]   ;;  %s8899_s4 = smov 8  }
   0x7   :  { %10789 = sst [smem:[#allocation31_spill]] %s8992_s5  ;;  %s8900_s10 = smov 9  }
   0x8   :  { %10790 = sst [smem:[#allocation32_spill]] %s8997_s9  ;;  %s8901_s15 = smov 10  }
   0x9   :  { %10791 = sst [smem:[#allocation33_spill]] %s9002_s13  ;;  %s8902_s20 = smov 11  }
   0xa   :  { %10792 = sst [smem:[#allocation34_spill]] %s9007_s17  ;;  %s8904_s1 = smov 13  }
   0xb   :  { %10793 = sst [smem:[#allocation35_spill]] %s9012_s21  ;;  %s8905_s7 = smov 14  }
   0xc   :  { %10794 = sst [smem:[#allocation36_spill]] %s9017_s25  ;;  %s8907_s22 = smov 16  }
   0xd   :  { %s9022_s29 = sld [smem:[%s10717_s0 + %s8897_s26]]   ;;  %s8903_s26 = smov 12  }
   0xe   :  { %s9027_s3 = sld [smem:[%s10717_s0 + %s8898_s30]]   ;;  %s8908_s28 = smov 17  }
   0xf   :  { %s9032_s8 = sld [smem:[%s10717_s0 + %s8899_s4]]  }
  0x10   :  { %s9037_s14 = sld [smem:[%s10717_s0 + %s8900_s10]]  }
  0x11   :  { %s9042_s19 = sld [smem:[%s10717_s0 + %s8901_s15]]   ;;  %s8906_s15 = smov 15  }
  0x12   :  { %s9047_s24 = sld [smem:[%s10717_s0 + %s8902_s20]]  }
  0x13   :  { %10795 = sst [smem:[#allocation37_spill]] %s9022_s29 }
  0x14   :  { %10796 = sst [smem:[#allocation38_spill]] %s9027_s3 }
  0x15   :  { %10797 = sst [smem:[#allocation39_spill]] %s9032_s8 }
  0x16   :  { %10798 = sst [smem:[#allocation40_spill]] %s9037_s14 }
  0x17   :  { %10799 = sst [smem:[#allocation41_spill]] %s9042_s19 }
  0x18   :  { %10800 = sst [smem:[#allocation42_spill]] %s9047_s24 }
  0x19   :  { %s9052_s30 = sld [smem:[%s10717_s0 + %s8903_s26]]  }
  0x1a   :  { %s9057_s6 = sld [smem:[%s10717_s0 + %s8904_s1]]  }
  0x1b   :  { %s9062_s12 = sld [smem:[%s10717_s0 + %s8905_s7]]   ;;  %s8909_s7 = smov 18  }
  0x1c   :  { %s9067_s20 = sld [smem:[%s10717_s0 + %s8906_s15]]   ;;  %s8910_s15 = smov 19  }
  0x1d   :  { %s9072_s27 = sld [smem:[%s10717_s0 + %s8907_s22]]   ;;  %s8911_s22 = smov 20  }
  0x1e   :  { %s9077_s4 = sld [smem:[%s10717_s0 + %s8908_s28]]   ;;  %s8912_s28 = smov 21  }
  0x1f   :  { %10801 = sst [smem:[#allocation43_spill]] %s9052_s30 }
  0x20   :  { %10802 = sst [smem:[#allocation44_spill]] %s9057_s6 }
  0x21   :  { %10803 = sst [smem:[#allocation45_spill]] %s9062_s12 }
  0x22   :  { %10804 = sst [smem:[#allocation46_spill]] %s9067_s20 }
  0x23   :  { %10805 = sst [smem:[#allocation47_spill]] %s9072_s27 }
  0x24   :  { %10806 = sst [smem:[#allocation48_spill]] %s9077_s4 }
  0x25   :  { %s9082_s29 = sld [smem:[%s10717_s0 + %s8909_s7]]   ;;  %s8913_s7 = smov 22  }
  0x26   :  { %s9087_s17 = sld [smem:[%s10717_s0 + %s8910_s15]]   ;;  %s8914_s15 = smov 23  }
  0x27   :  { %s9092_s21 = sld [smem:[%s10717_s0 + %s8911_s22]]   ;;  %s8915_s22 = smov 24  }
  0x28   :  { %s9097_s9 = sld [smem:[%s10717_s0 + %s8912_s28]]   ;;  %s8916_s28 = smov 25  }
  0x29   :  { %s9102_s4 = sld [smem:[%s10717_s0 + %s8913_s7]]   ;;  %s8917_s7 = smov 26  }
  0x2b   :  { %10807 = sst [smem:[#allocation49_spill]] %s9082_s29 }
  0x2c   :  { %10808 = sst [smem:[#allocation50_spill]] %s9087_s17 }
  0x2d   :  { %10809 = sst [smem:[#allocation51_spill]] %s9092_s21 }
  0x2e   :  { %10810 = sst [smem:[#allocation52_spill]] %s9097_s9 }
  0x2f   :  { %10811 = sst [smem:[#allocation53_spill]] %s9102_s4 }
  0x30   :  { %s9107_s17 = sld [smem:[%s10717_s0 + %s8914_s15]]   ;;  %s8918_s15 = smov 27  }
  0x31   :  { %s9112_s21 = sld [smem:[%s10717_s0 + %s8915_s22]]   ;;  %s8919_s22 = smov 28  }
  0x32   :  { %s9117_s9 = sld [smem:[%s10717_s0 + %s8916_s28]]   ;;  %s8920_s28 = smov 29  }
  0x33   :  { %s9122_s4 = sld [smem:[%s10717_s0 + %s8917_s7]]   ;;  %s8921_s7 = smov 30  }
  0x36   :  { %10812 = sst [smem:[#allocation54_spill]] %s9107_s17 }
  0x37   :  { %10813 = sst [smem:[#allocation55_spill]] %s9112_s21 }
  0x38   :  { %10814 = sst [smem:[#allocation56_spill]] %s9117_s9 }
  0x39   :  { %10815 = sst [smem:[#allocation57_spill]] %s9122_s4 }
  0x3a   :  { %s9127_s17 = sld [smem:[%s10717_s0 + %s8918_s15]]   ;;  %s8922_s15 = smov 31  }
  0x3b   :  { %s9132_s21 = sld [smem:[%s10717_s0 + %s8919_s22]]   ;;  %s8923_s22 = smov 32  }
  0x3c   :  { %s9137_s9 = sld [smem:[%s10717_s0 + %s8920_s28]]   ;;  %s8924_s28 = smov 33  }
  0x3d   :  { %s9142_s4 = sld [smem:[%s10717_s0 + %s8921_s7]]   ;;  %s8925_s7 = smov 34  }
  0x40   :  { %10816 = sst [smem:[#allocation58_spill]] %s9127_s17 }
  0x41   :  { %10817 = sst [smem:[#allocation59_spill]] %s9132_s21 }
  0x42   :  { %10818 = sst [smem:[#allocation60_spill]] %s9137_s9 }
  0x43   :  { %10819 = sst [smem:[#allocation61_spill]] %s9142_s4 }
  0x44   :  { %s9147_s17 = sld [smem:[%s10717_s0 + %s8922_s15]]   ;;  %s8926_s15 = smov 35  }
  0x45   :  { %s9152_s21 = sld [smem:[%s10717_s0 + %s8923_s22]]   ;;  %s8927_s22 = smov 36  }
  0x46   :  { %s9157_s9 = sld [smem:[%s10717_s0 + %s8924_s28]]   ;;  %s8928_s28 = smov 37  }
  0x47   :  { %s9162_s4 = sld [smem:[%s10717_s0 + %s8925_s7]]   ;;  %s8929_s7 = smov 38  }
  0x4a   :  { %10820 = sst [smem:[#allocation62_spill]] %s9147_s17 }
  0x4b   :  { %10821 = sst [smem:[#allocation63_spill]] %s9152_s21 }
  0x4c   :  { %10822 = sst [smem:[#allocation64_spill]] %s9157_s9 }
  0x4d   :  { %10823 = sst [smem:[#allocation65_spill]] %s9162_s4 }
  0x4e   :  { %s9167_s17 = sld [smem:[%s10717_s0 + %s8926_s15]]   ;;  %s8930_s15 = smov 39  }
  0x4f   :  { %s9172_s21 = sld [smem:[%s10717_s0 + %s8927_s22]]   ;;  %s8931_s22 = smov 40  }
  0x50   :  { %s9177_s9 = sld [smem:[%s10717_s0 + %s8928_s28]]   ;;  %s8932_s28 = smov 41  }
  0x51   :  { %s9182_s4 = sld [smem:[%s10717_s0 + %s8929_s7]]   ;;  %s8933_s7 = smov 42  }
  0x54   :  { %10824 = sst [smem:[#allocation66_spill]] %s9167_s17 }
  0x55   :  { %10825 = sst [smem:[#allocation67_spill]] %s9172_s21 }
  0x56   :  { %10826 = sst [smem:[#allocation68_spill]] %s9177_s9 }
  0x57   :  { %10827 = sst [smem:[#allocation69_spill]] %s9182_s4 }
  0x58   :  { %s9187_s17 = sld [smem:[%s10717_s0 + %s8930_s15]]   ;;  %s8934_s15 = smov 43  }
  0x59   :  { %s9192_s21 = sld [smem:[%s10717_s0 + %s8931_s22]]   ;;  %s8935_s22 = smov 44  }
  0x5a   :  { %s9197_s9 = sld [smem:[%s10717_s0 + %s8932_s28]]   ;;  %s8936_s28 = smov 45  }
  0x5b   :  { %s9202_s4 = sld [smem:[%s10717_s0 + %s8933_s7]]   ;;  %s8937_s7 = smov 46  }
  0x5c   :  { %s9217_s29 = sld [smem:[%s10717_s0 + %s8936_s28]]   ;;  %s8940_s28 = smov 49  }
  0x5d   :  { %s9222_s27 = sld [smem:[%s10717_s0 + %s8937_s7]]   ;;  %s8941_s7 = smov 50  }
  0x5e   :  { %10828 = sst [smem:[#allocation70_spill]] %s9187_s17 }
  0x5f   :  { %10829 = sst [smem:[#allocation71_spill]] %s9192_s21 }
  0x60   :  { %10830 = sst [smem:[#allocation72_spill]] %s9197_s9 }
  0x61   :  { %10831 = sst [smem:[#allocation73_spill]] %s9202_s4 }
  0x62   :  { %s9207_s17 = sld [smem:[%s10717_s0 + %s8934_s15]]   ;;  %s8938_s15 = smov 47  }
  0x63   :  { %s9212_s21 = sld [smem:[%s10717_s0 + %s8935_s22]]   ;;  %s8939_s22 = smov 48  }
  0x64   :  { %10834 = sst [smem:[#allocation76_spill]] %s9217_s29 }
  0x65   :  { %10835 = sst [smem:[#allocation77_spill]] %s9222_s27 }
  0x66   :  { %s9232_s20 = sld [smem:[%s10717_s0 + %s8939_s22]]   ;;  %s8943_s22 = smov 52  }
  0x67   :  { %s9237_s29 = sld [smem:[%s10717_s0 + %s8940_s28]]  }
  0x68   :  { %10832 = sst [smem:[#allocation74_spill]] %s9207_s17 }
  0x69   :  { %10833 = sst [smem:[#allocation75_spill]] %s9212_s21 }
  0x6a   :  { %s9227_s17 = sld [smem:[%s10717_s0 + %s8938_s15]]   ;;  %s8942_s15 = smov 51  }
  0x6b   :  { %s9242_s27 = sld [smem:[%s10717_s0 + %s8941_s7]]  }
  0x6c   :  { %10837 = sst [smem:[#allocation79_spill]] %s9232_s20 }
  0x6d   :  { %10838 = sst [smem:[#allocation80_spill]] %s9237_s29 }
  0x6e   :  { %s9247_s12 = sld [smem:[%s10717_s0 + %s8942_s15]]  }
  0x6f   :  { %s9252_s6 = sld [smem:[%s10717_s0 + %s8943_s22]]  }
  0x70   :  { %10836 = sst [smem:[#allocation78_spill]] %s9227_s17 }
  0x71   :  { %10839 = sst [smem:[#allocation81_spill]] %s9242_s27 }
  0x74   :  { %10840 = sst [smem:[#allocation82_spill]] %s9247_s12 }
  0x75   :  { %10841 = sst [smem:[#allocation83_spill]] %s9252_s6 }
  0x76   :  { %110 = vsyncpa [#allocation7], 0 }
  0x77   :  { %111 = vsyncpa [#allocation10], 0 }
  0x78   :  { %112 = vsyncpa [#allocation15], 0 }
  0x79   :  { %113 = vsyncpa [#allocation18], 0 }
  0x7a   :  { %114 = vsyncpa [#allocation21], 0 }
  0x7b   :  { %115 = vsyncpa [#allocation8], 0 }
  0x7c   :  { %117 = vsyncpa [#allocation8 + $0x1], 0  ;;  %s9254_s28 = smov 0   ;;  %s9256_s1 = smov 0  }
  0x7d   :  { %s9258_s2 = smov 0   ;;  %s9260_s7 = smov 0  }
  0x7e   :  { %s9262_s10 = smov 0   ;;  %s9264_s11 = smov 0  }
  0x7f   :  { %s9266_s0 = smov 0   ;;  %s9268_s15 = smov 0  }
  0x80   :  { %s9270_s16 = smov 0   ;;  %s9272_s18 = smov 0  }
  0x81   :  { %s9274_s22 = smov 0  }
  0x82 LB: > { %s10842_s4 = sld [smem:[#allocation73_spill]]  ;;  %s9310_s23 = sadd.s32 4294967295, %s8890_s22   ;;  %s8854_s1 = sphi %s9256_s1, %s11019_s1   ;;  %s8850_s28 = sphi %s9254_s28, %s11018_s28   ;;  %s8890_s22 = sphi %s9274_s22, %s123_s22   ;;  %s8886_s18 = sphi %s9272_s18, %s11027_s18   ;;  %s8882_s16 = sphi %s9270_s16, %s11026_s16   ;;  %s8878_s15 = sphi %s9268_s15, %s11025_s15   ;;  %s8874_s0 = sphi %s9266_s0, %s11024_s0   ;;  %s8870_s11 = sphi %s9264_s11, %s11023_s11   ;;  %s8866_s10 = sphi %s9262_s10, %s11022_s10   ;;  %s8862_s7 = sphi %s9260_s7, %s11021_s7   ;;  %s8858_s2 = sphi %s9258_s2, %s11020_s2  }
  0x83   : > { %s10843_s9 = sld [smem:[#allocation72_spill]]  ;;  %p7078_p0 = scmp.ge.s32.totalorder %s8890_s22, 1 }
  0x84   : > { %10844 = sst [smem:[#allocation84_spill]] %s8850_s28  ;;  %p10729_p1 = scmp.eq.s32.totalorder %s9310_s23, 0 }
  0x85   : > { %10845 = sst [smem:[#allocation85_spill]] %s8854_s1  ;;  %p1433_p2 = scmp.lt.s32.totalorder %s8890_s22, 5 }
  0x86   : > { %10846 = sst [smem:[#allocation86_spill]] %s8858_s2  ;;  %s8944_s6 = smov [#allocation6]  }
  0x87   : > { %10847 = sst [smem:[#allocation87_spill]] %s8866_s10  ;;  %p9315_p3 = pnand %p7078_p0, %p1433_p2 }
  0x88   : > { %10848 = sst [smem:[#allocation88_spill]] %s8870_s11  ;;  %s1449_s30 = sshll.u32 %s8944_s6, 4  ;;  %s1450_s30 = int_to_ptr.vmem [resolvable:$true] %s1449_s30 }
  0x89   : > { %10849 = sst [smem:[#allocation89_spill]] %s8874_s0  ;;  %p7898_p4 = pneg %p9315_p3 }
  0x8a   : > { %10850 = sst [smem:[#allocation90_spill]] %s8878_s15  ;;  %s8945_s24 = smov [#allocation9]  }
  0x8b   : > { %10851 = sst [smem:[#allocation91_spill]] %s8882_s16  ;;  %s1466_s19 = sshll.u32 %s8945_s24, 4  ;;  %s1467_s19 = int_to_ptr.vmem [resolvable:$true] %s1466_s19 }
  0x8c   : > { %10852 = sst [smem:[#allocation92_spill]] %s8886_s18  ;;  %p9323_p5 = pnand %p7898_p4, %p10729_p1 }
  0x8d   : > { %10853 = sst [smem:[#allocation93_spill]] %s8890_s22  ;;  %s8946_s8 = smov [#allocation14]  }
  0x8e   : > { %s10854_s26 = scalar_select %p9315_p3, 1, 0 }
  0x8f   : > { %s10855_s14 = scalar_select %p9323_p5, 1, 0 }
  0x90   : > { %s1506_s3 = sshll.u32 %s8946_s8, 4  ;;  %p9331_p6 = pneg %p9323_p5  ;;  %s9327_s3 = int_to_ptr.vmem [resolvable:$true] %s1506_s3 }
  0x91   : > { %s8493_s6 = scalar_lea.vmem %s1450_s30, 16  ;;  %s8500_s24 = scalar_lea.vmem %s1450_s30, 32 }
  0x92   : > { %p8494_p7 = scmp.ne.s32.totalorder %s1450_s30, %s8493_s6  ;;  %p8501_p10 = scmp.lt.s32.totalorder %s1450_s30, %s1450_s30 }
  0x93   : > { %p8502_p11 = scmp.lt.s32.totalorder %s8500_s24, %s8493_s6 }
  0x94   : > { %p8496_p8 = pnand %p8494_p7, %p9331_p6 }
  0x95   : > { %p8503_p12 = por %p8502_p11, %p8501_p10 }
  0x96   : > { %p8497_p9 = pneg %p8496_p8 }
  0x98   : > { %p8504_p13 = pnand %p8503_p12, %p8497_p9 }
  0x9a   : > { %8507 = shalt.err (!%p8504_p13)
}
  0x9b   : > { %s10857_s13 = sld [smem:[#allocation33_spill]]  ;;  %s8519_s8 = scalar_lea.vmem %s1467_s19, 16 }
  0x9c   : > { %p8520_p0 = scmp.ne.s32.totalorder %s1467_s19, %s8519_s8  ;;  %s8526_s0 = scalar_lea.vmem %s1467_s19, 32 }
  0x9d   : > { %p8527_p1 = scmp.lt.s32.totalorder %s1467_s19, %s1467_s19  ;;  %p8528_p7 = scmp.lt.s32.totalorder %s8526_s0, %s8519_s8 }
  0x9e   : > { %p8522_p2 = pnand %p8520_p0, %p9331_p6 }
  0x9f   : > { %p8529_p8 = por %p8528_p7, %p8527_p1 }
  0xa0   : > { %p8523_p4 = pneg %p8522_p2 }
  0xa1   : > { %7901 = dma.hbm_to_vmem [thread:$0]  (!%p9323_p5), %s10857_s13, 16, %s1450_s30, [#allocation7]  }
  0xa2   : > { %p8530_p3 = pnand %p8529_p8, %p8523_p4 }
  0xa4   : > { %8533 = shalt.err (!%p8530_p3)
}
  0xa5   : > { %s10858_s25 = sld [smem:[#allocation36_spill]]  ;;  %s8545_s30 = scalar_lea.vmem %s9327_s3, 16 }
  0xa6   : > { %p8546_p9 = scmp.ne.s32.totalorder %s9327_s3, %s8545_s30  ;;  %s8552_s6 = scalar_lea.vmem %s9327_s3, 32 }
  0xa7   : > { %p8553_p12 = scmp.lt.s32.totalorder %s9327_s3, %s9327_s3  ;;  %p8554_p1 = scmp.lt.s32.totalorder %s8552_s6, %s8545_s30 }
  0xa8   : > { %p8548_p10 = pnand %p8546_p9, %p9331_p6 }
  0xa9   : > { %p8555_p13 = por %p8554_p1, %p8553_p12 }
  0xaa   : > { %p8549_p11 = pneg %p8548_p10 }
  0xab   : > { %7904 = dma.hbm_to_vmem [thread:$0]  (!%p9323_p5), %s10858_s25, 16, %s1467_s19, [#allocation10]  }
  0xac   : > { %p8556_p3 = pnand %p8555_p13, %p8549_p11 }
  0xae   : > { %8559 = shalt.err (!%p8556_p3)
}
  0xaf   : > { %s10859_s17 = sld [smem:[#allocation78_spill]]  ;;  %s8947_s0 = smov [#allocation17]  }
  0xb0   : > { %s1528_s19 = sshll.u32 %s8947_s0, 4  ;;  %s1529_s19 = int_to_ptr.vmem [resolvable:$true] %s1528_s19 }
  0xb1   : > { %s8571_s24 = scalar_lea.vmem %s1529_s19, 16  ;;  %s8578_s8 = scalar_lea.vmem %s1529_s19, 32 }
  0xb2   : > { %p8572_p0 = scmp.ne.s32.totalorder %s1529_s19, %s8571_s24  ;;  %p8579_p7 = scmp.lt.s32.totalorder %s1529_s19, %s1529_s19 }
  0xb3   : > { %p8580_p8 = scmp.lt.s32.totalorder %s8578_s8, %s8571_s24 }
  0xb4   : > { %p8574_p2 = pnand %p8572_p0, %p9331_p6 }
  0xb5   : > { %7910 = dma.hbm_to_vmem [thread:$0]  (!%p9323_p5), %s10859_s17, 16, %s9327_s3, [#allocation15]  }
  0xb6   : > { %p8575_p4 = pneg %p8574_p2  ;;  %p8581_p9 = por %p8580_p8, %p8579_p7 }
  0xb8   : > { %p8582_p10 = pnand %p8581_p9, %p8575_p4 }
  0xba   : > { %8585 = shalt.err (!%p8582_p10)
}
  0xbb   : > { %s10860_s29 = sld [smem:[#allocation80_spill]]  ;;  %s7077_s3 = sadd.s32 4294967294, %s8890_s22  }
  0xbc   : > { %s132_s30 = sadd.s32 1, %s8882_s16  ;;  %s135_s6 = sadd.s32 1, %s8886_s18 }
  0xbd   : > { %p133_p11 = scmp.ge.s32.totalorder %s132_s30, 2  ;;  %s1168_s0 = sadd.s32 1, %s8870_s11 }
  0xbe   : > { %p1175_p12 = scmp.ne.s32.totalorder %s8870_s11, %s8866_s10  ;;  %p1176_p1 = scmp.eq.s32.totalorder %s8890_s22, 0 }
  0xbf   : > { %s11029_s30 = smov (%p133_p11, %s132_s30), 0  ;;  %s11031_s6 = smov (!%p133_p11, %s135_s6), %s8886_s18 }
  0xc0   : > { %10861 = sst [smem:[#allocation94_spill]] %s11029_s30  ;;  %s1165_s24 = ssub.s32 %s8882_s16, %s11029_s30 }
  0xc1   : > { %7916 = dma.hbm_to_vmem [thread:$0]  (!%p9323_p5), %s10860_s29, 16, %s1529_s19, [#allocation18]  }
  0xc2   : > { %p137_p13 = scmp.ge.s32.totalorder %s11031_s6, 2  ;;  %p1166_p3 = scmp.eq.s32.totalorder %s1165_s24, 0 }
  0xc3   : > { %p9373_p0 = por %p1176_p1, %p1175_p12  ;;  %p1181_p2 = scmp.ne.s32.totalorder %s8866_s10, %s8862_s7 }
  0xc4   : > { %s11033_s6 = smov (%p137_p13, %s11031_s6), 0  ;;  %p10865_p4 = scmp.eq.s32.totalorder %s9310_s23, 0 }
  0xc5   : > { %10863 = sst [smem:[#allocation95_spill]] %s11033_s6  ;;  %s1406_s24 = ssub.s32 %s8886_s18, %s11033_s6 }
  0xc6   : > { %s9382_s8 = scalar_select %p1166_p3, %s8870_s11, %s1168_s0  }
  0xc7   : > { %p9386_p7 = por %p10865_p4, %p1181_p2  ;;  %p1407_p8 = scmp.eq.s32.totalorder %s1406_s24, 0 }
  0xc8   : > { %10864 = sst [smem:[#allocation96_spill]] %s9382_s8  ;;  %s1409_s17 = sadd.s32 1, %s8858_s2 }
  0xc9   : > { %s10866_s13 = scalar_select %p9386_p7, 1, 0 }
  0xca   : > { %p1419_p9 = scmp.ne.s32.totalorder %s8858_s2, %s8854_s1  ;;  %p1420_p10 = scmp.eq.s32.totalorder %s9310_s23, 3 }
  0xcb   : > { %s9397_s7 = scalar_select %p1407_p8, %s8858_s2, %s1409_s17  }
  0xcc   : > { %p9399_p11 = por %p1420_p10, %p1419_p9  ;;  %p1425_p12 = scmp.ne.s32.totalorder %s8854_s1, %s8850_s28 }
  0xcd   : > { %10867 = sst [smem:[#allocation97_spill]] %s9397_s7  ;;  %p1426_p1 = scmp.eq.s32.totalorder %s7077_s3, 3 }
  0xce   : > { %s10868_s25 = scalar_select %p9399_p11, 1, 0 }
  0xcf   : > { %p7942_p13 = scmp.lt.s32.totalorder %s8890_s22, 4  ;;  %s1801_s0 = sand.u32 1, %s8890_s22  }
  0xd0   : > { %10869 = sst [smem:[#allocation98_spill]] %s10868_s25  ;;  %s10738_s29 = sand.u32 1, %s8870_s11  }
  0xd1   : > { %p9408_p3 = por %p1426_p1, %p1425_p12  ;;  %s10735_s24 = sshll.u32 %s8882_s16, 4 }
  0xd2   : > { %s9416_s6 = scalar_lea.hbm %s10843_s9, %s10735_s24  ;;  %s1804_s17 = scalar_lea.vmem [#allocation11], %s10738_s29 }
  0xd3   : > { %s10870_s30 = scalar_select %p9408_p3, 1, 0 }
  0xd4   : > { %s1811_s18 = sshll.u32 %s1804_s17, 4  ;;  %p9424_p2 = pnand %p7942_p13, %p9373_p0  ;;  %s9420_s18 = int_to_ptr.vmem [resolvable:$true] %s1811_s18 }
  0xd5   : > { %10871 = sst [smem:[#allocation99_spill]] %s10870_s30  ;;  %s8948_s8 = smov [#allocation13]  }
  0xd6   : > { %s10872_s3 = scalar_select %p9424_p2, 1, 0 }
  0xd7   : > { %s1489_s7 = sshll.u32 %s8948_s8, 4  ;;  %s9428_s2 = scalar_lea.sflag [#allocation7], %s1801_s0  ;;  %s1490_s7 = int_to_ptr.vmem [resolvable:$true] %s1489_s7 }
  0xd8   : > { %s8586_s24 = scalar_lea.hbm %s9416_s6, 16  ;;  %p10742_p8 = pneg %p9424_p2 }
  0xd9   : > { %p8587_p4 = scmp.ne.s32.totalorder %s9416_s6, %s8586_s24  ;;  %s8591_s17 = scalar_lea.hbm %s10843_s9, 32 }
  0xda   : > { %p8592_p12 = scmp.lt.s32.totalorder %s9416_s6, %s10843_s9  ;;  %p8593_p0 = scmp.lt.s32.totalorder %s8591_s17, %s8586_s24 }
  0xdb   : > { %p8589_p9 = pnand %p10742_p8, %p8587_p4 }
  0xdc   : > { %p8594_p1 = por %p8593_p0, %p8592_p12 }
  0xdd   : > { %p8590_p10 = pneg %p8589_p9 }
  0xdf   : > { %p8595_p13 = pnand %p8594_p1, %p8590_p10 }
  0xe1   : > { %8598 = shalt.err (!%p8595_p13)
}
  0xe2   : > { %s8599_s19 = scalar_lea.vmem %s9420_s18, 16  ;;  %s8949_s8 = smov [#allocation11]  }
  0xe3   : > { %p8600_p3 = scmp.ne.s32.totalorder %s9420_s18, %s8599_s19  ;;  %s8604_s0 = sshll.u32 %s8949_s8, 4  ;;  %s8605_s0 = int_to_ptr.vmem [resolvable:$false] %s8604_s0 }
  0xe4   : > { %s8606_s29 = scalar_lea.vmem %s8605_s0, 32  ;;  %p8607_p4 = scmp.lt.s32.totalorder %s9420_s18, %s8605_s0 }
  0xe5   : > { %p8602_p11 = pnand %p8600_p3, %p10742_p8  ;;  %p8608_p9 = scmp.lt.s32.totalorder %s8606_s29, %s8599_s19 }
  0xe7   : > { %p8603_p7 = pneg %p8602_p11  ;;  %p8609_p5 = por %p8608_p9, %p8607_p4 }
  0xe9   : > { %p8610_p12 = pnand %p8609_p5, %p8603_p7 }
  0xeb   : > { %8613 = shalt.err (!%p8610_p12)
}
  0xec   : > { %7926 = dma.hbm_to_vmem [thread:$0]  (!%p9424_p2), %s9416_s6, 16, %s9420_s18, %s9428_s2  }
  0xed   : > { %s8950_s24 = smov [#allocation16]   ;;  %s8625_s9 = scalar_lea.vmem %s1490_s7, 16 }
  0xee   : > { %s1517_s17 = sshll.u32 %s8950_s24, 4  ;;  %p8626_p11 = scmp.ne.s32.totalorder %s1490_s7, %s8625_s9  ;;  %s1518_s17 = int_to_ptr.vmem [resolvable:$true] %s1517_s17 }
  0xef   : > { %s8632_s8 = scalar_lea.vmem %s1490_s7, 32  ;;  %p8633_p0 = scmp.lt.s32.totalorder %s1490_s7, %s1490_s7 }
  0xf0   : > { %p8628_p3 = pnand %p8626_p11, %p9331_p6  ;;  %p8634_p1 = scmp.lt.s32.totalorder %s8632_s8, %s8625_s9 }
  0xf2   : > { %p8629_p10 = pneg %p8628_p3  ;;  %p8635_p5 = por %p8634_p1, %p8633_p0 }
  0xf4   : > { %p8636_p7 = pnand %p8635_p5, %p8629_p10 }
  0xf6   : > { %8639 = shalt.err (!%p8636_p7)
}
  0xf7   : > { %p10873_p13 = scmp.ne.s32.totalorder %s10855_s14, 0  ;;  %s10874_s21 = sld [smem:[#allocation75_spill]] }
  0xf8   : > { %s8651_s29 = scalar_lea.vmem %s1518_s17, 16  ;;  %s8658_s18 = scalar_lea.vmem %s1518_s17, 32 }
  0xf9   : > { %p8652_p4 = scmp.ne.s32.totalorder %s1518_s17, %s8651_s29  ;;  %p8659_p11 = scmp.lt.s32.totalorder %s1518_s17, %s1518_s17 }
  0xfa   : > { %p8660_p3 = scmp.lt.s32.totalorder %s8658_s18, %s8651_s29 }
  0xfb   : > { %p8654_p9 = pnand %p8652_p4, %p9331_p6 }
  0xfc   : > { %p8661_p8 = por %p8660_p3, %p8659_p11 }
  0xfd   : > { %7907 = dma.hbm_to_vmem [thread:$0]  (!%p10873_p13), %s10874_s21, 16, %s1490_s7, [#allocation10]  }
  0xfe   : > { %p8655_p12 = pneg %p8654_p9 }
 0x100   : > { %p8662_p2 = pnand %p8661_p8, %p8655_p12 }
 0x102   : > { %8665 = shalt.err (!%p8662_p2)
}
 0x103   : > { %s10875_s20 = sld [smem:[#allocation79_spill]]  ;;  %s8951_s9 = smov [#allocation19]  }
 0x104   : > { %s1539_s6 = sshll.u32 %s8951_s9, 4  ;;  %s8952_s7 = smov [#allocation20]   ;;  %s1540_s6 = int_to_ptr.vmem [resolvable:$true] %s1539_s6 }
 0x105   : > { %s1550_s19 = sshll.u32 %s8952_s7, 4  ;;  %s8677_s0 = scalar_lea.vmem %s1540_s6, 16  ;;  %s1551_s19 = int_to_ptr.vmem [resolvable:$true] %s1550_s19 }
 0x106   : > { %p8678_p10 = scmp.ne.s32.totalorder %s1540_s6, %s8677_s0  ;;  %s8684_s24 = scalar_lea.vmem %s1540_s6, 32 }
 0x107   : > { %p8685_p5 = scmp.lt.s32.totalorder %s1540_s6, %s1540_s6  ;;  %p8686_p7 = scmp.lt.s32.totalorder %s8684_s24, %s8677_s0 }
 0x108   : > { %p8680_p0 = pnand %p8678_p10, %p9331_p6 }
 0x109   : > { %7913 = dma.hbm_to_vmem [thread:$0]  (!%p10873_p13), %s10875_s20, 16, %s1518_s17, [#allocation15]  }
 0x10a   : > { %p8681_p1 = pneg %p8680_p0  ;;  %p8687_p8 = por %p8686_p7, %p8685_p5 }
 0x10c   : > { %p8688_p2 = pnand %p8687_p8, %p8681_p1 }
 0x10e   : > { %8691 = shalt.err (!%p8688_p2)
}
 0x10f   : > { %s10876_s27 = sld [smem:[#allocation81_spill]]  ;;  %s8703_s17 = scalar_lea.vmem %s1551_s19, 16 }
 0x110   : > { %p8704_p4 = scmp.ne.s32.totalorder %s1551_s19, %s8703_s17  ;;  %s8710_s8 = scalar_lea.vmem %s1551_s19, 32 }
 0x111   : > { %p8711_p11 = scmp.lt.s32.totalorder %s1551_s19, %s1551_s19  ;;  %p8712_p3 = scmp.lt.s32.totalorder %s8710_s8, %s8703_s17 }
 0x112   : > { %p8706_p9 = pnand %p8704_p4, %p9331_p6 }
 0x113   : > { %p8713_p10 = por %p8712_p3, %p8711_p11 }
 0x114   : > { %p8707_p12 = pneg %p8706_p9 }
 0x115   : > { %7919 = dma.hbm_to_vmem [thread:$0]  (!%p10873_p13), %s10876_s27, 16, %s1540_s6, [#allocation18]  }
 0x116   : > { %p8714_p0 = pnand %p8713_p10, %p8707_p12 }
 0x118   : > { %8717 = shalt.err (!%p8714_p0)
}
 0x119   : > { %s10877_s12 = sld [smem:[#allocation82_spill]]  ;;  %s10878_s29 = sshll.u32 %s8882_s16, 4 }
 0x11a   : > { %s1826_s5 = scalar_lea.hbm %s10842_s4, %s10878_s29  ;;  %s10879_s18 = sand.u32 1, %s8870_s11  }
 0x11b   : > { %s1821_s9 = scalar_lea.vmem [#allocation12], %s10879_s18  ;;  %s8718_s7 = scalar_lea.hbm %s1826_s5, 16 }
 0x11c   : > { %s1828_s6 = sshll.u32 %s1821_s9, 4  ;;  %p8719_p6 = scmp.ne.s32.totalorder %s1826_s5, %s8718_s7  ;;  %s1829_s6 = int_to_ptr.vmem [resolvable:$true] %s1828_s6 }
 0x11d   : > { %p10880_p1 = scmp.ne.s32.totalorder %s10872_s3, 0  ;;  %s8723_s14 = scalar_lea.hbm %s10842_s4, 32 }
 0x11e   : > { %p8724_p2 = scmp.lt.s32.totalorder %s1826_s5, %s10842_s4  ;;  %p8725_p4 = scmp.lt.s32.totalorder %s8723_s14, %s8718_s7 }
 0x11f   : > { %7922 = dma.hbm_to_vmem [thread:$0]  (!%p10873_p13), %s10877_s12, 16, %s1551_s19, [#allocation21]  }
 0x120   : > { %p10881_p5 = pneg %p10880_p1  ;;  %p8726_p9 = por %p8725_p4, %p8724_p2 }
 0x122   : > { %p8721_p7 = pnand %p8719_p6, %p10881_p5 }
 0x124   : > { %p8722_p8 = pneg %p8721_p7 }
 0x126   : > { %p8727_p12 = pnand %p8726_p9, %p8722_p8 }
 0x128   : > { %8730 = shalt.err (!%p8727_p12)
}
 0x129   : > { %s8731_s0 = scalar_lea.vmem %s1829_s6, 16  ;;  %p10882_p11 = pmov %p10881_p5 }
 0x12a   : > { %p8732_p13 = scmp.ne.s32.totalorder %s1829_s6, %s8731_s0  ;;  %s8953_s19 = smov [#allocation12]  }
 0x12b   : > { %s8736_s24 = sshll.u32 %s8953_s19, 4  ;;  %s8737_s24 = int_to_ptr.vmem [resolvable:$false] %s8736_s24 }
 0x12c   : > { %p8734_p3 = pnand %p8732_p13, %p10882_p11  ;;  %s8738_s17 = scalar_lea.vmem %s8737_s24, 32 }
 0x12d   : > { %p8739_p0 = scmp.lt.s32.totalorder %s1829_s6, %s8737_s24  ;;  %p8740_p6 = scmp.lt.s32.totalorder %s8738_s17, %s8731_s0 }
 0x12e   : > { %p8735_p10 = pneg %p8734_p3 }
 0x12f   : > { %p8741_p5 = por %p8740_p6, %p8739_p0 }
 0x131   : > { %p8742_p7 = pnand %p8741_p5, %p8735_p10 }
 0x133   : > { %8745 = shalt.err (!%p8742_p7)
}
 0x134   : > { %7929 = dma.hbm_to_vmem [thread:$0]  (!%p10880_p1), %s1826_s5, 16, %s1829_s6, %s9428_s2  }
 0x135   : > { %p10883_p8 = scmp.ne.s32.totalorder %s10854_s26, 0 }
 0x137   : > { %1837 = sbr.rel (%p10883_p8) target bundleno = 6904 (0x1af8), region = 228 }
 0x13c   : > { %p10884_p2 = scmp.eq.s32.totalorder %s9310_s23, 0 }
 0x13e   : > { %8817 = dma.done.wait (%p10884_p2), [#allocation7], 16   ;;  %p10885_p4 = pmov %p10884_p2 }
 0x13f   : > { %p10886_p9 = pmov %p10884_p2 }
 0x140   : > { %8819 = vsyncadd (%p10885_p4), [#allocation7], 4294967280 }
 0x141   : > { %8821 = dma.done.wait (%p10886_p9), [#allocation10], 16   ;;  %p10887_p12 = pmov %p10884_p2 }
 0x142   : > { %s1847_s3 = sand.u32 1, %s9310_s23   ;;  %s1849_s2 = sand.u32 1, %s8866_s10  }
 0x143   : > { %8823 = vsyncadd (%p10887_p12), [#allocation10], 4294967280  ;;  %s1848_s8 = scalar_lea.sflag [#allocation7], %s1847_s3  ;;  %s9499_s26 = scalar_lea.vmem [#allocation11], %s1849_s2 }
 0x144   : > { %10888 = sst [smem:[#allocation100_spill]] %s9499_s26  ;;  %p10889_p1 = scmp.ne.s32.totalorder %s10866_s13, 0 }
 0x146   : > { %8825 = dma.done.wait (%p10889_p1), %s1848_s8, 32  }
 0x147   : > { %8827 = vsyncadd (%p10889_p1), %s1848_s8, 4294967264  ;;  %s9505_s29 = scalar_lea.vmem [#allocation12], %s1849_s2  ;;  %p10891_p13 = pmov %p10884_p2 }
 0x148   : > { %10890 = sst [smem:[#allocation101_spill]] %s9505_s29 }
 0x149   : > { %8829 = dma.done.wait (%p10891_p13), [#allocation10], 16   ;;  %p10892_p11 = pmov %p10884_p2 }
 0x14a   : > { %p10893_p3 = pmov %p10884_p2 }
 0x14b   : > { %8831 = vsyncadd (%p10892_p11), [#allocation10], 4294967280 }
 0x14c   : > { %8833 = dma.done.wait (%p10893_p3), [#allocation15], 32   ;;  %p10894_p10 = pmov %p10884_p2 }
 0x14d   : > { %p10895_p0 = pmov %p10884_p2 }
 0x14e   : > { %8835 = vsyncadd (%p10894_p10), [#allocation15], 4294967264 }
 0x14f   : > { %8837 = dma.done.wait (%p10895_p0), [#allocation18], 32   ;;  %p10896_p6 = pmov %p10895_p0 }
 0x150   : > { %p10897_p5 = pmov %p10895_p0 }
 0x151   : > { %8839 = vsyncadd (%p10896_p6), [#allocation18], 4294967264 }
 0x152   : > { %8841 = dma.done.wait (%p10897_p5), [#allocation21], 16   ;;  %p10898_p7 = pmov %p10895_p0 }
 0x153   : > { %s10899_s13 = sld [smem:[#allocation89_spill]]  ;;  %p2146_p8 = scmp.lt.s32.totalorder %s8878_s15, 1 }
 0x154   : > { %8843 = vsyncadd (%p10898_p7), [#allocation21], 4294967280  ;;  %s10900_s5 = sld [smem:[#allocation31_spill]] }
 0x155   : > { %s10903_s6 = sld [smem:[#allocation40_spill]] }
 0x156   : > { %s10905_s14 = sld [smem:[#allocation42_spill]] }
 0x157   : > { %s10909_s3 = sld [smem:[#allocation46_spill]] }
 0x158   : > { %s2147_s23 = scalar_select %p2146_p8, %s8878_s15, 1 }
 0x159   : > { %p2151_p2 = scmp.lt.s32.totalorder %s10899_s13, 1  ;;  %s10913_s20 = sld [smem:[#allocation48_spill]] }
 0x15a   : > { %s7355_s4 = sshll.u32 %s2147_s23, 4  ;;  %s10914_s27 = sld [smem:[#allocation50_spill]] }
 0x15b   : > { %s9528_s8 = scalar_select %p2151_p2, %s10899_s13, 1 }
 0x15c   : > { %s9531_s12 = scalar_lea.vmem %s10900_s5, %s7355_s4  ;;  %s10915_s11 = sld [smem:[#allocation51_spill]] }
 0x15d   : > { %10912 = sst [smem:[#allocation102_spill]] %s9531_s12  ;;  %s7356_s10 = sshll.u32 %s9528_s8, 6 }
 0x15e   : > { %s10916_s30 = sld [smem:[#allocation52_spill]]  ;;  %s9539_s28 = scalar_lea.vmem %s10903_s6, %s7356_s10 }
 0x15f   : > { %10917 = sst [smem:[#allocation103_spill]] %s9539_s28  ;;  %s9542_s22 = sshll.u32 %s9528_s8, 1 }
 0x160   : > { %s10918_s23 = sld [smem:[#allocation54_spill]]  ;;  %s7357_s25 = sshll.u32 %s9528_s8, 5 }
 0x161   : > { %s10919_s5 = sld [smem:[#allocation53_spill]]  ;;  %s9548_s21 = scalar_lea.vmem %s10905_s14, %s7357_s25 }
 0x162   : > { %s10920_s18 = sld [smem:[#allocation55_spill]]  ;;  %s9557_s12 = scalar_lea.vmem %s10909_s3, %s7356_s10 }
 0x163   : > { %10921 = sst [smem:[#allocation104_spill]] %s9548_s21  ;;  %s7359_s4 = sshll.u32 %s9528_s8, 7 }
 0x164   : > { %s10922_s9 = sld [smem:[#allocation56_spill]]  ;;  %s9565_s0 = scalar_lea.vmem %s10913_s20, %s7359_s4 }
 0x165   : > { %s10923_s15 = sld [smem:[#allocation57_spill]]  ;;  %s9569_s6 = scalar_lea.vmem %s10914_s27, %s9542_s22 }
 0x166   : > { %s10924_s29 = sld [smem:[#allocation58_spill]]  ;;  %s9573_s17 = scalar_lea.vmem %s10915_s11, %s9542_s22 }
 0x167   : > { %s10925_s28 = sld [smem:[#allocation59_spill]]  ;;  %s9576_s3 = scalar_lea.vmem %s10916_s30, %s7357_s25 }
 0x168   : > { %10926 = sst [smem:[#allocation105_spill]] %s9557_s12  ;;  %s7361_s2 = sshll.u32 %s9528_s8, 3 }
 0x169   : > { %s10927_s7 = sld [smem:[#allocation61_spill]]  ;;  %s9581_s14 = scalar_lea.vmem %s10918_s23, %s9542_s22 }
 0x16a   : > { %s10928_s1 = sld [smem:[#allocation60_spill]]  ;;  %s9584_s4 = scalar_lea.vmem %s10919_s5, %s7361_s2 }
 0x16b   : > { %s10929_s21 = sld [smem:[#allocation62_spill]]  ;;  %s9593_s11 = scalar_lea.vmem %s10923_s15, %s7361_s2 }
 0x16c   : > { %10930 = sst [smem:[#allocation106_spill]] %s9565_s0  ;;  %s9587_s0 = scalar_lea.vmem %s10920_s18, %s7356_s10 }
 0x16d   : > { %s10931_s16 = sld [smem:[#allocation65_spill]]  ;;  %s9601_s30 = scalar_lea.vmem %s10925_s28, %s9542_s22 }
 0x16e   : > { %10932 = sst [smem:[#allocation107_spill]] %s9569_s6  ;;  %s9590_s6 = scalar_lea.vmem %s10922_s9, %s7361_s2 }
 0x16f   : > { %s10933_s24 = sld [smem:[#allocation66_spill]]  ;;  %s9606_s23 = scalar_lea.vmem %s10927_s7, %s9542_s22 }
 0x170   : > { %10934 = sst [smem:[#allocation108_spill]] %s9573_s17  ;;  %s9597_s17 = scalar_lea.vmem %s10924_s29, %s9542_s22 }
 0x171   : > { %s10935_s26 = sld [smem:[#allocation67_spill]]  ;;  %s9612_s5 = scalar_lea.vmem %s10929_s21, %s7356_s10 }
 0x172   : > { %10936 = sst [smem:[#allocation109_spill]] %s9576_s3  ;;  %s7365_s3 = sshll.u32 %s9528_s8, 4 }
 0x173   : > { %s10937_s12 = sld [smem:[#allocation68_spill]] }
 0x174   : > { %s10938_s13 = sld [smem:[#allocation69_spill]] }
 0x175   : > { %10939 = sst [smem:[#allocation110_spill]] %s9581_s14  ;;  %s9609_s14 = scalar_lea.vmem %s10928_s1, %s7365_s3 }
 0x176   : > { %s10940_s19 = sld [smem:[#allocation70_spill]]  ;;  %s9618_s18 = scalar_lea.vmem %s10933_s24, %s7365_s3 }
 0x177   : > { %10941 = sst [smem:[#allocation111_spill]] %s9584_s4  ;;  %s9615_s4 = scalar_lea.vmem %s10931_s16, %s7357_s25 }
 0x178   : > { %s10942_s20 = sld [smem:[#allocation71_spill]] }
 0x179   : > { %10943 = sst [smem:[#allocation112_spill]] %s9587_s0  ;;  %s2268_s0 = scalar_lea.vmem %s10935_s26, %s9528_s8 }
 0x17a   : > { %s10944_s27 = sld [smem:[#allocation85_spill]]  ;;  %s9623_s9 = scalar_lea.vmem %s10937_s12, %s7365_s3 }
 0x17b   : > { %10945 = sst [smem:[#allocation113_spill]] %s9601_s30  ;;  %s2276_s15 = scalar_lea.vmem %s10938_s13, %s9528_s8 }
 0x17c   : > { %10946 = sst [smem:[#allocation114_spill]] %s9606_s23  ;;  %s9628_s2 = scalar_lea.vmem %s10940_s19, %s7365_s3 }
 0x17d   : > { %s10948_s7 = sld [smem:[#allocation89_spill]] }
 0x17e   : > { %s9631_s29 = scalar_lea.vmem %s10942_s20, %s7365_s3 }
 0x180   : > { %s10947_s28 = sand.u32 1, %s10944_s27  }
 0x181   : > { %s9635_s30 = scalar_lea.vmem [#allocation22], %s10947_s28 }
 0x183   : > { %p7141_p4 = scmp.ne.s32.totalorder %s10948_s7, 0 }
 0x184   : > { %s10949_s21 = sld [smem:[#allocation32_spill]] (!%p7141_p4) }
 0x185   : > { %2291 = sbr.rel (%p7141_p4) target bundleno = 646 (0x286), region = 272  ;;  %s10950_s1 = sld [smem:[#allocation35_spill]] (!%p7141_p4) }
 0x186   : > { %s10952_s25 = sld [smem:[#allocation102_spill]] (!%p7141_p4) }
 0x187   : > { %s10953_s12 = sld [smem:[#allocation34_spill]] (!%p7141_p4) }
 0x188   : > { %s10954_s10 = sld [smem:[#allocation37_spill]] (!%p7141_p4) }
 0x18a   : > { %v8129_v0 = vld [vmem:[%s10949_s21 + $0x38] sm:$0xff]   ;;  %v8954_v1 = vmov 0   ;;  %v8131_v3 = vld [vmem:[%s10949_s21 + $0x30] sm:$0xff]   ;;  %v8133_v5 = vld [vmem:[%s10949_s21 + $0x28] sm:$0xff]   ;;  %vm2406_vm0 = vcmask 523264   ;;  %vm2605_vm1 = vcmask 261120  }
 0x18b   : > { %s10951_s23 = smov %s10950_s1  ;;  %2410 = vmatprep.subr.bf16.mxu0 %v8954_v1  ;;  %2560 = vmatprep.subr.bf16.mxu1 %v8954_v1  ;;  %v8130_v2 = vld [vmem:[%s10950_s1 + $0x38] sm:$0xff]   ;;  %v8135_v7 = vld [vmem:[%s10949_s21 + $0x20] sm:$0xff]   ;;  %v8139_v11 = vld [vmem:[%s10949_s21 + $0x10] sm:$0xff]   ;;  %v8955_v27 = vmov 0.0  }
 0x18c   : > { %2411 = vmatpush1.bf16.msra.mxu0 %v8129_v0  ;;  %2561 = vmatpush1.bf16.msra.mxu1 %v8130_v2  ;;  %v8132_v4 = vld [vmem:[%s10951_s23 + $0x30] sm:$0xff]   ;;  %v8134_v6 = vld [vmem:[%s10951_s23 + $0x28] sm:$0xff]   ;;  %v8136_v8 = vld [vmem:[%s10951_s23 + $0x20] sm:$0xff]   ;;  %2608 = vst.msk [vmem:[#allocation4] sm:$0xff] %vm2605_vm1, %v8955_v27 }
 0x18d   : > { %2412 = vmatprep.subr.bf16.mxu0 %v8954_v1  ;;  %2562 = vmatprep.subr.bf16.mxu1 %v8954_v1  ;;  %v8137_v9 = vld [vmem:[%s10949_s21 + $0x18] sm:$0xff]   ;;  %v8140_v12 = vld [vmem:[%s10951_s23 + $0x10] sm:$0xff]   ;;  %v8141_v13 = vld [vmem:[%s10949_s21 + $0x8] sm:$0xff]   ;;  %2609 = vst.msk [vmem:[#allocation4 + $0x8] sm:$0xff] %vm2605_vm1, %v8955_v27 }
 0x18e   : > { %v8138_v10 = vld [vmem:[%s10951_s23 + $0x18] sm:$0xff]   ;;  %v8142_v14 = vld [vmem:[%s10951_s23 + $0x8] sm:$0xff]   ;;  %v8143_v16 = vld [vmem:[%s10949_s21] sm:$0xff]   ;;  %s10955_s26 = smov %s10954_s10 }
 0x18f   : > { %v8155_v15 = vld [vmem:[%s10952_s25 + $0x4] ss:$8 sps:$4 sm:$0xff]   ;;  %v8145_v18 = vld [vmem:[%s10949_s21 + $0x58] sm:$0xff]   ;;  %v8147_v20 = vld [vmem:[%s10949_s21 + $0x50] sm:$0xff]  }
 0x190   : > { %2413 = vmatpush1.bf16.msra.mxu0 %v8131_v3  ;;  %2563 = vmatpush1.bf16.msra.mxu1 %v8132_v4  ;;  %v8144_v17 = vld [vmem:[%s10951_s23] sm:$0xff]   ;;  %v8146_v19 = vld [vmem:[%s10951_s23 + $0x58] sm:$0xff]   ;;  %v8148_v21 = vld [vmem:[%s10951_s23 + $0x50] sm:$0xff]  }
 0x191   : > { %2414 = vmatprep.subr.bf16.mxu0 %v8954_v1  ;;  %2564 = vmatprep.subr.bf16.mxu1 %v8954_v1  ;;  %v8149_v22 = vld [vmem:[%s10949_s21 + $0x48] sm:$0xff]   ;;  %v8151_v24 = vld [vmem:[%s10949_s21 + $0x40] sm:$0xff]  }
 0x192   : > { %7157 = vmatprep.mubr.msk.bf16.mxu0 %vm2406_vm0, %v8155_v15  ;;  %7171 = vmatprep.mubr.msk.bf16.mxu1 %vm2406_vm0, %v8155_v15  ;;  %v8150_v23 = vld [vmem:[%s10951_s23 + $0x48] sm:$0xff]   ;;  %v8152_v25 = vld [vmem:[%s10951_s23 + $0x40] sm:$0xff]  }
 0x193   : > { %v8153_v26 = vld [vmem:[%s10952_s25] ss:$8 sps:$4 sm:$0xff]  }
 0x194   : > { %2415 = vmatpush1.bf16.msra.mxu0 %v8133_v5  ;;  %2565 = vmatpush1.bf16.msra.mxu1 %v8134_v6  ;;  %v7142_v28 = vld [vmem:[#allocation6] ss:$0 sm:$0xff]  ;;  %v7158_v29 = vld [vmem:[#allocation9] ss:$0 sm:$0xff]  ;;  %v2452_v41 = vld [vmem:[%s10953_s12 + $0x8] sm:$0xff] }
 0x195   : > { %2416 = vmatprep.subr.bf16.mxu0 %v8954_v1  ;;  %2566 = vmatprep.subr.bf16.mxu1 %v8954_v1  ;;  %v2451_v31 = vld [vmem:[%s10953_s12] sm:$0xff]  ;;  %v2602_v44 = vld [vmem:[%s10955_s26 + $0x8] sm:$0xff] }
 0x196   : > { %v2601_v34 = vld [vmem:[%s10954_s10] sm:$0xff] }
 0x198   : > { %2417 = vmatpush1.bf16.msra.mxu0 %v8135_v7  ;;  %2567 = vmatpush1.bf16.msra.mxu1 %v8136_v8 }
 0x199   : > { %2418 = vmatprep.subr.bf16.mxu0 %v8954_v1  ;;  %2568 = vmatprep.subr.bf16.mxu1 %v8954_v1 }
 0x19c   : > { %2419 = vmatpush1.bf16.msra.mxu0 %v8137_v9  ;;  %2569 = vmatpush1.bf16.msra.mxu1 %v8138_v10 }
 0x19d   : > { %2420 = vmatprep.subr.bf16.mxu0 %v8954_v1  ;;  %2570 = vmatprep.subr.bf16.mxu1 %v8954_v1 }
 0x1a0   : > { %2421 = vmatpush1.bf16.msra.mxu0 %v8139_v11  ;;  %2571 = vmatpush1.bf16.msra.mxu1 %v8140_v12 }
 0x1a1   : > { %2422 = vmatprep.subr.bf16.mxu0 %v8954_v1  ;;  %2572 = vmatprep.subr.bf16.mxu1 %v8954_v1 }
 0x1a4   : > { %2423 = vmatpush1.bf16.msra.mxu0 %v8141_v13  ;;  %2573 = vmatpush1.bf16.msra.mxu1 %v8142_v14 }
 0x1a5   : > { %2424 = vmatprep.subr.bf16.mxu0 %v8954_v1  ;;  %2574 = vmatprep.subr.bf16.mxu1 %v8954_v1 }
 0x1a8   : > { %2425 = vmatpush1.bf16.msra.mxu0 %v8143_v16  ;;  %2575 = vmatpush1.bf16.msra.mxu1 %v8144_v17 }
 0x1a9   : > { %2434 = vmatprep.subr.bf16.mxu0 %v8954_v1  ;;  %2584 = vmatprep.subr.bf16.mxu1 %v8954_v1 }
 0x1ac   : > { %2435 = vmatpush2.bf16.msra.mxu0 %v8145_v18  ;;  %2585 = vmatpush2.bf16.msra.mxu1 %v8146_v19 }
 0x1ad   : > { %2436 = vmatprep.subr.bf16.mxu0 %v8954_v1  ;;  %2586 = vmatprep.subr.bf16.mxu1 %v8954_v1 }
 0x1b0   : > { %2437 = vmatpush2.bf16.msra.mxu0 %v8147_v20  ;;  %2587 = vmatpush2.bf16.msra.mxu1 %v8148_v21 }
 0x1b1   : > { %2438 = vmatprep.subr.bf16.mxu0 %v8954_v1  ;;  %2588 = vmatprep.subr.bf16.mxu1 %v8954_v1 }
 0x1b4   : > { %2439 = vmatpush2.bf16.msra.mxu0 %v8149_v22  ;;  %2589 = vmatpush2.bf16.msra.mxu1 %v8150_v23 }
 0x1b5   : > { %2440 = vmatprep.subr.bf16.mxu0 %v8954_v1  ;;  %2590 = vmatprep.subr.bf16.mxu1 %v8954_v1 }
 0x1b8   : > { %2441 = vmatpush2.bf16.msra.mxu0 %v8151_v24  ;;  %2591 = vmatpush2.bf16.msra.mxu1 %v8152_v25 }
 0x1bb   : > { %2443 = vmatmul.mubr.bf16.vlgmr.msra.gmra.mxu0 %v8153_v26  ;;  %2593 = vmatmul.mubr.bf16.vlgmr.msra.gmra.mxu1 %v8153_v26 }
 0x27b   : > { %v2444_v30 = vpop.f32.mrf.mxu0  ;;  %v2594_v33 = vpop.f32.mrf.mxu1 }
 0x27c   : > { %v2445_v32 = vadd.f32 %v7142_v28, %v2444_v30  ;;  %v2595_v35 = vadd.f32 %v7158_v29, %v2594_v33 }
 0x27d   : > { %v2446_v36 = vpop.f32.mrf.mxu0  ;;  %v2596_v38 = vpop.f32.mrf.mxu1 }
 0x27e   : > { %v2453_v37 = vadd.f32 %v2451_v31, %v2445_v32  ;;  %v2603_v39 = vadd.f32 %v2601_v34, %v2595_v35 }
 0x27f   : > { %v2447_v40 = vpop.f32.mrf.mxu0  ;;  %v2597_v43 = vpop.f32.mrf.mxu1 }
 0x280   : > { %2455 = vst.msk [vmem:[#allocation2] sm:$0xff] %vm2406_vm0, %v2453_v37  ;;  %v2448_v42 = vadd.f32 %v7142_v28, %v2447_v40  ;;  %v2598_v45 = vadd.f32 %v7158_v29, %v2597_v43 }
 0x281   : > { %2606 = vst.msk [vmem:[#allocation3] sm:$0xff] %vm2605_vm1, %v2603_v39  ;;  %v2449_v46 = vpop.f32.mrf.mxu0  ;;  %v2599_v48 = vpop.f32.mrf.mxu1 }
 0x282   : > { %v2454_v47 = vadd.f32 %v2452_v41, %v2448_v42  ;;  %v2604_v49 = vadd.f32 %v2602_v44, %v2598_v45 }
 0x284   : > { %2456 = vst.msk [vmem:[#allocation2 + $0x8] sm:$0xff] %vm2406_vm0, %v2454_v47 }
 0x285   : > { %2607 = vst.msk [vmem:[#allocation3 + $0x8] sm:$0xff] %vm2605_vm1, %v2604_v49 }
 0x286 PF: > { %vm2614_vm2 = vcmask 523264   ;;  %s10956_s16 = sld [smem:[#allocation103_spill]]  ;;  %v10771_v4 = vmov 0   ;;  %v2669_v26 = vlaneseq  ;;  %v8957_v28 = vmov 0.0   ;;  %s8959_s28 = smov 48  }
 0x287   : > { %v9700_v50 = vld [vmem:[#allocation2] sm:$0xff]  ;;  %2754 = vmatprep.mubr.bf16.mxu0 %v10771_v4  ;;  %8156 = vset.pattern.permute.xlu0 %v10771_v4  ;;  %s10957_s13 = sld [smem:[#allocation38_spill]]  ;;  %vm8958_vm3 = vmmov 0   ;;  %s8960_s7 = smov 64   ;;  %vm2770_vm4 = vcmask 130048   ;;  %vm3021_vm5 = vcmask 261248  }
 0x288   : > { %v2615_v52 = vsel %vm2614_vm2, %v9700_v50, 0.0  ;;  %s10958_s24 = sld [smem:[#allocation39_spill]]  ;;  %v9729_v27 = vshrl.u32 %v2669_v26, 7  ;;  %7534 = vmatprep.subr.bf16.mxu1 %v8957_v28  ;;  %7536 = vmatprep.mubr.msk.bf16.mxu1 %vm8958_vm3, %v8957_v28  ;;  %s8961_s1 = smov 112   ;;  %vm3155_vm6 = vcmask 392448   ;;  %vm3289_vm7 = vcmask 523648  }
 0x289   : > { %2616 = vadd.xlane.f32.xlu0 %v2615_v52  ;;  %s10960_s19 = sld [smem:[#allocation41_spill]]  ;;  %s8962_s25 = smov 96   ;;  %vm3769_vm8 = vcmask 261120   ;;  %vm4235_vm9 = vcmask 1040384   ;;  %vm4231_vm10 = vcmask 15360  }
 0x28a   : > { %v9734_v29 = vsub.s32 0, %v9729_v27  ;;  %s8963_s10 = smov 32   ;;  %v9752_v38 = vsub.s32 1, %v9729_v27 }
 0x28b   : > { %v9702_v51 = vld [vmem:[#allocation2 + $0x8] sm:$0xff] }
 0x28c   : > { %v2618_v53 = vsel %vm2614_vm2, %v9702_v51, 0.0  ;;  %v8221_v0 = vld [vmem:[%s10956_s16 + $0x34] ss:$8 sps:$4 sm:$0xff]   ;;  %v8223_v1 = vld [vmem:[%s10956_s16 + $0x30] ss:$8 sps:$4 sm:$0xff]  }
 0x28d   : > { %2619 = vadd.xlane.f32.xlu0 %v2618_v53  ;;  %v8224_v2 = vld [vmem:[%s10956_s16 + $0x24] ss:$8 sps:$4 sm:$0xff]   ;;  %2730 = vmatprep.subr.bf16.mxu0 %v8221_v0  ;;  %v8226_v3 = vld [vmem:[%s10956_s16 + $0x20] ss:$8 sps:$4 sm:$0xff]   ;;  %v8227_v5 = vld [vmem:[%s10956_s16 + $0x14] ss:$8 sps:$4 sm:$0xff]   ;;  %s10959_s3 = scalar_lea.vmem %s10957_s13, %s9528_s8 }
 0x28e   : > { %2731 = vmatpush1.bf16.msra.mxu0 %v8223_v1  ;;  %v8229_v6 = vld [vmem:[%s10956_s16 + $0x10] ss:$8 sps:$4 sm:$0xff]   ;;  %v8230_v7 = vld [vmem:[%s10956_s16 + $0x4] ss:$8 sps:$4 sm:$0xff]   ;;  %v8232_v8 = vld [vmem:[%s10956_s16] ss:$8 sps:$4 sm:$0xff]   ;;  %s10961_s20 = scalar_lea.vmem %s10958_s24, %s9528_s8 }
 0x28f   : > { %2732 = vmatprep.subr.bf16.mxu0 %v8224_v2  ;;  %v7172_v17 = vld [vmem:[%s10959_s3] ss:$0 sm:$0xff]  ;;  %s10962_s27 = scalar_lea.vmem %s10960_s19, %s9542_s22  ;;  %s8964_s16 = smov 80  }
 0x290   : > { %v7173_v21 = vld [vmem:[%s10961_s20] ss:$0 sm:$0xff]  ;;  %s8965_s13 = smov 16   ;;  %s10963_s24 = sld [smem:[#allocation104_spill]] }
 0x291   : > { %v2667_v30 = vld [vmem:[%s10962_s27] sm:$0x3]  ;;  %s10964_s3 = sld [smem:[#allocation43_spill]] }
 0x292   : > { %2733 = vmatpush1.bf16.msra.mxu0 %v8226_v3  ;;  %v2672_v32 = vrot.slane %v2667_v30, %v9734_v29  ;;  %v2676_v44 = vrot.slane %v2667_v30, %v9752_v38  ;;  %s10966_s20 = sld [smem:[#allocation105_spill]] }
 0x293   : > { %2734 = vmatprep.subr.bf16.mxu0 %v8227_v5  ;;  %s10967_s27 = sld [smem:[#allocation44_spill]] }
 0x296   : > { %2735 = vmatpush1.bf16.msra.mxu0 %v8229_v6 }
 0x297   : > { %2736 = vmatprep.subr.bf16.mxu0 %v8230_v7  ;;  %s10965_s19 = scalar_lea.vmem %s10964_s3, %s9528_s8  ;;  %s10975_s3 = sld [smem:[#allocation63_spill]] }
 0x29a   : > { %2737 = vmatpush1.bf16.msra.mxu0 %v8232_v8 }
 0x29b   : > { %7546 = vmatprep.subr.bf16.mxu0 %v8957_v28 }
 0x312   : > { %v2617_v54 = vpop.xlane.xlu0 %2616 }
 0x313   : > { %v2622_v55 = vmul.f32 0.015625, %v2617_v54 }
 0x315   : > { %v2624_v56 = vsub.f32 %v9700_v50, %v2622_v55 }
 0x316   : > { %v2620_v57 = vpop.xlane.xlu0 %2619 }
 0x317   : > { %v2623_v58 = vmul.f32 0.015625, %v2620_v57  ;;  %v2626_v59 = vmul.f32 %v2624_v56, %v2624_v56 }
 0x319   : > { %v2625_v60 = vsub.f32 %v9702_v51, %v2623_v58  ;;  %v2628_v61 = vsel %vm2614_vm2, %v2626_v59, 0.0 }
 0x31a   : > { %2629 = vadd.xlane.f32.xlu1 %v2628_v61 }
 0x31b   : > { %v2627_v62 = vmul.f32 %v2625_v60, %v2625_v60 }
 0x31d   : > { %v2631_v63 = vsel %vm2614_vm2, %v2627_v62, 0.0 }
 0x31e   : > { %2632 = vadd.xlane.f32.xlu1 %v2631_v63 }
 0x3a3   : > { %v2630_v9 = vpop.xlane.xlu1 %2629 }
 0x3a4   : > { %v2634_v10 = vmul.f32 0.015625, %v2630_v9 }
 0x3a6   : > { %v2636_v11 = vadd.f32 1e-06, %v2634_v10 }
 0x3a7   : > { %v2633_v12 = vpop.xlane.xlu1 %2632 }
 0x3a8   : > { %8297 = vrsqrt.f32 %v2636_v11  ;;  %v2635_v13 = vmul.f32 0.015625, %v2633_v12 }
 0x3aa   : > { %v2637_v14 = vadd.f32 1e-06, %v2635_v13 }
 0x3ac   : > { %8299 = vrsqrt.f32 %v2637_v14 }
 0x3b5   : > { %v8298_v15 = vpop.eup %8297 }
 0x3b6   : > { %v2640_v16 = vmul.f32 %v8298_v15, %v2624_v56 }
 0x3b8   : > { %v2648_v20 = vmul.f32 %v7172_v17, %v2640_v16 }
 0x3b9   : > { %v8300_v18 = vpop.eup %8299 }
 0x3ba   : > { %v2641_v19 = vmul.f32 %v8300_v18, %v2625_v60  ;;  %v2656_v23 = vadd.f32 %v7173_v21, %v2648_v20 }
 0x3bc   : > { %v2649_v22 = vmul.f32 %v7172_v17, %v2641_v19 }
 0x3be   : > { %v2657_v24 = vadd.f32 %v7173_v21, %v2649_v22 }
 0x3c0   : > { %v2658_v25 = vpack.c.bf16 %v2657_v24, %v2656_v23 }
 0x3c2   : > { %7182 = vmatmul.mubr.msk.bf16.vlgmr.msra.gmra.mxu0 %vm2614_vm2, %v2658_v25 }
 0x3c3   : > { %7548 = vmatprep.mubr.msk.bf16.mxu0 %vm8958_vm3, %v8957_v28 }
 0x482   : > { %v2756_v31 = vpop.f32.mrf.mxu0 }
 0x483   : > { %v2757_v35 = vadd.f32 %v2756_v31, %v2672_v32 }
 0x484   : > { %v2758_v33 = vpop.f32.mrf.mxu0 }
 0x485   : > { %v2759_v47 = vadd.f32 %v2758_v33, %v2676_v44 }
 0x486   : > { %v2760_v34 = vpop.f32.mrf.mxu0 }
 0x487   : > { %v2761_v36 = vadd.f32 %v2760_v34, %v2672_v32 }
 0x488   : > { %v2762_v41 = vpop.f32.mrf.mxu0 }
 0x489   : > { %v2765_v37 = vpack.c.bf16 %v2761_v36, %v2757_v35  ;;  %v2763_v45 = vadd.f32 %v2762_v41, %v2676_v44 }
 0x48b   : > { %2891 = vrot.lane.b32.xlu1 %v2765_v37, %s8959_s28  ;;  %2768 = vrot.lane.b32.xlu0 %v2765_v37, %s8960_s7  ;;  %v9759_v48 = vpack.c.bf16 %v2763_v45, %v2759_v47 }
 0x48f   : > { %2889 = vrot.lane.b32.xlu1 %v2765_v37, %s8961_s1  ;;  %3024 = vrot.lane.b32.xlu0 %v2765_v37, %s8962_s25 }
 0x493   : > { %3026 = vrot.lane.b32.xlu1 %v2765_v37, %s8963_s10  ;;  %3158 = vrot.lane.b32.xlu0 %v2765_v37, %s8964_s16 }
 0x497   : > { %3160 = vrot.lane.b32.xlu1 %v2765_v37, %s8965_s13 }
 0x4fd   : > { %v2892_v39 = vpop.permute.xlu1 %2891  ;;  %v2769_v40 = vpop.permute.xlu0 %2768 }
 0x4fe   : > { %v2897_v42 = vsel %vm2770_vm4, %v2892_v39, 0  ;;  %v2775_v43 = vsel %vm2770_vm4, %v2769_v40, 0 }
 0x4ff   : > { %7535 = vmatpush3.bf16.xpose.msra.mxu1 %v2775_v43  ;;  %7547 = vmatpush3.bf16.xpose.msra.mxu0 %v2897_v42 }
 0x500   : > { %7540 = vmatprep.subr.bf16.mxu1 %v8957_v28  ;;  %7558 = vmatprep.subr.bf16.mxu0 %v8957_v28 }
 0x501   : > { %v2890_v46 = vpop.permute.xlu1 %2889  ;;  %v3025_v54 = vpop.permute.xlu0 %3024 }
 0x505   : > { %v3027_v49 = vpop.permute.xlu1 %3026  ;;  %v3159_v56 = vpop.permute.xlu0 %3158 }
 0x506   : > { %v3032_v52 = vsel %vm2770_vm4, %v3027_v49, 0  ;;  %7537 = vmatmul.mubr.msk.bf16.vlgmr.msra.gmra.mxu1 %vm2770_vm4, %v2765_v37  ;;  %7549 = vmatmul.mubr.msk.bf16.vlgmr.msra.gmra.mxu0 %vm2770_vm4, %v2890_v46 }
 0x507   : > { %7541 = vmatpush3.bf16.msra.mxu1 %v9759_v48  ;;  %7559 = vmatpush3.bf16.xpose.msra.mxu0 %v3032_v52 }
 0x508   : > { %7560 = vmatprep.mubr.msk.bf16.mxu0 %vm8958_vm3, %v8957_v28  ;;  %7570 = vmatprep.subr.bf16.mxu0 %v8957_v28 }
 0x509   : > { %7542 = vmatprep.mubr.msk.bf16.mxu1 %vm8958_vm3, %v8957_v28  ;;  %7552 = vmatprep.subr.bf16.mxu1 %v8957_v28  ;;  %v3161_v53 = vpop.permute.xlu1 %3160 }
 0x50a   : > { %v3166_v55 = vsel %vm2770_vm4, %v3161_v53, 0 }
 0x50e   : > { %7561 = vmatmul.mubr.msk.bf16.vlgmr.msra.gmra.mxu0 %vm2770_vm4, %v3025_v54 }
 0x50f   : > { %7571 = vmatpush3.bf16.xpose.msra.mxu0 %v3166_v55  ;;  %7572 = vmatprep.mubr.msk.bf16.mxu0 %vm8958_vm3, %v8957_v28 }
 0x510   : > { %7582 = vmatprep.subr.bf16.mxu0 %v8957_v28 }
 0x516   : > { %7573 = vmatmul.mubr.msk.bf16.vlgmr.msra.gmra.mxu0 %vm2770_vm4, %v3159_v56 }
 0x517   : > { %7590 = vmatprep.mubr.msk.bf16.mxu0 %vm8958_vm3, %v8957_v28 }
 0x5c6   : > { %v2811_v57 = vpop.f32.mrf.mxu1  ;;  %v2933_v58 = vpop.f32.mrf.mxu0 }
 0x5c7   : > { %v2818_v59 = vmul.f32 0.25, %v2811_v57  ;;  %v9780_v5 = vmul.f32 0.25, %v2933_v58 }
 0x5c8   : > { %v7538_v60 = vpop.f32.mrf.mxu1  ;;  %v7550_v61 = vpop.f32.mrf.mxu0 }
 0x5c9   : > { %v2820_v62 = vsel %vm2770_vm4, %v2818_v59, -inf  ;;  %v2942_v11 = vsel %vm2770_vm4, %v9780_v5, -inf }
 0x5ca   : > { %v2936_v63 = vpop.f32.mrf.mxu0  ;;  %2821 = vmax.xlane.f32.xlu1 %v2820_v62  ;;  %v2814_v0 = vpop.f32.mrf.mxu1 }
 0x5cb   : > { %v2819_v1 = vmul.f32 0.25, %v2814_v0  ;;  %v2941_v10 = vmul.f32 0.25, %v2936_v63 }
 0x5cc   : > { %v7539_v2 = vpop.f32.mrf.mxu1  ;;  %v7551_v3 = vpop.f32.mrf.mxu0 }
 0x5cd   : > { %v2823_v6 = vsel %vm2770_vm4, %v2819_v1, -inf  ;;  %v2945_v16 = vsel %vm2770_vm4, %v2941_v10, -inf }
 0x5ce   : > { %2824 = vmax.xlane.f32.xlu0 %v2823_v6  ;;  %v3068_v7 = vpop.f32.mrf.mxu0 }
 0x5cf   : > { %v9783_v8 = vmul.f32 0.25, %v3068_v7 }
 0x5d0   : > { %v7562_v9 = vpop.f32.mrf.mxu0 }
 0x5d1   : > { %v3077_v12 = vsel %vm2770_vm4, %v9783_v8, -inf }
 0x5d2   : > { %2943 = vmax.xlane.f32.xlu0 %v2942_v11  ;;  %3078 = vmax.xlane.f32.xlu1 %v3077_v12  ;;  %v3071_v13 = vpop.f32.mrf.mxu0 }
 0x5d3   : > { %v3076_v15 = vmul.f32 0.25, %v3071_v13 }
 0x5d4   : > { %v7563_v14 = vpop.f32.mrf.mxu0 }
 0x5d5   : > { %v3080_v20 = vsel %vm2770_vm4, %v3076_v15, -inf }
 0x5d6   : > { %2946 = vmax.xlane.f32.xlu0 %v2945_v16  ;;  %v3202_v17 = vpop.f32.mrf.mxu0 }
 0x5d7   : > { %v3209_v18 = vmul.f32 0.25, %v3202_v17 }
 0x5d8   : > { %v7574_v19 = vpop.f32.mrf.mxu0 }
 0x5d9   : > { %v3211_v21 = vsel %vm2770_vm4, %v3209_v18, -inf }
 0x5da   : > { %3081 = vmax.xlane.f32.xlu0 %v3080_v20  ;;  %3212 = vmax.xlane.f32.xlu1 %v3211_v21  ;;  %v3205_v22 = vpop.f32.mrf.mxu0 }
 0x5db   : > { %v3210_v23 = vmul.f32 0.25, %v3205_v22 }
 0x5dc   : > { %v7575_v24 = vpop.f32.mrf.mxu0 }
 0x5dd   : > { %v3214_v25 = vsel %vm2770_vm4, %v3210_v23, -inf }
 0x5de   : > { %3215 = vmax.xlane.f32.xlu0 %v3214_v25 }
 0x653   : > { %v2822_v26 = vpop.xlane.xlu1 %2821 }
 0x654   : > { %v2826_v30 = vsub.f32 %v2818_v59, %v2822_v26 }
 0x656   : > { %v2828_v31 = vmul.f32 1.442695, %v2826_v30 }
 0x657   : > { %v2825_v32 = vpop.xlane.xlu0 %2824 }
 0x658   : > { %8301 = vpow2.f32 %v2828_v31  ;;  %v2827_v33 = vsub.f32 %v2819_v1, %v2825_v32 }
 0x65a   : > { %v2830_v34 = vmul.f32 1.442695, %v2827_v33 }
 0x65b   : > { %v2944_v35 = vpop.xlane.xlu0 %2943  ;;  %v3079_v60 = vpop.xlane.xlu1 %3078 }
 0x65c   : > { %8303 = vpow2.f32 %v2830_v34  ;;  %v2948_v59 = vsub.f32 %v9780_v5, %v2944_v35  ;;  %v3083_v61 = vsub.f32 %v9783_v8, %v3079_v60  ;;  %v8236_v60 = vld [vmem:[%s10963_s24] sm:$0xff]  }
 0x65e   : > { %v2950_v62 = vmul.f32 1.442695, %v2948_v59  ;;  %v3085_v0 = vmul.f32 1.442695, %v3083_v61 }
 0x65f   : > { %v2947_v36 = vpop.xlane.xlu0 %2946 }
 0x660   : > { %v2949_v37 = vsub.f32 %v2941_v10, %v2947_v36 }
 0x662   : > { %v2952_v39 = vmul.f32 1.442695, %v2949_v37 }
 0x663   : > { %v3082_v40 = vpop.xlane.xlu0 %3081  ;;  %v3213_v63 = vpop.xlane.xlu1 %3212 }
 0x664   : > { %8305 = vpow2.f32 %v2952_v39  ;;  %v3084_v41 = vsub.f32 %v3076_v15, %v3082_v40  ;;  %v3217_v1 = vsub.f32 %v3209_v18, %v3213_v63 }
 0x665   : > { %v8302_v42 = vpop.eup %8301 }
 0x666   : > { %v3087_v43 = vmul.f32 1.442695, %v3084_v41  ;;  %v2832_v44 = vsel %vm2770_vm4, %v8302_v42, 0.0  ;;  %v3219_v2 = vmul.f32 1.442695, %v3217_v1 }
 0x667   : > { %2833 = vadd.xlane.f32.xlu1 %v2832_v44  ;;  %v3216_v45 = vpop.xlane.xlu0 %3215 }
 0x668   : > { %v3218_v46 = vsub.f32 %v3210_v23, %v3216_v45  ;;  %8307 = vpow2.f32 %v3087_v43 }
 0x669   : > { %v8304_v47 = vpop.eup %8303 }
 0x66a   : > { %v3221_v49 = vmul.f32 1.442695, %v3218_v46  ;;  %v2835_v52 = vsel %vm2770_vm4, %v8304_v47, 0.0 }
 0x66b   : > { %2836 = vadd.xlane.f32.xlu0 %v2835_v52  ;;  %v8233_v52 = vld [vmem:[%s10963_s24 + $0x18] sm:$0xff]  }
 0x66c   : > { %8309 = vpow2.f32 %v3221_v49  ;;  %7583 = vmatpush3.bf16.msra.mxu0 %v8233_v52 }
 0x66d   : > { %8311 = vpow2.f32 %v2950_v62  ;;  %7584 = vmatprep.subr.bf16.mxu0 %v8957_v28 }
 0x66e   : > { %8313 = vpow2.f32 %v3085_v0 }
 0x66f   : > { %8315 = vpow2.f32 %v3219_v2 }
 0x671   : > { %v8306_v53 = vpop.eup %8305 }
 0x672   : > { %v2957_v54 = vsel %vm2770_vm4, %v8306_v53, 0.0 }
 0x673   : > { %2958 = vadd.xlane.f32.xlu0 %v2957_v54 }
 0x675   : > { %v9796_v55 = vpop.eup %8307 }
 0x676   : > { %v3092_v56 = vsel %vm2770_vm4, %v9796_v55, 0.0 }
 0x677   : > { %3093 = vadd.xlane.f32.xlu0 %v3092_v56 }
 0x678   : > { %2966 = vrot.lane.b32.xlu1 %v9759_v48, %s8961_s1  ;;  %s10969_s1 = sld [smem:[#allocation109_spill]] }
 0x679   : > { %v9802_v57 = vpop.eup %8309 }
 0x67a   : > { %v3226_v58 = vsel %vm2770_vm4, %v9802_v57, 0.0  ;;  %v8312_v3 = vpop.eup %8311 }
 0x67b   : > { %3227 = vadd.xlane.f32.xlu0 %v3226_v58  ;;  %v2954_v6 = vsel %vm2770_vm4, %v8312_v3, 0.0  ;;  %v8314_v7 = vpop.eup %8313  ;;  %v8235_v58 = vld [vmem:[%s10963_s24 + $0x8] sm:$0xff]  }
 0x67c   : > { %v3089_v5 = vsel %vm2770_vm4, %v8314_v7, 0.0  ;;  %v8316_v9 = vpop.eup %8315 }
 0x67d   : > { %v3223_v8 = vsel %vm2770_vm4, %v8316_v9, 0.0 }
 0x691   : > { %3100 = vrot.lane.b32.xlu0 %v9759_v48, %s8962_s25  ;;  %s10970_s25 = sld [smem:[#allocation107_spill]] }
 0x69c   : > { %2955 = vadd.xlane.f32.xlu1 %v2954_v6 }
 0x6a0   : > { %3090 = vadd.xlane.f32.xlu1 %v3089_v5 }
 0x6a4   : > { %3224 = vadd.xlane.f32.xlu1 %v3223_v8 }
 0x6b5   : > { %3234 = vrot.lane.b32.xlu1 %v9759_v48, %s8964_s16 }
 0x6f0   : > { %v2834_v10 = vpop.xlane.xlu1 %2833 }
 0x6f1   : > { %8317 = vrcp.f32 %v2834_v10 }
 0x6f4   : > { %v2837_v11 = vpop.xlane.xlu0 %2836  ;;  %v2967_v17 = vpop.permute.xlu1 %2966 }
 0x6f5   : > { %8319 = vrcp.f32 %v2837_v11 }
 0x6fc   : > { %v2959_v18 = vpop.xlane.xlu0 %2958 }
 0x6fd   : > { %8321 = vrcp.f32 %v2959_v18 }
 0x6fe   : > { %v8318_v12 = vpop.eup %8317 }
 0x6ff   : > { %v2840_v14 = vmul.f32 %v8318_v12, %v8302_v42 }
 0x700   : > { %v3094_v19 = vpop.xlane.xlu0 %3093 }
 0x702   : > { %v8320_v13 = vpop.eup %8319 }
 0x703   : > { %v2841_v15 = vmul.f32 %v8320_v13, %v8304_v47 }
 0x704   : > { %v3228_v23 = vpop.xlane.xlu0 %3227 }
 0x705   : > { %v2842_v16 = vpack.c.bf16 %v2841_v15, %v2840_v14  ;;  %v7196_v14 = vld [vmem:[%s10965_s19] ss:$0 sm:$0xff]  ;;  %v3761_v15 = vld [vmem:[#allocation3] sm:$0xff]  ;;  %s10976_s19 = sld [smem:[#allocation47_spill]] }
 0x707   : > { %7543 = vmatmul.mubr.msk.bf16.vlgmr.msra.gmra.mxu1 %vm2770_vm4, %v2842_v16  ;;  %v3763_v16 = vld [vmem:[#allocation4] sm:$0xff] }
 0x708   : > { %7553 = vmatpush3.bf16.msra.mxu1 %v2967_v17  ;;  %7554 = vmatprep.mubr.msk.bf16.mxu1 %vm8958_vm3, %v8957_v28  ;;  %v3101_v32 = vpop.permute.xlu0 %3100 }
 0x709   : > { %7564 = vmatprep.subr.bf16.mxu1 %v8957_v28 }
 0x70a   : > { %v8322_v22 = vpop.eup %8321 }
 0x70b   : > { %v2963_v26 = vmul.f32 %v8322_v22, %v8306_v53  ;;  %v3764_v22 = vld [vmem:[#allocation4 + $0x8] sm:$0xff] }
 0x725   : > { %v2956_v48 = vpop.xlane.xlu1 %2955 }
 0x726   : > { %8323 = vrcp.f32 %v2956_v48 }
 0x729   : > { %v3091_v20 = vpop.xlane.xlu1 %3090 }
 0x72a   : > { %8325 = vrcp.f32 %v3091_v20 }
 0x72b   : > { %8327 = vrcp.f32 %v3094_v19  ;;  %v9852_v19 = vadd.f32 %v3763_v16, %v3761_v15 }
 0x72d   : > { %v3225_v21 = vpop.xlane.xlu1 %3224 }
 0x72e   : > { %8329 = vrcp.f32 %v3225_v21  ;;  %v3762_v21 = vld [vmem:[#allocation3 + $0x8] sm:$0xff] }
 0x72f   : > { %8331 = vrcp.f32 %v3228_v23 }
 0x731   : > { %v3235_v39 = vpop.permute.xlu1 %3234 }
 0x733   : > { %v8324_v24 = vpop.eup %8323 }
 0x734   : > { %v2962_v25 = vmul.f32 %v8324_v24, %v8312_v3 }
 0x736   : > { %v2964_v30 = vpack.c.bf16 %v2963_v26, %v2962_v25 }
 0x737   : > { %v8326_v31 = vpop.eup %8325 }
 0x738   : > { %7555 = vmatmul.mubr.msk.bf16.vlgmr.msra.gmra.mxu1 %vm2770_vm4, %v2964_v30  ;;  %v8328_v33 = vpop.eup %8327  ;;  %v3097_v34 = vmul.f32 %v8326_v31, %v8314_v7  ;;  %v9861_v30 = vadd.f32 %v3764_v22, %v3762_v21 }
 0x739   : > { %7565 = vmatpush3.bf16.msra.mxu1 %v3101_v32  ;;  %7566 = vmatprep.mubr.msk.bf16.mxu1 %vm8958_vm3, %v8957_v28  ;;  %v3098_v35 = vmul.f32 %v8328_v33, %v9796_v55  ;;  %v8234_v55 = vld [vmem:[%s10963_s24 + $0x10] sm:$0xff]   ;;  %s10974_s24 = sld [smem:[#allocation106_spill]] }
 0x73a   : > { %7576 = vmatprep.subr.bf16.mxu1 %v8957_v28  ;;  %7585 = vmatpush3.bf16.msra.mxu0 %v8234_v55 }
 0x73b   : > { %v3099_v36 = vpack.c.bf16 %v3098_v35, %v3097_v34  ;;  %v8330_v37 = vpop.eup %8329  ;;  %7586 = vmatprep.subr.bf16.mxu0 %v8957_v28 }
 0x73c   : > { %v8332_v40 = vpop.eup %8331  ;;  %v3231_v41 = vmul.f32 %v8330_v37, %v8316_v9 }
 0x73d   : > { %v3232_v42 = vmul.f32 %v8332_v40, %v9802_v57 }
 0x73e   : > { %7587 = vmatpush3.bf16.msra.mxu0 %v8235_v58  ;;  %v8242_v58 = vld [vmem:[%s10966_s20 + $0x24] ss:$8 sps:$4 sm:$0xff]  }
 0x73f   : > { %v3233_v43 = vpack.c.bf16 %v3232_v42, %v3231_v41  ;;  %7588 = vmatprep.subr.bf16.mxu0 %v8957_v28 }
 0x740   : > { %7567 = vmatmul.mubr.msk.bf16.vlgmr.msra.gmra.mxu1 %vm2770_vm4, %v3099_v36 }
 0x741   : > { %7577 = vmatpush3.bf16.msra.mxu1 %v3235_v39  ;;  %7578 = vmatprep.mubr.msk.bf16.mxu1 %vm8958_vm3, %v8957_v28 }
 0x742   : > { %7589 = vmatpush3.bf16.msra.mxu0 %v8236_v60  ;;  %v8245_v60 = vld [vmem:[%s10966_s20 + $0x14] ss:$8 sps:$4 sm:$0xff]  }
 0x748   : > { %7579 = vmatmul.mubr.msk.bf16.vlgmr.msra.gmra.mxu1 %vm2770_vm4, %v3233_v43 }
 0x749   : > { %3522 = vmatprep.mubr.bf16.mxu1 %v10771_v4 }
 0x7c7   : > { %v2880_v44 = vpop.f32.mrf.mxu1 }
 0x7c8   : > { %2887 = vst.msk [vmem:[#allocation5] sm:$0xff] %vm2770_vm4, %v2880_v44 }
 0x7c9   : > { %v7544_v45 = vpop.f32.mrf.mxu1 }
 0x7cb   : > { %v2883_v46 = vpop.f32.mrf.mxu1 }
 0x7cc   : > { %2888 = vst.msk [vmem:[#allocation5 + $0x8] sm:$0xff] %vm2770_vm4, %v2883_v46 }
 0x7cd   : > { %v7545_v47 = vpop.f32.mrf.mxu1 }
 0x7f8   : > { %v3006_v49 = vpop.f32.mrf.mxu1 }
 0x7f9   : > { %3015 = vrot.lane.b32.xlu1 %v3006_v49, %s8965_s13 }
 0x7fa   : > { %v7556_v53 = vpop.f32.mrf.mxu1 }
 0x7fc   : > { %v3009_v54 = vpop.f32.mrf.mxu1 }
 0x7fd   : > { %3017 = vrot.lane.b32.xlu1 %v3009_v54, %s8965_s13  ;;  %s10973_s13 = sld [smem:[#allocation108_spill]] }
 0x7fe   : > { %v7557_v56 = vpop.f32.mrf.mxu1 }
 0x7ff   : > { %v8239_v56 = vld [vmem:[%s10966_s20 + $0x34] ss:$8 sps:$4 sm:$0xff]  }
 0x800   : > { %v3140_v57 = vpop.f32.mrf.mxu1  ;;  %3498 = vmatprep.subr.bf16.mxu1 %v8239_v56  ;;  %v8261_v56 = vld [vmem:[%s10974_s24 + $0x50] sm:$0xff]  }
 0x801   : > { %3149 = vrot.lane.b32.xlu0 %v3140_v57, %s8963_s10  ;;  %v8237_v57 = vld [vmem:[%s10966_s20 + $0x30] ss:$8 sps:$4 sm:$0xff]  }
 0x802   : > { %v7568_v59 = vpop.f32.mrf.mxu1  ;;  %3499 = vmatpush1.bf16.msra.mxu1 %v8237_v57  ;;  %v8262_v57 = vld [vmem:[%s10974_s24 + $0x10] sm:$0xff]  }
 0x803   : > { %v8240_v59 = vld [vmem:[%s10966_s20 + $0x20] ss:$8 sps:$4 sm:$0xff]   ;;  %3500 = vmatprep.subr.bf16.mxu1 %v8242_v58 }
 0x804   : > { %v3143_v61 = vpop.f32.mrf.mxu1  ;;  %v8263_v58 = vld [vmem:[%s10974_s24 + $0x48] sm:$0xff]  }
 0x805   : > { %3151 = vrot.lane.b32.xlu1 %v3143_v61, %s8963_s10  ;;  %v8243_v61 = vld [vmem:[%s10966_s20 + $0x10] ss:$8 sps:$4 sm:$0xff]   ;;  %s10971_s10 = scalar_lea.vmem %s10967_s27, %s9528_s8  ;;  %s10979_s27 = sld [smem:[#allocation111_spill]] }
 0x806   : > { %v7569_v62 = vpop.f32.mrf.mxu1  ;;  %3501 = vmatpush1.bf16.msra.mxu1 %v8240_v59  ;;  %v7197_v15 = vld [vmem:[%s10971_s10] ss:$0 sm:$0xff]  ;;  %v8264_v59 = vld [vmem:[%s10974_s24 + $0x8] sm:$0xff]   ;;  %s10981_s10 = sld [smem:[#allocation113_spill]] }
 0x807   : > { %3502 = vmatprep.subr.bf16.mxu1 %v8245_v60  ;;  %v8248_v62 = vld [vmem:[%s10966_s20 + $0x4] ss:$8 sps:$4 sm:$0xff]  }
 0x808   : > { %v3274_v63 = vpop.f32.mrf.mxu1  ;;  %v8265_v60 = vld [vmem:[%s10974_s24 + $0x40] sm:$0xff]  }
 0x809   : > { %3283 = vrot.lane.b32.xlu0 %v3274_v63, %s8959_s28  ;;  %v8246_v63 = vld [vmem:[%s10966_s20] ss:$8 sps:$4 sm:$0xff]   ;;  %s10977_s20 = scalar_lea.vmem %s10976_s19, %s9542_s22  ;;  %s10978_s22 = sld [smem:[#allocation112_spill]] }
 0x80a   : > { %v7580_v0 = vpop.f32.mrf.mxu1  ;;  %3503 = vmatpush1.bf16.msra.mxu1 %v8243_v61  ;;  %v8266_v61 = vld [vmem:[%s10974_s24] sm:$0xff]   ;;  %s10984_s19 = sld [smem:[#allocation114_spill]] }
 0x80b   : > { %3504 = vmatprep.subr.bf16.mxu1 %v8248_v62  ;;  %v3435_v62 = vld [vmem:[%s10977_s20] sm:$0x3] }
 0x80c   : > { %v3277_v1 = vpop.f32.mrf.mxu1 }
 0x80d   : > { %3285 = vrot.lane.b32.xlu1 %v3277_v1, %s8959_s28  ;;  %s10968_s28 = sld [smem:[#allocation45_spill]] }
 0x80e   : > { %v7581_v2 = vpop.f32.mrf.mxu1  ;;  %3505 = vmatpush1.bf16.msra.mxu1 %v8246_v63  ;;  %v3440_v63 = vrot.slane %v3435_v62, %v9734_v29 }
 0x80f   : > { %7594 = vmatprep.subr.bf16.mxu1 %v8957_v28 }
 0x813   : > { %s10972_s16 = scalar_lea.vmem %s10968_s28, %s9528_s8  ;;  %s10980_s28 = sld [smem:[#allocation110_spill]] }
 0x814   : > { %v7198_v21 = vld [vmem:[%s10972_s16] ss:$0 sm:$0xff]  ;;  %s10982_s16 = sld [smem:[#allocation64_spill]] }
 0x86b   : > { %v3016_v3 = vpop.permute.xlu1 %3015 }
 0x86c   : > { %3022 = vst.msk [vmem:[#allocation5] sm:$0xff] %vm3021_vm5, %v3016_v3 }
 0x86f   : > { %v3018_v6 = vpop.permute.xlu1 %3017 }
 0x870   : > { %3023 = vst.msk [vmem:[#allocation5 + $0x8] sm:$0xff] %vm3021_vm5, %v3018_v6 }
 0x873   : > { %v3150_v7 = vpop.permute.xlu0 %3149 }
 0x874   : > { %3156 = vst.msk [vmem:[#allocation5] sm:$0xff] %vm3155_vm6, %v3150_v7 }
 0x877   : > { %v3152_v5 = vpop.permute.xlu1 %3151 }
 0x878   : > { %3157 = vst.msk [vmem:[#allocation5 + $0x8] sm:$0xff] %vm3155_vm6, %v3152_v5 }
 0x87b   : > { %v3284_v9 = vpop.permute.xlu0 %3283 }
 0x87c   : > { %3290 = vst.msk [vmem:[#allocation5] sm:$0xff] %vm3289_vm7, %v3284_v9 }
 0x87f   : > { %v3286_v8 = vpop.permute.xlu1 %3285 }
 0x880   : > { %3291 = vst.msk [vmem:[#allocation5 + $0x8] sm:$0xff] %vm3289_vm7, %v3286_v8 }
 0x883   : > { %v3292_v10 = vld [vmem:[#allocation5] sm:$0xff] }
 0x887   : > { %v3293_v11 = vld [vmem:[#allocation5 + $0x8] sm:$0xff] }
 0x888   : > { %v3294_v12 = vpack.c.bf16 %v3293_v11, %v3292_v10 }
 0x88a   : > { %7591 = vmatmul.mubr.msk.bf16.vlgmr.msra.gmra.mxu0 %vm2614_vm2, %v3294_v12 }
 0x94a   : > { %v3364_v13 = vpop.f32.mrf.mxu0 }
 0x94b   : > { %v3371_v17 = vadd.f32 %v3364_v13, %v9700_v50  ;;  %v3770_v50 = vsel %vm3769_vm8, %v9852_v19, 0.0 }
 0x94c   : > { %v7592_v18 = vpop.f32.mrf.mxu0 }
 0x94d   : > { %v9850_v48 = vadd.f32 %v7196_v14, %v3371_v17 }
 0x94e   : > { %v3367_v20 = vpop.f32.mrf.mxu0 }
 0x94f   : > { %v3372_v23 = vadd.f32 %v3367_v20, %v9702_v51  ;;  %v3384_v24 = vsel %vm2614_vm2, %v9850_v48, 0.0  ;;  %v3773_v51 = vsel %vm3769_vm8, %v9861_v30, 0.0 }
 0x950   : > { %3385 = vadd.xlane.f32.xlu0 %v3384_v24  ;;  %v7593_v25 = vpop.f32.mrf.mxu0 }
 0x951   : > { %v9857_v26 = vadd.f32 %v7196_v14, %v3372_v23 }
 0x953   : > { %v3387_v31 = vsel %vm2614_vm2, %v9857_v26, 0.0 }
 0x954   : > { %3771 = vadd.xlane.f32.xlu0 %v3770_v50  ;;  %3388 = vadd.xlane.f32.xlu1 %v3387_v31 }
 0x958   : > { %3774 = vadd.xlane.f32.xlu0 %v3773_v51  ;;  %v8249_v51 = vld [vmem:[%s10969_s1 + $0x8] sm:$0xff]  }
 0x9d9   : > { %v3386_v32 = vpop.xlane.xlu0 %3385 }
 0x9da   : > { %v3390_v33 = vmul.f32 0.015625, %v3386_v32  ;;  %v7225_v32 = vld [vmem:[%s10970_s25] ss:$0 sm:$0xff] }
 0x9dc   : > { %v3392_v34 = vsub.f32 %v9850_v48, %v3390_v33 }
 0x9dd   : > { %v3772_v35 = vpop.xlane.xlu0 %3771  ;;  %v3389_v36 = vpop.xlane.xlu1 %3388 }
 0x9de   : > { %v3777_v37 = vmul.f32 0.03125, %v3772_v35  ;;  %v3391_v39 = vmul.f32 0.015625, %v3389_v36  ;;  %v3394_v40 = vmul.f32 %v3392_v34, %v3392_v34  ;;  %v8250_v36 = vld [vmem:[%s10969_s1] sm:$0xff]  }
 0x9e0   : > { %v3779_v41 = vsub.f32 %v9852_v19, %v3777_v37  ;;  %v3393_v42 = vsub.f32 %v9857_v26, %v3391_v39  ;;  %v3396_v43 = vsel %vm2614_vm2, %v3394_v40, 0.0  ;;  %v7226_v37 = vld [vmem:[%s10973_s13] ss:$0 sm:$0xff] }
 0x9e1   : > { %3397 = vadd.xlane.f32.xlu0 %v3396_v43  ;;  %v3775_v44 = vpop.xlane.xlu0 %3774  ;;  %v8252_v43 = vld [vmem:[%s10974_s24 + $0x38] sm:$0xff]  }
 0x9e2   : > { %v3778_v45 = vmul.f32 0.03125, %v3775_v44  ;;  %v3781_v46 = vmul.f32 %v3779_v41, %v3779_v41  ;;  %v3395_v47 = vmul.f32 %v3393_v42, %v3393_v42  ;;  %v8253_v44 = vld [vmem:[%s10974_s24 + $0x70] sm:$0xff]  }
 0x9e4   : > { %v3780_v49 = vsub.f32 %v9861_v30, %v3778_v45  ;;  %v3783_v52 = vsel %vm3769_vm8, %v3781_v46, 0.0  ;;  %v3399_v53 = vsel %vm2614_vm2, %v3395_v47, 0.0  ;;  %v8254_v45 = vld [vmem:[%s10974_s24 + $0x30] sm:$0xff]   ;;  %v3751_v46 = vld [vmem:[%s10975_s3] sm:$0xff]  ;;  %v8255_v47 = vld [vmem:[%s10974_s24 + $0x68] sm:$0xff]  }
 0x9e5   : > { %3784 = vadd.xlane.f32.xlu0 %v3783_v52  ;;  %3400 = vadd.xlane.f32.xlu1 %v3399_v53  ;;  %v8257_v52 = vld [vmem:[%s10974_s24 + $0x60] sm:$0xff]  }
 0x9e6   : > { %v3782_v54 = vmul.f32 %v3780_v49, %v3780_v49  ;;  %v8258_v53 = vld [vmem:[%s10974_s24 + $0x20] sm:$0xff]  }
 0x9e8   : > { %v3786_v55 = vsel %vm3769_vm8, %v3782_v54, 0.0  ;;  %v8259_v54 = vld [vmem:[%s10974_s24 + $0x58] sm:$0xff]  }
 0x9e9   : > { %3787 = vadd.xlane.f32.xlu1 %v3786_v55  ;;  %v8260_v55 = vld [vmem:[%s10974_s24 + $0x18] sm:$0xff]  }
 0xa6a   : > { %v3398_v0 = vpop.xlane.xlu0 %3397 }
 0xa6b   : > { %v3402_v1 = vmul.f32 0.015625, %v3398_v0  ;;  %v3444_v0 = vrot.slane %v3435_v62, %v9752_v38 }
 0xa6d   : > { %v3404_v2 = vadd.f32 1e-06, %v3402_v1 }
 0xa6e   : > { %v3785_v3 = vpop.xlane.xlu0 %3784  ;;  %v3401_v6 = vpop.xlane.xlu1 %3400 }
 0xa6f   : > { %8333 = vrsqrt.f32 %v3404_v2  ;;  %v3789_v7 = vmul.f32 0.03125, %v3785_v3  ;;  %v3403_v5 = vmul.f32 0.015625, %v3401_v6 }
 0xa71   : > { %v3405_v9 = vadd.f32 1e-06, %v3403_v5  ;;  %v3791_v8 = vadd.f32 1e-05, %v3789_v7 }
 0xa72   : > { %v3788_v10 = vpop.xlane.xlu1 %3787 }
 0xa73   : > { %v3790_v11 = vmul.f32 0.03125, %v3788_v10  ;;  %8335 = vrsqrt.f32 %v3405_v9 }
 0xa74   : > { %8337 = vrsqrt.f32 %v3791_v8 }
 0xa75   : > { %v3792_v12 = vadd.f32 1e-05, %v3790_v11 }
 0xa77   : > { %8339 = vrsqrt.f32 %v3792_v12 }
 0xa7c   : > { %v8334_v13 = vpop.eup %8333 }
 0xa7d   : > { %v3408_v14 = vmul.f32 %v8334_v13, %v3392_v34 }
 0xa7f   : > { %v3416_v18 = vmul.f32 %v7197_v15, %v3408_v14 }
 0xa80   : > { %v8336_v16 = vpop.eup %8335 }
 0xa81   : > { %v3409_v17 = vmul.f32 %v8336_v16, %v3393_v42  ;;  %v8338_v20 = vpop.eup %8337  ;;  %v3424_v50 = vadd.f32 %v7198_v21, %v3416_v18  ;;  %v8251_v42 = vld [vmem:[%s10974_s24 + $0x78] sm:$0xff]  }
 0xa82   : > { %v3795_v25 = vmul.f32 %v8338_v20, %v3779_v41  ;;  %7393 = vmatprep.subr.bf16.mxu0 %v8251_v42  ;;  %v3755_v42 = vld [vmem:[%s10975_s3 + $0x20] sm:$0xff] }
 0xa83   : > { %v3417_v23 = vmul.f32 %v7197_v15, %v3409_v17  ;;  %7394 = vmatpush3.bf16.msra.mxu0 %v8252_v43  ;;  %v3756_v43 = vld [vmem:[%s10975_s3 + $0x28] sm:$0xff] }
 0xa84   : > { %v8340_v22 = vpop.eup %8339  ;;  %v3803_v35 = vmul.f32 %v7225_v32, %v3795_v25  ;;  %7395 = vmatprep.subr.bf16.mxu0 %v8253_v44  ;;  %v3757_v44 = vld [vmem:[%s10975_s3 + $0x30] sm:$0xff] }
 0xa85   : > { %v3796_v24 = vmul.f32 %v8340_v22, %v3780_v49  ;;  %v3425_v31 = vadd.f32 %v7198_v21, %v3417_v23  ;;  %v8256_v49 = vld [vmem:[%s10974_s24 + $0x28] sm:$0xff]   ;;  %s10983_s24 = smov %s10982_s16 }
 0xa86   : > { %v3811_v40 = vadd.f32 %v7226_v37, %v3803_v35  ;;  %v3752_v35 = vld [vmem:[%s10975_s3 + $0x8] sm:$0xff] }
 0xa87   : > { %v3426_v33 = vpack.c.bf16 %v3425_v31, %v3424_v50  ;;  %v3804_v34 = vmul.f32 %v7225_v32, %v3796_v24  ;;  %7396 = vmatpush3.bf16.msra.mxu0 %v8254_v45  ;;  %v3758_v45 = vld [vmem:[%s10975_s3 + $0x38] sm:$0xff] }
 0xa88   : > { %7397 = vmatprep.subr.bf16.mxu0 %v8255_v47 }
 0xa89   : > { %7207 = vmatmul.mubr.msk.bf16.vlgmr.msra.gmra.mxu1 %vm2614_vm2, %v3426_v33  ;;  %v3812_v39 = vadd.f32 %v7226_v37, %v3804_v34 }
 0xa8a   : > { %7595 = vmatpush3.bf16.msra.mxu1 %v8249_v51  ;;  %7598 = vmatprep.mubr.msk.bf16.mxu1 %vm8958_vm3, %v8957_v28 }
 0xa8b   : > { %7596 = vmatprep.subr.bf16.mxu1 %v8957_v28  ;;  %v3813_v41 = vpack.c.bf16 %v3812_v39, %v3811_v40  ;;  %7398 = vmatpush3.bf16.msra.mxu0 %v8256_v49  ;;  %v3753_v39 = vld [vmem:[%s10975_s3 + $0x10] sm:$0xff] }
 0xa8c   : > { %7399 = vmatprep.subr.bf16.mxu0 %v8257_v52 }
 0xa8e   : > { %7597 = vmatpush3.bf16.msra.mxu1 %v8250_v36 }
 0xa8f   : > { %7400 = vmatpush3.bf16.msra.mxu0 %v8258_v53 }
 0xa90   : > { %7401 = vmatprep.subr.bf16.mxu0 %v8259_v54 }
 0xa91   : > { %7599 = vmatmul.mubr.msk.bf16.vlgmr.msra.gmra.mxu1 %vm3769_vm8, %v3813_v41  ;;  %v3754_v41 = vld [vmem:[%s10975_s3 + $0x18] sm:$0xff] }
 0xa92   : > { %7606 = vmatprep.mubr.msk.f32.mxu1 %vm2770_vm4, %v3751_v46 }
 0xa93   : > { %7402 = vmatpush3.bf16.msra.mxu0 %v8260_v55 }
 0xa94   : > { %7403 = vmatprep.subr.bf16.mxu0 %v8261_v56 }
 0xa97   : > { %7404 = vmatpush3.bf16.msra.mxu0 %v8262_v57 }
 0xa98   : > { %7405 = vmatprep.subr.bf16.mxu0 %v8263_v58 }
 0xa9b   : > { %7406 = vmatpush3.bf16.msra.mxu0 %v8264_v59 }
 0xa9c   : > { %7407 = vmatprep.subr.bf16.mxu0 %v8265_v60 }
 0xa9f   : > { %7408 = vmatpush3.bf16.msra.mxu0 %v8266_v61 }
 0xaa0   : > { %7630 = vmatprep.subr.bf16.mxu0 %v8957_v28 }
 0xb49   : > { %v3524_v1 = vpop.f32.mrf.mxu1 }
 0xb4a   : > { %v9923_v2 = vadd.f32 %v3524_v1, %v3440_v63 }
 0xb4b   : > { %v3526_v3 = vpop.f32.mrf.mxu1 }
 0xb4c   : > { %v3533_v6 = vmul.f32 %v9923_v2, %v9923_v2  ;;  %v9927_v7 = vadd.f32 %v3526_v3, %v3444_v0 }
 0xb4d   : > { %v3528_v5 = vpop.f32.mrf.mxu1 }
 0xb4e   : > { %v3537_v9 = vmul.f32 %v3533_v6, %v9923_v2  ;;  %v3534_v8 = vmul.f32 %v9927_v7, %v9927_v7  ;;  %v3529_v10 = vadd.f32 %v3528_v5, %v3440_v63  ;;  %v8267_v6 = vld [vmem:[%s10978_s22 + $0x18] sm:$0xff]   ;;  %v8268_v5 = vld [vmem:[%s10978_s22 + $0x10] sm:$0xff]  }
 0xb4f   : > { %v3530_v11 = vpop.f32.mrf.mxu1 }
 0xb50   : > { %v3541_v12 = vmul.f32 0.044715, %v3537_v9  ;;  %v3538_v13 = vmul.f32 %v3534_v8, %v9927_v7  ;;  %v3535_v14 = vmul.f32 %v3529_v10, %v3529_v10  ;;  %v3531_v15 = vadd.f32 %v3530_v11, %v3444_v0  ;;  %v4003_v9 = vld [vmem:[%s10979_s27] sm:$0xf] }
 0xb51   : > { %v9933_v16 = vpop.f32.mrf.mxu1  ;;  %v9975_v11 = vsub.s32 2, %v9729_v27 }
 0xb52   : > { %v3545_v17 = vadd.f32 %v3541_v12, %v9923_v2  ;;  %v3542_v18 = vmul.f32 0.044715, %v3538_v13  ;;  %v3539_v20 = vmul.f32 %v3535_v14, %v3529_v10  ;;  %v3536_v21 = vmul.f32 %v3531_v15, %v3531_v15 }
 0xb53   : > { %v7600_v22 = vpop.f32.mrf.mxu1  ;;  %v4022_v13 = vrot.slane %v4003_v9, %v9752_v38 }
 0xb54   : > { %v3549_v23 = vmul.f32 0.7978846, %v3545_v17  ;;  %v3546_v24 = vadd.f32 %v3542_v18, %v9927_v7  ;;  %v3543_v25 = vmul.f32 0.044715, %v3539_v20  ;;  %v3540_v50 = vmul.f32 %v3536_v21, %v3531_v15  ;;  %v7238_v20 = vld [vmem:[%s10980_s28] ss:$0 sm:$0xff] }
 0xb55   : > { %v9937_v31 = vpop.f32.mrf.mxu1  ;;  %v4030_v17 = vrot.slane %v4003_v9, %v9975_v11  ;;  %v9980_v18 = vsub.s32 3, %v9729_v27 }
 0xb56   : > { %v3550_v51 = vmul.f32 0.7978846, %v3546_v24  ;;  %v3547_v32 = vadd.f32 %v3543_v25, %v3529_v10  ;;  %v3544_v33 = vmul.f32 0.044715, %v3540_v50  ;;  %7602 = vmatprep.subr.mxu1 %v9937_v31  ;;  %8341 = vtanh.f32 %v3549_v23 }
 0xb57   : > { %v7601_v34 = vpop.f32.mrf.mxu1  ;;  %7603 = vmatpush3.msra.mxu1 %v9937_v31 }
 0xb58   : > { %8343 = vtanh.f32 %v3550_v51  ;;  %v3551_v36 = vmul.f32 0.7978846, %v3547_v32  ;;  %v3548_v37 = vadd.f32 %v3544_v33, %v3531_v15  ;;  %7604 = vmatprep.subr.mxu1 %v9933_v16  ;;  %v4038_v32 = vrot.slane %v4003_v9, %v9980_v18 }
 0xb59   : > { %7605 = vmatpush3.msra.mxu1 %v9933_v16 }
 0xb5a   : > { %8345 = vtanh.f32 %v3551_v36  ;;  %v3552_v40 = vmul.f32 0.7978846, %v3548_v37  ;;  %7607 = vmatmul.mubr.msk.f32.vlgmr.msra.gmra.mxu1 %vm2770_vm4, %v3752_v35  ;;  %7618 = vmatprep.subr.bf16.mxu1 %v8957_v28 }
 0xb5b   : > { %7609 = vmatprep.mubr.msk.f32.mxu1 %vm2770_vm4, %v3753_v39  ;;  %7619 = vmatpush3.bf16.msra.mxu1 %v8267_v6  ;;  %v4223_v6 = vld [vmem:[%s9597_s17] sm:$0x1] }
 0xb5c   : > { %8347 = vtanh.f32 %v3552_v40  ;;  %7620 = vmatprep.subr.bf16.mxu1 %v8957_v28 }
 0xb5e   : > { %7610 = vmatmul.mubr.msk.f32.gmra.mxu1 %vm2770_vm4, %v3754_v41 }
 0xb5f   : > { %7612 = vmatprep.mubr.msk.f32.mxu1 %vm2770_vm4, %v3755_v42  ;;  %7621 = vmatpush3.bf16.msra.mxu1 %v8268_v5  ;;  %v4237_v5 = vsel %vm4235_vm9, %v4223_v6, 0 }
 0xb60   : > { %7622 = vmatprep.subr.bf16.mxu1 %v8957_v28 }
 0xb62   : > { %7613 = vmatmul.mubr.msk.f32.gmra.mxu1 %vm2770_vm4, %v3756_v43 }
 0xb63   : > { %7615 = vmatprep.mubr.msk.f32.mxu1 %vm2770_vm4, %v3757_v44  ;;  %v8342_v46 = vpop.eup %8341 }
 0xb64   : > { %v3557_v53 = vadd.f32 1.0, %v8342_v46 }
 0xb65   : > { %v8344_v47 = vpop.eup %8343 }
 0xb66   : > { %7616 = vmatmul.mubr.msk.f32.gmra.mxu1 %vm2770_vm4, %v3758_v45  ;;  %v3558_v49 = vadd.f32 1.0, %v8344_v47  ;;  %v3561_v59 = vmul.f32 0.5, %v3557_v53 }
 0xb67   : > { %v8346_v52 = vpop.eup %8345  ;;  %7626 = vmatprep.mubr.msk.bf16.mxu1 %vm8958_vm3, %v8957_v28 }
 0xb68   : > { %v3559_v54 = vadd.f32 1.0, %v8346_v52  ;;  %v3562_v58 = vmul.f32 0.5, %v3558_v49  ;;  %v3565_v0 = vmul.f32 %v3561_v59, %v9923_v2  ;;  %v8270_v2 = vld [vmem:[%s10978_s22] sm:$0xff]  }
 0xb69   : > { %v8348_v55 = vpop.eup %8347 }
 0xb6a   : > { %v3563_v56 = vmul.f32 0.5, %v3559_v54  ;;  %v3560_v57 = vadd.f32 1.0, %v8348_v55  ;;  %v3566_v62 = vmul.f32 %v3562_v58, %v9927_v7  ;;  %v8269_v7 = vld [vmem:[%s10978_s22 + $0x8] sm:$0xff]  }
 0xb6b   : > { %7623 = vmatpush3.bf16.msra.mxu1 %v8269_v7  ;;  %v10776_v7 = vmov 1  }
 0xb6c   : > { %v3564_v60 = vmul.f32 0.5, %v3560_v57  ;;  %v3567_v61 = vmul.f32 %v3563_v56, %v3529_v10  ;;  %7624 = vmatprep.subr.bf16.mxu1 %v8957_v28  ;;  %v4008_v10 = vrot.slane %v4003_v9, %v9734_v29  ;;  %8157 = vset.pattern.permute.xlu1 %v10776_v7 }
 0xb6e   : > { %v3568_v63 = vmul.f32 %v3564_v60, %v3531_v15  ;;  %v3569_v3 = vpack.c.bf16 %v3567_v61, %v3565_v0 }
 0xb6f   : > { %7625 = vmatpush3.bf16.msra.mxu1 %v8270_v2 }
 0xb70   : > { %v3570_v1 = vpack.c.bf16 %v3568_v63, %v3566_v62  ;;  %7636 = vmatprep.subr.bf16.mxu1 %v8957_v28 }
 0xb72   : > { %3731 = vmatprep.mubr.bf16.mxu0 %v3570_v1  ;;  %v4134_v1 = vld [vmem:[%s9590_s6] sm:$0xf] }
 0xb73   : > { %3732 = vmatmul.mubr.bf16.vlgmr.msra.gmra.mxu0 %v3569_v3  ;;  %v4178_v3 = vld [vmem:[%s9593_s11] sm:$0xf] }
 0xb74   : > { %7632 = vmatprep.mubr.msk.bf16.mxu0 %vm8958_vm3, %v8957_v28 }
 0xc1a   : > { %v7608_v8 = vpop.f32.mrf.mxu1 }
 0xc1b   : > { %v4010_v15 = vmul.f32 %v7608_v8, %v4008_v10 }
 0xc1c   : > { %v3964_v12 = vpop.f32.mrf.mxu1 }
 0xc1d   : > { %v4009_v22 = vmul.f32 %v4008_v10, %v3964_v12  ;;  %v4018_v25 = vadd.f32 %v7238_v20, %v4010_v15 }
 0xc1e   : > { %v7611_v14 = vpop.f32.mrf.mxu1 }
 0xc1f   : > { %v4024_v23 = vmul.f32 %v7611_v14, %v4022_v13  ;;  %v4017_v34 = vadd.f32 %v7238_v20, %v4009_v22  ;;  %v7251_v22 = vmul.f32 -1.442695, %v9937_v31 }
 0xc20   : > { %v3974_v21 = vpop.f32.mrf.mxu1 }
 0xc21   : > { %v4023_v50 = vmul.f32 %v4022_v13, %v3974_v21  ;;  %v4026_v35 = vadd.f32 %v4024_v23, %v4018_v25  ;;  %v8967_v25 = vmov 2  }
 0xc22   : > { %v7614_v24 = vpop.f32.mrf.mxu1 }
 0xc23   : > { %v4032_v51 = vmul.f32 %v7614_v24, %v4030_v17  ;;  %v4025_v39 = vadd.f32 %v4023_v50, %v4017_v34  ;;  %v8968_v50 = vmov 9   ;;  %v8970_v34 = vmov 12  }
 0xc24   : > { %v3984_v33 = vpop.f32.mrf.mxu1 }
 0xc25   : > { %v4031_v36 = vmul.f32 %v4030_v17, %v3984_v33  ;;  %v4034_v40 = vadd.f32 %v4032_v51, %v4026_v35  ;;  %v8969_v33 = vmov 3   ;;  %v8971_v35 = vmov 4  }
 0xc26   : > { %v7617_v37 = vpop.f32.mrf.mxu1 }
 0xc27   : > { %v4040_v41 = vmul.f32 %v7617_v37, %v4038_v32  ;;  %v4033_v43 = vadd.f32 %v4031_v36, %v4025_v39  ;;  %v8972_v36 = vmov 15   ;;  %v10787_v39 = vmov 5  }
 0xc28   : > { %v3994_v42 = vpop.f32.mrf.mxu1 }
 0xc29   : > { %v4042_v44 = vadd.f32 %v4040_v41, %v4034_v40  ;;  %v4039_v45 = vmul.f32 %v4038_v32, %v3994_v42  ;;  %v10785_v40 = vmov 13   ;;  %v10783_v42 = vmov 6  }
 0xc2b   : > { %v7240_v46 = vmul.f32 -1.442695, %v4042_v44  ;;  %v4041_v47 = vadd.f32 %v4039_v45, %v4033_v43  ;;  %v10781_v43 = vmov 10   ;;  %v10777_v45 = vmov 8  }
 0xc2d   : > { %8349 = vpow2.f32 %v7240_v46  ;;  %v7239_v49 = vmul.f32 -1.442695, %v4041_v47 }
 0xc2f   : > { %8351 = vpow2.f32 %v7239_v49  ;;  %v10774_v49 = vmov 11  }
 0xc33   : > { %v7409_v52 = vpop.f32.mrf.mxu0 }
 0xc35   : > { %v7410_v53 = vpop.f32.mrf.mxu0 }
 0xc36   : > { %v9984_v54 = vadd.f32 %v7410_v53, %v7409_v52  ;;  %v10772_v52 = vmov 14  }
 0xc37   : > { %v10007_v9 = vpop.f32.mrf.mxu0 }
 0xc39   : > { %v10009_v13 = vpop.f32.mrf.mxu0 }
 0xc3a   : > { %v8350_v55 = vpop.eup %8349 }
 0xc3b   : > { %v4050_v56 = vadd.f32 1.0, %v8350_v55 }
 0xc3c   : > { %v8352_v57 = vpop.eup %8351 }
 0xc3d   : > { %8353 = vrcp.f32 %v4050_v56  ;;  %v4049_v58 = vadd.f32 1.0, %v8352_v57 }
 0xc3f   : > { %8355 = vrcp.f32 %v4049_v58  ;;  %v7248_v58 = vld [vmem:[%s10981_s10] ss:$0 sm:$0xff] }
 0xc40   : > { %8357 = vpow2.f32 %v7251_v22  ;;  %v8272_v22 = vld [vmem:[%s9612_s5 + $0x10] sm:$0xff]  }
 0xc4a   : > { %v8354_v59 = vpop.eup %8353 }
 0xc4b   : > { %v9986_v61 = vmul.f32 %v8354_v59, %v4042_v44  ;;  %v10779_v44 = vmov 7  }
 0xc4c   : > { %v8356_v60 = vpop.eup %8355 }
 0xc4d   : > { %v9988_v62 = vmul.f32 %v8356_v60, %v4041_v47  ;;  %v8358_v37 = vpop.eup %8357 }
 0xc4e   : > { %v4307_v41 = vadd.f32 1.0, %v8358_v37 }
 0xc4f   : > { %v4057_v63 = vpack.c.bf16 %v9986_v61, %v9988_v62 }
 0xc50   : > { %8359 = vrcp.f32 %v4307_v41 }
 0xc51   : > { %7627 = vmatmul.mubr.msk.bf16.vlgmr.msra.gmra.mxu1 %vm2614_vm2, %v4057_v63  ;;  %v4091_v0 = vsel %vm2614_vm2, %v4057_v63, 0 }
 0xc52   : > { %7631 = vmatpush3.bf16.xpose.msra.mxu0 %v4091_v0  ;;  %7637 = vmatpush3.bf16.xpose.msra.mxu1 %v4091_v0 }
 0xc53   : > { %7638 = vmatprep.mubr.msk.bf16.mxu1 %vm8958_vm3, %v8957_v28  ;;  %7642 = vmatprep.subr.bf16.mxu0 %v8957_v28 }
 0xc59   : > { %7633 = vmatmul.mubr.msk.bf16.vlgmr.msra.gmra.mxu0 %vm2614_vm2, %v4134_v1  ;;  %7639 = vmatmul.mubr.msk.bf16.vlgmr.msra.gmra.mxu1 %vm2614_vm2, %v4178_v3 }
 0xc5a   : > { %7644 = vmatprep.mubr.msk.bf16.mxu0 %vm8958_vm3, %v8957_v28  ;;  %7643 = vmatpush3.bf16.msra.mxu0 %v4237_v5 }
 0xc5b   : > { %7683 = vmatprep.subr.bf16.mxu0 %v8957_v28 }
 0xc5d   : > { %v8360_v46 = vpop.eup %8359 }
 0xc5e   : > { %v4313_v47 = vmul.f32 %v8360_v46, %v9937_v31  ;;  %v7250_v31 = vmul.f32 -1.442695, %v9933_v16 }
 0xc60   : > { %8361 = vpow2.f32 %v7250_v31  ;;  %v10109_v31 = vld [vmem:[%s9609_s14] sm:$0xff] }
 0xc6d   : > { %v8362_v53 = vpop.eup %8361 }
 0xc6e   : > { %v4306_v55 = vadd.f32 1.0, %v8362_v53 }
 0xc70   : > { %8363 = vrcp.f32 %v4306_v55 }
 0xc7d   : > { %v8364_v56 = vpop.eup %8363 }
 0xc7e   : > { %v4312_v57 = vmul.f32 %v8364_v56, %v9933_v16 }
 0xd11   : > { %v4127_v2 = vpop.f32.mrf.mxu1 }
 0xd13   : > { %v7628_v8 = vpop.f32.mrf.mxu1 }
 0xd15   : > { %v4130_v10 = vpop.f32.mrf.mxu1 }
 0xd16   : > { %v4222_v12 = vpack.c.bf16 %v4130_v10, %v4127_v2 }
 0xd17   : > { %v7629_v14 = vpop.f32.mrf.mxu1 }
 0xd18   : > { %7645 = vmatmul.mubr.msk.bf16.vlgmr.msra.gmra.mxu0 %vm4231_vm10, %v4222_v12 }
 0xd19   : > { %v10012_v15 = vpop.f32.mrf.mxu0  ;;  %v10014_v17 = vpop.f32.mrf.mxu1  ;;  %7691 = vmatprep.mubr.msk.bf16.mxu0 %vm8958_vm3, %v8957_v28 }
 0xd1a   : > { %4438 = vperm.xlu1 %8157, %v10012_v15   ;;  %4429 = vperm.xlu0 %8156, %v10012_v15  }
 0xd1b   : > { %v7634_v20 = vpop.f32.mrf.mxu0  ;;  %v7640_v21 = vpop.f32.mrf.mxu1 }
 0xd1c   : > { %v10097_v20 = vld [vmem:[%s10982_s16] sm:$0xff]  ;;  %v8271_v21 = vld [vmem:[%s9612_s5 + $0x18] sm:$0xff]  }
 0xd1d   : > { %v4175_v23 = vpop.f32.mrf.mxu0  ;;  %v4219_v24 = vpop.f32.mrf.mxu1  ;;  %7680 = vmatprep.mubr.f32.mxu1 %v10097_v20  ;;  %7684 = vmatpush3.bf16.msra.mxu0 %v8271_v21 }
 0xd1e   : > { %8158 = vset.pattern.permute.xlu1 %v8967_v25  ;;  %8165 = vset.pattern.permute.xlu0 %v8968_v50 }
 0xd1f   : > { %4447 = vperm.xlu1 %8158, %v10012_v15   ;;  %4510 = vperm.xlu0 %8165, %v10012_v15   ;;  %v7635_v51 = vpop.f32.mrf.mxu0  ;;  %v7641_v32 = vpop.f32.mrf.mxu1 }
 0xd20   : > { %7685 = vmatprep.subr.bf16.mxu0 %v8957_v28 }
 0xd21   : > { %7686 = vmatpush3.bf16.msra.mxu0 %v8272_v22 }
 0xd22   : > { %7687 = vmatprep.subr.bf16.mxu0 %v8957_v28 }
 0xd23   : > { %8159 = vset.pattern.permute.xlu1 %v8969_v33  ;;  %8168 = vset.pattern.permute.xlu0 %v8970_v34 }
 0xd24   : > { %4456 = vperm.xlu1 %8159, %v10012_v15   ;;  %4537 = vperm.xlu0 %8168, %v10012_v15  }
 0xd28   : > { %8160 = vset.pattern.permute.xlu1 %v8971_v35  ;;  %8171 = vset.pattern.permute.xlu0 %v8972_v36 }
 0xd29   : > { %4465 = vperm.xlu1 %8160, %v10012_v15   ;;  %4564 = vperm.xlu0 %8171, %v10012_v15  }
 0xd2d   : > { %8161 = vset.pattern.permute.xlu1 %v10787_v39  ;;  %8174 = vset.pattern.permute.xlu0 %v10785_v40 }
 0xd2e   : > { %4474 = vperm.xlu1 %8161, %v10012_v15   ;;  %4667 = vperm.xlu0 %8174, %v10014_v17  }
 0xd32   : > { %8162 = vset.pattern.permute.xlu1 %v10783_v42  ;;  %8177 = vset.pattern.permute.xlu0 %v10781_v43 }
 0xd33   : > { %4483 = vperm.xlu1 %8162, %v10012_v15   ;;  %4646 = vperm.xlu0 %8177, %v10014_v17  }
 0xd37   : > { %8163 = vset.pattern.permute.xlu1 %v10779_v44  ;;  %8180 = vset.pattern.permute.xlu0 %v10779_v44 }
 0xd38   : > { %4492 = vperm.xlu1 %8163, %v10012_v15   ;;  %4625 = vperm.xlu0 %8180, %v10014_v17  }
 0xd3c   : > { %8164 = vset.pattern.permute.xlu1 %v10777_v45  ;;  %8183 = vset.pattern.permute.xlu0 %v8971_v35 }
 0xd3d   : > { %4501 = vperm.xlu1 %8164, %v10012_v15   ;;  %4604 = vperm.xlu0 %8183, %v10014_v17  }
 0xd41   : > { %8166 = vset.pattern.permute.xlu1 %v10781_v43  ;;  %8186 = vset.pattern.permute.xlu0 %v10776_v7 }
 0xd42   : > { %4519 = vperm.xlu1 %8166, %v10012_v15   ;;  %4583 = vperm.xlu0 %8186, %v10014_v17  }
 0xd46   : > { %8167 = vset.pattern.permute.xlu1 %v10774_v49  ;;  %4773 = vrot.lane.b32.xlu0 %v4313_v47, %s8960_s7 }
 0xd47   : > { %4528 = vperm.xlu1 %8167, %v10012_v15   ;;  %8188 = vset.pattern.permute.xlu0 %v10771_v4 }
 0xd4b   : > { %8169 = vset.pattern.permute.xlu1 %v10785_v40 }
 0xd4c   : > { %4546 = vperm.xlu1 %8169, %v10012_v15  }
 0xd50   : > { %8170 = vset.pattern.permute.xlu1 %v10772_v52 }
 0xd51   : > { %4555 = vperm.xlu1 %8170, %v10012_v15  }
 0xd55   : > { %8172 = vset.pattern.permute.xlu1 %v8972_v36 }
 0xd56   : > { %4681 = vperm.xlu1 %8172, %v10014_v17  }
 0xd5a   : > { %8173 = vset.pattern.permute.xlu1 %v10772_v52 }
 0xd5b   : > { %4674 = vperm.xlu1 %8173, %v10014_v17  }
 0xd5f   : > { %8175 = vset.pattern.permute.xlu1 %v8970_v34 }
 0xd60   : > { %4660 = vperm.xlu1 %8175, %v10014_v17  }
 0xd64   : > { %8176 = vset.pattern.permute.xlu1 %v10774_v49 }
 0xd65   : > { %4653 = vperm.xlu1 %8176, %v10014_v17  }
 0xd69   : > { %8178 = vset.pattern.permute.xlu1 %v8968_v50 }
 0xd6a   : > { %4639 = vperm.xlu1 %8178, %v10014_v17  }
 0xd6e   : > { %8179 = vset.pattern.permute.xlu1 %v10777_v45 }
 0xd6f   : > { %4632 = vperm.xlu1 %8179, %v10014_v17  }
 0xd73   : > { %8181 = vset.pattern.permute.xlu1 %v10783_v42 }
 0xd74   : > { %4618 = vperm.xlu1 %8181, %v10014_v17  }
 0xd78   : > { %8182 = vset.pattern.permute.xlu1 %v10787_v39 }
 0xd79   : > { %4611 = vperm.xlu1 %8182, %v10014_v17  }
 0xd7d   : > { %8184 = vset.pattern.permute.xlu1 %v8969_v33 }
 0xd7e   : > { %4597 = vperm.xlu1 %8184, %v10014_v17  }
 0xd82   : > { %8185 = vset.pattern.permute.xlu1 %v8967_v25 }
 0xd83   : > { %4590 = vperm.xlu1 %8185, %v10014_v17  }
 0xd87   : > { %8187 = vset.pattern.permute.xlu1 %v10771_v4 }
 0xd88   : > { %4576 = vperm.xlu1 %8187, %v10014_v17  }
 0xd8c   : > { %4771 = vrot.lane.b32.xlu1 %v4312_v57, %s8960_s7 }
 0xd8d   : > { %8189 = vset.pattern.permute.xlu1 %v10776_v7 }
 0xd95   : > { %v10092_v15 = vpop.permute.xlu1 %4438 }
 0xd9a   : > { %v10094_v17 = vpop.permute.xlu1 %4447 }
 0xd9f   : > { %v10102_v23 = vpop.permute.xlu1 %4456 }
 0xda4   : > { %v10106_v47 = vpop.permute.xlu1 %4465 }
 0xdd8   : > { %v4273_v59 = vpop.f32.mrf.mxu0 }
 0xdd9   : > { %v4274_v60 = vadd.f32 %v7248_v58, %v4273_v59 }
 0xdda   : > { %v7646_v63 = vpop.f32.mrf.mxu0 }
 0xddb   : > { %v4282_v0 = vand.u32 2147483647, %v4274_v60  ;;  %v4280_v32 = vmax.f32 %v4274_v60, 0.0  ;;  %v10116_v60 = vpop.permute.xlu1 %4474  ;;  %v10119_v63 = vsub.s32 4, %v9729_v27 }
 0xddc   : > { %v4276_v1 = vpop.f32.mrf.mxu0 }
 0xddd   : > { %v4284_v3 = vsub.f32 0.0, %v4282_v0  ;;  %v10089_v2 = vadd.f32 %v7248_v58, %v4276_v1 }
 0xdde   : > { %v7647_v6 = vpop.f32.mrf.mxu0 }
 0xddf   : > { %v4286_v5 = vmul.f32 1.442695, %v4284_v3  ;;  %v4283_v16 = vand.u32 2147483647, %v10089_v2  ;;  %v10124_v6 = vsub.s32 5, %v9729_v27 }
 0xde1   : > { %8365 = vpow2.f32 %v4286_v5  ;;  %v4285_v8 = vsub.f32 0.0, %v4283_v16 }
 0xde3   : > { %v4288_v10 = vmul.f32 1.442695, %v4285_v8 }
 0xde5   : > { %8367 = vpow2.f32 %v4288_v10  ;;  %v10128_v10 = vpop.permute.xlu1 %4483 }
 0xdee   : > { %v8366_v12 = vpop.eup %8365 }
 0xdef   : > { %v4290_v14 = vadd.f32 1.0, %v8366_v12 }
 0xdf1   : > { %8369 = vlog2.f32 %v4290_v14 }
 0xdf2   : > { %v8368_v24 = vpop.eup %8367 }
 0xdf3   : > { %v4291_v41 = vadd.f32 1.0, %v8368_v24 }
 0xdf5   : > { %8371 = vlog2.f32 %v4291_v41 }
 0xdfe   : > { %v8370_v51 = vpop.eup %8369 }
 0xdff   : > { %v4293_v37 = vmul.f32 0.6931472, %v8370_v51  ;;  %v10136_v51 = vsub.s32 6, %v9729_v27 }
 0xe01   : > { %v4296_v46 = vadd.f32 %v4293_v37, %v4280_v32  ;;  %v10140_v37 = vpop.permute.xlu1 %4492 }
 0xe02   : > { %v8372_v21 = vpop.eup %8371 }
 0xe03   : > { %v4318_v53 = vrot.slane %v4296_v46, %v9734_v29  ;;  %v4325_v55 = vrot.slane %v4296_v46, %v9752_v38  ;;  %v4332_v58 = vrot.slane %v4296_v46, %v9975_v11  ;;  %v4339_v3 = vrot.slane %v4296_v46, %v9980_v18 }
 0xe04   : > { %v4346_v8 = vrot.slane %v4296_v46, %v10119_v63  ;;  %v10131_v12 = vmul.f32 %v4296_v46, %v9988_v62  ;;  %v4353_v14 = vrot.slane %v4296_v46, %v10124_v6  ;;  %v4295_v41 = vmul.f32 0.6931472, %v8372_v21 }
 0xe05   : > { %v4319_v56 = vmul.f32 %v4318_v53, %v10109_v31  ;;  %v4326_v57 = vmul.f32 %v4325_v55, %v10109_v31  ;;  %v4333_v1 = vmul.f32 %v4332_v58, %v10109_v31  ;;  %v4340_v16 = vmul.f32 %v4339_v3, %v10109_v31 }
 0xe06   : > { %v4347_v24 = vmul.f32 %v4346_v8, %v10109_v31  ;;  %v4435_v32 = vrot.slane %v10131_v12, %v9734_v29  ;;  %v4354_v53 = vmul.f32 %v4353_v14, %v10109_v31 }
 0xe07   : > { %v4320_v59 = vmul.f32 1.442695, %v4319_v56  ;;  %v4327_v0 = vmul.f32 1.442695, %v4326_v57  ;;  %v4334_v5 = vmul.f32 1.442695, %v4333_v1  ;;  %v4360_v57 = vrot.slane %v4296_v46, %v10136_v51 }
 0xe08   : > { %v4341_v22 = vmul.f32 1.442695, %v4340_v16  ;;  %v4348_v55 = vmul.f32 1.442695, %v4347_v24  ;;  %v10144_v56 = vsub.s32 7, %v9729_v27  ;;  %v10156_v24 = vpop.permute.xlu1 %4501 }
 0xe09   : > { %8373 = vpow2.f32 %v4320_v59  ;;  %v4430_v59 = vpop.permute.xlu0 %4429  ;;  %v4355_v8 = vmul.f32 1.442695, %v4354_v53  ;;  %v4361_v27 = vmul.f32 %v4360_v57, %v10109_v31 }
 0xe0a   : > { %8375 = vpow2.f32 %v4327_v0  ;;  %v4281_v0 = vmax.f32 %v10089_v2, 0.0  ;;  %v4436_v1 = vmul.f32 %v4435_v32, %v4430_v59  ;;  %v4367_v21 = vrot.slane %v4296_v46, %v10144_v56 }
 0xe0b   : > { %8377 = vpow2.f32 %v4334_v5  ;;  %v4444_v5 = vrot.slane %v10131_v12, %v9752_v38  ;;  %v4362_v53 = vmul.f32 1.442695, %v4361_v27 }
 0xe0c   : > { %8379 = vpow2.f32 %v4341_v22  ;;  %v10150_v16 = vadd.f32 %v4295_v41, %v4281_v0  ;;  %v4462_v0 = vrot.slane %v10131_v12, %v9980_v18 }
 0xe0d   : > { %8381 = vpow2.f32 %v4348_v55  ;;  %v4445_v32 = vmul.f32 %v4444_v5, %v10092_v15  ;;  %v4368_v55 = vmul.f32 %v4367_v21, %v10109_v31 }
 0xe0e   : > { %v4374_v41 = vrot.slane %v10150_v16, %v9734_v29  ;;  %8383 = vpow2.f32 %v4355_v8  ;;  %v4381_v8 = vrot.slane %v10150_v16, %v9752_v38 }
 0xe0f   : > { %8385 = vpow2.f32 %v4362_v53  ;;  %v4369_v5 = vmul.f32 1.442695, %v4368_v55 }
 0xe11   : > { %8387 = vpow2.f32 %v4369_v5 }
 0xe16   : > { %v8374_v58 = vpop.eup %8373 }
 0xe17   : > { %v4572_v3 = vmul.f32 0.0, %v8374_v58  ;;  %v8376_v22 = vpop.eup %8375  ;;  %v4453_v58 = vrot.slane %v10131_v12, %v9975_v11 }
 0xe18   : > { %v8378_v46 = vpop.eup %8377 }
 0xe19   : > { %v10152_v14 = vadd.f32 %v4572_v3, %v4436_v1  ;;  %v4454_v59 = vmul.f32 %v4453_v58, %v10094_v17  ;;  %v10171_v1 = vpop.permute.xlu1 %4519  ;;  %v4375_v3 = vmul.f32 %v4374_v41, %v10109_v31  ;;  %v8380_v21 = vpop.eup %8379  ;;  %v4471_v17 = vrot.slane %v10131_v12, %v10119_v63 }
 0xe1a   : > { %v4382_v41 = vmul.f32 %v4381_v8, %v10109_v31  ;;  %v8382_v55 = vpop.eup %8381 }
 0xe1b   : > { %v4580_v2 = vmul.f32 %v8376_v22, %v10152_v14  ;;  %v4463_v22 = vmul.f32 %v4462_v0, %v10102_v23  ;;  %v4376_v58 = vmul.f32 1.442695, %v4375_v3  ;;  %v4480_v23 = vrot.slane %v10131_v12, %v10124_v6 }
 0xe1c   : > { %v4383_v5 = vmul.f32 1.442695, %v4382_v41 }
 0xe1d   : > { %v10165_v57 = vadd.f32 %v4580_v2, %v4445_v32  ;;  %v4388_v32 = vrot.slane %v10150_v16, %v9975_v11  ;;  %8389 = vpow2.f32 %v4376_v58  ;;  %v4402_v58 = vrot.slane %v10150_v16, %v10119_v63 }
 0xe1e   : > { %8391 = vpow2.f32 %v4383_v5 }
 0xe1f   : > { %v4587_v15 = vmul.f32 %v8378_v46, %v10165_v57  ;;  %v10187_v46 = vpop.permute.xlu1 %4528  ;;  %v4389_v3 = vmul.f32 %v4388_v32, %v10109_v31  ;;  %v4403_v5 = vmul.f32 %v4402_v58, %v10109_v31 }
 0xe21   : > { %v10176_v27 = vadd.f32 %v4587_v15, %v4454_v59  ;;  %v4472_v59 = vmul.f32 %v4471_v17, %v10106_v47  ;;  %v4395_v15 = vrot.slane %v10150_v16, %v9980_v18  ;;  %v4489_v47 = vrot.slane %v10131_v12, %v10136_v51 }
 0xe22   : > { %v4390_v4 = vmul.f32 1.442695, %v4389_v3  ;;  %v4409_v3 = vrot.slane %v10150_v16, %v10124_v6 }
 0xe23   : > { %v4594_v2 = vmul.f32 %v8380_v21, %v10176_v27  ;;  %v8384_v21 = vpop.eup %8383 }
 0xe24   : > { %v8386_v41 = vpop.eup %8385  ;;  %8393 = vpow2.f32 %v4390_v4  ;;  %v4404_v4 = vmul.f32 1.442695, %v4403_v5 }
 0xe25   : > { %v10185_v53 = vadd.f32 %v4594_v2, %v4463_v22  ;;  %v4481_v22 = vmul.f32 %v4480_v23, %v10116_v60  ;;  %v10202_v2 = vpop.permute.xlu1 %4546  ;;  %v10211_v60 = vmul.f32 %v10150_v16, %v9986_v61  ;;  %v4498_v23 = vrot.slane %v10131_v12, %v10144_v56 }
 0xe27   : > { %v4601_v0 = vmul.f32 %v8382_v55, %v10185_v53  ;;  %v4396_v55 = vmul.f32 %v4395_v15, %v10109_v31  ;;  %v4499_v52 = vmul.f32 %v4498_v23, %v10140_v37  ;;  %v4516_v37 = vrot.slane %v10211_v60, %v9752_v38 }
 0xe29   : > { %v10196_v8 = vadd.f32 %v4601_v0, %v4472_v59  ;;  %v4490_v59 = vmul.f32 %v4489_v47, %v10128_v10  ;;  %v4397_v15 = vmul.f32 1.442695, %v4396_v55  ;;  %v4507_v10 = vrot.slane %v10211_v60, %v9734_v29 }
 0xe2a   : > { %v4416_v47 = vrot.slane %v10150_v16, %v10136_v51  ;;  %v4410_v55 = vmul.f32 %v4409_v3, %v10109_v31  ;;  %v4511_v3 = vpop.permute.xlu0 %4510 }
 0xe2b   : > { %v4608_v17 = vmul.f32 %v8384_v21, %v10196_v8  ;;  %8395 = vpow2.f32 %v4397_v15 }
 0xe2c   : > { %8397 = vpow2.f32 %v4404_v4  ;;  %v4411_v49 = vmul.f32 1.442695, %v4410_v55  ;;  %v4417_v15 = vmul.f32 %v4416_v47, %v10109_v31  ;;  %v4534_v47 = vrot.slane %v10211_v60, %v9980_v18 }
 0xe2d   : > { %v10207_v32 = vadd.f32 %v4608_v17, %v4481_v22  ;;  %v8388_v22 = vpop.eup %8387  ;;  %v4556_v17 = vpop.permute.xlu1 %4555 }
 0xe2e   : > { %8399 = vpow2.f32 %v4411_v49  ;;  %v4535_v44 = vmul.f32 %v4534_v47, %v10187_v46  ;;  %v4543_v49 = vrot.slane %v10211_v60, %v10119_v63  ;;  %v4561_v46 = vrot.slane %v10211_v60, %v10136_v51 }
 0xe2f   : > { %v4615_v0 = vmul.f32 %v8386_v41, %v10207_v32  ;;  %v8390_v41 = vpop.eup %8389 }
 0xe31   : > { %v10220_v21 = vadd.f32 %v4615_v0, %v4490_v59  ;;  %v4508_v59 = vmul.f32 %v4507_v10, %v10156_v24  ;;  %v4682_v0 = vpop.permute.xlu1 %4681  ;;  %v4525_v24 = vrot.slane %v10211_v60, %v9975_v11 }
 0xe33   : > { %v4622_v12 = vmul.f32 %v8388_v22, %v10220_v21  ;;  %v4423_v22 = vrot.slane %v10150_v16, %v10144_v56  ;;  %v4526_v55 = vmul.f32 %v4525_v24, %v10171_v1  ;;  %v4552_v24 = vrot.slane %v10211_v60, %v10124_v6 }
 0xe35   : > { %v10229_v58 = vadd.f32 %v4622_v12, %v4499_v52  ;;  %v8392_v52 = vpop.eup %8391  ;;  %v4517_v12 = vmul.f32 %v4516_v37, %v4511_v3  ;;  %v4424_v7 = vmul.f32 %v4423_v22, %v10109_v31  ;;  %v4675_v4 = vpop.permute.xlu1 %4674 }
 0xe36   : > { %v8394_v16 = vpop.eup %8393 }
 0xe37   : > { %v4629_v23 = vmul.f32 %v8390_v41, %v10229_v58  ;;  %v4418_v41 = vmul.f32 1.442695, %v4417_v15  ;;  %v4425_v37 = vmul.f32 1.442695, %v4424_v7 }
 0xe38   : > { %v8396_v3 = vpop.eup %8395 }
 0xe39   : > { %v10238_v5 = vadd.f32 %v4629_v23, %v4508_v59  ;;  %8401 = vpow2.f32 %v4418_v41  ;;  %v4661_v31 = vpop.permute.xlu1 %4660 }
 0xe3a   : > { %8403 = vpow2.f32 %v4425_v37  ;;  %v4562_v37 = vmul.f32 %v4561_v46, %v4556_v17 }
 0xe3b   : > { %v4636_v10 = vmul.f32 %v8392_v52, %v10238_v5  ;;  %v8398_v52 = vpop.eup %8397 }
 0xe3c   : > { %v8400_v7 = vpop.eup %8399 }
 0xe3d   : > { %v4637_v45 = vadd.f32 %v4636_v10, %v4517_v12  ;;  %v4538_v12 = vpop.permute.xlu0 %4537 }
 0xe3e   : > { %v4544_v1 = vmul.f32 %v4543_v49, %v4538_v12  ;;  %v4570_v49 = vrot.slane %v10211_v60, %v10144_v56 }
 0xe3f   : > { %v4643_v59 = vmul.f32 %v8394_v16, %v4637_v45  ;;  %v4654_v16 = vpop.permute.xlu1 %4653 }
 0xe41   : > { %v4644_v23 = vadd.f32 %v4643_v59, %v4526_v55  ;;  %v4553_v55 = vmul.f32 %v4552_v24, %v10202_v2 }
 0xe43   : > { %v4650_v15 = vmul.f32 %v8396_v3, %v4644_v23 }
 0xe45   : > { %v4651_v22 = vadd.f32 %v4650_v15, %v4535_v44  ;;  %v4640_v15 = vpop.permute.xlu1 %4639 }
 0xe46   : > { %v8402_v3 = vpop.eup %8401 }
 0xe47   : > { %v4657_v10 = vmul.f32 %v8398_v52, %v4651_v22  ;;  %v8404_v43 = vpop.eup %8403  ;;  %v4565_v52 = vpop.permute.xlu0 %4564  ;;  %v4656_v60 = vmul.f32 %v4654_v16, %v4651_v22 }
 0xe49   : > { %v4658_v41 = vadd.f32 %v4657_v10, %v4544_v1  ;;  %v4571_v10 = vmul.f32 %v4570_v49, %v4565_v52  ;;  %v4633_v40 = vpop.permute.xlu1 %4632 }
 0xe4b   : > { %v4664_v47 = vmul.f32 %v8400_v7, %v4658_v41  ;;  %v4668_v39 = vpop.permute.xlu0 %4667 }
 0xe4d   : > { %v4665_v59 = vadd.f32 %v4664_v47, %v4553_v55  ;;  %v4619_v17 = vpop.permute.xlu1 %4618  ;;  %v4663_v55 = vmul.f32 %v4661_v31, %v4658_v41 }
 0xe4e   : > { %v4621_v22 = vmul.f32 %v4619_v17, %v10220_v21 }
 0xe4f   : > { %v4671_v44 = vmul.f32 %v8402_v3, %v4665_v59  ;;  %v4670_v7 = vmul.f32 %v4668_v39, %v4665_v59  ;;  %v4647_v46 = vpop.permute.xlu0 %4646  ;;  %v8273_v59 = vld [vmem:[%s9612_s5 + $0x8] sm:$0xff]   ;;  %v8274_v3 = vld [vmem:[%s9612_s5] sm:$0xff]  }
 0xe50   : > { %7688 = vmatpush3.bf16.msra.mxu0 %v8273_v59 }
 0xe51   : > { %v4672_v12 = vadd.f32 %v4671_v44, %v4562_v37  ;;  %v4612_v47 = vpop.permute.xlu1 %4611  ;;  %7689 = vmatprep.subr.bf16.mxu0 %v8957_v28 }
 0xe53   : > { %v4678_v1 = vmul.f32 %v8404_v43, %v4672_v12  ;;  %v4677_v24 = vmul.f32 %v4675_v4, %v4672_v12  ;;  %v4649_v43 = vmul.f32 %v4647_v46, %v4644_v23  ;;  %v4626_v39 = vpop.permute.xlu0 %4625  ;;  %v4614_v23 = vmul.f32 %v4612_v47, %v10207_v32 }
 0xe54   : > { %v4628_v4 = vmul.f32 %v4626_v39, %v10229_v58  ;;  %7690 = vmatpush3.bf16.msra.mxu0 %v8274_v3 }
 0xe55   : > { %v4679_v42 = vadd.f32 %v4678_v1, %v4571_v10  ;;  %v4598_v31 = vpop.permute.xlu1 %4597  ;;  %7695 = vmatprep.subr.bf16.mxu0 %v8957_v28 }
 0xe56   : > { %v4600_v41 = vmul.f32 %v4598_v31, %v10185_v53  ;;  %v3760_v53 = vld [vmem:[%s10983_s24 + $0x8] sm:$0xff] }
 0xe57   : > { %v4684_v2 = vmul.f32 %v4682_v0, %v4679_v42  ;;  %v4642_v42 = vmul.f32 %v4640_v15, %v4637_v45  ;;  %v4635_v0 = vmul.f32 %v4633_v40, %v10238_v5  ;;  %v4605_v45 = vpop.permute.xlu0 %4604 }
 0xe58   : > { %v4607_v40 = vmul.f32 %v4605_v45, %v10196_v8  ;;  %v8275_v45 = vld [vmem:[%s10969_s1 + $0x18] sm:$0xff]  }
 0xe59   : > { %7648 = vmatprep.subr.mxu1 %v4684_v2  ;;  %v4591_v5 = vpop.permute.xlu1 %4590 }
 0xe5a   : > { %7649 = vmatpush3.msra.mxu1 %v4684_v2  ;;  %v4593_v21 = vmul.f32 %v4591_v5, %v10176_v27  ;;  %v8465_v27 = vld [vmem:[%s10975_s3] sm:$0xff] }
 0xe5b   : > { %7650 = vmatprep.subr.mxu1 %v4677_v24  ;;  %v4584_v58 = vpop.permute.xlu0 %4583 }
 0xe5c   : > { %7651 = vmatpush3.msra.mxu1 %v4677_v24  ;;  %v4586_v32 = vmul.f32 %v4584_v58, %v10165_v57  ;;  %v7252_v57 = vld [vmem:[%s10984_s19] ss:$0 sm:$0xff] }
 0xe5d   : > { %7652 = vmatprep.subr.mxu1 %v4670_v7  ;;  %v4577_v16 = vpop.permute.xlu1 %4576  ;;  %v4692_v49 = vmul.f32 %v7252_v57, %v9988_v62 }
 0xe5e   : > { %7653 = vmatpush3.msra.mxu1 %v4670_v7  ;;  %v4579_v8 = vmul.f32 %v4577_v16, %v10152_v14  ;;  %v4693_v14 = vmul.f32 %v7252_v57, %v9986_v61 }
 0xe5f   : > { %7654 = vmatprep.subr.mxu1 %v4663_v55  ;;  %v4774_v52 = vpop.permute.xlu0 %4773 }
 0xe60   : > { %7655 = vmatpush3.msra.mxu1 %v4663_v55 }
 0xe61   : > { %7656 = vmatprep.subr.mxu1 %v4656_v60  ;;  %v4772_v1 = vpop.permute.xlu1 %4771 }
 0xe62   : > { %7657 = vmatpush3.msra.mxu1 %v4656_v60 }
 0xe63   : > { %7658 = vmatprep.subr.mxu1 %v4649_v43 }
 0xe64   : > { %7659 = vmatpush3.msra.mxu1 %v4649_v43 }
 0xe65   : > { %7660 = vmatprep.subr.mxu1 %v4642_v42 }
 0xe66   : > { %7661 = vmatpush3.msra.mxu1 %v4642_v42 }
 0xe67   : > { %7662 = vmatprep.subr.mxu1 %v4635_v0 }
 0xe68   : > { %7663 = vmatpush3.msra.mxu1 %v4635_v0 }
 0xe69   : > { %7664 = vmatprep.subr.mxu1 %v4628_v4 }
 0xe6a   : > { %7665 = vmatpush3.msra.mxu1 %v4628_v4 }
 0xe6b   : > { %7666 = vmatprep.subr.mxu1 %v4621_v22 }
 0xe6c   : > { %7667 = vmatpush3.msra.mxu1 %v4621_v22 }
 0xe6d   : > { %7668 = vmatprep.subr.mxu1 %v4614_v23 }
 0xe6e   : > { %7669 = vmatpush3.msra.mxu1 %v4614_v23 }
 0xe6f   : > { %7670 = vmatprep.subr.mxu1 %v4607_v40 }
 0xe70   : > { %7671 = vmatpush3.msra.mxu1 %v4607_v40  ;;  %v8276_v40 = vld [vmem:[%s10969_s1 + $0x10] sm:$0xff]  }
 0xe71   : > { %7672 = vmatprep.subr.mxu1 %v4600_v41 }
 0xe72   : > { %7673 = vmatpush3.msra.mxu1 %v4600_v41 }
 0xe73   : > { %7674 = vmatprep.subr.mxu1 %v4593_v21 }
 0xe74   : > { %7675 = vmatpush3.msra.mxu1 %v4593_v21 }
 0xe75   : > { %7676 = vmatprep.subr.mxu1 %v4586_v32 }
 0xe76   : > { %7677 = vmatpush3.msra.mxu1 %v4586_v32 }
 0xe77   : > { %7678 = vmatprep.subr.mxu1 %v4579_v8 }
 0xe78   : > { %7679 = vmatpush3.msra.mxu1 %v4579_v8 }
 0xe79   : > { %7681 = vmatmul.mubr.f32.vlgmr.msra.gmra.mxu1 %v3760_v53 }
 0xe7a   : > { %7707 = vmatprep.mubr.msk.f32.mxu1 %vm2770_vm4, %v8465_v27  ;;  %v7260_v27 = vld [vmem:[%s10970_s25 + $0x1] ss:$0 sm:$0xff] }
 0xf39   : > { %v7682_v37 = vpop.f32.mrf.mxu1 }
 0xf3a   : > { %v4766_v44 = vadd.f32 %v7682_v37, %v4693_v14  ;;  %v7261_v14 = vld [vmem:[%s10973_s13 + $0x1] ss:$0 sm:$0xff] }
 0xf3b   : > { %v4760_v15 = vpop.f32.mrf.mxu1 }
 0xf3c   : > { %v4761_v12 = vadd.f32 %v4760_v15, %v4692_v49  ;;  %v4778_v10 = vmul.f32 %v4774_v52, %v4766_v44 }
 0xf3e   : > { %v4777_v2 = vmul.f32 %v4772_v1, %v4761_v12 }
 0xf40   : > { %v4779_v24 = vpack.c.bf16 %v4778_v10, %v4777_v2  ;;  %v8466_v2 = vld [vmem:[%s10975_s3 + $0x8] sm:$0xff] }
 0xf42   : > { %7692 = vmatmul.mubr.msk.bf16.vlgmr.msra.gmra.mxu0 %vm2614_vm2, %v4779_v24  ;;  %v8467_v24 = vld [vmem:[%s10975_s3 + $0x10] sm:$0xff] }
 0xf43   : > { %7699 = vmatprep.mubr.msk.bf16.mxu0 %vm8958_vm3, %v8957_v28  ;;  %7696 = vmatpush3.bf16.msra.mxu0 %v8275_v45 }
 0xf44   : > { %7697 = vmatprep.subr.bf16.mxu0 %v8957_v28 }
 0xf47   : > { %7698 = vmatpush3.bf16.msra.mxu0 %v8276_v40 }
 0xf48   : > { %7719 = vmatprep.subr.bf16.mxu0 %v8957_v28 }
0x1002   : > { %v4849_v7 = vpop.f32.mrf.mxu0 }
0x1003   : > { %v4850_v17 = vadd.f32 %v4849_v7, %v9852_v19  ;;  %v8468_v7 = vld [vmem:[%s10975_s3 + $0x18] sm:$0xff] }
0x1004   : > { %v7693_v61 = vpop.f32.mrf.mxu0 }
0x1005   : > { %5930 = vst.msk [vmem:[#allocation4] sm:$0xff] %vm3769_vm8, %v4850_v17  ;;  %v4860_v62 = vsel %vm3769_vm8, %v4850_v17, 0.0  ;;  %v8470_v61 = vld [vmem:[%s10975_s3 + $0x28] sm:$0xff] }
0x1006   : > { %4861 = vadd.xlane.f32.xlu1 %v4860_v62  ;;  %v4852_v55 = vpop.f32.mrf.mxu0  ;;  %v8471_v62 = vld [vmem:[%s10975_s3 + $0x30] sm:$0xff] }
0x1007   : > { %v4853_v60 = vadd.f32 %v4852_v55, %v9861_v30  ;;  %v8472_v55 = vld [vmem:[%s10975_s3 + $0x38] sm:$0xff] }
0x1008   : > { %v7694_v46 = vpop.f32.mrf.mxu0 }
0x1009   : > { %5931 = vst.msk [vmem:[#allocation4 + $0x8] sm:$0xff] %vm3769_vm8, %v4853_v60  ;;  %v4863_v43 = vsel %vm3769_vm8, %v4853_v60, 0.0  ;;  %v8278_v46 = vld [vmem:[%s10978_s22 + $0x30] sm:$0xff]  }
0x100a   : > { %4864 = vadd.xlane.f32.xlu0 %v4863_v43  ;;  %v8279_v43 = vld [vmem:[%s10978_s22 + $0x28] sm:$0xff]  }
0x108f   : > { %v4862_v47 = vpop.xlane.xlu1 %4861 }
0x1090   : > { %v4866_v42 = vmul.f32 0.03125, %v4862_v47  ;;  %v8280_v47 = vld [vmem:[%s10978_s22 + $0x20] sm:$0xff]  }
0x1092   : > { %v4868_v19 = vsub.f32 %v4850_v17, %v4866_v42  ;;  %v8469_v17 = vld [vmem:[%s10975_s3 + $0x20] sm:$0xff] }
0x1093   : > { %v4865_v0 = vpop.xlane.xlu0 %4864  ;;  %v7277_v42 = vld [vmem:[%s10979_s27 + $0x4] sm:$0xf] }
0x1094   : > { %v4867_v39 = vmul.f32 0.03125, %v4865_v0  ;;  %v4870_v4 = vmul.f32 %v4868_v19, %v4868_v19  ;;  %v5076_v0 = vrot.slane %v7277_v42, %v9734_v29 }
0x1096   : > { %v4869_v31 = vsub.f32 %v4853_v60, %v4867_v39  ;;  %v4872_v22 = vsel %vm3769_vm8, %v4870_v4, 0.0  ;;  %v8277_v60 = vld [vmem:[%s10978_s22 + $0x38] sm:$0xff]   ;;  %v5090_v4 = vrot.slane %v7277_v42, %v9752_v38 }
0x1097   : > { %4873 = vadd.xlane.f32.xlu0 %v4872_v22 }
0x1098   : > { %v4871_v23 = vmul.f32 %v4869_v31, %v4869_v31 }
0x109a   : > { %v4875_v30 = vsel %vm3769_vm8, %v4871_v23, 0.0  ;;  %v5098_v23 = vrot.slane %v7277_v42, %v9975_v11 }
0x109b   : > { %4876 = vadd.xlane.f32.xlu1 %v4875_v30  ;;  %v7279_v30 = vld [vmem:[%s10980_s28 + $0x1] ss:$0 sm:$0xff] }
0x1120   : > { %v4874_v5 = vpop.xlane.xlu0 %4873 }
0x1121   : > { %v4878_v41 = vmul.f32 0.03125, %v4874_v5 }
0x1123   : > { %v4880_v21 = vadd.f32 1e-05, %v4878_v41 }
0x1124   : > { %v4877_v58 = vpop.xlane.xlu1 %4876 }
0x1125   : > { %8405 = vrsqrt.f32 %v4880_v21  ;;  %v4879_v32 = vmul.f32 0.03125, %v4877_v58 }
0x1127   : > { %v4881_v16 = vadd.f32 1e-05, %v4879_v32 }
0x1129   : > { %8407 = vrsqrt.f32 %v4881_v16  ;;  %v5106_v16 = vrot.slane %v7277_v42, %v9980_v18 }
0x1132   : > { %v8406_v8 = vpop.eup %8405 }
0x1133   : > { %v4884_v53 = vmul.f32 %v8406_v8, %v4868_v19 }
0x1135   : > { %v4892_v57 = vmul.f32 %v7260_v27, %v4884_v53 }
0x1136   : > { %v8408_v59 = vpop.eup %8407 }
0x1137   : > { %v4885_v3 = vmul.f32 %v8408_v59, %v4869_v31  ;;  %v4900_v44 = vadd.f32 %v7261_v14, %v4892_v57 }
0x1139   : > { %v4893_v37 = vmul.f32 %v7260_v27, %v4885_v3 }
0x113b   : > { %v4901_v49 = vadd.f32 %v7261_v14, %v4893_v37 }
0x113d   : > { %v4902_v15 = vpack.c.bf16 %v4901_v49, %v4900_v44 }
0x113f   : > { %7700 = vmatmul.mubr.msk.bf16.vlgmr.msra.gmra.mxu0 %vm3769_vm8, %v4902_v15 }
0x1140   : > { %7727 = vmatprep.mubr.msk.bf16.mxu0 %vm8958_vm3, %v8957_v28  ;;  %7720 = vmatpush3.bf16.msra.mxu0 %v8277_v60 }
0x1141   : > { %7721 = vmatprep.subr.bf16.mxu0 %v8957_v28 }
0x1144   : > { %7722 = vmatpush3.bf16.msra.mxu0 %v8278_v46 }
0x1145   : > { %7723 = vmatprep.subr.bf16.mxu0 %v8957_v28 }
0x1148   : > { %7724 = vmatpush3.bf16.msra.mxu0 %v8279_v43 }
0x1149   : > { %7725 = vmatprep.subr.bf16.mxu0 %v8957_v28 }
0x114c   : > { %7726 = vmatpush3.bf16.msra.mxu0 %v8280_v47 }
0x114d   : > { %7737 = vmatprep.subr.bf16.mxu0 %v8957_v28 }
0x11ff   : > { %v10296_v12 = vpop.f32.mrf.mxu0 }
0x1201   : > { %v7701_v52 = vpop.f32.mrf.mxu0 }
0x1203   : > { %v10298_v1 = vpop.f32.mrf.mxu0 }
0x1204   : > { %7703 = vmatprep.subr.mxu1 %v10298_v1 }
0x1205   : > { %v7702_v10 = vpop.f32.mrf.mxu0  ;;  %7704 = vmatpush3.msra.mxu1 %v10298_v1 }
0x1206   : > { %7705 = vmatprep.subr.mxu1 %v10296_v12 }
0x1207   : > { %7706 = vmatpush3.msra.mxu1 %v10296_v12 }
0x1208   : > { %7708 = vmatmul.mubr.msk.f32.vlgmr.msra.gmra.mxu1 %vm2770_vm4, %v8466_v2  ;;  %7731 = vmatprep.subr.bf16.mxu1 %v8957_v28 }
0x1209   : > { %7710 = vmatprep.mubr.msk.f32.mxu1 %vm2770_vm4, %v8467_v24 }
0x120c   : > { %7711 = vmatmul.mubr.msk.f32.gmra.mxu1 %vm2770_vm4, %v8468_v7 }
0x120d   : > { %7713 = vmatprep.mubr.msk.f32.mxu1 %vm2770_vm4, %v8469_v17 }
0x1210   : > { %7714 = vmatmul.mubr.msk.f32.gmra.mxu1 %vm2770_vm4, %v8470_v61 }
0x1211   : > { %7716 = vmatprep.mubr.msk.f32.mxu1 %vm2770_vm4, %v8471_v62 }
0x1214   : > { %7717 = vmatmul.mubr.msk.f32.gmra.mxu1 %vm2770_vm4, %v8472_v55 }
0x1215   : > { %7733 = vmatprep.mubr.msk.bf16.mxu1 %vm8958_vm3, %v8957_v28 }
0x12c8   : > { %v7709_v19 = vpop.f32.mrf.mxu1 }
0x12c9   : > { %v5078_v22 = vmul.f32 %v7709_v19, %v5076_v0  ;;  %v7295_v19 = vld [vmem:[%s9590_s6 + $0x4] sm:$0xf]  ;;  %s10995_s6 = sld [smem:[#allocation49_spill]] }
0x12ca   : > { %v5030_v39 = vpop.f32.mrf.mxu1 }
0x12cb   : > { %v5077_v40 = vmul.f32 %v5076_v0, %v5030_v39  ;;  %v5086_v21 = vadd.f32 %v7279_v30, %v5078_v22  ;;  %v7297_v0 = vld [vmem:[%s9593_s11 + $0x4] sm:$0xf]  ;;  %v7299_v39 = vld [vmem:[%s9597_s17 + $0x1] sm:$0x1]  ;;  %s11000_s11 = sld [smem:[#allocation101_spill]] }
0x12cc   : > { %v7712_v31 = vpop.f32.mrf.mxu1 }
0x12cd   : > { %v5092_v5 = vmul.f32 %v7712_v31, %v5090_v4  ;;  %v5085_v53 = vadd.f32 %v7279_v30, %v5077_v40 }
0x12ce   : > { %v5040_v45 = vpop.f32.mrf.mxu1 }
0x12cf   : > { %v5091_v58 = vmul.f32 %v5090_v4, %v5040_v45  ;;  %v5094_v27 = vadd.f32 %v5092_v5, %v5086_v21  ;;  %v5308_v4 = vsel %vm4235_vm9, %v7299_v39, 0  ;;  %v7304_v21 = vmul.f32 -1.442695, %v10298_v1 }
0x12d0   : > { %v7715_v41 = vpop.f32.mrf.mxu1 }
0x12d1   : > { %v5100_v32 = vmul.f32 %v7715_v41, %v5098_v23  ;;  %v5093_v57 = vadd.f32 %v5091_v58, %v5085_v53 }
0x12d2   : > { %v5050_v8 = vpop.f32.mrf.mxu1 }
0x12d3   : > { %v5099_v59 = vmul.f32 %v5098_v23, %v5050_v8  ;;  %v5102_v14 = vadd.f32 %v5100_v32, %v5094_v27  ;;  %v10985_v27 = vmov 5  }
0x12d4   : > { %v7718_v3 = vpop.f32.mrf.mxu1 }
0x12d5   : > { %v5108_v37 = vmul.f32 %v7718_v3, %v5106_v16  ;;  %v5101_v49 = vadd.f32 %v5099_v59, %v5093_v57  ;;  %v10986_v59 = vmov 13   ;;  %v10987_v57 = vmov 6  }
0x12d6   : > { %v5060_v44 = vpop.f32.mrf.mxu1 }
0x12d7   : > { %v5110_v15 = vadd.f32 %v5108_v37, %v5102_v14  ;;  %v5107_v52 = vmul.f32 %v5106_v16, %v5060_v44  ;;  %v10988_v14 = vmov 10   ;;  %v10989_v37 = vmov 7  }
0x12d8   : > { %v10990_v44 = vmov 8  }
0x12d9   : > { %v7281_v10 = vmul.f32 -1.442695, %v5110_v15  ;;  %v5109_v2 = vadd.f32 %v5107_v52, %v5101_v49 }
0x12db   : > { %8409 = vpow2.f32 %v7281_v10  ;;  %v7280_v24 = vmul.f32 -1.442695, %v5109_v2  ;;  %v10992_v10 = vmov 11  }
0x12dd   : > { %8411 = vpow2.f32 %v7280_v24 }
0x12e8   : > { %v8410_v7 = vpop.eup %8409 }
0x12e9   : > { %v5118_v17 = vadd.f32 1.0, %v8410_v7  ;;  %v7301_v7 = vld [vmem:[%s10981_s10 + $0x1] ss:$0 sm:$0xff] }
0x12ea   : > { %v8412_v61 = vpop.eup %8411 }
0x12eb   : > { %8413 = vrcp.f32 %v5118_v17  ;;  %v5117_v62 = vadd.f32 1.0, %v8412_v61 }
0x12ed   : > { %8415 = vrcp.f32 %v5117_v62 }
0x12ee   : > { %8417 = vpow2.f32 %v7304_v21 }
0x12f8   : > { %v8414_v55 = vpop.eup %8413 }
0x12f9   : > { %v10335_v46 = vmul.f32 %v8414_v55, %v5110_v15  ;;  %v10991_v15 = vmov 1  }
0x12fa   : > { %v8416_v60 = vpop.eup %8415 }
0x12fb   : > { %v10337_v43 = vmul.f32 %v8416_v60, %v5109_v2  ;;  %v8418_v53 = vpop.eup %8417  ;;  %v10994_v2 = vmov 0  }
0x12fc   : > { %v5378_v3 = vadd.f32 1.0, %v8418_v53 }
0x12fd   : > { %v5125_v47 = vpack.c.bf16 %v10335_v46, %v10337_v43 }
0x12fe   : > { %8419 = vrcp.f32 %v5378_v3 }
0x12ff   : > { %7728 = vmatmul.mubr.msk.bf16.vlgmr.msra.gmra.mxu0 %vm2614_vm2, %v5125_v47  ;;  %v5160_v42 = vsel %vm2614_vm2, %v5125_v47, 0 }
0x1300   : > { %7732 = vmatpush3.bf16.xpose.msra.mxu1 %v5160_v42  ;;  %7738 = vmatpush3.bf16.xpose.msra.mxu0 %v5160_v42 }
0x1301   : > { %7739 = vmatprep.mubr.msk.bf16.mxu0 %vm8958_vm3, %v8957_v28  ;;  %7743 = vmatprep.subr.bf16.mxu1 %v8957_v28 }
0x1307   : > { %7734 = vmatmul.mubr.msk.bf16.vlgmr.msra.gmra.mxu1 %vm2614_vm2, %v7295_v19  ;;  %7740 = vmatmul.mubr.msk.bf16.vlgmr.msra.gmra.mxu0 %vm2614_vm2, %v7297_v0 }
0x1308   : > { %7745 = vmatprep.mubr.msk.bf16.mxu1 %vm8958_vm3, %v8957_v28  ;;  %7781 = vmatprep.mubr.f32.mxu0 %v10097_v20 }
0x1309   : > { %7744 = vmatpush3.bf16.msra.mxu1 %v5308_v4 }
0x130a   : > { %7784 = vmatprep.subr.bf16.mxu1 %v8957_v28 }
0x130b   : > { %v8420_v49 = vpop.eup %8419 }
0x130c   : > { %v5384_v52 = vmul.f32 %v8420_v49, %v10298_v1  ;;  %v7303_v1 = vmul.f32 -1.442695, %v10296_v12 }
0x130e   : > { %8421 = vpow2.f32 %v7303_v1 }
0x13bf   : > { %v5196_v31 = vpop.f32.mrf.mxu0 }
0x13c1   : > { %v7729_v22 = vpop.f32.mrf.mxu0 }
0x13c3   : > { %v5199_v23 = vpop.f32.mrf.mxu0 }
0x13c4   : > { %v5293_v30 = vpack.c.bf16 %v5199_v23, %v5196_v31  ;;  %v8281_v23 = vld [vmem:[%s9612_s5 + $0x38] sm:$0xff]  }
0x13c5   : > { %v7730_v45 = vpop.f32.mrf.mxu0 }
0x13c6   : > { %7746 = vmatmul.mubr.msk.bf16.vlgmr.msra.gmra.mxu1 %vm4231_vm10, %v5293_v30  ;;  %v8282_v30 = vld [vmem:[%s9612_s5 + $0x30] sm:$0xff]  }
0x13c7   : > { %v5242_v40 = vpop.f32.mrf.mxu1  ;;  %v10357_v5 = vpop.f32.mrf.mxu0  ;;  %7792 = vmatprep.mubr.msk.bf16.mxu1 %vm8958_vm3, %v8957_v28  ;;  %7785 = vmatpush3.bf16.msra.mxu1 %v8281_v23 }
0x13c8   : > { %5510 = vperm.xlu1 %8189, %v5242_v40   ;;  %5501 = vperm.xlu0 %8188, %v5242_v40  }
0x13c9   : > { %v7735_v20 = vpop.f32.mrf.mxu1  ;;  %v7741_v41 = vpop.f32.mrf.mxu0  ;;  %7786 = vmatprep.subr.bf16.mxu1 %v8957_v28 }
0x13cb   : > { %v5245_v58 = vpop.f32.mrf.mxu1  ;;  %v5290_v32 = vpop.f32.mrf.mxu0  ;;  %7787 = vmatpush3.bf16.msra.mxu1 %v8282_v30 }
0x13cc   : > { %8190 = vset.pattern.permute.xlu1 %v8967_v25  ;;  %8197 = vset.pattern.permute.xlu0 %v8968_v50 }
0x13cd   : > { %5519 = vperm.xlu1 %8190, %v5242_v40   ;;  %5582 = vperm.xlu0 %8197, %v5242_v40   ;;  %v7736_v16 = vpop.f32.mrf.mxu1  ;;  %v7742_v8 = vpop.f32.mrf.mxu0 }
0x13ce   : > { %7788 = vmatprep.subr.bf16.mxu1 %v8957_v28  ;;  %v10431_v16 = vld [vmem:[%s9609_s14 + $0x8] sm:$0xff]  ;;  %s10996_s14 = scalar_lea.vmem %s10995_s6, %s9528_s8  ;;  %s11001_s8 = sld [smem:[#allocation89_spill]] }
0x13d1   : > { %8191 = vset.pattern.permute.xlu1 %v8969_v33  ;;  %8200 = vset.pattern.permute.xlu0 %v8970_v34 }
0x13d2   : > { %5528 = vperm.xlu1 %8191, %v5242_v40   ;;  %5609 = vperm.xlu0 %8200, %v5242_v40  }
0x13d4   : > { %p7342_p9 = scmp.ne.s32.totalorder %s11001_s8, 1 }
0x13d6   : > { %8192 = vset.pattern.permute.xlu1 %v8971_v35  ;;  %8203 = vset.pattern.permute.xlu0 %v8972_v36 }
0x13d7   : > { %5537 = vperm.xlu1 %8192, %v5242_v40   ;;  %5636 = vperm.xlu0 %8203, %v5242_v40  }
0x13db   : > { %8193 = vset.pattern.permute.xlu1 %v10985_v27  ;;  %8206 = vset.pattern.permute.xlu0 %v10986_v59 }
0x13dc   : > { %5546 = vperm.xlu1 %8193, %v5242_v40   ;;  %5739 = vperm.xlu0 %8206, %v10357_v5  }
0x13e0   : > { %8194 = vset.pattern.permute.xlu1 %v10987_v57  ;;  %8209 = vset.pattern.permute.xlu0 %v10988_v14 }
0x13e1   : > { %5555 = vperm.xlu1 %8194, %v5242_v40   ;;  %5718 = vperm.xlu0 %8209, %v10357_v5  }
0x13e5   : > { %8195 = vset.pattern.permute.xlu1 %v10989_v37  ;;  %8212 = vset.pattern.permute.xlu0 %v10989_v37 }
0x13e6   : > { %5564 = vperm.xlu1 %8195, %v5242_v40   ;;  %5697 = vperm.xlu0 %8212, %v10357_v5  }
0x13ea   : > { %8196 = vset.pattern.permute.xlu1 %v10990_v44  ;;  %8215 = vset.pattern.permute.xlu0 %v8971_v35  ;;  %v10993_v35 = vmov 14  }
0x13eb   : > { %5573 = vperm.xlu1 %8196, %v5242_v40   ;;  %5676 = vperm.xlu0 %8215, %v10357_v5  }
0x13ef   : > { %8198 = vset.pattern.permute.xlu1 %v10988_v14  ;;  %8218 = vset.pattern.permute.xlu0 %v10991_v15 }
0x13f0   : > { %5591 = vperm.xlu1 %8198, %v5242_v40   ;;  %5655 = vperm.xlu0 %8218, %v10357_v5  }
0x13f4   : > { %8199 = vset.pattern.permute.xlu1 %v10992_v10  ;;  %5846 = vrot.lane.b32.xlu0 %v5384_v52, %s8960_s7 }
0x13f5   : > { %5600 = vperm.xlu1 %8199, %v5242_v40   ;;  %8220 = vset.pattern.permute.xlu0 %v8972_v36 }
0x13f9   : > { %8201 = vset.pattern.permute.xlu1 %v10986_v59 }
0x13fa   : > { %5618 = vperm.xlu1 %8201, %v5242_v40  }
0x13fe   : > { %8202 = vset.pattern.permute.xlu1 %v10993_v35 }
0x13ff   : > { %5627 = vperm.xlu1 %8202, %v5242_v40  }
0x1403   : > { %8204 = vset.pattern.permute.xlu1 %v8972_v36  ;;  %v8422_v36 = vpop.eup %8421 }
0x1404   : > { %5753 = vperm.xlu1 %8204, %v10357_v5  }
0x1408   : > { %8205 = vset.pattern.permute.xlu1 %v10993_v35 }
0x1409   : > { %5746 = vperm.xlu1 %8205, %v10357_v5  }
0x140d   : > { %8207 = vset.pattern.permute.xlu1 %v8970_v34  ;;  %v5377_v34 = vadd.f32 1.0, %v8422_v36 }
0x140e   : > { %5732 = vperm.xlu1 %8207, %v10357_v5  }
0x140f   : > { %8423 = vrcp.f32 %v5377_v34 }
0x1412   : > { %8208 = vset.pattern.permute.xlu1 %v10992_v10 }
0x1413   : > { %5725 = vperm.xlu1 %8208, %v10357_v5  }
0x1417   : > { %8210 = vset.pattern.permute.xlu1 %v8968_v50 }
0x1418   : > { %5711 = vperm.xlu1 %8210, %v10357_v5  }
0x141c   : > { %8211 = vset.pattern.permute.xlu1 %v10990_v44  ;;  %v8424_v50 = vpop.eup %8423 }
0x141d   : > { %5704 = vperm.xlu1 %8211, %v10357_v5   ;;  %v5383_v24 = vmul.f32 %v8424_v50, %v10296_v12 }
0x1421   : > { %8213 = vset.pattern.permute.xlu1 %v10987_v57 }
0x1422   : > { %5690 = vperm.xlu1 %8213, %v10357_v5  }
0x1426   : > { %8214 = vset.pattern.permute.xlu1 %v10985_v27 }
0x1427   : > { %5683 = vperm.xlu1 %8214, %v10357_v5  }
0x142b   : > { %8216 = vset.pattern.permute.xlu1 %v8969_v33 }
0x142c   : > { %5669 = vperm.xlu1 %8216, %v10357_v5  }
0x1430   : > { %8217 = vset.pattern.permute.xlu1 %v8967_v25 }
0x1431   : > { %5662 = vperm.xlu1 %8217, %v10357_v5  }
0x1435   : > { %8219 = vset.pattern.permute.xlu1 %v10994_v2 }
0x1436   : > { %5648 = vperm.xlu1 %8219, %v10357_v5  }
0x143a   : > { %5844 = vrot.lane.b32.xlu1 %v5383_v24, %s8960_s7 }
0x1443   : > { %v10418_v31 = vpop.permute.xlu1 %5510 }
0x1448   : > { %v10420_v22 = vpop.permute.xlu1 %5519 }
0x144d   : > { %v10424_v45 = vpop.permute.xlu1 %5528 }
0x1452   : > { %v10428_v32 = vpop.permute.xlu1 %5537 }
0x1457   : > { %v10438_v14 = vpop.permute.xlu1 %5546 }
0x145c   : > { %v10444_v35 = vpop.permute.xlu1 %5555 }
0x1486   : > { %v5344_v17 = vpop.f32.mrf.mxu1 }
0x1487   : > { %v5345_v61 = vadd.f32 %v7301_v7, %v5344_v17 }
0x1488   : > { %v7747_v62 = vpop.f32.mrf.mxu1 }
0x1489   : > { %v5353_v33 = vand.u32 2147483647, %v5345_v61  ;;  %v5351_v20 = vmax.f32 %v5345_v61, 0.0 }
0x148a   : > { %v5347_v55 = vpop.f32.mrf.mxu1 }
0x148b   : > { %v5355_v60 = vsub.f32 0.0, %v5353_v33  ;;  %v10415_v42 = vadd.f32 %v7301_v7, %v5347_v55  ;;  %v10453_v7 = vpop.permute.xlu1 %5564 }
0x148c   : > { %v7748_v25 = vpop.f32.mrf.mxu1 }
0x148d   : > { %v5357_v47 = vmul.f32 1.442695, %v5355_v60  ;;  %v5354_v19 = vand.u32 2147483647, %v10415_v42  ;;  %v5502_v60 = vpop.permute.xlu0 %5501 }
0x148f   : > { %8425 = vpow2.f32 %v5357_v47  ;;  %v5356_v0 = vsub.f32 0.0, %v5354_v19  ;;  %v5352_v19 = vmax.f32 %v10415_v42, 0.0 }
0x1491   : > { %v5359_v12 = vmul.f32 1.442695, %v5356_v0 }
0x1493   : > { %8427 = vpow2.f32 %v5359_v12 }
0x149c   : > { %v8426_v39 = vpop.eup %8425 }
0x149d   : > { %v5361_v4 = vadd.f32 1.0, %v8426_v39 }
0x149f   : > { %8429 = vlog2.f32 %v5361_v4 }
0x14a0   : > { %v8428_v40 = vpop.eup %8427 }
0x14a1   : > { %v5362_v58 = vadd.f32 1.0, %v8428_v40 }
0x14a3   : > { %8431 = vlog2.f32 %v5362_v58 }
0x14ac   : > { %v8430_v5 = vpop.eup %8429 }
0x14ad   : > { %v5364_v41 = vmul.f32 0.6931472, %v8430_v5  ;;  %v10466_v5 = vpop.permute.xlu1 %5573 }
0x14af   : > { %v5367_v21 = vadd.f32 %v5364_v41, %v5351_v20 }
0x14b0   : > { %v8432_v2 = vpop.eup %8431 }
0x14b1   : > { %v5390_v8 = vrot.slane %v5367_v21, %v9734_v29  ;;  %v5397_v53 = vrot.slane %v5367_v21, %v9752_v38  ;;  %v5404_v3 = vrot.slane %v5367_v21, %v9975_v11  ;;  %v5411_v49 = vrot.slane %v5367_v21, %v9980_v18 }
0x14b2   : > { %v5418_v10 = vrot.slane %v5367_v21, %v10119_v63  ;;  %v10447_v1 = vmul.f32 %v5367_v21, %v10337_v43  ;;  %v5425_v50 = vrot.slane %v5367_v21, %v10124_v6  ;;  %v5432_v17 = vrot.slane %v5367_v21, %v10136_v51 }
0x14b3   : > { %v5391_v27 = vmul.f32 %v10431_v16, %v5390_v8  ;;  %v5398_v59 = vmul.f32 %v10431_v16, %v5397_v53  ;;  %v5405_v44 = vmul.f32 %v10431_v16, %v5404_v3  ;;  %v5412_v52 = vmul.f32 %v10431_v16, %v5411_v49 }
0x14b4   : > { %v5419_v34 = vmul.f32 %v10431_v16, %v5418_v10  ;;  %v5507_v24 = vrot.slane %v10447_v1, %v9734_v29  ;;  %v5426_v62 = vmul.f32 %v10431_v16, %v5425_v50  ;;  %v5366_v33 = vmul.f32 0.6931472, %v8432_v2 }
0x14b5   : > { %v5392_v57 = vmul.f32 1.442695, %v5391_v27  ;;  %v5399_v37 = vmul.f32 1.442695, %v5398_v59  ;;  %v5406_v15 = vmul.f32 1.442695, %v5405_v44  ;;  %v5516_v0 = vrot.slane %v10447_v1, %v9752_v38 }
0x14b6   : > { %v5413_v36 = vmul.f32 1.442695, %v5412_v52  ;;  %v5420_v61 = vmul.f32 1.442695, %v5419_v34  ;;  %v5508_v25 = vmul.f32 %v5507_v24, %v5502_v60  ;;  %v5433_v12 = vmul.f32 %v10431_v16, %v5432_v17 }
0x14b7   : > { %8433 = vpow2.f32 %v5392_v57  ;;  %v5439_v39 = vrot.slane %v5367_v21, %v10144_v56  ;;  %v5427_v4 = vmul.f32 1.442695, %v5426_v62  ;;  %v10464_v30 = vadd.f32 %v5366_v33, %v5352_v19  ;;  %v10481_v57 = vpop.permute.xlu1 %5591 }
0x14b8   : > { %8435 = vpow2.f32 %v5399_v37  ;;  %v5517_v42 = vmul.f32 %v5516_v0, %v10418_v31  ;;  %v5525_v41 = vrot.slane %v10447_v1, %v9975_v11  ;;  %v5434_v21 = vmul.f32 1.442695, %v5433_v12 }
0x14b9   : > { %8437 = vpow2.f32 %v5406_v15  ;;  %v5440_v58 = vmul.f32 %v10431_v16, %v5439_v39  ;;  %v5446_v8 = vrot.slane %v10464_v30, %v9734_v29  ;;  %v5534_v3 = vrot.slane %v10447_v1, %v9980_v18 }
0x14ba   : > { %8439 = vpow2.f32 %v5413_v36  ;;  %v5526_v59 = vmul.f32 %v5525_v41, %v10420_v22  ;;  %v5453_v49 = vrot.slane %v10464_v30, %v9752_v38  ;;  %v5543_v22 = vrot.slane %v10447_v1, %v10119_v63 }
0x14bb   : > { %8441 = vpow2.f32 %v5420_v61  ;;  %v5441_v37 = vmul.f32 1.442695, %v5440_v58  ;;  %v5447_v44 = vmul.f32 %v10431_v16, %v5446_v8  ;;  %v5535_v10 = vmul.f32 %v5534_v3, %v10424_v45  ;;  %v10497_v61 = vpop.permute.xlu1 %5600 }
0x14bc   : > { %8443 = vpow2.f32 %v5427_v4  ;;  %v5460_v34 = vrot.slane %v10464_v30, %v9975_v11  ;;  %v5454_v2 = vmul.f32 %v10431_v16, %v5453_v49  ;;  %v5544_v62 = vmul.f32 %v5543_v22, %v10428_v32 }
0x14bd   : > { %8445 = vpow2.f32 %v5434_v21  ;;  %v5448_v50 = vmul.f32 1.442695, %v5447_v44  ;;  %v5552_v45 = vrot.slane %v10447_v1, %v10124_v6  ;;  %v5561_v32 = vrot.slane %v10447_v1, %v10136_v51 }
0x14be   : > { %8447 = vpow2.f32 %v5441_v37  ;;  %v5455_v60 = vmul.f32 1.442695, %v5454_v2  ;;  %v5474_v4 = vrot.slane %v10464_v30, %v10119_v63  ;;  %v5570_v21 = vrot.slane %v10447_v1, %v10144_v56 }
0x14bf   : > { %8449 = vpow2.f32 %v5448_v50  ;;  %v5553_v0 = vmul.f32 %v5552_v45, %v10438_v14  ;;  %v10512_v39 = vpop.permute.xlu1 %5618  ;;  %v10521_v14 = vmul.f32 %v10464_v30, %v10335_v46  ;;  %v5562_v58 = vmul.f32 %v5561_v32, %v10444_v35 }
0x14c0   : > { %8451 = vpow2.f32 %v5455_v60  ;;  %v5475_v3 = vmul.f32 %v10431_v16, %v5474_v4  ;;  %v5571_v49 = vmul.f32 %v5570_v21, %v10453_v7  ;;  %v5488_v22 = vrot.slane %v10464_v30, %v10136_v51  ;;  %v5583_v60 = vpop.permute.xlu0 %5582 }
0x14c1   : > { %v5579_v35 = vrot.slane %v10521_v14, %v9734_v29  ;;  %v5588_v7 = vrot.slane %v10521_v14, %v9752_v38 }
0x14c2   : > { %v5489_v45 = vmul.f32 %v10431_v16, %v5488_v22 }
0x14c3   : > { %v5628_v44 = vpop.permute.xlu1 %5627  ;;  %v5580_v50 = vmul.f32 %v5579_v35, %v10466_v5  ;;  %v5597_v5 = vrot.slane %v10521_v14, %v9975_v11 }
0x14c4   : > { %v8434_v55 = vpop.eup %8433 }
0x14c5   : > { %v5644_v47 = vmul.f32 0.0, %v8434_v55  ;;  %v8436_v40 = vpop.eup %8435  ;;  %v5467_v55 = vrot.slane %v10464_v30, %v9980_v18  ;;  %v5598_v4 = vmul.f32 %v5597_v5, %v10481_v57 }
0x14c6   : > { %v8438_v27 = vpop.eup %8437 }
0x14c7   : > { %v10462_v23 = vadd.f32 %v5644_v47, %v5508_v25  ;;  %v8440_v52 = vpop.eup %8439  ;;  %v5461_v25 = vmul.f32 %v10431_v16, %v5460_v34  ;;  %v5754_v29 = vpop.permute.xlu1 %5753 }
0x14c8   : > { %v8442_v17 = vpop.eup %8441 }
0x14c9   : > { %v5652_v20 = vmul.f32 %v8436_v40, %v10462_v23  ;;  %v8444_v19 = vpop.eup %8443  ;;  %v5462_v40 = vmul.f32 1.442695, %v5461_v25  ;;  %v5589_v25 = vmul.f32 %v5588_v7, %v5583_v60 }
0x14ca   : > { %v8446_v41 = vpop.eup %8445 }
0x14cb   : > { %v10475_v53 = vadd.f32 %v5652_v20, %v5517_v42  ;;  %v5468_v20 = vmul.f32 %v10431_v16, %v5467_v55  ;;  %8453 = vpow2.f32 %v5462_v40  ;;  %v8448_v37 = vpop.eup %8447  ;;  %v5606_v40 = vrot.slane %v10521_v14, %v9980_v18 }
0x14cc   : > { %v8450_v34 = vpop.eup %8449  ;;  %v5624_v18 = vrot.slane %v10521_v14, %v10124_v6 }
0x14cd   : > { %v5659_v31 = vmul.f32 %v8438_v27, %v10475_v53  ;;  %v5481_v27 = vrot.slane %v10464_v30, %v10124_v6  ;;  %v8452_v55 = vpop.eup %8451  ;;  %v5607_v11 = vmul.f32 %v5606_v40, %v10497_v61  ;;  %v5633_v61 = vrot.slane %v10521_v14, %v10136_v51 }
0x14cf   : > { %v10486_v15 = vadd.f32 %v5659_v31, %v5526_v59  ;;  %v5469_v59 = vmul.f32 1.442695, %v5468_v20 }
0x14d1   : > { %v5666_v36 = vmul.f32 %v8440_v52, %v10486_v15  ;;  %v5482_v52 = vmul.f32 %v10431_v16, %v5481_v27  ;;  %8455 = vpow2.f32 %v5469_v59 }
0x14d3   : > { %v10495_v24 = vadd.f32 %v5666_v36, %v5535_v10  ;;  %v5476_v10 = vmul.f32 1.442695, %v5475_v3 }
0x14d5   : > { %v5673_v33 = vmul.f32 %v8442_v17, %v10495_v24  ;;  %v5495_v17 = vrot.slane %v10464_v30, %v10144_v56  ;;  %8457 = vpow2.f32 %v5476_v10  ;;  %v5625_v10 = vmul.f32 %v5624_v18, %v10512_v39 }
0x14d7   : > { %v10506_v47 = vadd.f32 %v5673_v33, %v5544_v62  ;;  %v5483_v62 = vmul.f32 1.442695, %v5482_v52 }
0x14d8   : > { %v8454_v30 = vpop.eup %8453 }
0x14d9   : > { %v5680_v12 = vmul.f32 %v8444_v19, %v10506_v47  ;;  %8459 = vpow2.f32 %v5483_v62  ;;  %v5490_v19 = vmul.f32 1.442695, %v5489_v45 }
0x14db   : > { %v10517_v42 = vadd.f32 %v5680_v12, %v5553_v0  ;;  %v5496_v0 = vmul.f32 %v10431_v16, %v5495_v17  ;;  %v5747_v12 = vpop.permute.xlu1 %5746  ;;  %8461 = vpow2.f32 %v5490_v19 }
0x14dd   : > { %v5687_v8 = vmul.f32 %v8446_v41, %v10517_v42  ;;  %v5497_v41 = vmul.f32 1.442695, %v5496_v0 }
0x14de   : > { %v8456_v21 = vpop.eup %8455 }
0x14df   : > { %v10530_v31 = vadd.f32 %v5687_v8, %v5562_v58  ;;  %v5615_v8 = vrot.slane %v10521_v14, %v10119_v63  ;;  %v5733_v16 = vpop.permute.xlu1 %5732  ;;  %8463 = vpow2.f32 %v5497_v41 }
0x14e1   : > { %v5694_v1 = vmul.f32 %v8448_v37, %v10530_v31  ;;  %v5610_v37 = vpop.permute.xlu0 %5609 }
0x14e2   : > { %v8458_v3 = vpop.eup %8457  ;;  %v5616_v57 = vmul.f32 %v5615_v8, %v5610_v37 }
0x14e3   : > { %v10539_v36 = vadd.f32 %v5694_v1, %v5571_v49  ;;  %v5726_v52 = vpop.permute.xlu1 %5725 }
0x14e5   : > { %v5701_v2 = vmul.f32 %v8450_v34, %v10539_v36  ;;  %v5637_v45 = vpop.permute.xlu0 %5636 }
0x14e6   : > { %v8460_v1 = vpop.eup %8459 }
0x14e7   : > { %v10548_v33 = vadd.f32 %v5701_v2, %v5580_v50  ;;  %v5634_v50 = vmul.f32 %v5633_v61, %v5628_v44  ;;  %v5642_v2 = vrot.slane %v10521_v14, %v10144_v56  ;;  %v5712_v17 = vpop.permute.xlu1 %5711 }
0x14e8   : > { %v8462_v34 = vpop.eup %8461 }
0x14e9   : > { %v5708_v38 = vmul.f32 %v8452_v55, %v10548_v33  ;;  %v5643_v60 = vmul.f32 %v5642_v2, %v5637_v45  ;;  %v5740_v51 = vpop.permute.xlu0 %5739  ;;  %v8288_v2 = vld [vmem:[%s9615_s4 + $0x10] sm:$0xff]   ;;  %v3740_v45 = vadd.f32 %v9984_v54, %v9850_v48  ;;  %v8291_v48 = vld [vmem:[%s9623_s9 + $0x8] sm:$0xff]  }
0x14eb   : > { %v5709_v32 = vadd.f32 %v5708_v38, %v5589_v25  ;;  %v5705_v5 = vpop.permute.xlu1 %5704 }
0x14ec   : > { %v8464_v6 = vpop.eup %8463 }
0x14ed   : > { %v5715_v20 = vmul.f32 %v8454_v30, %v5709_v32  ;;  %v5719_v14 = vpop.permute.xlu0 %5718 }
0x14ef   : > { %v5716_v58 = vadd.f32 %v5715_v20, %v5598_v4  ;;  %v5691_v44 = vpop.permute.xlu1 %5690 }
0x14f1   : > { %v5722_v27 = vmul.f32 %v8456_v21, %v5716_v58  ;;  %v5721_v30 = vmul.f32 %v5719_v14, %v5716_v58  ;;  %v5698_v40 = vpop.permute.xlu0 %5697  ;;  %v5693_v21 = vmul.f32 %v5691_v44, %v10530_v31 }
0x14f2   : > { %v5700_v20 = vmul.f32 %v5698_v40, %v10539_v36  ;;  %v8293_v40 = vld [vmem:[%s9628_s2 + $0x8] sm:$0xff]  }
0x14f3   : > { %v5723_v59 = vadd.f32 %v5722_v27, %v5607_v11  ;;  %v5684_v4 = vpop.permute.xlu1 %5683 }
0x14f4   : > { %v5686_v58 = vmul.f32 %v5684_v4, %v10517_v42 }
0x14f5   : > { %v5729_v49 = vmul.f32 %v8458_v3, %v5723_v59  ;;  %v5728_v56 = vmul.f32 %v5726_v52, %v5723_v59 }
0x14f7   : > { %v5730_v35 = vadd.f32 %v5729_v49, %v5616_v57  ;;  %v5670_v41 = vpop.permute.xlu1 %5669 }
0x14f8   : > { %v5672_v8 = vmul.f32 %v5670_v41, %v10495_v24  ;;  %v8473_v24 = vld [vmem:[%s10983_s24 + $0x8] sm:$0xff]  ;;  %v8295_v41 = vld [vmem:[%s9628_s2] sm:$0xff]  }
0x14f9   : > { %v5736_v63 = vmul.f32 %v8460_v1, %v5730_v35  ;;  %v5735_v0 = vmul.f32 %v5733_v16, %v5730_v35 }
0x14fb   : > { %v5737_v22 = vadd.f32 %v5736_v63, %v5625_v10  ;;  %v5663_v11 = vpop.permute.xlu1 %5662  ;;  %v8285_v10 = vld [vmem:[%s9618_s18 + $0x8] sm:$0xff]  }
0x14fc   : > { %v5665_v36 = vmul.f32 %v5663_v11, %v10486_v15  ;;  %v8283_v15 = vld [vmem:[%s9612_s5 + $0x28] sm:$0xff]  }
0x14fd   : > { %v5743_v7 = vmul.f32 %v8462_v34, %v5737_v22  ;;  %v5742_v19 = vmul.f32 %v5740_v51, %v5737_v22  ;;  %7789 = vmatpush3.bf16.msra.mxu1 %v8283_v15  ;;  %v8287_v34 = vld [vmem:[%s9615_s4 + $0x18] sm:$0xff]  }
0x14fe   : > { %7790 = vmatprep.subr.bf16.mxu1 %v8957_v28 }
0x14ff   : > { %v5744_v62 = vadd.f32 %v5743_v7, %v5634_v50  ;;  %v5649_v27 = vpop.permute.xlu1 %5648 }
0x1501   : > { %v5750_v55 = vmul.f32 %v8464_v6, %v5744_v62  ;;  %v5749_v38 = vmul.f32 %v5747_v12, %v5744_v62  ;;  %v5707_v12 = vmul.f32 %v5705_v5, %v10548_v33  ;;  %v8289_v62 = vld [vmem:[%s9615_s4 + $0x8] sm:$0xff]  }
0x1503   : > { %v5751_v25 = vadd.f32 %v5750_v55, %v5643_v60  ;;  %v5845_v35 = vpop.permute.xlu1 %5844  ;;  %v7224_v55 = vld [vmem:[%s10996_s14] ss:$0 sm:$0xff] }
0x1504   : > { %v8290_v60 = vld [vmem:[%s9615_s4] sm:$0xff]  }
0x1505   : > { %v5756_v39 = vmul.f32 %v5754_v29, %v5751_v25  ;;  %v5714_v29 = vmul.f32 %v5712_v17, %v5709_v32  ;;  %v5677_v32 = vpop.permute.xlu0 %5676  ;;  %v7414_v17 = vadd.f32 %v10009_v13, %v10007_v9  ;;  %v3749_v9 = vadd.f32 %v7224_v55, %v3740_v45 }
0x1506   : > { %v5679_v33 = vmul.f32 %v5677_v32, %v10506_v47  ;;  %v5651_v47 = vmul.f32 %v5649_v27, %v10462_v23  ;;  %v7307_v23 = vld [vmem:[%s10984_s19 + $0x1] ss:$0 sm:$0xff]  ;;  %v7330_v32 = vld [vmem:[%s2276_s15] ss:$0 sm:$0xff]  ;;  %s11005_s15 = sld [smem:[#allocation76_spill]] (!%p7342_p9) }
0x1507   : > { %7749 = vmatprep.subr.mxu0 %v5756_v39  ;;  %v5766_v16 = vmul.f32 %v7307_v23, %v10335_v46  ;;  %v5765_v37 = vmul.f32 %v7307_v23, %v10337_v43  ;;  %v8286_v46 = vld [vmem:[%s9618_s18] sm:$0xff]   ;;  %v3741_v6 = vadd.f32 %v7414_v17, %v9857_v26  ;;  %s11003_s18 = sld [smem:[#allocation77_spill]] (!%p7342_p9) }
0x1508   : > { %7750 = vmatpush3.msra.mxu0 %v5756_v39  ;;  %v8292_v26 = vld [vmem:[%s9623_s9] sm:$0xff]  }
0x1509   : > { %7751 = vmatprep.subr.mxu0 %v5749_v38  ;;  %v5656_v31 = vpop.permute.xlu0 %5655  ;;  %v10617_v25 = vadd.f32 %v7224_v55, %v3741_v6 }
0x150a   : > { %7752 = vmatpush3.msra.mxu0 %v5749_v38  ;;  %v5658_v42 = vmul.f32 %v5656_v31, %v10475_v53  ;;  %v8284_v53 = vld [vmem:[%s9612_s5 + $0x20] sm:$0xff]   ;;  %s11002_s5 = sld [smem:[#allocation74_spill]] (!%p7342_p9) }
0x150b   : > { %7753 = vmatprep.subr.mxu0 %v5742_v19  ;;  %7791 = vmatpush3.bf16.msra.mxu1 %v8284_v53  ;;  %v5932_v13 = vpack.c.bf16 %v10617_v25, %v3749_v9 }
0x150c   : > { %7754 = vmatpush3.msra.mxu0 %v5742_v19  ;;  %7796 = vmatprep.subr.bf16.mxu1 %v8957_v28 }
0x150d   : > { %7755 = vmatprep.subr.mxu0 %v5735_v0  ;;  %v5847_v49 = vpop.permute.xlu0 %5846  ;;  %s11004_s9 = smov (!%p7342_p9), %s11003_s18 }
0x150e   : > { %7756 = vmatpush3.msra.mxu0 %v5735_v0  ;;  %v7329_v0 = vld [vmem:[%s2268_s0] ss:$0 sm:$0xff]  ;;  %s10999_s0 = sld [smem:[#allocation100_spill]] }
0x150f   : > { %7757 = vmatprep.subr.mxu0 %v5728_v56 }
0x1510   : > { %7758 = vmatpush3.msra.mxu0 %v5728_v56 }
0x1511   : > { %7759 = vmatprep.subr.mxu0 %v5721_v30 }
0x1512   : > { %7760 = vmatpush3.msra.mxu0 %v5721_v30 }
0x1513   : > { %7761 = vmatprep.subr.mxu0 %v5714_v29 }
0x1514   : > { %7762 = vmatpush3.msra.mxu0 %v5714_v29  ;;  %v7337_v27 = vld [vmem:[%s10999_s0] ss:$0 sm:$0xff] }
0x1515   : > { %7763 = vmatprep.subr.mxu0 %v5707_v12 }
0x1516   : > { %7764 = vmatpush3.msra.mxu0 %v5707_v12 }
0x1517   : > { %7765 = vmatprep.subr.mxu0 %v5700_v20 }
0x1518   : > { %7766 = vmatpush3.msra.mxu0 %v5700_v20  ;;  %v8294_v20 = vld [vmem:[%s9631_s29 + $0x8] sm:$0xff]  }
0x1519   : > { %7767 = vmatprep.subr.mxu0 %v5693_v21 }
0x151a   : > { %7768 = vmatpush3.msra.mxu0 %v5693_v21  ;;  %v8296_v21 = vld [vmem:[%s9631_s29] sm:$0xff]   ;;  %s11006_s29 = smov (!%p7342_p9), %s11005_s15 }
0x151b   : > { %7769 = vmatprep.subr.mxu0 %v5686_v58 }
0x151c   : > { %7770 = vmatpush3.msra.mxu0 %v5686_v58 }
0x151d   : > { %7771 = vmatprep.subr.mxu0 %v5679_v33 }
0x151e   : > { %7772 = vmatpush3.msra.mxu0 %v5679_v33 }
0x151f   : > { %7773 = vmatprep.subr.mxu0 %v5672_v8 }
0x1520   : > { %7774 = vmatpush3.msra.mxu0 %v5672_v8 }
0x1521   : > { %7775 = vmatprep.subr.mxu0 %v5665_v36 }
0x1522   : > { %7776 = vmatpush3.msra.mxu0 %v5665_v36 }
0x1523   : > { %7777 = vmatprep.subr.mxu0 %v5658_v42 }
0x1524   : > { %7778 = vmatpush3.msra.mxu0 %v5658_v42 }
0x1525   : > { %7779 = vmatprep.subr.mxu0 %v5651_v47 }
0x1526   : > { %7780 = vmatpush3.msra.mxu0 %v5651_v47 }
0x1527   : > { %7782 = vmatmul.mubr.f32.vlgmr.msra.gmra.mxu0 %v8473_v24  ;;  %7816 = vmatprep.subr.bf16.mxu0 %v8957_v28  ;;  %v7341_v24 = vld [vmem:[%s11000_s11] ss:$0 sm:$0xff] }
0x1528   : > { %7820 = vmatprep.mubr.msk.bf16.mxu0 %vm8958_vm3, %v8957_v28  ;;  %7817 = vmatpush3.bf16.msra.mxu0 %v8291_v48 }
0x1529   : > { %7818 = vmatprep.subr.bf16.mxu0 %v8957_v28 }
0x152c   : > { %7819 = vmatpush3.bf16.msra.mxu0 %v8292_v26 }
0x152d   : > { %7824 = vmatprep.subr.bf16.mxu0 %v8957_v28 }
0x15e7   : > { %v7783_v59 = vpop.f32.mrf.mxu0 }
0x15e8   : > { %v5839_v3 = vadd.f32 %v7783_v59, %v5766_v16 }
0x15e9   : > { %v5833_v57 = vpop.f32.mrf.mxu0 }
0x15ea   : > { %v5834_v18 = vadd.f32 %v5833_v57, %v5765_v37  ;;  %v5851_v1 = vmul.f32 %v5847_v49, %v5839_v3 }
0x15ec   : > { %v5850_v52 = vmul.f32 %v5845_v35, %v5834_v18 }
0x15ee   : > { %v5852_v61 = vpack.c.bf16 %v5851_v1, %v5850_v52 }
0x15f0   : > { %7793 = vmatmul.mubr.msk.bf16.vlgmr.msra.gmra.mxu1 %vm2614_vm2, %v5852_v61 }
0x15f1   : > { %7797 = vmatpush3.bf16.msra.mxu1 %v8285_v10  ;;  %7800 = vmatprep.mubr.msk.bf16.mxu1 %vm8958_vm3, %v8957_v28 }
0x15f2   : > { %7798 = vmatprep.subr.bf16.mxu1 %v8957_v28 }
0x15f5   : > { %7799 = vmatpush3.bf16.msra.mxu1 %v8286_v46 }
0x15f6   : > { %7804 = vmatprep.subr.bf16.mxu1 %v8957_v28 }
0x16b0   : > { %v10594_v43 = vpop.f32.mrf.mxu1 }
0x16b2   : > { %v7794_v63 = vpop.f32.mrf.mxu1 }
0x16b4   : > { %v10596_v22 = vpop.f32.mrf.mxu1 }
0x16b5   : > { %v5933_v50 = vpack.c.bf16 %v10596_v22, %v10594_v43 }
0x16b6   : > { %v7795_v7 = vpop.f32.mrf.mxu1 }
0x16b7   : > { %7801 = vmatmul.mubr.msk.bf16.vlgmr.msra.gmra.mxu1 %vm3769_vm8, %v5933_v50 }
0x16b8   : > { %7805 = vmatpush3.bf16.msra.mxu1 %v8287_v34  ;;  %7812 = vmatprep.mubr.msk.bf16.mxu1 %vm8958_vm3, %v8957_v28 }
0x16b9   : > { %7806 = vmatprep.subr.bf16.mxu1 %v8957_v28 }
0x16bc   : > { %7807 = vmatpush3.bf16.msra.mxu1 %v8288_v2 }
0x16bd   : > { %7808 = vmatprep.subr.bf16.mxu1 %v8957_v28 }
0x16c0   : > { %7809 = vmatpush3.bf16.msra.mxu1 %v8289_v62 }
0x16c1   : > { %7810 = vmatprep.subr.bf16.mxu1 %v8957_v28 }
0x16c4   : > { %7811 = vmatpush3.bf16.msra.mxu1 %v8290_v60 }
0x16c5   : > { %7832 = vmatprep.subr.bf16.mxu1 %v8957_v28 }
0x16c7   : > { %7813 = vmatmul.mubr.msk.bf16.vlgmr.msra.gmra.mxu1 %vm2614_vm2, %v5932_v13 }
0x16c8   : > { %7836 = vmatprep.mubr.msk.bf16.mxu1 %vm8958_vm3, %v8957_v28  ;;  %7833 = vmatpush3.bf16.msra.mxu1 %v8294_v20 }
0x16c9   : > { %7834 = vmatprep.subr.bf16.mxu1 %v8957_v28 }
0x16cc   : > { %7835 = vmatpush3.bf16.msra.mxu1 %v8296_v21 }
0x1777   : > { %v5995_v54 = vpop.f32.mrf.mxu1 }
0x1779   : > { %v7802_v5 = vpop.f32.mrf.mxu1 }
0x177b   : > { %v5998_v39 = vpop.f32.mrf.mxu1 }
0x177d   : > { %v7803_v38 = vpop.f32.mrf.mxu1 }
0x1787   : > { %v6063_v51 = vpop.f32.mrf.mxu1 }
0x1788   : > { %v6064_v44 = vadd.f32 %v6063_v51, %v5995_v54 }
0x1789   : > { %v7814_v19 = vpop.f32.mrf.mxu1 }
0x178a   : > { %v6077_v4 = vadd.f32 %v7329_v0, %v6064_v44 }
0x178b   : > { %v6066_v56 = vpop.f32.mrf.mxu1 }
0x178c   : > { %v6067_v14 = vadd.f32 %v6066_v56, %v5998_v39 }
0x178d   : > { %v7815_v30 = vpop.f32.mrf.mxu1 }
0x178e   : > { %v6078_v29 = vadd.f32 %v7329_v0, %v6067_v14 }
0x1790   : > { %v6079_v12 = vpack.c.bf16 %v6078_v29, %v6077_v4 }
0x1792   : > { %7821 = vmatmul.mubr.msk.bf16.vlgmr.msra.gmra.mxu0 %vm3769_vm8, %v6079_v12 }
0x1793   : > { %7828 = vmatprep.mubr.msk.bf16.mxu0 %vm8958_vm3, %v8957_v28  ;;  %7825 = vmatpush3.bf16.msra.mxu0 %v8293_v40 }
0x1794   : > { %7826 = vmatprep.subr.bf16.mxu0 %v8957_v28 }
0x1797   : > { %7827 = vmatpush3.bf16.msra.mxu0 %v8295_v41 }
0x1852   : > { %v6140_v58 = vpop.f32.mrf.mxu0 }
0x1853   : > { %v6141_v8 = vadd.f32 %v7330_v32, %v6140_v58 }
0x1854   : > { %v7822_v33 = vpop.f32.mrf.mxu0 }
0x1856   : > { %v6143_v11 = vpop.f32.mrf.mxu0 }
0x1857   : > { %v6144_v36 = vadd.f32 %v7330_v32, %v6143_v11 }
0x1858   : > { %v7823_v31 = vpop.f32.mrf.mxu0 }
0x1859   : > { %v6147_v42 = vpack.c.bf16 %v6144_v36, %v6141_v8 }
0x185b   : > { %7829 = vmatmul.mubr.msk.bf16.vlgmr.msra.gmra.mxu0 %vm3769_vm8, %v6147_v42  ;;  %7837 = vmatmul.mubr.msk.bf16.vlgmr.msra.gmra.mxu1 %vm3769_vm8, %v6147_v42 }
0x191b   : > { %v6201_v28 = vpop.f32.mrf.mxu0  ;;  %v6269_v47 = vpop.f32.mrf.mxu1 }
0x191c   : > { %v6208_v15 = vadd.f32 %v6201_v28, %v3749_v9  ;;  %v6276_v53 = vadd.f32 %v6269_v47, %v10594_v43 }
0x191d   : > { %v7830_v23 = vpop.f32.mrf.mxu0  ;;  %v7838_v16 = vpop.f32.mrf.mxu1 }
0x191e   : > { %v6217_v59 = vadd.f32 %v7337_v27, %v6208_v15  ;;  %v6285_v3 = vadd.f32 %v7341_v24, %v6276_v53 }
0x191f   : > { %v6204_v37 = vpop.f32.mrf.mxu0  ;;  %v6272_v57 = vpop.f32.mrf.mxu1 }
0x1920   : > { %6287 = vst.msk [vmem:[#allocation2] sm:$0xff] %vm2614_vm2, %v6217_v59  ;;  %v6209_v18 = vadd.f32 %v6204_v37, %v10617_v25  ;;  %v6277_v49 = vadd.f32 %v6272_v57, %v10596_v22 }
0x1921   : > { %6289 = vst.msk [vmem:[#allocation3] sm:$0xff] %vm3769_vm8, %v6285_v3  ;;  %v7831_v35 = vpop.f32.mrf.mxu0  ;;  %v7839_v1 = vpop.f32.mrf.mxu1  ;;  %6294 = sbr.rel (%p7342_p9) target bundleno = 6875 (0x1adb), region = 276 }
0x1922   : > { %v6218_v52 = vadd.f32 %v7337_v27, %v6209_v18  ;;  %v6286_v10 = vadd.f32 %v7341_v24, %v6277_v49 }
0x1924   : > { %6288 = vst.msk [vmem:[#allocation2 + $0x8] sm:$0xff] %vm2614_vm2, %v6218_v52 }
0x1925   : > { %6290 = vst.msk [vmem:[#allocation3 + $0x8] sm:$0xff] %vm3769_vm8, %v6286_v10 }
0x1926   : > { %v8474_v61 = vld [vmem:[%s11002_s5 + $0x8] sm:$0xff]   ;;  %v8981_v46 = vmov 0.0   ;;  %v8475_v43 = vld [vmem:[%s11002_s5] sm:$0xff]   ;;  %vm8982_vm11 = vmmov 0   ;;  %v8476_v63 = vld [vmem:[%s11003_s18 + $0x18] sm:$0xff]   ;;  %v6295_v22 = vpack.c.bf16 %v6286_v10, %v6285_v3  ;;  %vm6448_vm12 = vcmask 64512  }
0x1927   : > { %7840 = vmatprep.subr.bf16.mxu0 %v8981_v46  ;;  %7848 = vmatprep.subr.bf16.mxu1 %v8981_v46  ;;  %v8477_v34 = vld [vmem:[%s11004_s9 + $0x10] sm:$0xff]   ;;  %v8478_v50 = vld [vmem:[%s11004_s9 + $0x8] sm:$0xff]   ;;  %v8479_v7 = vld [vmem:[%s11004_s9] sm:$0xff]   ;;  %vm6470_vm13 = vcmask 57344  }
0x1928   : > { %7841 = vmatpush3.bf16.msra.mxu0 %v8474_v61  ;;  %7844 = vmatprep.mubr.msk.bf16.mxu0 %vm8982_vm11, %v8981_v46  ;;  %v7346_v6 = vld [vmem:[#allocation13] ss:$0 sm:$0xff]  ;;  %v6444_v26 = vld [vmem:[%s11005_s15] sm:$0xff]  ;;  %v6462_v38 = vld [vmem:[#allocation20] sm:$0x1] }
0x1929   : > { %7842 = vmatprep.subr.bf16.mxu0 %v8981_v46  ;;  %7856 = vmatprep.mubr.msk.bf16.mxu1 %vm8982_vm11, %v8981_v46  ;;  %v6445_v5 = vld [vmem:[%s11006_s29 + $0x8] sm:$0xff]  ;;  %v6463_v44 = vadd.f32 1e-05, %v6462_v38  ;;  %v6460_v58 = vld [vmem:[#allocation19] sm:$0x1] }
0x192a   : > { %7849 = vmatpush3.bf16.msra.mxu1 %v8476_v63  ;;  %v6458_v41 = vld [vmem:[#allocation14] sm:$0x1]  ;;  %v6466_v8 = vld [vmem:[#allocation16] sm:$0x1]  ;;  %v6468_v31 = vld [vmem:[#allocation17] sm:$0x1] }
0x192b   : > { %7850 = vmatprep.subr.bf16.mxu1 %v8981_v46  ;;  %8480 = vrsqrt.f32 %v6463_v44 }
0x192c   : > { %7843 = vmatpush3.bf16.msra.mxu0 %v8475_v43 }
0x192e   : > { %7851 = vmatpush3.bf16.msra.mxu1 %v8477_v34 }
0x192f   : > { %7845 = vmatmul.mubr.msk.bf16.vlgmr.msra.gmra.mxu0 %vm3769_vm8, %v6295_v22  ;;  %7852 = vmatprep.subr.bf16.mxu1 %v8981_v46 }
0x1932   : > { %7853 = vmatpush3.bf16.msra.mxu1 %v8478_v50 }
0x1933   : > { %7854 = vmatprep.subr.bf16.mxu1 %v8981_v46 }
0x1936   : > { %7855 = vmatpush3.bf16.msra.mxu1 %v8479_v7 }
0x1938   : > { %v8481_v33 = vpop.eup %8480 }
0x19ef   : > { %v6349_v2 = vpop.f32.mrf.mxu0 }
0x19f0   : > { %v6356_v62 = vadd.f32 %v6349_v2, %v6217_v59 }
0x19f1   : > { %v7846_v17 = vpop.f32.mrf.mxu0 }
0x19f2   : > { %v6365_v25 = vadd.f32 %v7346_v6, %v6356_v62 }
0x19f3   : > { %v6352_v45 = vpop.f32.mrf.mxu0 }
0x19f4   : > { %v6357_v55 = vadd.f32 %v6352_v45, %v6218_v52 }
0x19f5   : > { %v7847_v60 = vpop.f32.mrf.mxu0 }
0x19f6   : > { %v6366_v9 = vadd.f32 %v7346_v6, %v6357_v55 }
0x19f8   : > { %v6367_v13 = vpack.c.bf16 %v6366_v9, %v6365_v25 }
0x19fa   : > { %7857 = vmatmul.mubr.msk.bf16.vlgmr.msra.gmra.mxu1 %vm2614_vm2, %v6367_v13 }
0x1aba   : > { %v6437_v48 = vpop.f32.mrf.mxu1 }
0x1abb   : > { %v6446_v39 = vmul.f32 %v6444_v26, %v6437_v48 }
0x1abc   : > { %v7858_v54 = vpop.f32.mrf.mxu1 }
0x1abd   : > { %v6449_v56 = vsel %vm6448_vm12, %v6446_v39, 0.0 }
0x1abe   : > { %v6440_v51 = vpop.f32.mrf.mxu1 }
0x1abf   : > { %v6447_v19 = vmul.f32 %v6445_v5, %v6440_v51 }
0x1ac0   : > { %v7859_v0 = vpop.f32.mrf.mxu1 }
0x1ac1   : > { %v6450_v14 = vsel %vm6448_vm12, %v6447_v19, 0.0 }
0x1ac2   : > { %v6451_v30 = vadd.f32 %v6450_v14, %v6449_v56 }
0x1ac4   : > { %v6452_v4 = vrot.slane %v6451_v30, 4 }
0x1ac6   : > { %v6453_v29 = vadd.f32 %v6452_v4, %v6451_v30 }
0x1ac8   : > { %v6454_v12 = vrot.slane %v6453_v29, 2 }
0x1aca   : > { %v6455_v40 = vadd.f32 %v6454_v12, %v6453_v29 }
0x1acc   : > { %v6456_v20 = vrot.slane %v6455_v40, 1 }
0x1ace   : > { %v6457_v21 = vadd.f32 %v6456_v20, %v6455_v40 }
0x1ad0   : > { %v6459_v32 = vadd.f32 %v6458_v41, %v6457_v21 }
0x1ad2   : > { %v6461_v11 = vsub.f32 %v6459_v32, %v6460_v58 }
0x1ad4   : > { %v6465_v36 = vmul.f32 %v8481_v33, %v6461_v11 }
0x1ad6   : > { %v6467_v42 = vmul.f32 %v6466_v8, %v6465_v36 }
0x1ad8   : > { %v6469_v28 = vadd.f32 %v6468_v31, %v6467_v42 }
0x1ada   : > { %6471 = vst.msk [vmem:[%s9635_s30] sm:$0x1] %vm6470_vm13, %v6469_v28 }
0x1adb PF: > { %s11007_s2 = sld [smem:[#allocation90_spill]]  ;;  %s6485_s27 = sshll.u32 %s9635_s30, 4  ;;  %s6486_s27 = int_to_ptr.vmem [resolvable:$true] %s6485_s27 }
0x1adc   : > { %s11008_s7 = sld [smem:[#allocation83_spill]]  ;;  %s8746_s16 = scalar_lea.vmem %s6486_s27, 16 }
0x1add   : > { %s11010_s1 = sld [smem:[#allocation85_spill]]  ;;  %p8747_p12 = scmp.ne.s32.totalorder %s6486_s27, %s8746_s16 }
0x1ade   : > { %s11011_s13 = sld [smem:[#allocation98_spill]]  ;;  %s8983_s19 = smov [#allocation22]  }
0x1adf   : > { %s8750_s6 = sshll.u32 %s8983_s19, 4  ;;  %s8751_s6 = int_to_ptr.vmem [resolvable:$false] %s8750_s6 }
0x1ae0   : > { %s8752_s14 = scalar_lea.vmem %s8751_s6, 32  ;;  %p8753_p3 = scmp.lt.s32.totalorder %s6486_s27, %s8751_s6 }
0x1ae1   : > { %s7352_s20 = sshll.u32 %s11007_s2, 4  ;;  %p8754_p10 = scmp.lt.s32.totalorder %s8752_s14, %s8746_s16 }
0x1ae2   : > { %s11009_s25 = smov %s11008_s7  ;;  %s6483_s22 = scalar_lea.hbm %s11008_s7, %s7352_s20 }
0x1ae3   : > { %s11012_s28 = sand.u32 1, %s11010_s1   ;;  %p8755_p0 = por %p8754_p10, %p8753_p3 }
0x1ae4   : > { %s6473_s10 = scalar_lea.sflag [#allocation8], %s11012_s28  ;;  %p11013_p1 = scmp.ne.s32.totalorder %s11011_s13, 0 }
0x1ae6   : > { %p8748_p13 = pnand %p8747_p12, %p11013_p1 }
0x1ae8   : > { %p8749_p11 = pneg %p8748_p13 }
0x1aea   : > { %p8756_p6 = pnand %p8755_p0, %p8749_p11 }
0x1aec   : > { %8759 = shalt.err (!%p8756_p6)
}
0x1aed   : > { %s8760_s17 = scalar_lea.hbm %s6483_s22, 16  ;;  %s8764_s30 = scalar_lea.hbm %s11009_s25, 32 }
0x1aee   : > { %p8761_p5 = scmp.ne.s32.totalorder %s6483_s22, %s8760_s17  ;;  %p8765_p2 = scmp.lt.s32.totalorder %s6483_s22, %s11009_s25 }
0x1aef   : > { %p8766_p4 = scmp.lt.s32.totalorder %s8764_s30, %s8760_s17 }
0x1af0   : > { %p8762_p7 = pnand %p8761_p5, %p11013_p1 }
0x1af1   : > { %p8767_p9 = por %p8766_p4, %p8765_p2 }
0x1af2   : > { %p8763_p8 = pneg %p8762_p7 }
0x1af4   : > { %p8768_p12 = pnand %p8767_p9, %p8763_p8 }
0x1af6   : > { %8771 = shalt.err (!%p8768_p12)
}
0x1af7   : > { %7896 = dma.vmem_to_hbm [thread:$0]  (%p11013_p1), %s6486_s27, 16, %s6483_s22, %s6473_s10  }
0x1af8 PF: > { %s11014_s4 = sld [smem:[#allocation93_spill]] }
0x1af9   : > { %s11015_s0 = sld [smem:[#allocation84_spill]] }
0x1afa   : > { %s11016_s11 = sld [smem:[#allocation99_spill]] }
0x1afe   : > { %p7951_p13 = scmp.ge.s32.totalorder %s11014_s4, 2 }
0x1aff   : > { %s6497_s8 = sand.u32 1, %s11015_s0  }
0x1b00   : > { %p11017_p11 = scmp.ne.s32.totalorder %s11016_s11, 0  ;;  %s6498_s18 = scalar_lea.sflag [#allocation8], %s6497_s8 }
0x1b02   : > { %p7931_p3 = pnand %p7951_p13, %p11017_p11 }
0x1b04   : > { %p7932_p10 = pneg %p7931_p3 }
0x1b06   : > { %8845 = dma.done.wait (%p7932_p10), %s6498_s18, 16  }
0x1b07   : > { %8847 = vsyncadd (%p7932_p10), %s6498_s18, 4294967280  ;;  %s123_s22 = sadd.s32 1, %s11014_s4   ;;  %s11018_s28 = sld [smem:[#allocation85_spill]] }
0x1b08   : > { %p120_p0 = scmp.ge.s32.totalorder %s123_s22, 6   ;;  %s11019_s1 = sld [smem:[#allocation86_spill]] }
0x1b09   : > { %s11020_s2 = sld [smem:[#allocation97_spill]] }
0x1b0a   : > { %s11021_s7 = sld [smem:[#allocation87_spill]] }
0x1b0b   : > { %s11022_s10 = sld [smem:[#allocation88_spill]] }
0x1b0c   : > { %s11023_s11 = sld [smem:[#allocation96_spill]]  ;;  %122 = sbr.rel (!%p120_p0) target bundleno = 130 (0x82), region = 487 }
0x1b0d   : > { %s11024_s0 = sld [smem:[#allocation91_spill]] }
0x1b0e   : > { %s11025_s15 = sld [smem:[#allocation92_spill]] }
0x1b0f   : > { %s11026_s16 = sld [smem:[#allocation94_spill]] }
0x1b10   : > { %s11027_s18 = sld [smem:[#allocation95_spill]] }
0x1b11   :  { %6502 = vsyncpa [#allocation7], 1 }
0x1b12   :  { %6504 = vsyncpa [#allocation7 + $0x1], 1 }
0x1b13   :  { %6505 = vsyncpa [#allocation10], 1 }
0x1b14   :  { %6506 = vsyncpa [#allocation15], 1 }
0x1b15   :  { %6507 = vsyncpa [#allocation18], 1 }
0x1b16   :  { %6508 = vsyncpa [#allocation21], 1 }
0x1b17   :  { %6509 = vsyncpa [#allocation8], 1 }
0x1b18   :  { %6511 = vsyncpa [#allocation8 + $0x1], 1 }

</bundles_post_ra>
